<compile_context>
chip_gen: v6e
topology: v6e:2x2x1
jax: 0.10.0
libtpu: 0.0.40
codegen_flags: <defaults>
</compile_context>

<pallas_src>
import numpy as np

import jax
import jax.numpy as jnp
from jax import lax
from jax.experimental import pallas as pl
from jax.experimental.pallas import tpu as pltpu


MOBILENET_CONFIG = [[64, 1], [128, 2], [128, 1], [256, 2], [256, 1],
                    [512, 2], [512, 1], [512, 1], [512, 1], [512, 1],
                    [512, 1], [1024, 2], [1024, 1]]


# ----------------------------------------------------------------------------
# Parameter construction (mirrors the PyTorch __init__ / _initialize_weights)
# ----------------------------------------------------------------------------

def _make_divisible(v, divisor=8, min_value=None):
    if min_value is None:
        min_value = divisor
    new_v = max(min_value, int(v + divisor / 2) // divisor * divisor)
    if new_v < 0.9 * v:
        new_v += divisor
    return new_v


def build_mobilenet_params(key, num_classes=16, width_multiplier=0.25):
    """Raw (float32, HWIO) parameters with BatchNorm folded in (eval mode)."""
    bn_eps = 1e-5

    def conv_bn_folded(k, cin, cout):
        # kaiming_normal_(mode='fan_out', nonlinearity='relu'): std = sqrt(2/fan_out)
        std = (2.0 / (cout * 3 * 3)) ** 0.5
        w = jax.random.normal(k, (cout, cin, 3, 3), jnp.float32) * std
        w = jnp.transpose(w, (2, 3, 1, 0))            # -> (kh, kw, cin, cout)
        gamma = jnp.ones((cout,), jnp.float32)
        beta = jnp.zeros((cout,), jnp.float32)
        rmean = jnp.zeros((cout,), jnp.float32)
        rvar = jnp.ones((cout,), jnp.float32)
        scale = gamma / jnp.sqrt(rvar + bn_eps)
        return w * scale, beta - rmean * scale        # BN folded into conv

    c0 = _make_divisible(32 * width_multiplier)
    key, sub = jax.random.split(key)
    w0, b0 = conv_bn_folded(sub, 3, c0)

    blocks = []
    cin = c0
    for channels, stride in MOBILENET_CONFIG:
        cout = _make_divisible(channels * width_multiplier)
        key, sub = jax.random.split(key)
        w, b = conv_bn_folded(sub, cin, cout)
        blocks.append({"w": w, "b": b, "stride": stride})
        cin = cout

    key, sub = jax.random.split(key)
    wc = jax.random.normal(sub, (num_classes, cin), jnp.float32) * 0.01  # normal(0,0.01)
    bc = jnp.zeros((num_classes,), jnp.float32)
    return {"stem": {"w": w0, "b": b0}, "blocks": blocks,
            "wc": jnp.transpose(wc), "bc": bc}


# ----------------------------------------------------------------------------
# Host-side packing: block-Toeplitz weights (all static, numpy)
# ----------------------------------------------------------------------------

def _toeplitz_weight(w_hwio, W, stride):
    """(3,3,cin,cout) conv weight -> (3*W*cin, Wo*cout) block-Toeplitz matrix.

    The kw taps, the input-channel mixing, the zero padding in W and the
    stride-2 column subsampling are all folded into the zeros of this matrix,
    so the kernel only has to select input *rows*."""
    w_np = np.asarray(w_hwio, np.float32)
    cin, cout = w_np.shape[2], w_np.shape[3]
    Wo = (W - 1) // stride + 1
    t = np.zeros((3, W * cin, Wo * cout), np.float32)
    for di in range(3):
        for wo in range(Wo):
            for dj in range(3):
                w = stride * wo + dj - 1
                if 0 <= w < W:
                    t[di, w * cin:(w + 1) * cin,
                      wo * cout:(wo + 1) * cout] = w_np[di, dj]
    return t.reshape(3 * W * cin, Wo * cout)


def pack_kernel_operands(params, in_hw):
    """Build the static kernel operands + per-layer plan for an input (H, W)."""
    Hin, Win = in_hw
    c0 = int(params["stem"]["b"].shape[0])
    H0 = (Hin - 1) // 2 + 1
    W0 = (Win - 1) // 2 + 1

    stem_w = jnp.asarray(_toeplitz_weight(params["stem"]["w"], Win, 2),
                         dtype=jnp.bfloat16)                       # (3*Win*3, W0*c0)
    stem_b = jnp.asarray(np.tile(np.asarray(params["stem"]["b"], np.float32),
                                 W0).reshape(1, W0 * c0), jnp.float32)

    plan, blk_ops = [], []
    H, W, cin = H0, W0, c0
    for blk in params["blocks"]:
        stride = int(blk["stride"])
        cout = int(blk["b"].shape[0])
        Ho = (H - 1) // stride + 1
        Wo = (W - 1) // stride + 1
        wt = jnp.asarray(_toeplitz_weight(blk["w"], W, stride), dtype=jnp.bfloat16)
        bt = jnp.asarray(np.tile(np.asarray(blk["b"], np.float32),
                                 Wo).reshape(1, Wo * cout), jnp.float32)
        blk_ops.append((wt, bt))
        plan.append(dict(cin=cin, cout=cout, stride=stride,
                         H=H, W=W, Ho=Ho, Wo=Wo))
        H, W, cin = Ho, Wo, cout

    meta = dict(H0=H0, W0=W0, C0=c0, Hf=H, Wf=W, Cf=cin)
    return dict(stem_w=stem_w, stem_b=stem_b, blocks=blk_ops,
                wc=params["wc"].astype(jnp.bfloat16),
                bc=params["bc"].astype(jnp.float32).reshape(1, -1),
                plan=plan, meta=meta)


# ----------------------------------------------------------------------------
# The fused Pallas kernel (one grid step = one image)
# ----------------------------------------------------------------------------

def _build_kernel(plan, meta):
    n_blocks = len(plan)
    Hf, Wf, Cf = meta["Hf"], meta["Wf"], meta["Cf"]

    def kernel(*refs):
        out_ref = refs[-1]
        stem_lhs_ref, stem_w_ref, stem_b_ref = refs[0], refs[1], refs[2]
        blk_refs = [(refs[3 + 2 * i], refs[4 + 2 * i]) for i in range(n_blocks)]
        wc_ref = refs[3 + 2 * n_blocks]
        bc_ref = refs[4 + 2 * n_blocks]

        # ---- stem: one MXU matmul + bias + ReLU ------------------------------
        acc = jnp.dot(stem_lhs_ref[0], stem_w_ref[...],
                      preferred_element_type=jnp.float32)          # (H0, W0*C0)
        x = jnp.maximum(acc + stem_b_ref[...], 0.0)                # f32, lane-dense

        # ---- 13 Conv(3x3)-BN-ReLU blocks: one matmul each --------------------
        for p, (w_ref, b_ref) in zip(plan, blk_refs):
            W, Cin = p["W"], p["cin"]
            Ho, stride = p["Ho"], p["stride"]
            K = W * Cin                                            # 128 or 256
            zr = jnp.zeros((1, K), jnp.float32)
            xrp = jnp.concatenate([zr, x, zr], axis=0)             # (H+2, K) row-padded
            parts = []
            for di in range(3):
                if stride == 1:
                    parts.append(xrp[di:di + Ho, :])
                else:
                    rows = [xrp[di + stride * k: di + stride * k + 1, :]
                            for k in range(Ho)]
                    parts.append(rows[0] if Ho == 1
                                 else jnp.concatenate(rows, axis=0))
            lhs = jnp.concatenate(parts, axis=1)                   # (Ho, 3*K)
            acc = jnp.dot(lhs.astype(jnp.bfloat16), w_ref[...],
                          preferred_element_type=jnp.float32)      # (Ho, Wo*Cout)
            x = jnp.maximum(acc + b_ref[...], 0.0)

        # ---- global average pool (lane-group reduction) + classifier ---------
        row_sum = jnp.sum(x, axis=0, keepdims=True)                # (1, Wf*Cf)
        pooled = row_sum[:, 0:Cf]
        for w_i in range(1, Wf):
            pooled = pooled + row_sum[:, w_i * Cf:(w_i + 1) * Cf]
        pooled = pooled * (1.0 / (Hf * Wf))
        logits = jnp.dot(pooled.astype(jnp.bfloat16), wc_ref[...],
                         preferred_element_type=jnp.float32) + bc_ref[...]
        out_ref[0] = logits.astype(out_ref.dtype)

    return kernel


def _const_index_map(ndim):
    def imap(b):
        return (0,) * ndim
    return imap


# ----------------------------------------------------------------------------
# Forward pass
# ----------------------------------------------------------------------------

def make_forward(packed):
    plan, meta = packed["plan"], packed["meta"]
    kernel = _build_kernel(plan, meta)
    arrays = dict(stem_w=packed["stem_w"], stem_b=packed["stem_b"],
                  blocks=packed["blocks"], wc=packed["wc"], bc=packed["bc"])

    def forward(x_nchw, arrs):
        N, _, Hin, Win = x_nchw.shape
        H0, W0, C0 = meta["H0"], meta["W0"], meta["C0"]
        num_classes = arrs["bc"].shape[-1]

        # Stem LHS: NCHW -> NHWC, row-only zero pad, stride-2 row selection for
        # the 3 kh taps, taps concatenated on the lane axis.  (Tiny XLA prep on
        # the HBM input; the stem matmul itself runs inside the kernel.)
        x = jnp.transpose(x_nchw, (0, 2, 3, 1)).astype(jnp.float32)   # (N,H,W,3)
        xr = jnp.pad(x, ((0, 0), (1, 1), (0, 0), (0, 0)))             # rows only
        xr = xr.reshape(N, Hin + 2, Win * 3)
        taps = [xr[:, di:di + 2 * (H0 - 1) + 1:2, :] for di in range(3)]
        stem_lhs = jnp.concatenate(taps, axis=-1).astype(jnp.bfloat16)  # (N,H0,3*Win*3)
        assert stem_lhs.shape[-1] == arrs["stem_w"].shape[0]

        operands = [stem_lhs, arrs["stem_w"], arrs["stem_b"]]
        for wt, bt in arrs["blocks"]:
            operands += [wt, bt]
        operands += [arrs["wc"], arrs["bc"]]

        in_specs = [pl.BlockSpec((1,) + stem_lhs.shape[1:], lambda b: (b, 0, 0))]
        in_specs += [pl.BlockSpec(a.shape, _const_index_map(a.ndim))
                     for a in operands[1:]]
        out_specs = pl.BlockSpec((1, 1, num_classes), lambda b: (b, 0, 0))

        # Advisory cost estimate.
        macs = H0 * stem_lhs.shape[-1] * (W0 * C0)
        for p, (wt, _) in zip(plan, arrs["blocks"]):
            macs += p["Ho"] * wt.shape[0] * wt.shape[1]
        macs += arrs["wc"].shape[0] * num_classes
        bytes_accessed = sum(int(np.prod(a.shape)) * a.dtype.itemsize
                             for a in operands) + N * num_classes * 4
        cost = pl.CostEstimate(flops=int(2 * N * macs), transcendentals=0,
                               bytes_accessed=int(bytes_accessed))

        out = pl.pallas_call(
            kernel,
            out_shape=jax.ShapeDtypeStruct((N, 1, num_classes), jnp.float32),
            grid=(N,),
            in_specs=in_specs,
            out_specs=out_specs,
            compiler_params=pltpu.CompilerParams(
                dimension_semantics=("parallel",),
                vmem_limit_bytes=24 * 1024 * 1024),
            cost_estimate=cost,
        )(*operands)
        return out[:, 0, :]

    return jax.jit(forward), arrays


# ----------------------------------------------------------------------------
# Pure-JAX reference (float32) for a loose sanity check
# ----------------------------------------------------------------------------

def mobilenet_reference(x_nchw, params):
    dn = ('NHWC', 'HWIO', 'NHWC')
    x = jnp.transpose(x_nchw, (0, 2, 3, 1)).astype(jnp.float32)
    x = jax.nn.relu(
        lax.conv_general_dilated(x, params["stem"]["w"], (2, 2), ((1, 1), (1, 1)),
                                 dimension_numbers=dn) + params["stem"]["b"])
    for blk in params["blocks"]:
        s = int(blk["stride"])
        x = jax.nn.relu(
            lax.conv_general_dilated(x, blk["w"], (s, s), ((1, 1), (1, 1)),
                                     dimension_numbers=dn) + blk["b"])
    x = jnp.mean(x, axis=(1, 2))
    return x @ params["wc"] + params["bc"]


# ----------------------------------------------------------------------------

if __name__ == "__main__":
    key = jax.random.PRNGKey(0)
    key, xkey = jax.random.split(key)

    num_classes = 16
    width_multiplier = 0.25
    params = build_mobilenet_params(key, num_classes=num_classes,
                                    width_multiplier=width_multiplier)

    # small ImageNet-like input, NCHW as in PyTorch
    x = jax.random.normal(xkey, (2, 3, 32, 32), jnp.float32)

    packed = pack_kernel_operands(params, (32, 32))
    forward, arrays = make_forward(packed)
    out = jax.block_until_ready(forward(x, arrays))

    assert out.shape == (2, num_classes), out.shape
    assert bool(jnp.all(jnp.isfinite(out)))

    # Loose sanity check vs an f32 reference (kernel math is bf16 on the MXU).
    ref = jax.jit(lambda a: mobilenet_reference(a, params))(x)
    err = float(jnp.max(jnp.abs(out - ref)))
    scale = float(jnp.max(jnp.abs(ref))) + 1e-6
    assert err <= 0.1 * (1.0 + scale), (err, scale)

    print("KERNEL_OK")
</pallas_src>

<mosaic_0001>
module attributes {stable_mosaic.version = 11 : i64} {
  func.func @kernel(%arg0: i32, %arg1: memref<1x16x288xbf16, #tpu.memory_space<vmem>>, %arg2: memref<288x128xbf16, #tpu.memory_space<vmem>>, %arg3: memref<1x128xf32, #tpu.memory_space<vmem>>, %arg4: memref<384x256xbf16, #tpu.memory_space<vmem>>, %arg5: memref<1x256xf32, #tpu.memory_space<vmem>>, %arg6: memref<768x256xbf16, #tpu.memory_space<vmem>>, %arg7: memref<1x256xf32, #tpu.memory_space<vmem>>, %arg8: memref<768x256xbf16, #tpu.memory_space<vmem>>, %arg9: memref<1x256xf32, #tpu.memory_space<vmem>>, %arg10: memref<768x256xbf16, #tpu.memory_space<vmem>>, %arg11: memref<1x256xf32, #tpu.memory_space<vmem>>, %arg12: memref<768x256xbf16, #tpu.memory_space<vmem>>, %arg13: memref<1x256xf32, #tpu.memory_space<vmem>>, %arg14: memref<768x256xbf16, #tpu.memory_space<vmem>>, %arg15: memref<1x256xf32, #tpu.memory_space<vmem>>, %arg16: memref<768x256xbf16, #tpu.memory_space<vmem>>, %arg17: memref<1x256xf32, #tpu.memory_space<vmem>>, %arg18: memref<768x256xbf16, #tpu.memory_space<vmem>>, %arg19: memref<1x256xf32, #tpu.memory_space<vmem>>, %arg20: memref<768x256xbf16, #tpu.memory_space<vmem>>, %arg21: memref<1x256xf32, #tpu.memory_space<vmem>>, %arg22: memref<768x256xbf16, #tpu.memory_space<vmem>>, %arg23: memref<1x256xf32, #tpu.memory_space<vmem>>, %arg24: memref<768x256xbf16, #tpu.memory_space<vmem>>, %arg25: memref<1x256xf32, #tpu.memory_space<vmem>>, %arg26: memref<768x256xbf16, #tpu.memory_space<vmem>>, %arg27: memref<1x256xf32, #tpu.memory_space<vmem>>, %arg28: memref<768x256xbf16, #tpu.memory_space<vmem>>, %arg29: memref<1x256xf32, #tpu.memory_space<vmem>>, %arg30: memref<256x16xbf16, #tpu.memory_space<vmem>>, %arg31: memref<1x16xf32, #tpu.memory_space<vmem>>, %arg32: memref<1x1x16xf32, #tpu.memory_space<vmem>>) attributes {dimension_semantics = [#tpu.dimension_semantics<parallel>], iteration_bounds = array<i64: 2>, scalar_prefetch = 0 : i64, scratch_operands = 0 : i64, tpu.core_type = #tpu.core_type<tc>, window_params = [{transform_indices = @transform_0, window_bounds = array<i64: 1, 16, 288>}, {pipeline_mode = #tpu.pipeline_mode<synchronous>, transform_indices = @transform_1, window_bounds = array<i64: 288, 128>}, {pipeline_mode = #tpu.pipeline_mode<synchronous>, transform_indices = @transform_2, window_bounds = array<i64: 1, 128>}, {pipeline_mode = #tpu.pipeline_mode<synchronous>, transform_indices = @transform_3, window_bounds = array<i64: 384, 256>}, {pipeline_mode = #tpu.pipeline_mode<synchronous>, transform_indices = @transform_4, window_bounds = array<i64: 1, 256>}, {pipeline_mode = #tpu.pipeline_mode<synchronous>, transform_indices = @transform_5, window_bounds = array<i64: 768, 256>}, {pipeline_mode = #tpu.pipeline_mode<synchronous>, transform_indices = @transform_6, window_bounds = array<i64: 1, 256>}, {pipeline_mode = #tpu.pipeline_mode<synchronous>, transform_indices = @transform_7, window_bounds = array<i64: 768, 256>}, {pipeline_mode = #tpu.pipeline_mode<synchronous>, transform_indices = @transform_8, window_bounds = array<i64: 1, 256>}, {pipeline_mode = #tpu.pipeline_mode<synchronous>, transform_indices = @transform_9, window_bounds = array<i64: 768, 256>}, {pipeline_mode = #tpu.pipeline_mode<synchronous>, transform_indices = @transform_10, window_bounds = array<i64: 1, 256>}, {pipeline_mode = #tpu.pipeline_mode<synchronous>, transform_indices = @transform_11, window_bounds = array<i64: 768, 256>}, {pipeline_mode = #tpu.pipeline_mode<synchronous>, transform_indices = @transform_12, window_bounds = array<i64: 1, 256>}, {pipeline_mode = #tpu.pipeline_mode<synchronous>, transform_indices = @transform_13, window_bounds = array<i64: 768, 256>}, {pipeline_mode = #tpu.pipeline_mode<synchronous>, transform_indices = @transform_14, window_bounds = array<i64: 1, 256>}, {pipeline_mode = #tpu.pipeline_mode<synchronous>, transform_indices = @transform_15, window_bounds = array<i64: 768, 256>}, {pipeline_mode = #tpu.pipeline_mode<synchronous>, transform_indices = @transform_16, window_bounds = array<i64: 1, 256>}, {pipeline_mode = #tpu.pipeline_mode<synchronous>, transform_indices = @transform_17, window_bounds = array<i64: 768, 256>}, {pipeline_mode = #tpu.pipeline_mode<synchronous>, transform_indices = @transform_18, window_bounds = array<i64: 1, 256>}, {pipeline_mode = #tpu.pipeline_mode<synchronous>, transform_indices = @transform_19, window_bounds = array<i64: 768, 256>}, {pipeline_mode = #tpu.pipeline_mode<synchronous>, transform_indices = @transform_20, window_bounds = array<i64: 1, 256>}, {pipeline_mode = #tpu.pipeline_mode<synchronous>, transform_indices = @transform_21, window_bounds = array<i64: 768, 256>}, {pipeline_mode = #tpu.pipeline_mode<synchronous>, transform_indices = @transform_22, window_bounds = array<i64: 1, 256>}, {pipeline_mode = #tpu.pipeline_mode<synchronous>, transform_indices = @transform_23, window_bounds = array<i64: 768, 256>}, {pipeline_mode = #tpu.pipeline_mode<synchronous>, transform_indices = @transform_24, window_bounds = array<i64: 1, 256>}, {pipeline_mode = #tpu.pipeline_mode<synchronous>, transform_indices = @transform_25, window_bounds = array<i64: 768, 256>}, {pipeline_mode = #tpu.pipeline_mode<synchronous>, transform_indices = @transform_26, window_bounds = array<i64: 1, 256>}, {pipeline_mode = #tpu.pipeline_mode<synchronous>, transform_indices = @transform_27, window_bounds = array<i64: 768, 256>}, {pipeline_mode = #tpu.pipeline_mode<synchronous>, transform_indices = @transform_28, window_bounds = array<i64: 1, 256>}, {pipeline_mode = #tpu.pipeline_mode<synchronous>, transform_indices = @transform_29, window_bounds = array<i64: 256, 16>}, {pipeline_mode = #tpu.pipeline_mode<synchronous>, transform_indices = @transform_30, window_bounds = array<i64: 1, 16>}, {transform_indices = @transform_31, window_bounds = array<i64: 1, 1, 16>}]} {
    %c0 = arith.constant 0 : index
    %c0_0 = arith.constant 0 : index
    %c0_1 = arith.constant 0 : index
    %0 = vector.load %arg1[%c0, %c0_0, %c0_1] : memref<1x16x288xbf16, #tpu.memory_space<vmem>>, vector<1x16x288xbf16>
    %1 = vector.shape_cast %0 : vector<1x16x288xbf16> to vector<16x288xbf16>
    %c0_2 = arith.constant 0 : index
    %c0_3 = arith.constant 0 : index
    %2 = vector.load %arg2[%c0_2, %c0_3] : memref<288x128xbf16, #tpu.memory_space<vmem>>, vector<288x128xbf16>
    %cst = arith.constant dense<0.000000e+00> : vector<16x128xf32>
    %3 = tpu.matmul %1, %2, %cst {dimension_numbers = #tpu.dot_dimension_numbers<[1], [0], [0], [1], [0, 0, 1, 1], [], []>} : vector<16x288xbf16>, vector<288x128xbf16>, vector<16x128xf32> -> vector<16x128xf32>
    %c0_4 = arith.constant 0 : index
    %c0_5 = arith.constant 0 : index
    %4 = vector.load %arg3[%c0_4, %c0_5] : memref<1x128xf32, #tpu.memory_space<vmem>>, vector<1x128xf32>
    %5 = vector.broadcast %4 : vector<1x128xf32> to vector<16x128xf32>
    %6 = arith.addf %3, %5 : vector<16x128xf32>
    %cst_6 = arith.constant 0.000000e+00 : f32
    %7 = vector.broadcast %cst_6 : f32 to vector<16x128xf32>
    %8 = arith.maximumf %6, %7 : vector<16x128xf32>
    %cst_7 = arith.constant 0.000000e+00 : f32
    %9 = vector.broadcast %cst_7 : f32 to vector<1x128xf32>
    %10 = tpu.concatenate %9, %8, %9 in 0 : vector<1x128xf32>, vector<16x128xf32>, vector<1x128xf32> -> vector<18x128xf32>
    %11 = vector.extract_strided_slice %10 {offsets = [0, 0], sizes = [16, 128], strides = [1, 1]} : vector<18x128xf32> to vector<16x128xf32>
    %12 = vector.extract_strided_slice %10 {offsets = [1, 0], sizes = [16, 128], strides = [1, 1]} : vector<18x128xf32> to vector<16x128xf32>
    %13 = vector.extract_strided_slice %10 {offsets = [2, 0], sizes = [16, 128], strides = [1, 1]} : vector<18x128xf32> to vector<16x128xf32>
    %14 = tpu.concatenate %11, %12, %13 in 1 : vector<16x128xf32>, vector<16x128xf32>, vector<16x128xf32> -> vector<16x384xf32>
    %15 = arith.truncf %14 : vector<16x384xf32> to vector<16x384xbf16>
    %c0_8 = arith.constant 0 : index
    %c0_9 = arith.constant 0 : index
    %16 = vector.load %arg4[%c0_8, %c0_9] : memref<384x256xbf16, #tpu.memory_space<vmem>>, vector<384x256xbf16>
    %cst_10 = arith.constant dense<0.000000e+00> : vector<16x256xf32>
    %17 = tpu.matmul %15, %16, %cst_10 {dimension_numbers = #tpu.dot_dimension_numbers<[1], [0], [0], [1], [0, 0, 1, 1], [], []>} : vector<16x384xbf16>, vector<384x256xbf16>, vector<16x256xf32> -> vector<16x256xf32>
    %c0_11 = arith.constant 0 : index
    %c0_12 = arith.constant 0 : index
    %18 = vector.load %arg5[%c0_11, %c0_12] : memref<1x256xf32, #tpu.memory_space<vmem>>, vector<1x256xf32>
    %19 = vector.broadcast %18 : vector<1x256xf32> to vector<16x256xf32>
    %20 = arith.addf %17, %19 : vector<16x256xf32>
    %cst_13 = arith.constant 0.000000e+00 : f32
    %21 = vector.broadcast %cst_13 : f32 to vector<16x256xf32>
    %22 = arith.maximumf %20, %21 : vector<16x256xf32>
    %cst_14 = arith.constant 0.000000e+00 : f32
    %23 = vector.broadcast %cst_14 : f32 to vector<1x256xf32>
    %24 = tpu.concatenate %23, %22, %23 in 0 : vector<1x256xf32>, vector<16x256xf32>, vector<1x256xf32> -> vector<18x256xf32>
    %25 = vector.extract_strided_slice %24 {offsets = [0, 0], sizes = [1, 256], strides = [1, 1]} : vector<18x256xf32> to vector<1x256xf32>
    %26 = vector.extract_strided_slice %24 {offsets = [2, 0], sizes = [1, 256], strides = [1, 1]} : vector<18x256xf32> to vector<1x256xf32>
    %27 = vector.extract_strided_slice %24 {offsets = [4, 0], sizes = [1, 256], strides = [1, 1]} : vector<18x256xf32> to vector<1x256xf32>
    %28 = vector.extract_strided_slice %24 {offsets = [6, 0], sizes = [1, 256], strides = [1, 1]} : vector<18x256xf32> to vector<1x256xf32>
    %29 = vector.extract_strided_slice %24 {offsets = [8, 0], sizes = [1, 256], strides = [1, 1]} : vector<18x256xf32> to vector<1x256xf32>
    %30 = vector.extract_strided_slice %24 {offsets = [10, 0], sizes = [1, 256], strides = [1, 1]} : vector<18x256xf32> to vector<1x256xf32>
    %31 = vector.extract_strided_slice %24 {offsets = [12, 0], sizes = [1, 256], strides = [1, 1]} : vector<18x256xf32> to vector<1x256xf32>
    %32 = vector.extract_strided_slice %24 {offsets = [14, 0], sizes = [1, 256], strides = [1, 1]} : vector<18x256xf32> to vector<1x256xf32>
    %33 = tpu.concatenate %25, %26, %27, %28, %29, %30, %31, %32 in 0 : vector<1x256xf32>, vector<1x256xf32>, vector<1x256xf32>, vector<1x256xf32>, vector<1x256xf32>, vector<1x256xf32>, vector<1x256xf32>, vector<1x256xf32> -> vector<8x256xf32>
    %34 = vector.extract_strided_slice %24 {offsets = [1, 0], sizes = [1, 256], strides = [1, 1]} : vector<18x256xf32> to vector<1x256xf32>
    %35 = vector.extract_strided_slice %24 {offsets = [3, 0], sizes = [1, 256], strides = [1, 1]} : vector<18x256xf32> to vector<1x256xf32>
    %36 = vector.extract_strided_slice %24 {offsets = [5, 0], sizes = [1, 256], strides = [1, 1]} : vector<18x256xf32> to vector<1x256xf32>
    %37 = vector.extract_strided_slice %24 {offsets = [7, 0], sizes = [1, 256], strides = [1, 1]} : vector<18x256xf32> to vector<1x256xf32>
    %38 = vector.extract_strided_slice %24 {offsets = [9, 0], sizes = [1, 256], strides = [1, 1]} : vector<18x256xf32> to vector<1x256xf32>
    %39 = vector.extract_strided_slice %24 {offsets = [11, 0], sizes = [1, 256], strides = [1, 1]} : vector<18x256xf32> to vector<1x256xf32>
    %40 = vector.extract_strided_slice %24 {offsets = [13, 0], sizes = [1, 256], strides = [1, 1]} : vector<18x256xf32> to vector<1x256xf32>
    %41 = vector.extract_strided_slice %24 {offsets = [15, 0], sizes = [1, 256], strides = [1, 1]} : vector<18x256xf32> to vector<1x256xf32>
    %42 = tpu.concatenate %34, %35, %36, %37, %38, %39, %40, %41 in 0 : vector<1x256xf32>, vector<1x256xf32>, vector<1x256xf32>, vector<1x256xf32>, vector<1x256xf32>, vector<1x256xf32>, vector<1x256xf32>, vector<1x256xf32> -> vector<8x256xf32>
    %43 = vector.extract_strided_slice %24 {offsets = [2, 0], sizes = [1, 256], strides = [1, 1]} : vector<18x256xf32> to vector<1x256xf32>
    %44 = vector.extract_strided_slice %24 {offsets = [4, 0], sizes = [1, 256], strides = [1, 1]} : vector<18x256xf32> to vector<1x256xf32>
    %45 = vector.extract_strided_slice %24 {offsets = [6, 0], sizes = [1, 256], strides = [1, 1]} : vector<18x256xf32> to vector<1x256xf32>
    %46 = vector.extract_strided_slice %24 {offsets = [8, 0], sizes = [1, 256], strides = [1, 1]} : vector<18x256xf32> to vector<1x256xf32>
    %47 = vector.extract_strided_slice %24 {offsets = [10, 0], sizes = [1, 256], strides = [1, 1]} : vector<18x256xf32> to vector<1x256xf32>
    %48 = vector.extract_strided_slice %24 {offsets = [12, 0], sizes = [1, 256], strides = [1, 1]} : vector<18x256xf32> to vector<1x256xf32>
    %49 = vector.extract_strided_slice %24 {offsets = [14, 0], sizes = [1, 256], strides = [1, 1]} : vector<18x256xf32> to vector<1x256xf32>
    %50 = vector.extract_strided_slice %24 {offsets = [16, 0], sizes = [1, 256], strides = [1, 1]} : vector<18x256xf32> to vector<1x256xf32>
    %51 = tpu.concatenate %43, %44, %45, %46, %47, %48, %49, %50 in 0 : vector<1x256xf32>, vector<1x256xf32>, vector<1x256xf32>, vector<1x256xf32>, vector<1x256xf32>, vector<1x256xf32>, vector<1x256xf32>, vector<1x256xf32> -> vector<8x256xf32>
    %52 = tpu.concatenate %33, %42, %51 in 1 : vector<8x256xf32>, vector<8x256xf32>, vector<8x256xf32> -> vector<8x768xf32>
    %53 = arith.truncf %52 : vector<8x768xf32> to vector<8x768xbf16>
    %c0_15 = arith.constant 0 : index
    %c0_16 = arith.constant 0 : index
    %54 = vector.load %arg6[%c0_15, %c0_16] : memref<768x256xbf16, #tpu.memory_space<vmem>>, vector<768x256xbf16>
    %cst_17 = arith.constant dense<0.000000e+00> : vector<8x256xf32>
    %55 = tpu.matmul %53, %54, %cst_17 {dimension_numbers = #tpu.dot_dimension_numbers<[1], [0], [0], [1], [0, 0, 1, 1], [], []>} : vector<8x768xbf16>, vector<768x256xbf16>, vector<8x256xf32> -> vector<8x256xf32>
    %c0_18 = arith.constant 0 : index
    %c0_19 = arith.constant 0 : index
    %56 = vector.load %arg7[%c0_18, %c0_19] : memref<1x256xf32, #tpu.memory_space<vmem>>, vector<1x256xf32>
    %57 = vector.broadcast %56 : vector<1x256xf32> to vector<8x256xf32>
    %58 = arith.addf %55, %57 : vector<8x256xf32>
    %cst_20 = arith.constant 0.000000e+00 : f32
    %59 = vector.broadcast %cst_20 : f32 to vector<8x256xf32>
    %60 = arith.maximumf %58, %59 : vector<8x256xf32>
    %cst_21 = arith.constant 0.000000e+00 : f32
    %61 = vector.broadcast %cst_21 : f32 to vector<1x256xf32>
    %62 = tpu.concatenate %61, %60, %61 in 0 : vector<1x256xf32>, vector<8x256xf32>, vector<1x256xf32> -> vector<10x256xf32>
    %63 = vector.extract_strided_slice %62 {offsets = [0, 0], sizes = [8, 256], strides = [1, 1]} : vector<10x256xf32> to vector<8x256xf32>
    %64 = vector.extract_strided_slice %62 {offsets = [1, 0], sizes = [8, 256], strides = [1, 1]} : vector<10x256xf32> to vector<8x256xf32>
    %65 = vector.extract_strided_slice %62 {offsets = [2, 0], sizes = [8, 256], strides = [1, 1]} : vector<10x256xf32> to vector<8x256xf32>
    %66 = tpu.concatenate %63, %64, %65 in 1 : vector<8x256xf32>, vector<8x256xf32>, vector<8x256xf32> -> vector<8x768xf32>
    %67 = arith.truncf %66 : vector<8x768xf32> to vector<8x768xbf16>
    %c0_22 = arith.constant 0 : index
    %c0_23 = arith.constant 0 : index
    %68 = vector.load %arg8[%c0_22, %c0_23] : memref<768x256xbf16, #tpu.memory_space<vmem>>, vector<768x256xbf16>
    %cst_24 = arith.constant dense<0.000000e+00> : vector<8x256xf32>
    %69 = tpu.matmul %67, %68, %cst_24 {dimension_numbers = #tpu.dot_dimension_numbers<[1], [0], [0], [1], [0, 0, 1, 1], [], []>} : vector<8x768xbf16>, vector<768x256xbf16>, vector<8x256xf32> -> vector<8x256xf32>
    %c0_25 = arith.constant 0 : index
    %c0_26 = arith.constant 0 : index
    %70 = vector.load %arg9[%c0_25, %c0_26] : memref<1x256xf32, #tpu.memory_space<vmem>>, vector<1x256xf32>
    %71 = vector.broadcast %70 : vector<1x256xf32> to vector<8x256xf32>
    %72 = arith.addf %69, %71 : vector<8x256xf32>
    %cst_27 = arith.constant 0.000000e+00 : f32
    %73 = vector.broadcast %cst_27 : f32 to vector<8x256xf32>
    %74 = arith.maximumf %72, %73 : vector<8x256xf32>
    %cst_28 = arith.constant 0.000000e+00 : f32
    %75 = vector.broadcast %cst_28 : f32 to vector<1x256xf32>
    %76 = tpu.concatenate %75, %74, %75 in 0 : vector<1x256xf32>, vector<8x256xf32>, vector<1x256xf32> -> vector<10x256xf32>
    %77 = vector.extract_strided_slice %76 {offsets = [0, 0], sizes = [1, 256], strides = [1, 1]} : vector<10x256xf32> to vector<1x256xf32>
    %78 = vector.extract_strided_slice %76 {offsets = [2, 0], sizes = [1, 256], strides = [1, 1]} : vector<10x256xf32> to vector<1x256xf32>
    %79 = vector.extract_strided_slice %76 {offsets = [4, 0], sizes = [1, 256], strides = [1, 1]} : vector<10x256xf32> to vector<1x256xf32>
    %80 = vector.extract_strided_slice %76 {offsets = [6, 0], sizes = [1, 256], strides = [1, 1]} : vector<10x256xf32> to vector<1x256xf32>
    %81 = tpu.concatenate %77, %78, %79, %80 in 0 : vector<1x256xf32>, vector<1x256xf32>, vector<1x256xf32>, vector<1x256xf32> -> vector<4x256xf32>
    %82 = vector.extract_strided_slice %76 {offsets = [1, 0], sizes = [1, 256], strides = [1, 1]} : vector<10x256xf32> to vector<1x256xf32>
    %83 = vector.extract_strided_slice %76 {offsets = [3, 0], sizes = [1, 256], strides = [1, 1]} : vector<10x256xf32> to vector<1x256xf32>
    %84 = vector.extract_strided_slice %76 {offsets = [5, 0], sizes = [1, 256], strides = [1, 1]} : vector<10x256xf32> to vector<1x256xf32>
    %85 = vector.extract_strided_slice %76 {offsets = [7, 0], sizes = [1, 256], strides = [1, 1]} : vector<10x256xf32> to vector<1x256xf32>
    %86 = tpu.concatenate %82, %83, %84, %85 in 0 : vector<1x256xf32>, vector<1x256xf32>, vector<1x256xf32>, vector<1x256xf32> -> vector<4x256xf32>
    %87 = vector.extract_strided_slice %76 {offsets = [2, 0], sizes = [1, 256], strides = [1, 1]} : vector<10x256xf32> to vector<1x256xf32>
    %88 = vector.extract_strided_slice %76 {offsets = [4, 0], sizes = [1, 256], strides = [1, 1]} : vector<10x256xf32> to vector<1x256xf32>
    %89 = vector.extract_strided_slice %76 {offsets = [6, 0], sizes = [1, 256], strides = [1, 1]} : vector<10x256xf32> to vector<1x256xf32>
    %90 = vector.extract_strided_slice %76 {offsets = [8, 0], sizes = [1, 256], strides = [1, 1]} : vector<10x256xf32> to vector<1x256xf32>
    %91 = tpu.concatenate %87, %88, %89, %90 in 0 : vector<1x256xf32>, vector<1x256xf32>, vector<1x256xf32>, vector<1x256xf32> -> vector<4x256xf32>
    %92 = tpu.concatenate %81, %86, %91 in 1 : vector<4x256xf32>, vector<4x256xf32>, vector<4x256xf32> -> vector<4x768xf32>
    %93 = arith.truncf %92 : vector<4x768xf32> to vector<4x768xbf16>
    %c0_29 = arith.constant 0 : index
    %c0_30 = arith.constant 0 : index
    %94 = vector.load %arg10[%c0_29, %c0_30] : memref<768x256xbf16, #tpu.memory_space<vmem>>, vector<768x256xbf16>
    %cst_31 = arith.constant dense<0.000000e+00> : vector<4x256xf32>
    %95 = tpu.matmul %93, %94, %cst_31 {dimension_numbers = #tpu.dot_dimension_numbers<[1], [0], [0], [1], [0, 0, 1, 1], [], []>} : vector<4x768xbf16>, vector<768x256xbf16>, vector<4x256xf32> -> vector<4x256xf32>
    %c0_32 = arith.constant 0 : index
    %c0_33 = arith.constant 0 : index
    %96 = vector.load %arg11[%c0_32, %c0_33] : memref<1x256xf32, #tpu.memory_space<vmem>>, vector<1x256xf32>
    %97 = vector.broadcast %96 : vector<1x256xf32> to vector<4x256xf32>
    %98 = arith.addf %95, %97 : vector<4x256xf32>
    %cst_34 = arith.constant 0.000000e+00 : f32
    %99 = vector.broadcast %cst_34 : f32 to vector<4x256xf32>
    %100 = arith.maximumf %98, %99 : vector<4x256xf32>
    %cst_35 = arith.constant 0.000000e+00 : f32
    %101 = vector.broadcast %cst_35 : f32 to vector<1x256xf32>
    %102 = tpu.concatenate %101, %100, %101 in 0 : vector<1x256xf32>, vector<4x256xf32>, vector<1x256xf32> -> vector<6x256xf32>
    %103 = vector.extract_strided_slice %102 {offsets = [0, 0], sizes = [4, 256], strides = [1, 1]} : vector<6x256xf32> to vector<4x256xf32>
    %104 = vector.extract_strided_slice %102 {offsets = [1, 0], sizes = [4, 256], strides = [1, 1]} : vector<6x256xf32> to vector<4x256xf32>
    %105 = vector.extract_strided_slice %102 {offsets = [2, 0], sizes = [4, 256], strides = [1, 1]} : vector<6x256xf32> to vector<4x256xf32>
    %106 = tpu.concatenate %103, %104, %105 in 1 : vector<4x256xf32>, vector<4x256xf32>, vector<4x256xf32> -> vector<4x768xf32>
    %107 = arith.truncf %106 : vector<4x768xf32> to vector<4x768xbf16>
    %c0_36 = arith.constant 0 : index
    %c0_37 = arith.constant 0 : index
    %108 = vector.load %arg12[%c0_36, %c0_37] : memref<768x256xbf16, #tpu.memory_space<vmem>>, vector<768x256xbf16>
    %cst_38 = arith.constant dense<0.000000e+00> : vector<4x256xf32>
    %109 = tpu.matmul %107, %108, %cst_38 {dimension_numbers = #tpu.dot_dimension_numbers<[1], [0], [0], [1], [0, 0, 1, 1], [], []>} : vector<4x768xbf16>, vector<768x256xbf16>, vector<4x256xf32> -> vector<4x256xf32>
    %c0_39 = arith.constant 0 : index
    %c0_40 = arith.constant 0 : index
    %110 = vector.load %arg13[%c0_39, %c0_40] : memref<1x256xf32, #tpu.memory_space<vmem>>, vector<1x256xf32>
    %111 = vector.broadcast %110 : vector<1x256xf32> to vector<4x256xf32>
    %112 = arith.addf %109, %111 : vector<4x256xf32>
    %cst_41 = arith.constant 0.000000e+00 : f32
    %113 = vector.broadcast %cst_41 : f32 to vector<4x256xf32>
    %114 = arith.maximumf %112, %113 : vector<4x256xf32>
    %cst_42 = arith.constant 0.000000e+00 : f32
    %115 = vector.broadcast %cst_42 : f32 to vector<1x256xf32>
    %116 = tpu.concatenate %115, %114, %115 in 0 : vector<1x256xf32>, vector<4x256xf32>, vector<1x256xf32> -> vector<6x256xf32>
    %117 = vector.extract_strided_slice %116 {offsets = [0, 0], sizes = [1, 256], strides = [1, 1]} : vector<6x256xf32> to vector<1x256xf32>
    %118 = vector.extract_strided_slice %116 {offsets = [2, 0], sizes = [1, 256], strides = [1, 1]} : vector<6x256xf32> to vector<1x256xf32>
    %119 = tpu.concatenate %117, %118 in 0 : vector<1x256xf32>, vector<1x256xf32> -> vector<2x256xf32>
    %120 = vector.extract_strided_slice %116 {offsets = [1, 0], sizes = [1, 256], strides = [1, 1]} : vector<6x256xf32> to vector<1x256xf32>
    %121 = vector.extract_strided_slice %116 {offsets = [3, 0], sizes = [1, 256], strides = [1, 1]} : vector<6x256xf32> to vector<1x256xf32>
    %122 = tpu.concatenate %120, %121 in 0 : vector<1x256xf32>, vector<1x256xf32> -> vector<2x256xf32>
    %123 = vector.extract_strided_slice %116 {offsets = [2, 0], sizes = [1, 256], strides = [1, 1]} : vector<6x256xf32> to vector<1x256xf32>
    %124 = vector.extract_strided_slice %116 {offsets = [4, 0], sizes = [1, 256], strides = [1, 1]} : vector<6x256xf32> to vector<1x256xf32>
    %125 = tpu.concatenate %123, %124 in 0 : vector<1x256xf32>, vector<1x256xf32> -> vector<2x256xf32>
    %126 = tpu.concatenate %119, %122, %125 in 1 : vector<2x256xf32>, vector<2x256xf32>, vector<2x256xf32> -> vector<2x768xf32>
    %127 = arith.truncf %126 : vector<2x768xf32> to vector<2x768xbf16>
    %c0_43 = arith.constant 0 : index
    %c0_44 = arith.constant 0 : index
    %128 = vector.load %arg14[%c0_43, %c0_44] : memref<768x256xbf16, #tpu.memory_space<vmem>>, vector<768x256xbf16>
    %cst_45 = arith.constant dense<0.000000e+00> : vector<2x256xf32>
    %129 = tpu.matmul %127, %128, %cst_45 {dimension_numbers = #tpu.dot_dimension_numbers<[1], [0], [0], [1], [0, 0, 1, 1], [], []>} : vector<2x768xbf16>, vector<768x256xbf16>, vector<2x256xf32> -> vector<2x256xf32>
    %c0_46 = arith.constant 0 : index
    %c0_47 = arith.constant 0 : index
    %130 = vector.load %arg15[%c0_46, %c0_47] : memref<1x256xf32, #tpu.memory_space<vmem>>, vector<1x256xf32>
    %131 = vector.broadcast %130 : vector<1x256xf32> to vector<2x256xf32>
    %132 = arith.addf %129, %131 : vector<2x256xf32>
    %cst_48 = arith.constant 0.000000e+00 : f32
    %133 = vector.broadcast %cst_48 : f32 to vector<2x256xf32>
    %134 = arith.maximumf %132, %133 : vector<2x256xf32>
    %cst_49 = arith.constant 0.000000e+00 : f32
    %135 = vector.broadcast %cst_49 : f32 to vector<1x256xf32>
    %136 = tpu.concatenate %135, %134, %135 in 0 : vector<1x256xf32>, vector<2x256xf32>, vector<1x256xf32> -> vector<4x256xf32>
    %137 = vector.extract_strided_slice %136 {offsets = [0, 0], sizes = [2, 256], strides = [1, 1]} : vector<4x256xf32> to vector<2x256xf32>
    %138 = vector.extract_strided_slice %136 {offsets = [1, 0], sizes = [2, 256], strides = [1, 1]} : vector<4x256xf32> to vector<2x256xf32>
    %139 = vector.extract_strided_slice %136 {offsets = [2, 0], sizes = [2, 256], strides = [1, 1]} : vector<4x256xf32> to vector<2x256xf32>
    %140 = tpu.concatenate %137, %138, %139 in 1 : vector<2x256xf32>, vector<2x256xf32>, vector<2x256xf32> -> vector<2x768xf32>
    %141 = arith.truncf %140 : vector<2x768xf32> to vector<2x768xbf16>
    %c0_50 = arith.constant 0 : index
    %c0_51 = arith.constant 0 : index
    %142 = vector.load %arg16[%c0_50, %c0_51] : memref<768x256xbf16, #tpu.memory_space<vmem>>, vector<768x256xbf16>
    %cst_52 = arith.constant dense<0.000000e+00> : vector<2x256xf32>
    %143 = tpu.matmul %141, %142, %cst_52 {dimension_numbers = #tpu.dot_dimension_numbers<[1], [0], [0], [1], [0, 0, 1, 1], [], []>} : vector<2x768xbf16>, vector<768x256xbf16>, vector<2x256xf32> -> vector<2x256xf32>
    %c0_53 = arith.constant 0 : index
    %c0_54 = arith.constant 0 : index
    %144 = vector.load %arg17[%c0_53, %c0_54] : memref<1x256xf32, #tpu.memory_space<vmem>>, vector<1x256xf32>
    %145 = vector.broadcast %144 : vector<1x256xf32> to vector<2x256xf32>
    %146 = arith.addf %143, %145 : vector<2x256xf32>
    %cst_55 = arith.constant 0.000000e+00 : f32
    %147 = vector.broadcast %cst_55 : f32 to vector<2x256xf32>
    %148 = arith.maximumf %146, %147 : vector<2x256xf32>
    %cst_56 = arith.constant 0.000000e+00 : f32
    %149 = vector.broadcast %cst_56 : f32 to vector<1x256xf32>
    %150 = tpu.concatenate %149, %148, %149 in 0 : vector<1x256xf32>, vector<2x256xf32>, vector<1x256xf32> -> vector<4x256xf32>
    %151 = vector.extract_strided_slice %150 {offsets = [0, 0], sizes = [2, 256], strides = [1, 1]} : vector<4x256xf32> to vector<2x256xf32>
    %152 = vector.extract_strided_slice %150 {offsets = [1, 0], sizes = [2, 256], strides = [1, 1]} : vector<4x256xf32> to vector<2x256xf32>
    %153 = vector.extract_strided_slice %150 {offsets = [2, 0], sizes = [2, 256], strides = [1, 1]} : vector<4x256xf32> to vector<2x256xf32>
    %154 = tpu.concatenate %151, %152, %153 in 1 : vector<2x256xf32>, vector<2x256xf32>, vector<2x256xf32> -> vector<2x768xf32>
    %155 = arith.truncf %154 : vector<2x768xf32> to vector<2x768xbf16>
    %c0_57 = arith.constant 0 : index
    %c0_58 = arith.constant 0 : index
    %156 = vector.load %arg18[%c0_57, %c0_58] : memref<768x256xbf16, #tpu.memory_space<vmem>>, vector<768x256xbf16>
    %cst_59 = arith.constant dense<0.000000e+00> : vector<2x256xf32>
    %157 = tpu.matmul %155, %156, %cst_59 {dimension_numbers = #tpu.dot_dimension_numbers<[1], [0], [0], [1], [0, 0, 1, 1], [], []>} : vector<2x768xbf16>, vector<768x256xbf16>, vector<2x256xf32> -> vector<2x256xf32>
    %c0_60 = arith.constant 0 : index
    %c0_61 = arith.constant 0 : index
    %158 = vector.load %arg19[%c0_60, %c0_61] : memref<1x256xf32, #tpu.memory_space<vmem>>, vector<1x256xf32>
    %159 = vector.broadcast %158 : vector<1x256xf32> to vector<2x256xf32>
    %160 = arith.addf %157, %159 : vector<2x256xf32>
    %cst_62 = arith.constant 0.000000e+00 : f32
    %161 = vector.broadcast %cst_62 : f32 to vector<2x256xf32>
    %162 = arith.maximumf %160, %161 : vector<2x256xf32>
    %cst_63 = arith.constant 0.000000e+00 : f32
    %163 = vector.broadcast %cst_63 : f32 to vector<1x256xf32>
    %164 = tpu.concatenate %163, %162, %163 in 0 : vector<1x256xf32>, vector<2x256xf32>, vector<1x256xf32> -> vector<4x256xf32>
    %165 = vector.extract_strided_slice %164 {offsets = [0, 0], sizes = [2, 256], strides = [1, 1]} : vector<4x256xf32> to vector<2x256xf32>
    %166 = vector.extract_strided_slice %164 {offsets = [1, 0], sizes = [2, 256], strides = [1, 1]} : vector<4x256xf32> to vector<2x256xf32>
    %167 = vector.extract_strided_slice %164 {offsets = [2, 0], sizes = [2, 256], strides = [1, 1]} : vector<4x256xf32> to vector<2x256xf32>
    %168 = tpu.concatenate %165, %166, %167 in 1 : vector<2x256xf32>, vector<2x256xf32>, vector<2x256xf32> -> vector<2x768xf32>
    %169 = arith.truncf %168 : vector<2x768xf32> to vector<2x768xbf16>
    %c0_64 = arith.constant 0 : index
    %c0_65 = arith.constant 0 : index
    %170 = vector.load %arg20[%c0_64, %c0_65] : memref<768x256xbf16, #tpu.memory_space<vmem>>, vector<768x256xbf16>
    %cst_66 = arith.constant dense<0.000000e+00> : vector<2x256xf32>
    %171 = tpu.matmul %169, %170, %cst_66 {dimension_numbers = #tpu.dot_dimension_numbers<[1], [0], [0], [1], [0, 0, 1, 1], [], []>} : vector<2x768xbf16>, vector<768x256xbf16>, vector<2x256xf32> -> vector<2x256xf32>
    %c0_67 = arith.constant 0 : index
    %c0_68 = arith.constant 0 : index
    %172 = vector.load %arg21[%c0_67, %c0_68] : memref<1x256xf32, #tpu.memory_space<vmem>>, vector<1x256xf32>
    %173 = vector.broadcast %172 : vector<1x256xf32> to vector<2x256xf32>
    %174 = arith.addf %171, %173 : vector<2x256xf32>
    %cst_69 = arith.constant 0.000000e+00 : f32
    %175 = vector.broadcast %cst_69 : f32 to vector<2x256xf32>
    %176 = arith.maximumf %174, %175 : vector<2x256xf32>
    %cst_70 = arith.constant 0.000000e+00 : f32
    %177 = vector.broadcast %cst_70 : f32 to vector<1x256xf32>
    %178 = tpu.concatenate %177, %176, %177 in 0 : vector<1x256xf32>, vector<2x256xf32>, vector<1x256xf32> -> vector<4x256xf32>
    %179 = vector.extract_strided_slice %178 {offsets = [0, 0], sizes = [2, 256], strides = [1, 1]} : vector<4x256xf32> to vector<2x256xf32>
    %180 = vector.extract_strided_slice %178 {offsets = [1, 0], sizes = [2, 256], strides = [1, 1]} : vector<4x256xf32> to vector<2x256xf32>
    %181 = vector.extract_strided_slice %178 {offsets = [2, 0], sizes = [2, 256], strides = [1, 1]} : vector<4x256xf32> to vector<2x256xf32>
    %182 = tpu.concatenate %179, %180, %181 in 1 : vector<2x256xf32>, vector<2x256xf32>, vector<2x256xf32> -> vector<2x768xf32>
    %183 = arith.truncf %182 : vector<2x768xf32> to vector<2x768xbf16>
    %c0_71 = arith.constant 0 : index
    %c0_72 = arith.constant 0 : index
    %184 = vector.load %arg22[%c0_71, %c0_72] : memref<768x256xbf16, #tpu.memory_space<vmem>>, vector<768x256xbf16>
    %cst_73 = arith.constant dense<0.000000e+00> : vector<2x256xf32>
    %185 = tpu.matmul %183, %184, %cst_73 {dimension_numbers = #tpu.dot_dimension_numbers<[1], [0], [0], [1], [0, 0, 1, 1], [], []>} : vector<2x768xbf16>, vector<768x256xbf16>, vector<2x256xf32> -> vector<2x256xf32>
    %c0_74 = arith.constant 0 : index
    %c0_75 = arith.constant 0 : index
    %186 = vector.load %arg23[%c0_74, %c0_75] : memref<1x256xf32, #tpu.memory_space<vmem>>, vector<1x256xf32>
    %187 = vector.broadcast %186 : vector<1x256xf32> to vector<2x256xf32>
    %188 = arith.addf %185, %187 : vector<2x256xf32>
    %cst_76 = arith.constant 0.000000e+00 : f32
    %189 = vector.broadcast %cst_76 : f32 to vector<2x256xf32>
    %190 = arith.maximumf %188, %189 : vector<2x256xf32>
    %cst_77 = arith.constant 0.000000e+00 : f32
    %191 = vector.broadcast %cst_77 : f32 to vector<1x256xf32>
    %192 = tpu.concatenate %191, %190, %191 in 0 : vector<1x256xf32>, vector<2x256xf32>, vector<1x256xf32> -> vector<4x256xf32>
    %193 = vector.extract_strided_slice %192 {offsets = [0, 0], sizes = [2, 256], strides = [1, 1]} : vector<4x256xf32> to vector<2x256xf32>
    %194 = vector.extract_strided_slice %192 {offsets = [1, 0], sizes = [2, 256], strides = [1, 1]} : vector<4x256xf32> to vector<2x256xf32>
    %195 = vector.extract_strided_slice %192 {offsets = [2, 0], sizes = [2, 256], strides = [1, 1]} : vector<4x256xf32> to vector<2x256xf32>
    %196 = tpu.concatenate %193, %194, %195 in 1 : vector<2x256xf32>, vector<2x256xf32>, vector<2x256xf32> -> vector<2x768xf32>
    %197 = arith.truncf %196 : vector<2x768xf32> to vector<2x768xbf16>
    %c0_78 = arith.constant 0 : index
    %c0_79 = arith.constant 0 : index
    %198 = vector.load %arg24[%c0_78, %c0_79] : memref<768x256xbf16, #tpu.memory_space<vmem>>, vector<768x256xbf16>
    %cst_80 = arith.constant dense<0.000000e+00> : vector<2x256xf32>
    %199 = tpu.matmul %197, %198, %cst_80 {dimension_numbers = #tpu.dot_dimension_numbers<[1], [0], [0], [1], [0, 0, 1, 1], [], []>} : vector<2x768xbf16>, vector<768x256xbf16>, vector<2x256xf32> -> vector<2x256xf32>
    %c0_81 = arith.constant 0 : index
    %c0_82 = arith.constant 0 : index
    %200 = vector.load %arg25[%c0_81, %c0_82] : memref<1x256xf32, #tpu.memory_space<vmem>>, vector<1x256xf32>
    %201 = vector.broadcast %200 : vector<1x256xf32> to vector<2x256xf32>
    %202 = arith.addf %199, %201 : vector<2x256xf32>
    %cst_83 = arith.constant 0.000000e+00 : f32
    %203 = vector.broadcast %cst_83 : f32 to vector<2x256xf32>
    %204 = arith.maximumf %202, %203 : vector<2x256xf32>
    %cst_84 = arith.constant 0.000000e+00 : f32
    %205 = vector.broadcast %cst_84 : f32 to vector<1x256xf32>
    %206 = tpu.concatenate %205, %204, %205 in 0 : vector<1x256xf32>, vector<2x256xf32>, vector<1x256xf32> -> vector<4x256xf32>
    %207 = vector.extract_strided_slice %206 {offsets = [0, 0], sizes = [1, 256], strides = [1, 1]} : vector<4x256xf32> to vector<1x256xf32>
    %208 = vector.extract_strided_slice %206 {offsets = [1, 0], sizes = [1, 256], strides = [1, 1]} : vector<4x256xf32> to vector<1x256xf32>
    %209 = vector.extract_strided_slice %206 {offsets = [2, 0], sizes = [1, 256], strides = [1, 1]} : vector<4x256xf32> to vector<1x256xf32>
    %210 = tpu.concatenate %207, %208, %209 in 1 : vector<1x256xf32>, vector<1x256xf32>, vector<1x256xf32> -> vector<1x768xf32>
    %211 = arith.truncf %210 : vector<1x768xf32> to vector<1x768xbf16>
    %c0_85 = arith.constant 0 : index
    %c0_86 = arith.constant 0 : index
    %212 = vector.load %arg26[%c0_85, %c0_86] : memref<768x256xbf16, #tpu.memory_space<vmem>>, vector<768x256xbf16>
    %cst_87 = arith.constant dense<0.000000e+00> : vector<1x256xf32>
    %213 = tpu.matmul %211, %212, %cst_87 {dimension_numbers = #tpu.dot_dimension_numbers<[1], [0], [0], [1], [0, 0, 1, 1], [], []>} : vector<1x768xbf16>, vector<768x256xbf16>, vector<1x256xf32> -> vector<1x256xf32>
    %c0_88 = arith.constant 0 : index
    %c0_89 = arith.constant 0 : index
    %214 = vector.load %arg27[%c0_88, %c0_89] : memref<1x256xf32, #tpu.memory_space<vmem>>, vector<1x256xf32>
    %215 = arith.addf %213, %214 : vector<1x256xf32>
    %cst_90 = arith.constant 0.000000e+00 : f32
    %216 = vector.broadcast %cst_90 : f32 to vector<1x256xf32>
    %217 = arith.maximumf %215, %216 : vector<1x256xf32>
    %cst_91 = arith.constant 0.000000e+00 : f32
    %218 = vector.broadcast %cst_91 : f32 to vector<1x256xf32>
    %219 = tpu.concatenate %218, %217, %218 in 0 : vector<1x256xf32>, vector<1x256xf32>, vector<1x256xf32> -> vector<3x256xf32>
    %220 = vector.extract_strided_slice %219 {offsets = [0, 0], sizes = [1, 256], strides = [1, 1]} : vector<3x256xf32> to vector<1x256xf32>
    %221 = vector.extract_strided_slice %219 {offsets = [1, 0], sizes = [1, 256], strides = [1, 1]} : vector<3x256xf32> to vector<1x256xf32>
    %222 = vector.extract_strided_slice %219 {offsets = [2, 0], sizes = [1, 256], strides = [1, 1]} : vector<3x256xf32> to vector<1x256xf32>
    %223 = tpu.concatenate %220, %221, %222 in 1 : vector<1x256xf32>, vector<1x256xf32>, vector<1x256xf32> -> vector<1x768xf32>
    %224 = arith.truncf %223 : vector<1x768xf32> to vector<1x768xbf16>
    %c0_92 = arith.constant 0 : index
    %c0_93 = arith.constant 0 : index
    %225 = vector.load %arg28[%c0_92, %c0_93] : memref<768x256xbf16, #tpu.memory_space<vmem>>, vector<768x256xbf16>
    %cst_94 = arith.constant dense<0.000000e+00> : vector<1x256xf32>
    %226 = tpu.matmul %224, %225, %cst_94 {dimension_numbers = #tpu.dot_dimension_numbers<[1], [0], [0], [1], [0, 0, 1, 1], [], []>} : vector<1x768xbf16>, vector<768x256xbf16>, vector<1x256xf32> -> vector<1x256xf32>
    %c0_95 = arith.constant 0 : index
    %c0_96 = arith.constant 0 : index
    %227 = vector.load %arg29[%c0_95, %c0_96] : memref<1x256xf32, #tpu.memory_space<vmem>>, vector<1x256xf32>
    %228 = arith.addf %226, %227 : vector<1x256xf32>
    %cst_97 = arith.constant 0.000000e+00 : f32
    %229 = vector.broadcast %cst_97 : f32 to vector<1x256xf32>
    %230 = arith.maximumf %228, %229 : vector<1x256xf32>
    %cst_98 = arith.constant dense<0.000000e+00> : vector<256xf32>
    %231 = vector.multi_reduction <add>, %230, %cst_98 [0] : vector<1x256xf32> to vector<256xf32>
    %232 = vector.shape_cast %231 : vector<256xf32> to vector<1x256xf32>
    %cst_99 = arith.constant 1.000000e+00 : f32
    %233 = vector.broadcast %cst_99 : f32 to vector<1x256xf32>
    %234 = arith.mulf %232, %233 : vector<1x256xf32>
    %235 = arith.truncf %234 : vector<1x256xf32> to vector<1x256xbf16>
    %c0_100 = arith.constant 0 : index
    %c0_101 = arith.constant 0 : index
    %236 = vector.load %arg30[%c0_100, %c0_101] : memref<256x16xbf16, #tpu.memory_space<vmem>>, vector<256x16xbf16>
    %cst_102 = arith.constant dense<0.000000e+00> : vector<1x16xf32>
    %237 = tpu.matmul %235, %236, %cst_102 {dimension_numbers = #tpu.dot_dimension_numbers<[1], [0], [0], [1], [0, 0, 1, 1], [], []>} : vector<1x256xbf16>, vector<256x16xbf16>, vector<1x16xf32> -> vector<1x16xf32>
    %c0_103 = arith.constant 0 : index
    %c0_104 = arith.constant 0 : index
    %238 = vector.load %arg31[%c0_103, %c0_104] : memref<1x16xf32, #tpu.memory_space<vmem>>, vector<1x16xf32>
    %239 = arith.addf %237, %238 : vector<1x16xf32>
    %c0_105 = arith.constant 0 : index
    %c0_106 = arith.constant 0 : index
    %c0_107 = arith.constant 0 : index
    %240 = vector.load %arg32[%c0_105, %c0_106, %c0_107] : memref<1x1x16xf32, #tpu.memory_space<vmem>>, vector<1x1x16xf32>
    %241 = vector.shape_cast %240 : vector<1x1x16xf32> to vector<1x16xf32>
    %242 = vector.shape_cast %239 : vector<1x16xf32> to vector<1x1x16xf32>
    tpu.vector_store %arg32[%c0_105, %c0_106, %c0_107], %242 {strides = array<i32>} : memref<1x1x16xf32, #tpu.memory_space<vmem>>, vector<1x1x16xf32>,
    return
  }
  func.func @transform_0(%arg0: i32) -> (i32, i32, i32) {
    %c0_i32 = arith.constant 0 : i32
    %c0_i32_0 = arith.constant 0 : i32
    %c0_i32_1 = arith.constant 0 : i32
    return %arg0, %c0_i32, %c0_i32_0 : i32, i32, i32
  }
  func.func @transform_1(%arg0: i32) -> (i32, i32) {
    %c0_i32 = arith.constant 0 : i32
    %c0_i32_0 = arith.constant 0 : i32
    %c0_i32_1 = arith.constant 0 : i32
    return %c0_i32, %c0_i32_0 : i32, i32
  }
  func.func @transform_2(%arg0: i32) -> (i32, i32) {
    %c0_i32 = arith.constant 0 : i32
    %c0_i32_0 = arith.constant 0 : i32
    %c0_i32_1 = arith.constant 0 : i32
    return %c0_i32, %c0_i32_0 : i32, i32
  }
  func.func @transform_3(%arg0: i32) -> (i32, i32) {
    %c0_i32 = arith.constant 0 : i32
    %c0_i32_0 = arith.constant 0 : i32
    %c0_i32_1 = arith.constant 0 : i32
    return %c0_i32, %c0_i32_0 : i32, i32
  }
  func.func @transform_4(%arg0: i32) -> (i32, i32) {
    %c0_i32 = arith.constant 0 : i32
    %c0_i32_0 = arith.constant 0 : i32
    %c0_i32_1 = arith.constant 0 : i32
    return %c0_i32, %c0_i32_0 : i32, i32
  }
  func.func @transform_5(%arg0: i32) -> (i32, i32) {
    %c0_i32 = arith.constant 0 : i32
    %c0_i32_0 = arith.constant 0 : i32
    %c0_i32_1 = arith.constant 0 : i32
    return %c0_i32, %c0_i32_0 : i32, i32
  }
  func.func @transform_6(%arg0: i32) -> (i32, i32) {
    %c0_i32 = arith.constant 0 : i32
    %c0_i32_0 = arith.constant 0 : i32
    %c0_i32_1 = arith.constant 0 : i32
    return %c0_i32, %c0_i32_0 : i32, i32
  }
  func.func @transform_7(%arg0: i32) -> (i32, i32) {
    %c0_i32 = arith.constant 0 : i32
    %c0_i32_0 = arith.constant 0 : i32
    %c0_i32_1 = arith.constant 0 : i32
    return %c0_i32, %c0_i32_0 : i32, i32
  }
  func.func @transform_8(%arg0: i32) -> (i32, i32) {
    %c0_i32 = arith.constant 0 : i32
    %c0_i32_0 = arith.constant 0 : i32
    %c0_i32_1 = arith.constant 0 : i32
    return %c0_i32, %c0_i32_0 : i32, i32
  }
  func.func @transform_9(%arg0: i32) -> (i32, i32) {
    %c0_i32 = arith.constant 0 : i32
    %c0_i32_0 = arith.constant 0 : i32
    %c0_i32_1 = arith.constant 0 : i32
    return %c0_i32, %c0_i32_0 : i32, i32
  }
  func.func @transform_10(%arg0: i32) -> (i32, i32) {
    %c0_i32 = arith.constant 0 : i32
    %c0_i32_0 = arith.constant 0 : i32
    %c0_i32_1 = arith.constant 0 : i32
    return %c0_i32, %c0_i32_0 : i32, i32
  }
  func.func @transform_11(%arg0: i32) -> (i32, i32) {
    %c0_i32 = arith.constant 0 : i32
    %c0_i32_0 = arith.constant 0 : i32
    %c0_i32_1 = arith.constant 0 : i32
    return %c0_i32, %c0_i32_0 : i32, i32
  }
  func.func @transform_12(%arg0: i32) -> (i32, i32) {
    %c0_i32 = arith.constant 0 : i32
    %c0_i32_0 = arith.constant 0 : i32
    %c0_i32_1 = arith.constant 0 : i32
    return %c0_i32, %c0_i32_0 : i32, i32
  }
  func.func @transform_13(%arg0: i32) -> (i32, i32) {
    %c0_i32 = arith.constant 0 : i32
    %c0_i32_0 = arith.constant 0 : i32
    %c0_i32_1 = arith.constant 0 : i32
    return %c0_i32, %c0_i32_0 : i32, i32
  }
  func.func @transform_14(%arg0: i32) -> (i32, i32) {
    %c0_i32 = arith.constant 0 : i32
    %c0_i32_0 = arith.constant 0 : i32
    %c0_i32_1 = arith.constant 0 : i32
    return %c0_i32, %c0_i32_0 : i32, i32
  }
  func.func @transform_15(%arg0: i32) -> (i32, i32) {
    %c0_i32 = arith.constant 0 : i32
    %c0_i32_0 = arith.constant 0 : i32
    %c0_i32_1 = arith.constant 0 : i32
    return %c0_i32, %c0_i32_0 : i32, i32
  }
  func.func @transform_16(%arg0: i32) -> (i32, i32) {
    %c0_i32 = arith.constant 0 : i32
    %c0_i32_0 = arith.constant 0 : i32
    %c0_i32_1 = arith.constant 0 : i32
    return %c0_i32, %c0_i32_0 : i32, i32
  }
  func.func @transform_17(%arg0: i32) -> (i32, i32) {
    %c0_i32 = arith.constant 0 : i32
    %c0_i32_0 = arith.constant 0 : i32
    %c0_i32_1 = arith.constant 0 : i32
    return %c0_i32, %c0_i32_0 : i32, i32
  }
  func.func @transform_18(%arg0: i32) -> (i32, i32) {
    %c0_i32 = arith.constant 0 : i32
    %c0_i32_0 = arith.constant 0 : i32
    %c0_i32_1 = arith.constant 0 : i32
    return %c0_i32, %c0_i32_0 : i32, i32
  }
  func.func @transform_19(%arg0: i32) -> (i32, i32) {
    %c0_i32 = arith.constant 0 : i32
    %c0_i32_0 = arith.constant 0 : i32
    %c0_i32_1 = arith.constant 0 : i32
    return %c0_i32, %c0_i32_0 : i32, i32
  }
  func.func @transform_20(%arg0: i32) -> (i32, i32) {
    %c0_i32 = arith.constant 0 : i32
    %c0_i32_0 = arith.constant 0 : i32
    %c0_i32_1 = arith.constant 0 : i32
    return %c0_i32, %c0_i32_0 : i32, i32
  }
  func.func @transform_21(%arg0: i32) -> (i32, i32) {
    %c0_i32 = arith.constant 0 : i32
    %c0_i32_0 = arith.constant 0 : i32
    %c0_i32_1 = arith.constant 0 : i32
    return %c0_i32, %c0_i32_0 : i32, i32
  }
  func.func @transform_22(%arg0: i32) -> (i32, i32) {
    %c0_i32 = arith.constant 0 : i32
    %c0_i32_0 = arith.constant 0 : i32
    %c0_i32_1 = arith.constant 0 : i32
    return %c0_i32, %c0_i32_0 : i32, i32
  }
  func.func @transform_23(%arg0: i32) -> (i32, i32) {
    %c0_i32 = arith.constant 0 : i32
    %c0_i32_0 = arith.constant 0 : i32
    %c0_i32_1 = arith.constant 0 : i32
    return %c0_i32, %c0_i32_0 : i32, i32
  }
  func.func @transform_24(%arg0: i32) -> (i32, i32) {
    %c0_i32 = arith.constant 0 : i32
    %c0_i32_0 = arith.constant 0 : i32
    %c0_i32_1 = arith.constant 0 : i32
    return %c0_i32, %c0_i32_0 : i32, i32
  }
  func.func @transform_25(%arg0: i32) -> (i32, i32) {
    %c0_i32 = arith.constant 0 : i32
    %c0_i32_0 = arith.constant 0 : i32
    %c0_i32_1 = arith.constant 0 : i32
    return %c0_i32, %c0_i32_0 : i32, i32
  }
  func.func @transform_26(%arg0: i32) -> (i32, i32) {
    %c0_i32 = arith.constant 0 : i32
    %c0_i32_0 = arith.constant 0 : i32
    %c0_i32_1 = arith.constant 0 : i32
    return %c0_i32, %c0_i32_0 : i32, i32
  }
  func.func @transform_27(%arg0: i32) -> (i32, i32) {
    %c0_i32 = arith.constant 0 : i32
    %c0_i32_0 = arith.constant 0 : i32
    %c0_i32_1 = arith.constant 0 : i32
    return %c0_i32, %c0_i32_0 : i32, i32
  }
  func.func @transform_28(%arg0: i32) -> (i32, i32) {
    %c0_i32 = arith.constant 0 : i32
    %c0_i32_0 = arith.constant 0 : i32
    %c0_i32_1 = arith.constant 0 : i32
    return %c0_i32, %c0_i32_0 : i32, i32
  }
  func.func @transform_29(%arg0: i32) -> (i32, i32) {
    %c0_i32 = arith.constant 0 : i32
    %c0_i32_0 = arith.constant 0 : i32
    %c0_i32_1 = arith.constant 0 : i32
    return %c0_i32, %c0_i32_0 : i32, i32
  }
  func.func @transform_30(%arg0: i32) -> (i32, i32) {
    %c0_i32 = arith.constant 0 : i32
    %c0_i32_0 = arith.constant 0 : i32
    %c0_i32_1 = arith.constant 0 : i32
    return %c0_i32, %c0_i32_0 : i32, i32
  }
  func.func @transform_31(%arg0: i32) -> (i32, i32, i32) {
    %c0_i32 = arith.constant 0 : i32
    %c0_i32_0 = arith.constant 0 : i32
    %c0_i32_1 = arith.constant 0 : i32
    return %arg0, %c0_i32, %c0_i32_0 : i32, i32, i32
  }
}

</mosaic_0001>

<bundles_post_ra>
// kernel: forward.1
= control target key start
LH: loop header
LB: loop body
LE: loop exit
PB: predicated region body
PF: predicated region fallthrough
CT: control target
= control target key end

     0   :  { %s14968_s6 = smov 1   ;;  %s14969_s10 = smov 2   ;;  %s15896_s0 = inlined_call_operand.smem [shape: u32[32], index: -1, kind: input, shape index: {}] }
   0x1   :  { %s15025_s5 = sld [smem:[%s15896_s0]]   ;;  %s14970_s14 = smov 3  }
   0x2   :  { %s15030_s9 = sld [smem:[%s15896_s0 + %s14968_s6]]   ;;  %s14971_s18 = smov 4  }
   0x3   :  { %s15035_s13 = sld [smem:[%s15896_s0 + %s14969_s10]]   ;;  %s14972_s22 = smov 5  }
   0x4   :  { %s15040_s17 = sld [smem:[%s15896_s0 + %s14970_s14]]   ;;  %s14973_s26 = smov 6  }
   0x5   :  { %s15045_s21 = sld [smem:[%s15896_s0 + %s14971_s18]]   ;;  %s14974_s30 = smov 7  }
   0x6   :  { %s15050_s25 = sld [smem:[%s15896_s0 + %s14972_s22]]   ;;  %s14975_s4 = smov 8  }
   0x7   :  { %s15055_s29 = sld [smem:[%s15896_s0 + %s14973_s26]]   ;;  %s14976_s10 = smov 9  }
   0x8   :  { %s15060_s3 = sld [smem:[%s15896_s0 + %s14974_s30]]   ;;  %s14977_s15 = smov 10  }
   0x9   :  { %15906 = sst [smem:[#allocation28_spill]] %s15035_s13  ;;  %s14978_s20 = smov 11  }
   0xa   :  { %s15065_s8 = sld [smem:[%s15896_s0 + %s14975_s4]]   ;;  %s14979_s26 = smov 12  }
   0xb   :  { %15907 = sst [smem:[#allocation29_spill]] %s15045_s21  ;;  %s14980_s1 = smov 13  }
   0xc   :  { %s15070_s14 = sld [smem:[%s15896_s0 + %s14976_s10]]   ;;  %s14981_s7 = smov 14  }
   0xd   :  { %15908 = sst [smem:[#allocation30_spill]] %s15055_s29  ;;  %s14983_s22 = smov 16  }
   0xe   :  { %15909 = sst [smem:[#allocation31_spill]] %s15060_s3  ;;  %s14984_s28 = smov 17  }
   0xf   :  { %s15075_s19 = sld [smem:[%s15896_s0 + %s14977_s15]]   ;;  %s14982_s15 = smov 15  }
  0x10   :  { %15910 = sst [smem:[#allocation32_spill]] %s15065_s8 }
  0x11   :  { %s15080_s24 = sld [smem:[%s15896_s0 + %s14978_s20]]  }
  0x12   :  { %15911 = sst [smem:[#allocation33_spill]] %s15070_s14 }
  0x13   :  { %s15085_s30 = sld [smem:[%s15896_s0 + %s14979_s26]]  }
  0x14   :  { %s15090_s6 = sld [smem:[%s15896_s0 + %s14980_s1]]  }
  0x15   :  { %15912 = sst [smem:[#allocation34_spill]] %s15075_s19 }
  0x16   :  { %s15095_s12 = sld [smem:[%s15896_s0 + %s14981_s7]]   ;;  %s14985_s7 = smov 18  }
  0x17   :  { %s15100_s20 = sld [smem:[%s15896_s0 + %s14982_s15]]   ;;  %s14986_s15 = smov 19  }
  0x18   :  { %s15105_s27 = sld [smem:[%s15896_s0 + %s14983_s22]]   ;;  %s14987_s22 = smov 20  }
  0x19   :  { %15913 = sst [smem:[#allocation35_spill]] %s15085_s30 }
  0x1a   :  { %15914 = sst [smem:[#allocation36_spill]] %s15090_s6 }
  0x1b   :  { %s15110_s4 = sld [smem:[%s15896_s0 + %s14984_s28]]   ;;  %s14988_s28 = smov 21  }
  0x1c   :  { %15915 = sst [smem:[#allocation37_spill]] %s15095_s12 }
  0x1d   :  { %s15115_s12 = sld [smem:[%s15896_s0 + %s14985_s7]]   ;;  %s14989_s7 = smov 22  }
  0x1e   :  { %15916 = sst [smem:[#allocation38_spill]] %s15105_s27 }
  0x1f   :  { %s15120_s30 = sld [smem:[%s15896_s0 + %s14986_s15]]   ;;  %s14990_s15 = smov 23  }
  0x20   :  { %s15125_s27 = sld [smem:[%s15896_s0 + %s14987_s22]]   ;;  %s14991_s22 = smov 24  }
  0x21   :  { %s15130_s19 = sld [smem:[%s15896_s0 + %s14988_s28]]   ;;  %s14992_s28 = smov 25  }
  0x22   :  { %s15140_s8 = sld [smem:[%s15896_s0 + %s14990_s15]]   ;;  %s14994_s15 = smov 27  }
  0x23   :  { %15917 = sst [smem:[#allocation39_spill]] %s15115_s12 }
  0x24   :  { %s15135_s12 = sld [smem:[%s15896_s0 + %s14989_s7]]   ;;  %s14993_s7 = smov 26  }
  0x25   :  { %s15150_s29 = sld [smem:[%s15896_s0 + %s14992_s28]]   ;;  %s14996_s28 = smov 29  }
  0x26   :  { %15918 = sst [smem:[#allocation40_spill]] %s15125_s27 }
  0x27   :  { %s15145_s27 = sld [smem:[%s15896_s0 + %s14991_s22]]   ;;  %s14995_s22 = smov 28  }
  0x28   :  { %s15160_s3 = sld [smem:[%s15896_s0 + %s14994_s15]]   ;;  %s14998_s15 = smov 31  }
  0x29   :  { %s15170_s21 = sld [smem:[%s15896_s0 + %s14996_s28]]  }
  0x2a   :  { %15919 = sst [smem:[#allocation41_spill]] %s15135_s12 }
  0x2b   :  { %s15155_s12 = sld [smem:[%s15896_s0 + %s14993_s7]]   ;;  %s14997_s7 = smov 30  }
  0x2c   :  { %s15180_s13 = sld [smem:[%s15896_s0 + %s14998_s15]]  }
  0x2d   :  { %15920 = sst [smem:[#allocation42_spill]] %s15145_s27 }
  0x2e   :  { %s15165_s27 = sld [smem:[%s15896_s0 + %s14995_s22]]  }
  0x31   :  { %15921 = sst [smem:[#allocation43_spill]] %s15155_s12 }
  0x32   :  { %s15175_s12 = sld [smem:[%s15896_s0 + %s14997_s7]]  }
  0x33   :  { %68 = vsyncpa [#allocation3], 0 }
  0x34   :  { %69 = vsyncpa [#allocation6], 0 }
  0x35   :  { %70 = vsyncpa [#allocation9], 0 }
  0x36   :  { %71 = vsyncpa [#allocation12], 0 }
  0x37   :  { %72 = vsyncpa [#allocation15], 0 }
  0x38   :  { %73 = vsyncpa [#allocation18], 0 }
  0x39   :  { %74 = vsyncpa [#allocation4], 0 }
  0x3a   :  { %76 = vsyncpa [#allocation4 + $0x1], 0  ;;  %s15182_s22 = smov 0   ;;  %s15184_s23 = smov 0  }
  0x3b   :  { %s15186_s26 = smov 0   ;;  %s15188_s28 = smov 0  }
  0x3c LB: > { %15922 = sst [smem:[#allocation44_spill]] %s14954_s22  ;;  %s15203_s0 = sadd.s32 4294967295, %s14966_s28   ;;  %s14966_s28 = sphi %s15188_s28, %s15972_s28   ;;  %s14962_s26 = sphi %s15186_s26, %s15974_s26   ;;  %s14958_s23 = sphi %s15184_s23, %s15976_s23   ;;  %s14954_s22 = sphi %s15182_s22, %s15975_s22  }
  0x3d   : > { %15923 = sst [smem:[#allocation45_spill]] %s14962_s26  ;;  %s11184_s1 = sadd.s32 4294967294, %s14966_s28  }
  0x3e   : > { %15924 = sst [smem:[#allocation46_spill]] %s14966_s28  ;;  %s15207_s2 = sadd.s32 1, %s14966_s28  }
  0x3f   : > { %15925 = sst [smem:[#allocation47_spill]] %s15207_s2  ;;  %s745_s7 = sadd.s32 1, %s14962_s26 }
  0x40   : > { %s742_s10 = ssub.s32 %s14966_s28, %s15207_s2  ;;  %p755_p0 = scmp.ne.s32.totalorder %s14962_s26, %s14958_s23 }
  0x41   : > { %p743_p1 = scmp.eq.s32.totalorder %s742_s10, 0  ;;  %p756_p2 = scmp.eq.s32.totalorder %s15203_s0, 1 }
  0x42   : > { %p761_p3 = scmp.ne.s32.totalorder %s14958_s23, %s14954_s22  ;;  %p762_p4 = scmp.eq.s32.totalorder %s11184_s1, 1 }
  0x43   : > { %s15218_s11 = scalar_select %p743_p1, %s14962_s26, %s745_s7  }
  0x44   : > { %p15220_p5 = por %p756_p2, %p755_p0  ;;  %p15224_p6 = por %p762_p4, %p761_p3 }
  0x45   : > { %15926 = sst [smem:[#allocation48_spill]] %s15218_s11  ;;  %p11185_p7 = scmp.ge.s32.totalorder %s14966_s28, 1 }
  0x46   : > { %s15927_s15 = scalar_select %p15220_p5, 1, 0 }
  0x47   : > { %s15928_s16 = scalar_select %p15224_p6, 1, 0 }
  0x48   : > { %p769_p8 = scmp.lt.s32.totalorder %s14966_s28, 3  ;;  %p15904_p9 = scmp.eq.s32.totalorder %s15203_s0, 0 }
  0x49   : > { %15929 = sst [smem:[#allocation49_spill]] %s15928_s16  ;;  %s14999_s1 = smov [#allocation5]  }
  0x4a   : > { %p15231_p10 = pnand %p11185_p7, %p769_p8  ;;  %s815_s7 = sshll.u32 %s14999_s1, 4  ;;  %s816_s7 = int_to_ptr.vmem [resolvable:$true] %s815_s7 }
  0x4b   : > { %s15000_s11 = smov [#allocation8]   ;;  %s15001_s2 = smov [#allocation11]  }
  0x4c   : > { %p12617_p11 = pneg %p15231_p10  ;;  %s847_s26 = sshll.u32 %s15000_s11, 4  ;;  %s848_s26 = int_to_ptr.vmem [resolvable:$true] %s847_s26 }
  0x4d   : > { %s879_s16 = sshll.u32 %s15001_s2, 4  ;;  %s14607_s28 = scalar_lea.vmem %s816_s7, 12288  ;;  %s880_s16 = int_to_ptr.vmem [resolvable:$true] %s879_s16 }
  0x4e   : > { %p15239_p12 = pnand %p15904_p9, %p12617_p11  ;;  %p14608_p0 = scmp.ne.s32.totalorder %s816_s7, %s14607_s28 }
  0x4f   : > { %p14615_p3 = scmp.lt.s32.totalorder %s816_s7, %s816_s7  ;;  %p14616_p4 = scmp.lt.s32.totalorder %s14607_s28, %s14607_s28 }
  0x50   : > { %p15245_p13 = pneg %p15239_p12 }
  0x51   : > { %p14617_p7 = por %p14616_p4, %p14615_p3 }
  0x52   : > { %p14610_p1 = pnand %p14608_p0, %p15245_p13 }
  0x54   : > { %p14611_p2 = pneg %p14610_p1 }
  0x56   : > { %p14618_p8 = pnand %p14617_p7, %p14611_p2 }
  0x58   : > { %14621 = shalt.err (!%p14618_p8)
}
  0x59   : > { %s15002_s11 = smov 128   ;;  %s15933_s14 = sld [smem:[#allocation33_spill]] }
  0x5a   : > { %s15003_s2 = smov 8   ;;  %s14633_s1 = scalar_lea.vmem %s848_s26, 12288 }
  0x5b   : > { %p14634_p11 = scmp.ne.s32.totalorder %s848_s26, %s14633_s1  ;;  %p14641_p9 = scmp.lt.s32.totalorder %s848_s26, %s848_s26 }
  0x5c   : > { %p14642_p6 = scmp.lt.s32.totalorder %s14633_s1, %s14633_s1 }
  0x5d   : > { %p14636_p0 = pnand %p14634_p11, %p15245_p13 }
  0x5e   : > { %p14643_p3 = por %p14642_p6, %p14641_p9 }
  0x5f   : > { %12623 = dma.hbm_to_vmem [thread:$0]  (!%p15239_p12), %s15933_s14, 12288, %s816_s7, [#allocation6], %s15002_s11, %s15002_s11, %s15003_s2  }
  0x60   : > { %p14637_p1 = pneg %p14636_p0 }
  0x62   : > { %p14644_p2 = pnand %p14643_p3, %p14637_p1 }
  0x64   : > { %14647 = shalt.err (!%p14644_p2)
}
  0x65   : > { %s15934_s6 = sld [smem:[#allocation36_spill]]  ;;  %s14659_s28 = scalar_lea.vmem %s880_s16, 12288 }
  0x66   : > { %p14660_p4 = scmp.ne.s32.totalorder %s880_s16, %s14659_s28  ;;  %p14667_p11 = scmp.lt.s32.totalorder %s880_s16, %s880_s16 }
  0x67   : > { %p14668_p0 = scmp.lt.s32.totalorder %s14659_s28, %s14659_s28 }
  0x68   : > { %p14662_p7 = pnand %p14660_p4, %p15245_p13 }
  0x69   : > { %p14669_p5 = por %p14668_p0, %p14667_p11 }
  0x6a   : > { %p14663_p8 = pneg %p14662_p7 }
  0x6b   : > { %12629 = dma.hbm_to_vmem [thread:$0]  (!%p15239_p12), %s15934_s6, 12288, %s848_s26, [#allocation9], %s15002_s11, %s15002_s11, %s15003_s2  }
  0x6c   : > { %p14670_p6 = pnand %p14669_p5, %p14663_p8 }
  0x6e   : > { %14673 = shalt.err (!%p14670_p6)
}
  0x6f   : > { %12635 = dma.hbm_to_vmem [thread:$0]  (!%p15239_p12), %s15110_s4, 12288, %s880_s16, [#allocation12], %s15002_s11, %s15002_s11, %s15003_s2  }
  0x70   : > { %s15004_s26 = smov [#allocation14]   ;;  %s15005_s1 = smov [#allocation17]  }
  0x71   : > { %s911_s7 = sshll.u32 %s15004_s26, 4  ;;  %s943_s6 = sshll.u32 %s15005_s1, 4  ;;  %s912_s7 = int_to_ptr.vmem [resolvable:$true] %s911_s7  ;;  %s944_s6 = int_to_ptr.vmem [resolvable:$true] %s943_s6 }
  0x72   : > { %s14685_s14 = scalar_lea.vmem %s912_s7, 12288  ;;  %p14693_p5 = scmp.lt.s32.totalorder %s912_s7, %s912_s7 }
  0x73   : > { %p14686_p9 = scmp.ne.s32.totalorder %s912_s7, %s14685_s14  ;;  %p14694_p2 = scmp.lt.s32.totalorder %s14685_s14, %s14685_s14 }
  0x75   : > { %p14688_p1 = pnand %p14686_p9, %p15245_p13  ;;  %p14695_p4 = por %p14694_p2, %p14693_p5 }
  0x77   : > { %p14689_p3 = pneg %p14688_p1 }
  0x79   : > { %p14696_p7 = pnand %p14695_p4, %p14689_p3 }
  0x7b   : > { %14699 = shalt.err (!%p14696_p7)
}
  0x7c   : > { %12641 = dma.hbm_to_vmem [thread:$0]  (!%p15239_p12), %s15130_s19, 12288, %s912_s7, [#allocation15], %s15002_s11, %s15002_s11, %s15003_s2  }
  0x7d   : > { %s14711_s16 = scalar_lea.vmem %s944_s6, 12288  ;;  %p14719_p6 = scmp.lt.s32.totalorder %s944_s6, %s944_s6 }
  0x7e   : > { %p14712_p8 = scmp.ne.s32.totalorder %s944_s6, %s14711_s16  ;;  %p14720_p9 = scmp.lt.s32.totalorder %s14711_s16, %s14711_s16 }
  0x80   : > { %p14714_p11 = pnand %p14712_p8, %p15245_p13  ;;  %p14721_p1 = por %p14720_p9, %p14719_p6 }
  0x82   : > { %p14715_p0 = pneg %p14714_p11 }
  0x84   : > { %p14722_p5 = pnand %p14721_p1, %p14715_p0 }
  0x86   : > { %14725 = shalt.err (!%p14722_p5)
}
  0x87   : > { %12647 = dma.hbm_to_vmem [thread:$0]  (!%p15239_p12), %s15150_s29, 12288, %s944_s6, [#allocation18], %s15002_s11, %s15002_s11, %s15003_s2  }
  0x88   : > { %s15006_s14 = smov [#allocation2]   ;;  %s15007_s26 = smov [#allocation7]  }
  0x89   : > { %s787_s28 = sshll.u32 %s15006_s14, 4  ;;  %s831_s7 = sshll.u32 %s15007_s26, 4  ;;  %s788_s28 = int_to_ptr.vmem [resolvable:$true] %s787_s28  ;;  %s832_s7 = int_to_ptr.vmem [resolvable:$true] %s831_s7 }
  0x8a   : > { %s14737_s1 = scalar_lea.vmem %s788_s28, 6144  ;;  %p14745_p7 = scmp.lt.s32.totalorder %s788_s28, %s788_s28 }
  0x8b   : > { %p14738_p3 = scmp.ne.s32.totalorder %s788_s28, %s14737_s1  ;;  %p14746_p8 = scmp.lt.s32.totalorder %s14737_s1, %s14737_s1 }
  0x8d   : > { %p14740_p2 = pnand %p14738_p3, %p15245_p13  ;;  %p14747_p11 = por %p14746_p8, %p14745_p7 }
  0x8f   : > { %p14741_p4 = pneg %p14740_p2 }
  0x91   : > { %p14748_p0 = pnand %p14747_p11, %p14741_p4 }
  0x93   : > { %14751 = shalt.err (!%p14748_p0)
}
  0x94   : > { %12620 = dma.hbm_to_vmem [thread:$0]  (!%p15239_p12), %s15040_s17, 6144, %s788_s28, [#allocation3], %s15002_s11, %s15002_s11, %s15003_s2  }
  0x95   : > { %s14763_s6 = scalar_lea.vmem %s832_s7, 12288  ;;  %p14771_p5 = scmp.lt.s32.totalorder %s832_s7, %s832_s7 }
  0x96   : > { %p14764_p6 = scmp.ne.s32.totalorder %s832_s7, %s14763_s6  ;;  %p14772_p3 = scmp.lt.s32.totalorder %s14763_s6, %s14763_s6 }
  0x98   : > { %p14766_p9 = pnand %p14764_p6, %p15245_p13  ;;  %p14773_p2 = por %p14772_p3, %p14771_p5 }
  0x9a   : > { %p14767_p1 = pneg %p14766_p9 }
  0x9c   : > { %p14774_p7 = pnand %p14773_p2, %p14767_p1 }
  0x9e   : > { %14777 = shalt.err (!%p14774_p7)
}
  0x9f   : > { %12626 = dma.hbm_to_vmem [thread:$0]  (!%p15239_p12), %s15080_s24, 12288, %s832_s7, [#allocation6], %s15002_s11, %s15002_s11, %s15003_s2  }
  0xa0   : > { %s15008_s16 = smov [#allocation10]   ;;  %s15009_s28 = smov [#allocation13]  }
  0xa1   : > { %s863_s14 = sshll.u32 %s15008_s16, 4  ;;  %s895_s26 = sshll.u32 %s15009_s28, 4  ;;  %s864_s14 = int_to_ptr.vmem [resolvable:$true] %s863_s14  ;;  %s896_s26 = int_to_ptr.vmem [resolvable:$true] %s895_s26 }
  0xa2   : > { %s14789_s1 = scalar_lea.vmem %s864_s14, 12288  ;;  %p14797_p0 = scmp.lt.s32.totalorder %s864_s14, %s864_s14 }
  0xa3   : > { %p14790_p4 = scmp.ne.s32.totalorder %s864_s14, %s14789_s1  ;;  %p14798_p6 = scmp.lt.s32.totalorder %s14789_s1, %s14789_s1 }
  0xa5   : > { %p14792_p8 = pnand %p14790_p4, %p15245_p13  ;;  %p14799_p9 = por %p14798_p6, %p14797_p0 }
  0xa7   : > { %p14793_p11 = pneg %p14792_p8 }
  0xa9   : > { %p14800_p1 = pnand %p14799_p9, %p14793_p11 }
  0xab   : > { %14803 = shalt.err (!%p14800_p1)
}
  0xac   : > { %12632 = dma.hbm_to_vmem [thread:$0]  (!%p15239_p12), %s15100_s20, 12288, %s864_s14, [#allocation9], %s15002_s11, %s15002_s11, %s15003_s2  }
  0xad   : > { %s14815_s7 = scalar_lea.vmem %s896_s26, 12288  ;;  %p14823_p7 = scmp.lt.s32.totalorder %s896_s26, %s896_s26 }
  0xae   : > { %p14816_p5 = scmp.ne.s32.totalorder %s896_s26, %s14815_s7  ;;  %p14824_p4 = scmp.lt.s32.totalorder %s14815_s7, %s14815_s7 }
  0xb0   : > { %p14818_p3 = pnand %p14816_p5, %p15245_p13  ;;  %p14825_p8 = por %p14824_p4, %p14823_p7 }
  0xb2   : > { %p14819_p2 = pneg %p14818_p3 }
  0xb4   : > { %p14826_p0 = pnand %p14825_p8, %p14819_p2 }
  0xb6   : > { %14829 = shalt.err (!%p14826_p0)
}
  0xb7   : > { %12638 = dma.hbm_to_vmem [thread:$0]  (!%p15239_p12), %s15120_s30, 12288, %s896_s26, [#allocation12], %s15002_s11, %s15002_s11, %s15003_s2  }
  0xb8   : > { %s15010_s6 = smov [#allocation16]   ;;  %s15011_s14 = smov [#allocation19]  }
  0xb9   : > { %s927_s16 = sshll.u32 %s15010_s6, 4  ;;  %s959_s28 = sshll.u32 %s15011_s14, 4  ;;  %s928_s16 = int_to_ptr.vmem [resolvable:$true] %s927_s16  ;;  %s960_s28 = int_to_ptr.vmem [resolvable:$true] %s959_s28 }
  0xba   : > { %s14841_s1 = scalar_lea.vmem %s928_s16, 12288  ;;  %p14849_p1 = scmp.lt.s32.totalorder %s928_s16, %s928_s16 }
  0xbb   : > { %p14842_p11 = scmp.ne.s32.totalorder %s928_s16, %s14841_s1  ;;  %p14850_p5 = scmp.lt.s32.totalorder %s14841_s1, %s14841_s1 }
  0xbd   : > { %p14844_p6 = pnand %p14842_p11, %p15245_p13  ;;  %p14851_p3 = por %p14850_p5, %p14849_p1 }
  0xbf   : > { %p14845_p9 = pneg %p14844_p6 }
  0xc1   : > { %p14852_p2 = pnand %p14851_p3, %p14845_p9 }
  0xc3   : > { %14855 = shalt.err (!%p14852_p2)
}
  0xc4   : > { %12644 = dma.hbm_to_vmem [thread:$0]  (!%p15239_p12), %s15140_s8, 12288, %s928_s16, [#allocation15], %s15002_s11, %s15002_s11, %s15003_s2  }
  0xc5   : > { %s14867_s26 = scalar_lea.vmem %s960_s28, 12288  ;;  %p14875_p0 = scmp.lt.s32.totalorder %s960_s28, %s960_s28 }
  0xc6   : > { %p14868_p7 = scmp.ne.s32.totalorder %s960_s28, %s14867_s26  ;;  %p14876_p11 = scmp.lt.s32.totalorder %s14867_s26, %s14867_s26 }
  0xc8   : > { %p14870_p4 = pnand %p14868_p7, %p15245_p13  ;;  %p14877_p6 = por %p14876_p11, %p14875_p0 }
  0xca   : > { %p14871_p8 = pneg %p14870_p4 }
  0xcc   : > { %p14878_p1 = pnand %p14877_p6, %p14871_p8 }
  0xce   : > { %14881 = shalt.err (!%p14878_p1)
}
  0xcf   : > { %12650 = dma.hbm_to_vmem [thread:$0]  (!%p15239_p12), %s15160_s3, 12288, %s960_s28, [#allocation18], %s15002_s11, %s15002_s11, %s15003_s2  }
  0xd0   : > { %992 = sbr.rel (%p15231_p10) target bundleno = 4144 (0x1030), region = 144  ;;  %p15935_p9 = scmp.eq.s32.totalorder (!%p15231_p10), %s15203_s0, 0 }
  0xd5   : > { %14925 = dma.done.wait (%p15935_p9), [#allocation3], 6144   ;;  %p15936_p13 = pmov %p15935_p9 }
  0xd6   : > { %p15937_p5 = pmov %p15935_p9 }
  0xd7   : > { %14927 = vsyncadd (%p15936_p13), [#allocation3], 4294961152 }
  0xd8   : > { %14929 = dma.done.wait (%p15937_p5), [#allocation6], 24576   ;;  %p15938_p3 = pmov %p15937_p5 }
  0xda   : > { %14931 = vsyncadd (%p15938_p3), [#allocation6], 4294942720  ;;  %p15939_p2 = pmov %p15938_p3 }
  0xdc   : > { %14933 = dma.done.wait (%p15939_p2), [#allocation9], 24576   ;;  %p15940_p12 = pmov %p15939_p2 }
  0xdd   : > { %p15941_p10 = pmov %p15939_p2 }
  0xde   : > { %14935 = vsyncadd (%p15940_p12), [#allocation9], 4294942720 }
  0xdf   : > { %14937 = dma.done.wait (%p15941_p10), [#allocation12], 24576   ;;  %p15942_p7 = pmov %p15939_p2 }
  0xe0   : > { %p15943_p4 = pmov %p15939_p2 }
  0xe1   : > { %14939 = vsyncadd (%p15942_p7), [#allocation12], 4294942720 }
  0xe2   : > { %14941 = dma.done.wait (%p15943_p4), [#allocation15], 24576   ;;  %p15944_p8 = pmov %p15939_p2 }
  0xe3   : > { %p15945_p0 = pmov %p15939_p2 }
  0xe4   : > { %14943 = vsyncadd (%p15944_p8), [#allocation15], 4294942720 }
  0xe5   : > { %14945 = dma.done.wait (%p15945_p0), [#allocation18], 24576   ;;  %p15946_p11 = pmov %p15945_p0 }
  0xe6   : > { %v15012_v0 = vmov 0.0   ;;  %vm15013_vm0 = vmmov 0   ;;  %v12758_v1 = vld [vmem:[%s15030_s9 + $0x78] sm:$0xff]   ;;  %v12760_v3 = vld [vmem:[%s15030_s9 + $0x70] sm:$0xff]   ;;  %v12762_v5 = vld [vmem:[%s15030_s9 + $0x68] sm:$0xff]   ;;  %p1111_p6 = scmp.lt.s32.totalorder %s15203_s0, 1 }
  0xe7   : > { %14947 = vsyncadd (%p15946_p11), [#allocation18], 4294942720  ;;  %12562 = vmatprep.subr.bf16.mxu1 %v15012_v0  ;;  %12566 = vmatprep.mubr.msk.bf16.mxu1 %vm15013_vm0, %v15012_v0  ;;  %v12759_v2 = vld [vmem:[%s15030_s9 + $0x38] sm:$0xff]   ;;  %v12761_v4 = vld [vmem:[%s15030_s9 + $0x30] sm:$0xff]   ;;  %vm1287_vm1 = vcmask 261120   ;;  %s15947_s11 = sld [smem:[#allocation28_spill]] }
  0xe8   : > { %12515 = vmatprep.subr.bf16.mxu0 %v12758_v1  ;;  %v12763_v6 = vld [vmem:[%s15030_s9 + $0x28] sm:$0xff]   ;;  %v12764_v7 = vld [vmem:[%s15030_s9 + $0x60] sm:$0xff]   ;;  %s1112_s22 = scalar_select %p1111_p6, %s15203_s0, 1  ;;  %v12766_v9 = vld [vmem:[%s15030_s9 + $0x58] sm:$0xff]   ;;  %vm1377_vm2 = vcmask 1040384   ;;  %vm1388_vm4 = vcmask 1046528  }
  0xe9   : > { %12516 = vmatpush3.bf16.msra.mxu0 %v12759_v2  ;;  %v12765_v8 = vld [vmem:[%s15030_s9 + $0x20] sm:$0xff]   ;;  %v12772_v10 = vld [vmem:[%s15030_s9 + $0x88] sm:$0xff]   ;;  %v12767_v11 = vld [vmem:[%s15030_s9 + $0x18] sm:$0xff]   ;;  %vm1396_vm5 = vcmask 1045504   ;;  %vm15015_vm6 = vmmov 1   ;;  %s15952_s2 = sld [smem:[#allocation29_spill]] }
  0xea   : > { %12517 = vmatprep.subr.bf16.mxu0 %v12760_v3  ;;  %s12570_s18 = smul.u32 24, %s1112_s22  ;;  %v12768_v12 = vld [vmem:[%s15030_s9 + $0x50] sm:$0xff]   ;;  %12563 = vmatpush3.bf16.msra.mxu1 %v12772_v10  ;;  %v12775_v14 = vld [vmem:[%s15030_s9 + $0x80] sm:$0xff]   ;;  %v12770_v15 = vld [vmem:[%s15030_s9 + $0x48] sm:$0xff]   ;;  %vm1849_vm8 = vcmask 1041408   ;;  %vm1852_vm9 = vcmask 1042432  }
  0xeb   : > { %v12769_v13 = vld [vmem:[%s15030_s9 + $0x10] sm:$0xff]   ;;  %12564 = vmatprep.subr.bf16.mxu1 %v15012_v0  ;;  %v12785_v20 = vld [vmem:[#allocation2 + $0x64] ss:$8 sps:$4 sm:$0xff]   ;;  %v12783_v23 = vld [vmem:[#allocation2 + $0x60] ss:$8 sps:$4 sm:$0xff]   ;;  %vm1855_vm10 = vcmask 1043456  }
  0xec   : > { %s1115_s10 = scalar_lea.vmem %s15025_s5, %s12570_s18  ;;  %v12780_v18 = vld [vmem:[#allocation2 + $0x70] ss:$8 sps:$4 sm:$0xff]   ;;  %v12782_v19 = vld [vmem:[#allocation2 + $0x74] ss:$8 sps:$4 sm:$0xff]   ;;  %v12771_v21 = vld [vmem:[%s15030_s9 + $0x8] sm:$0xff]   ;;  %vm1858_vm11 = vcmask 1044480  }
  0xed   : > { %12518 = vmatpush3.bf16.msra.mxu0 %v12761_v4  ;;  %v12778_v16 = vld [vmem:[%s1115_s10 + $0x4] ss:$12 sps:$4 sm:$0xff]   ;;  %v12779_v17 = vld [vmem:[%s1115_s10 + $0x8] ss:$12 sps:$4 sm:$0xff]   ;;  %v12776_v27 = vld [vmem:[%s1115_s10] ss:$12 sps:$4 sm:$0xff]  }
  0xee   : > { %12519 = vmatprep.subr.bf16.mxu0 %v12762_v5  ;;  %12565 = vmatpush3.bf16.msra.mxu1 %v12775_v14  ;;  %v12773_v22 = vld [vmem:[%s15030_s9 + $0x40] sm:$0xff]   ;;  %v12788_v24 = vld [vmem:[#allocation2 + $0x54] ss:$8 sps:$4 sm:$0xff]   ;;  %v12786_v26 = vld [vmem:[#allocation2 + $0x50] ss:$8 sps:$4 sm:$0xff]   ;;  %s15953_s7 = sld [smem:[#allocation31_spill]] }
  0xef   : > { %1323 = vmatprep.mubr.bf16.mxu0 %v12778_v16  ;;  %1707 = vmatprep.subr.bf16.mxu1 %v12782_v19  ;;  %v12774_v25 = vld [vmem:[%s15030_s9] sm:$0xff]   ;;  %v12804_v29 = vld [vmem:[#allocation2 + $0x170] ss:$8 sps:$4 sm:$0xff]   ;;  %v12806_v30 = vld [vmem:[#allocation2 + $0x174] ss:$8 sps:$4 sm:$0xff]   ;;  %s15954_s6 = sld [smem:[#allocation30_spill]] }
  0xf0   : > { %v12791_v28 = vld [vmem:[#allocation2 + $0x44] ss:$8 sps:$4 sm:$0xff]   ;;  %v12789_v31 = vld [vmem:[#allocation2 + $0x40] ss:$8 sps:$4 sm:$0xff]   ;;  %v12794_v32 = vld [vmem:[#allocation2 + $0x34] ss:$8 sps:$4 sm:$0xff]  }
  0xf1   : > { %12520 = vmatpush3.bf16.msra.mxu0 %v12763_v6  ;;  %12567 = vmatmul.mubr.msk.bf16.vlgmr.msra.gmra.mxu1 %vm1287_vm1, %v12779_v17  ;;  %v12812_v33 = vld [vmem:[#allocation2 + $0x164] ss:$8 sps:$4 sm:$0xff]   ;;  %v12792_v34 = vld [vmem:[#allocation2 + $0x30] ss:$8 sps:$4 sm:$0xff]   ;;  %v12810_v35 = vld [vmem:[#allocation2 + $0x160] ss:$8 sps:$4 sm:$0xff]  }
  0xf2   : > { %12521 = vmatprep.subr.bf16.mxu0 %v12764_v7  ;;  %1708 = vmatpush1.bf16.msra.mxu1 %v12780_v18  ;;  %v12797_v36 = vld [vmem:[#allocation2 + $0x24] ss:$8 sps:$4 sm:$0xff]   ;;  %v12818_v37 = vld [vmem:[#allocation2 + $0x154] ss:$8 sps:$4 sm:$0xff]   ;;  %v12816_v38 = vld [vmem:[#allocation2 + $0x150] ss:$8 sps:$4 sm:$0xff]  }
  0xf3   : > { %1709 = vmatprep.subr.bf16.mxu1 %v12785_v20  ;;  %v12795_v39 = vld [vmem:[#allocation2 + $0x20] ss:$8 sps:$4 sm:$0xff]   ;;  %v12800_v40 = vld [vmem:[#allocation2 + $0x14] ss:$8 sps:$4 sm:$0xff]   ;;  %v12798_v41 = vld [vmem:[#allocation2 + $0x10] ss:$8 sps:$4 sm:$0xff]  }
  0xf4   : > { %v12803_v42 = vld [vmem:[#allocation2 + $0x4] ss:$8 sps:$4 sm:$0xff]   ;;  %v12801_v43 = vld [vmem:[#allocation2] ss:$8 sps:$4 sm:$0xff]   ;;  %v12809_v44 = vld [vmem:[#allocation2 + $0xf4] ss:$8 sps:$4 sm:$0xff]  }
  0xf5   : > { %12522 = vmatpush3.bf16.msra.mxu0 %v12765_v8  ;;  %v12807_v45 = vld [vmem:[#allocation2 + $0xf0] ss:$8 sps:$4 sm:$0xff]   ;;  %v12815_v46 = vld [vmem:[#allocation2 + $0xe4] ss:$8 sps:$4 sm:$0xff]   ;;  %v12813_v47 = vld [vmem:[#allocation2 + $0xe0] ss:$8 sps:$4 sm:$0xff]  }
  0xf6   : > { %12523 = vmatprep.subr.bf16.mxu0 %v12766_v9  ;;  %1710 = vmatpush1.bf16.msra.mxu1 %v12783_v23  ;;  %v12821_v48 = vld [vmem:[#allocation2 + $0xd4] ss:$8 sps:$4 sm:$0xff]   ;;  %v12819_v49 = vld [vmem:[#allocation2 + $0xd0] ss:$8 sps:$4 sm:$0xff]   ;;  %v12824_v50 = vld [vmem:[#allocation2 + $0x144] ss:$8 sps:$4 sm:$0xff]  }
  0xf7   : > { %1711 = vmatprep.subr.bf16.mxu1 %v12788_v24  ;;  %v12822_v51 = vld [vmem:[#allocation2 + $0x140] ss:$8 sps:$4 sm:$0xff]   ;;  %v12827_v52 = vld [vmem:[#allocation2 + $0xc4] ss:$8 sps:$4 sm:$0xff]   ;;  %v12830_v54 = vld [vmem:[#allocation2 + $0x134] ss:$8 sps:$4 sm:$0xff]  }
  0xf8   : > { %v12825_v53 = vld [vmem:[#allocation2 + $0xc0] ss:$8 sps:$4 sm:$0xff]   ;;  %v12828_v55 = vld [vmem:[#allocation2 + $0x130] ss:$8 sps:$4 sm:$0xff]   ;;  %v12833_v56 = vld [vmem:[#allocation2 + $0xb4] ss:$8 sps:$4 sm:$0xff]  }
  0xf9   : > { %12524 = vmatpush3.bf16.msra.mxu0 %v12767_v11  ;;  %v12831_v57 = vld [vmem:[#allocation2 + $0xb0] ss:$8 sps:$4 sm:$0xff]   ;;  %v12836_v58 = vld [vmem:[#allocation2 + $0x124] ss:$8 sps:$4 sm:$0xff]   ;;  %v12834_v59 = vld [vmem:[#allocation2 + $0x120] ss:$8 sps:$4 sm:$0xff]  }
  0xfa   : > { %12525 = vmatprep.subr.bf16.mxu0 %v12768_v12  ;;  %1712 = vmatpush1.bf16.msra.mxu1 %v12786_v26  ;;  %v12839_v60 = vld [vmem:[#allocation2 + $0xa4] ss:$8 sps:$4 sm:$0xff]   ;;  %v12837_v61 = vld [vmem:[#allocation2 + $0xa0] ss:$8 sps:$4 sm:$0xff]   ;;  %v12842_v62 = vld [vmem:[#allocation2 + $0x114] ss:$8 sps:$4 sm:$0xff]  }
  0xfb   : > { %1713 = vmatprep.subr.bf16.mxu1 %v12791_v28  ;;  %v12840_v63 = vld [vmem:[#allocation2 + $0x110] ss:$8 sps:$4 sm:$0xff]   ;;  %v12845_v0 = vld [vmem:[#allocation2 + $0x94] ss:$8 sps:$4 sm:$0xff]   ;;  %v12848_v2 = vld [vmem:[#allocation2 + $0x104] ss:$8 sps:$4 sm:$0xff]  }
  0xfc   : > { %v12843_v1 = vld [vmem:[#allocation2 + $0x90] ss:$8 sps:$4 sm:$0xff]   ;;  %v12846_v3 = vld [vmem:[#allocation2 + $0x100] ss:$8 sps:$4 sm:$0xff]   ;;  %v12851_v5 = vld [vmem:[#allocation2 + $0x84] ss:$8 sps:$4 sm:$0xff]  }
  0xfd   : > { %12526 = vmatpush3.bf16.msra.mxu0 %v12769_v13  ;;  %v12849_v4 = vld [vmem:[#allocation2 + $0x80] ss:$8 sps:$4 sm:$0xff]   ;;  %v15014_v6 = vmov 0   ;;  %v12854_v7 = vld [vmem:[%s15050_s25 + $0x74] ss:$8 sps:$4 sm:$0xff]   ;;  %vm15388_vm3 = vmneg %vm1377_vm2  ;;  %s15955_s16 = sld [smem:[#allocation32_spill]] }
  0xfe   : > { %12527 = vmatprep.subr.bf16.mxu0 %v12770_v15  ;;  %1714 = vmatpush1.bf16.msra.mxu1 %v12789_v31  ;;  %v12857_v8 = vld [vmem:[%s15050_s25 + $0x174] ss:$8 sps:$4 sm:$0xff]   ;;  %v11211_v14 = vld [vmem:[%s15947_s11] ss:$0 sm:$0xff]  ;;  %vm15397_vm7 = vmpackc.low %vm15015_vm6, %vm15388_vm3  ;;  %s15956_s14 = sld [smem:[#allocation34_spill]]  ;;  %vm10976_vm0 = vcmask 122880  }
  0xff   : > { %1715 = vmatprep.subr.bf16.mxu1 %v12794_v32  ;;  %vm11480_vm12 = vmpackc.low %vm15388_vm3, %vm15388_vm3  ;;  %s15957_s28 = sld [smem:[#allocation35_spill]]  ;;  %p15967_p9 = scmp.ne.s32.totalorder %s15927_s15, 0 }
 0x100   : > { %vm11680_vm13 = vmpackc.low %vm1858_vm11, %vm1858_vm11  ;;  %s15958_s1 = sld [smem:[#allocation37_spill]] }
 0x101   : > { %12528 = vmatpush3.bf16.msra.mxu0 %v12771_v21  ;;  %vm15743_vm14 = vmpackc.low %vm1852_vm9, %vm1852_vm9  ;;  %s15961_s26 = sld [smem:[#allocation38_spill]] }
 0x102   : > { %12529 = vmatprep.subr.bf16.mxu0 %v12773_v22  ;;  %1716 = vmatpush1.bf16.msra.mxu1 %v12792_v34  ;;  %s15962_s22 = sld [smem:[#allocation39_spill]]  ;;  %vm12490_vm15 = vmpackc.low %vm1849_vm8, %vm1849_vm8 }
 0x103   : > { %1717 = vmatprep.subr.bf16.mxu1 %v12797_v36  ;;  %s15963_s18 = sld [smem:[#allocation40_spill]] }
 0x104   : > { %s15964_s10 = sld [smem:[#allocation41_spill]] }
 0x105   : > { %12530 = vmatpush3.bf16.msra.mxu0 %v12774_v25  ;;  %s15965_s11 = sld [smem:[#allocation42_spill]] }
 0x106   : > { %1750 = vmatprep.subr.bf16.mxu0 %v12806_v30  ;;  %1718 = vmatpush1.bf16.msra.mxu1 %v12795_v39  ;;  %v12852_v39 = vld [vmem:[%s15050_s25 + $0x70] ss:$8 sps:$4 sm:$0xff]  }
 0x107   : > { %1719 = vmatprep.subr.bf16.mxu1 %v12800_v40  ;;  %v12855_v40 = vld [vmem:[%s15050_s25 + $0x170] ss:$8 sps:$4 sm:$0xff]  }
 0x108   : > { %1324 = vmatmul.mubr.bf16.vlgmr.msra.gmra.mxu0 %v12776_v27 }
 0x109   : > { %1751 = vmatpush1.bf16.msra.mxu0 %v12804_v29  ;;  %1782 = vmatprep.mubr.bf16.mxu0 %v15014_v6  ;;  %v12888_v6 = vld [vmem:[%s15050_s25 + $0x10] ss:$8 sps:$4 sm:$0xff]  }
 0x10a   : > { %1752 = vmatprep.subr.bf16.mxu0 %v12812_v33  ;;  %1720 = vmatpush1.bf16.msra.mxu1 %v12798_v41  ;;  %v12860_v41 = vld [vmem:[%s15050_s25 + $0x64] ss:$8 sps:$4 sm:$0xff]  }
 0x10b   : > { %1721 = vmatprep.subr.bf16.mxu1 %v12803_v42 }
 0x10d   : > { %1753 = vmatpush1.bf16.msra.mxu0 %v12810_v35 }
 0x10e   : > { %1754 = vmatprep.subr.bf16.mxu0 %v12818_v37  ;;  %1722 = vmatpush1.bf16.msra.mxu1 %v12801_v43 }
 0x10f   : > { %1723 = vmatprep.subr.bf16.mxu1 %v12809_v44 }
 0x111   : > { %1755 = vmatpush1.bf16.msra.mxu0 %v12816_v38  ;;  %v12936_v38 = vld [vmem:[%s15050_s25 + $0x90] ss:$8 sps:$4 sm:$0xff]  }
 0x112   : > { %1724 = vmatpush2.bf16.msra.mxu1 %v12807_v45  ;;  %1756 = vmatprep.subr.bf16.mxu0 %v12824_v50  ;;  %v12858_v50 = vld [vmem:[%s15050_s25 + $0x60] ss:$8 sps:$4 sm:$0xff]  }
 0x113   : > { %1725 = vmatprep.subr.bf16.mxu1 %v12815_v46  ;;  %v12863_v46 = vld [vmem:[%s15050_s25 + $0x164] ss:$8 sps:$4 sm:$0xff]  }
 0x115   : > { %1757 = vmatpush1.bf16.msra.mxu0 %v12822_v51  ;;  %v12861_v51 = vld [vmem:[%s15050_s25 + $0x160] ss:$8 sps:$4 sm:$0xff]  }
 0x116   : > { %1726 = vmatpush2.bf16.msra.mxu1 %v12813_v47  ;;  %1758 = vmatprep.subr.bf16.mxu0 %v12830_v54  ;;  %v12864_v54 = vld [vmem:[%s15050_s25 + $0x50] ss:$8 sps:$4 sm:$0xff]  }
 0x117   : > { %1727 = vmatprep.subr.bf16.mxu1 %v12821_v48 }
 0x119   : > { %1759 = vmatpush1.bf16.msra.mxu0 %v12828_v55  ;;  %v12867_v55 = vld [vmem:[%s15050_s25 + $0x150] ss:$8 sps:$4 sm:$0xff]  }
 0x11a   : > { %1728 = vmatpush2.bf16.msra.mxu1 %v12819_v49  ;;  %1760 = vmatprep.subr.bf16.mxu0 %v12836_v58  ;;  %v12870_v58 = vld [vmem:[%s15050_s25 + $0x40] ss:$8 sps:$4 sm:$0xff]  }
 0x11b   : > { %1729 = vmatprep.subr.bf16.mxu1 %v12827_v52  ;;  %v12866_v52 = vld [vmem:[%s15050_s25 + $0x54] ss:$8 sps:$4 sm:$0xff]  }
 0x11d   : > { %1761 = vmatpush1.bf16.msra.mxu0 %v12834_v59  ;;  %v12873_v59 = vld [vmem:[%s15050_s25 + $0x140] ss:$8 sps:$4 sm:$0xff]  }
 0x11e   : > { %1730 = vmatpush2.bf16.msra.mxu1 %v12825_v53  ;;  %1762 = vmatprep.subr.bf16.mxu0 %v12842_v62  ;;  %v12869_v53 = vld [vmem:[%s15050_s25 + $0x154] ss:$8 sps:$4 sm:$0xff]   ;;  %v12876_v62 = vld [vmem:[%s15050_s25 + $0x30] ss:$8 sps:$4 sm:$0xff]  }
 0x11f   : > { %1731 = vmatprep.subr.bf16.mxu1 %v12833_v56  ;;  %v12872_v56 = vld [vmem:[%s15050_s25 + $0x44] ss:$8 sps:$4 sm:$0xff]  }
 0x121   : > { %1763 = vmatpush1.bf16.msra.mxu0 %v12840_v63  ;;  %v12879_v63 = vld [vmem:[%s15050_s25 + $0x130] ss:$8 sps:$4 sm:$0xff]  }
 0x122   : > { %1732 = vmatpush2.bf16.msra.mxu1 %v12831_v57  ;;  %1764 = vmatprep.subr.bf16.mxu0 %v12848_v2  ;;  %v12875_v57 = vld [vmem:[%s15050_s25 + $0x144] ss:$8 sps:$4 sm:$0xff]   ;;  %v12882_v2 = vld [vmem:[%s15050_s25 + $0x20] ss:$8 sps:$4 sm:$0xff]  }
 0x123   : > { %1733 = vmatprep.subr.bf16.mxu1 %v12839_v60  ;;  %v12878_v60 = vld [vmem:[%s15050_s25 + $0x34] ss:$8 sps:$4 sm:$0xff]  }
 0x125   : > { %1765 = vmatpush1.bf16.msra.mxu0 %v12846_v3  ;;  %v12885_v3 = vld [vmem:[%s15050_s25 + $0x120] ss:$8 sps:$4 sm:$0xff]  }
 0x126   : > { %1734 = vmatpush2.bf16.msra.mxu1 %v12837_v61  ;;  %2497 = vmatprep.subr.bf16.mxu0 %v12854_v7  ;;  %v12881_v61 = vld [vmem:[%s15050_s25 + $0x134] ss:$8 sps:$4 sm:$0xff]   ;;  %v12891_v7 = vld [vmem:[%s15050_s25 + $0x110] ss:$8 sps:$4 sm:$0xff]  }
 0x127   : > { %1735 = vmatprep.subr.bf16.mxu1 %v12845_v0  ;;  %v12884_v0 = vld [vmem:[%s15050_s25 + $0x24] ss:$8 sps:$4 sm:$0xff]  }
 0x12a   : > { %1736 = vmatpush2.bf16.msra.mxu1 %v12843_v1  ;;  %v12887_v1 = vld [vmem:[%s15050_s25 + $0x124] ss:$8 sps:$4 sm:$0xff]  }
 0x12b   : > { %1737 = vmatprep.subr.bf16.mxu1 %v12851_v5  ;;  %v12893_v5 = vld [vmem:[%s15050_s25 + $0x114] ss:$8 sps:$4 sm:$0xff]  }
 0x12e   : > { %1738 = vmatpush2.bf16.msra.mxu1 %v12849_v4  ;;  %v12890_v4 = vld [vmem:[%s15050_s25 + $0x14] ss:$8 sps:$4 sm:$0xff]  }
 0x12f   : > { %2538 = vmatprep.subr.bf16.mxu1 %v12857_v8  ;;  %v12896_v8 = vld [vmem:[%s15050_s25 + $0x4] ss:$8 sps:$4 sm:$0xff]  }
 0x1b1   : > { %v1366_v9 = vpop.f32.mrf.mxu1 }
 0x1b3   : > { %v12568_v10 = vpop.f32.mrf.mxu1 }
 0x1b4   : > { %v12894_v10 = vld [vmem:[%s15050_s25] ss:$8 sps:$4 sm:$0xff]  }
 0x1b5   : > { %v1369_v11 = vpop.f32.mrf.mxu1 }
 0x1b7   : > { %v12569_v12 = vpop.f32.mrf.mxu1 }
 0x1b8   : > { %v12902_v12 = vld [vmem:[%s15050_s25 + $0xf4] ss:$8 sps:$4 sm:$0xff]  }
 0x1c8   : > { %v12531_v13 = vpop.f32.mrf.mxu0 }
 0x1ca   : > { %v12532_v15 = vpop.f32.mrf.mxu0 }
 0x1cb   : > { %v12533_v16 = vadd.f32 %v12532_v15, %v12531_v13  ;;  %v12905_v13 = vld [vmem:[%s15050_s25 + $0x1f4] ss:$8 sps:$4 sm:$0xff]   ;;  %v12903_v15 = vld [vmem:[%s15050_s25 + $0x1f0] ss:$8 sps:$4 sm:$0xff]  }
 0x1cc   : > { %v12534_v17 = vpop.f32.mrf.mxu0 }
 0x1cd   : > { %v1326_v18 = vadd.f32 %v12533_v16, %v11211_v14  ;;  %v12908_v16 = vld [vmem:[%s15050_s25 + $0xe4] ss:$8 sps:$4 sm:$0xff]  }
 0x1ce   : > { %v12535_v19 = vpop.f32.mrf.mxu0 }
 0x1cf   : > { %v1367_v20 = vadd.f32 %v1366_v9, %v1326_v18  ;;  %v12536_v21 = vadd.f32 %v12535_v19, %v12534_v17  ;;  %v12899_v9 = vld [vmem:[%s15050_s25 + $0x104] ss:$8 sps:$4 sm:$0xff]   ;;  %v12906_v18 = vld [vmem:[%s15050_s25 + $0xe0] ss:$8 sps:$4 sm:$0xff]  }
 0x1d0   : > { %v12911_v17 = vld [vmem:[%s15050_s25 + $0x1e4] ss:$8 sps:$4 sm:$0xff]   ;;  %v12909_v19 = vld [vmem:[%s15050_s25 + $0x1e0] ss:$8 sps:$4 sm:$0xff]  }
 0x1d1   : > { %v1373_v23 = vmax.f32 %v1367_v20, 0.0  ;;  %v1329_v24 = vadd.f32 %v12536_v21, %v11211_v14  ;;  %v12900_v14 = vld [vmem:[%s15050_s25 + $0xf0] ss:$8 sps:$4 sm:$0xff]   ;;  %v12914_v20 = vld [vmem:[%s15050_s25 + $0xd4] ss:$8 sps:$4 sm:$0xff]  }
 0x1d2   : > { %v12912_v21 = vld [vmem:[%s15050_s25 + $0xd0] ss:$8 sps:$4 sm:$0xff]  }
 0x1d3   : > { %v1378_v25 = vrot.slane %v1373_v23, 7  ;;  %v1370_v26 = vadd.f32 %v1369_v11, %v1329_v24  ;;  %v12897_v11 = vld [vmem:[%s15050_s25 + $0x100] ss:$8 sps:$4 sm:$0xff]   ;;  %v12917_v23 = vld [vmem:[%s15050_s25 + $0x1d4] ss:$8 sps:$4 sm:$0xff]  }
 0x1d4   : > { %v12915_v24 = vld [vmem:[%s15050_s25 + $0x1d0] ss:$8 sps:$4 sm:$0xff]  }
 0x1d5   : > { %v1374_v27 = vmax.f32 %v1370_v26, 0.0  ;;  %v1384_v28 = vsel %vm1377_vm2, 0.0, %v1378_v25  ;;  %v12918_v26 = vld [vmem:[%s15050_s25 + $0xc0] ss:$8 sps:$4 sm:$0xff]  }
 0x1d6   : > { %v1397_v30 = vrot.slane %v1384_v28, 2  ;;  %v1389_v33 = vrot.slane %v1384_v28, 1  ;;  %v12921_v28 = vld [vmem:[%s15050_s25 + $0x1c0] ss:$8 sps:$4 sm:$0xff]  }
 0x1d7   : > { %v1379_v29 = vrot.slane %v1374_v27, 7  ;;  %v12923_v27 = vld [vmem:[%s15050_s25 + $0x1c4] ss:$8 sps:$4 sm:$0xff]  }
 0x1d9   : > { %v1380_v31 = vsel %vm1377_vm2, %v1378_v25, %v1379_v29  ;;  %v1385_v32 = vsel %vm1377_vm2, %v1379_v29, 0.0  ;;  %v12926_v29 = vld [vmem:[%s15050_s25 + $0xb4] ss:$8 sps:$4 sm:$0xff]  }
 0x1da   : > { %v1392_v34 = vrot.slane %v1385_v32, 1  ;;  %v1398_v35 = vrot.slane %v1380_v31, 2  ;;  %v1400_v36 = vrot.slane %v1385_v32, 2  ;;  %v1390_v37 = vrot.slane %v1380_v31, 1  ;;  %v12927_v32 = vld [vmem:[%s15050_s25 + $0x1b0] ss:$8 sps:$4 sm:$0xff]  }
 0x1db   : > { %v11284_v49 = vpack.c.bf16 %v1380_v31, %v1378_v25  ;;  %v12920_v25 = vld [vmem:[%s15050_s25 + $0xc4] ss:$8 sps:$4 sm:$0xff]   ;;  %v12929_v31 = vld [vmem:[%s15050_s25 + $0x1b4] ss:$8 sps:$4 sm:$0xff]  }
 0x1dc   : > { %v1391_v42 = vsel %vm1388_vm4, %v1389_v33, %v1390_v37  ;;  %v1393_v43 = vsel %vm1388_vm4, %v1390_v37, %v1392_v34  ;;  %v1399_v44 = vsel %vm1396_vm5, %v1397_v30, %v1398_v35  ;;  %v1401_v45 = vsel %vm1396_vm5, %v1398_v35, %v1400_v36  ;;  %v12924_v30 = vld [vmem:[%s15050_s25 + $0xb0] ss:$8 sps:$4 sm:$0xff]   ;;  %v12932_v33 = vld [vmem:[%s15050_s25 + $0xa4] ss:$8 sps:$4 sm:$0xff]   ;;  %v12930_v34 = vld [vmem:[%s15050_s25 + $0xa0] ss:$8 sps:$4 sm:$0xff]  }
 0x1dd   : > { %v1405_v47 = vpack.c.bf16 %v1393_v43, %v1391_v42  ;;  %v1406_v48 = vpack.c.bf16 %v1401_v45, %v1399_v44  ;;  %v12935_v35 = vld [vmem:[%s15050_s25 + $0x1a4] ss:$8 sps:$4 sm:$0xff]   ;;  %v12933_v36 = vld [vmem:[%s15050_s25 + $0x1a0] ss:$8 sps:$4 sm:$0xff]   ;;  %v12938_v37 = vld [vmem:[%s15050_s25 + $0x94] ss:$8 sps:$4 sm:$0xff]  }
 0x1de   : > { %v12942_v42 = vld [vmem:[%s15050_s25 + $0x80] ss:$8 sps:$4 sm:$0xff]   ;;  %v12947_v44 = vld [vmem:[%s15050_s25 + $0x184] ss:$8 sps:$4 sm:$0xff]   ;;  %v12950_v45 = vld [vmem:[%s15050_s25 + $0x274] ss:$8 sps:$4 sm:$0xff]  }
 0x1df   : > { %1739 = vmatprep.mubr.bf16.mxu1 %v1405_v47  ;;  %1783 = vmatmul.mubr.bf16.vlgmr.msra.gmra.mxu0 %v1406_v48  ;;  %v12945_v43 = vld [vmem:[%s15050_s25 + $0x180] ss:$8 sps:$4 sm:$0xff]  }
 0x1e0   : > { %11285 = vmatmul.mubr.msk.bf16.vlgmr.msra.gmra.mxu1 %vm15397_vm7, %v11284_v49  ;;  %2498 = vmatpush1.bf16.msra.mxu0 %v12852_v39  ;;  %v12941_v39 = vld [vmem:[%s15050_s25 + $0x194] ss:$8 sps:$4 sm:$0xff]   ;;  %v1455_v48 = vld [vmem:[%s15952_s2] sm:$0x3]  ;;  %s15966_s2 = sld [smem:[#allocation43_spill]] }
 0x1e1   : > { %2539 = vmatpush1.bf16.msra.mxu1 %v12855_v40  ;;  %2499 = vmatprep.subr.bf16.mxu0 %v12860_v41  ;;  %v12939_v40 = vld [vmem:[%s15050_s25 + $0x190] ss:$8 sps:$4 sm:$0xff]   ;;  %v12944_v41 = vld [vmem:[%s15050_s25 + $0x84] ss:$8 sps:$4 sm:$0xff]  }
 0x1e2   : > { %2540 = vmatprep.subr.bf16.mxu1 %v12863_v46  ;;  %v1457_v46 = vlaneseq }
 0x1e4   : > { %2500 = vmatpush1.bf16.msra.mxu0 %v12858_v50  ;;  %v1458_v47 = vshrl.u32 %v1457_v46, 7 }
 0x1e5   : > { %2541 = vmatpush1.bf16.msra.mxu1 %v12861_v51  ;;  %2501 = vmatprep.subr.bf16.mxu0 %v12866_v52 }
 0x1e6   : > { %2542 = vmatprep.subr.bf16.mxu1 %v12869_v53  ;;  %v15471_v49 = vsub.s32 0, %v1458_v47  ;;  %v15473_v50 = vsub.s32 1, %v1458_v47 }
 0x1e8   : > { %2502 = vmatpush1.bf16.msra.mxu0 %v12864_v54  ;;  %v1460_v51 = vrot.slane %v1455_v48, %v15471_v49  ;;  %v1464_v53 = vrot.slane %v1455_v48, %v15473_v50 }
 0x1e9   : > { %2543 = vmatpush1.bf16.msra.mxu1 %v12867_v55  ;;  %2503 = vmatprep.subr.bf16.mxu0 %v12872_v56 }
 0x1ea   : > { %2544 = vmatprep.subr.bf16.mxu1 %v12875_v57 }
 0x1ec   : > { %2504 = vmatpush1.bf16.msra.mxu0 %v12870_v58 }
 0x1ed   : > { %2545 = vmatpush1.bf16.msra.mxu1 %v12873_v59  ;;  %2505 = vmatprep.subr.bf16.mxu0 %v12878_v60 }
 0x1ee   : > { %2546 = vmatprep.subr.bf16.mxu1 %v12881_v61 }
 0x1f0   : > { %2506 = vmatpush1.bf16.msra.mxu0 %v12876_v62 }
 0x1f1   : > { %2547 = vmatpush1.bf16.msra.mxu1 %v12879_v63  ;;  %2507 = vmatprep.subr.bf16.mxu0 %v12884_v0 }
 0x1f2   : > { %2548 = vmatprep.subr.bf16.mxu1 %v12887_v1 }
 0x1f4   : > { %2508 = vmatpush1.bf16.msra.mxu0 %v12882_v2 }
 0x1f5   : > { %2549 = vmatpush1.bf16.msra.mxu1 %v12885_v3  ;;  %2509 = vmatprep.subr.bf16.mxu0 %v12890_v4 }
 0x1f6   : > { %2550 = vmatprep.subr.bf16.mxu1 %v12893_v5 }
 0x1f8   : > { %2510 = vmatpush1.bf16.msra.mxu0 %v12888_v6 }
 0x1f9   : > { %2551 = vmatpush1.bf16.msra.mxu1 %v12891_v7  ;;  %2511 = vmatprep.subr.bf16.mxu0 %v12896_v8 }
 0x1fa   : > { %2552 = vmatprep.subr.bf16.mxu1 %v12899_v9 }
 0x1fc   : > { %2512 = vmatpush1.bf16.msra.mxu0 %v12894_v10 }
 0x1fd   : > { %2553 = vmatpush1.bf16.msra.mxu1 %v12897_v11  ;;  %2513 = vmatprep.subr.bf16.mxu0 %v12902_v12 }
 0x1fe   : > { %2554 = vmatprep.subr.bf16.mxu1 %v12905_v13 }
 0x200   : > { %2514 = vmatpush2.bf16.msra.mxu0 %v12900_v14 }
 0x201   : > { %2555 = vmatpush2.bf16.msra.mxu1 %v12903_v15  ;;  %2515 = vmatprep.subr.bf16.mxu0 %v12908_v16 }
 0x202   : > { %2556 = vmatprep.subr.bf16.mxu1 %v12911_v17 }
 0x204   : > { %2516 = vmatpush2.bf16.msra.mxu0 %v12906_v18 }
 0x205   : > { %2557 = vmatpush2.bf16.msra.mxu1 %v12909_v19  ;;  %2517 = vmatprep.subr.bf16.mxu0 %v12914_v20 }
 0x206   : > { %2558 = vmatprep.subr.bf16.mxu1 %v12917_v23 }
 0x208   : > { %2518 = vmatpush2.bf16.msra.mxu0 %v12912_v21 }
 0x209   : > { %2559 = vmatpush2.bf16.msra.mxu1 %v12915_v24  ;;  %2519 = vmatprep.subr.bf16.mxu0 %v12920_v25 }
 0x20a   : > { %2560 = vmatprep.subr.bf16.mxu1 %v12923_v27 }
 0x20c   : > { %2520 = vmatpush2.bf16.msra.mxu0 %v12918_v26 }
 0x20d   : > { %2561 = vmatpush2.bf16.msra.mxu1 %v12921_v28  ;;  %2521 = vmatprep.subr.bf16.mxu0 %v12926_v29 }
 0x20e   : > { %2562 = vmatprep.subr.bf16.mxu1 %v12929_v31 }
 0x210   : > { %2522 = vmatpush2.bf16.msra.mxu0 %v12924_v30 }
 0x211   : > { %2563 = vmatpush2.bf16.msra.mxu1 %v12927_v32  ;;  %2523 = vmatprep.subr.bf16.mxu0 %v12932_v33 }
 0x212   : > { %2564 = vmatprep.subr.bf16.mxu1 %v12935_v35 }
 0x214   : > { %2524 = vmatpush2.bf16.msra.mxu0 %v12930_v34 }
 0x215   : > { %2565 = vmatpush2.bf16.msra.mxu1 %v12933_v36  ;;  %2525 = vmatprep.subr.bf16.mxu0 %v12938_v37 }
 0x216   : > { %2566 = vmatprep.subr.bf16.mxu1 %v12941_v39 }
 0x218   : > { %2526 = vmatpush2.bf16.msra.mxu0 %v12936_v38 }
 0x219   : > { %2567 = vmatpush2.bf16.msra.mxu1 %v12939_v40  ;;  %2527 = vmatprep.subr.bf16.mxu0 %v12944_v41 }
 0x21a   : > { %2568 = vmatprep.subr.bf16.mxu1 %v12947_v44 }
 0x21c   : > { %2528 = vmatpush2.bf16.msra.mxu0 %v12942_v42 }
 0x21d   : > { %2569 = vmatpush2.bf16.msra.mxu1 %v12945_v43  ;;  %2579 = vmatprep.subr.bf16.mxu0 %v12950_v45 }
 0x29f   : > { %v1784_v52 = vpop.f32.mrf.mxu0 }
 0x2a0   : > { %v1741_v54 = vpop.f32.mrf.mxu1 }
 0x2a1   : > { %v1742_v55 = vadd.f32 %v1741_v54, %v1460_v51  ;;  %v1786_v56 = vpop.f32.mrf.mxu0 }
 0x2a2   : > { %v1743_v57 = vpop.f32.mrf.mxu1 }
 0x2a3   : > { %v1785_v58 = vadd.f32 %v1784_v52, %v1742_v55  ;;  %v1744_v59 = vadd.f32 %v1743_v57, %v1464_v53  ;;  %v1788_v60 = vpop.f32.mrf.mxu0 }
 0x2a4   : > { %v1745_v61 = vpop.f32.mrf.mxu1 }
 0x2a5   : > { %v1793_v62 = vmax.f32 %v1785_v58, 0.0  ;;  %v1787_v63 = vadd.f32 %v1786_v56, %v1744_v59  ;;  %v1746_v0 = vadd.f32 %v1745_v61, %v1460_v51  ;;  %v1790_v6 = vpop.f32.mrf.mxu0 }
 0x2a6   : > { %v1747_v1 = vpop.f32.mrf.mxu1 }
 0x2a7   : > { %v1801_v2 = vrot.slane %v1793_v62, 7  ;;  %v1794_v3 = vmax.f32 %v1787_v63, 0.0  ;;  %v1789_v4 = vadd.f32 %v1788_v60, %v1746_v0  ;;  %v1748_v5 = vadd.f32 %v1747_v1, %v1464_v53  ;;  %v12948_v63 = vld [vmem:[%s15050_s25 + $0x270] ss:$8 sps:$4 sm:$0xff]  }
 0x2a9   : > { %v1813_v7 = vsel %vm1377_vm2, 0.0, %v1801_v2  ;;  %v1802_v8 = vrot.slane %v1794_v3, 7  ;;  %v1795_v9 = vmax.f32 %v1789_v4, 0.0  ;;  %v1791_v10 = vadd.f32 %v1790_v6, %v1748_v5  ;;  %v12953_v6 = vld [vmem:[%s15050_s25 + $0x264] ss:$8 sps:$4 sm:$0xff]  }
 0x2aa   : > { %v1819_v11 = vrot.slane %v1813_v7, 1  ;;  %v1823_v12 = vrot.slane %v1813_v7, 2  ;;  %v1827_v13 = vrot.slane %v1813_v7, 3  ;;  %v1865_v14 = vrot.slane %v1813_v7, 4 }
 0x2ab   : > { %v1814_v15 = vsel %vm1377_vm2, 0.0, %v1802_v8  ;;  %v1803_v16 = vrot.slane %v1795_v9, 7  ;;  %v1796_v17 = vmax.f32 %v1791_v10, 0.0 }
 0x2ac   : > { %v1847_v18 = vsel %vm1377_vm2, %v1813_v7, %v1819_v11  ;;  %v1869_v19 = vsel %vm1377_vm2, %v1819_v11, %v1823_v12  ;;  %v1889_v20 = vsel %vm1377_vm2, %v1823_v12, %v1827_v13  ;;  %v1820_v21 = vrot.slane %v1814_v15, 1 }
 0x2ad   : > { %v1891_v23 = vsel %vm1849_vm8, %v1889_v20, %v1865_v14  ;;  %v1824_v24 = vrot.slane %v1814_v15, 2  ;;  %v1850_v25 = vsel %vm1849_vm8, %v1847_v18, %v1823_v12  ;;  %v1871_v26 = vsel %vm1849_vm8, %v1869_v19, %v1827_v13 }
 0x2ae   : > { %v1828_v27 = vrot.slane %v1814_v15, 3  ;;  %v1848_v28 = vsel %vm1377_vm2, %v1814_v15, %v1820_v21  ;;  %v1804_v31 = vsel %vm1377_vm2, %v1801_v2, %v1803_v16  ;;  %v1866_v32 = vrot.slane %v1814_v15, 4 }
 0x2af   : > { %v1851_v29 = vsel %vm1849_vm8, %v1848_v28, %v1824_v24  ;;  %v1870_v30 = vsel %vm1377_vm2, %v1820_v21, %v1824_v24  ;;  %v1831_v33 = vrot.slane %v1804_v31, 4  ;;  %v1805_v34 = vrot.slane %v1796_v17, 7  ;;  %v12951_v17 = vld [vmem:[%s15050_s25 + $0x260] ss:$8 sps:$4 sm:$0xff]   ;;  %v12956_v21 = vld [vmem:[%s15050_s25 + $0x254] ss:$8 sps:$4 sm:$0xff]  }
 0x2b0   : > { %v1853_v35 = vsel %vm1852_vm9, %v1850_v25, %v1827_v13  ;;  %v1873_v36 = vsel %vm1852_vm9, %v1871_v26, %v1865_v14  ;;  %v1872_v37 = vsel %vm1849_vm8, %v1870_v30, %v1828_v27  ;;  %v1835_v38 = vrot.slane %v1804_v31, 5  ;;  %v12954_v28 = vld [vmem:[%s15050_s25 + $0x250] ss:$8 sps:$4 sm:$0xff]   ;;  %v12957_v30 = vld [vmem:[%s15050_s25 + $0x240] ss:$8 sps:$4 sm:$0xff]  }
 0x2b1   : > { %v1806_v39 = vsel %vm1377_vm2, %v1802_v8, %v1805_v34  ;;  %v1854_v40 = vsel %vm1852_vm9, %v1851_v29, %v1828_v27  ;;  %v1874_v41 = vsel %vm1852_vm9, %v1872_v37, %v1866_v32  ;;  %v1839_v42 = vrot.slane %v1804_v31, 6  ;;  %v12959_v29 = vld [vmem:[%s15050_s25 + $0x244] ss:$8 sps:$4 sm:$0xff]  }
 0x2b2   : > { %v1890_v43 = vsel %vm1377_vm2, %v1824_v24, %v1828_v27  ;;  %v1832_v44 = vrot.slane %v1806_v39, 4  ;;  %v1836_v45 = vrot.slane %v1806_v39, 5  ;;  %v1840_v46 = vrot.slane %v1806_v39, 6  ;;  %v12971_v37 = vld [vmem:[%s15050_s25 + $0x204] ss:$8 sps:$4 sm:$0xff]  }
 0x2b3   : > { %v1844_v47 = vrot.slane %v1806_v39, 7  ;;  %v1843_v48 = vrot.slane %v1804_v31, 7  ;;  %v1856_v51 = vsel %vm1855_vm10, %v1853_v35, %v1831_v33  ;;  %v1875_v52 = vsel %vm1855_vm10, %v1873_v36, %v1835_v38  ;;  %v12965_v33 = vld [vmem:[%s15050_s25 + $0x224] ss:$8 sps:$4 sm:$0xff]   ;;  %v12968_v35 = vld [vmem:[%s15050_s25 + $0x214] ss:$8 sps:$4 sm:$0xff]  }
 0x2b4   : > { %v1857_v53 = vsel %vm1855_vm10, %v1854_v40, %v1832_v44  ;;  %v1876_v54 = vsel %vm1855_vm10, %v1874_v41, %v1836_v45  ;;  %v1859_v55 = vsel %vm1858_vm11, %v1856_v51, %v1835_v38  ;;  %v1877_v56 = vsel %vm1858_vm11, %v1875_v52, %v1839_v42  ;;  %v12966_v36 = vld [vmem:[%s15050_s25 + $0x210] ss:$8 sps:$4 sm:$0xff]   ;;  %v12977_v41 = vld [vmem:[%s15050_s25 + $0x2e4] ss:$8 sps:$4 sm:$0xff]   ;;  %v12987_v52 = vld [vmem:[%s15050_s25 + $0x2a0] ss:$8 sps:$4 sm:$0xff]  }
 0x2b5   : > { %v1860_v57 = vsel %vm1858_vm11, %v1857_v53, %v1836_v45  ;;  %v1878_v58 = vsel %vm1858_vm11, %v1876_v54, %v1840_v46  ;;  %v1861_v59 = vsel %vm1396_vm5, %v1859_v55, %v1839_v42  ;;  %v1879_v60 = vsel %vm1396_vm5, %v1877_v56, %v1843_v48  ;;  %v12972_v40 = vld [vmem:[%s15050_s25 + $0x2f0] ss:$8 sps:$4 sm:$0xff]   ;;  %v12989_v51 = vld [vmem:[%s15050_s25 + $0x2a4] ss:$8 sps:$4 sm:$0xff]   ;;  %v12992_v53 = vld [vmem:[%s15050_s25 + $0x294] ss:$8 sps:$4 sm:$0xff]  }
 0x2b6   : > { %v1862_v61 = vsel %vm1396_vm5, %v1860_v57, %v1840_v46  ;;  %v1880_v62 = vsel %vm1396_vm5, %v1878_v58, %v1844_v47  ;;  %v1863_v0 = vsel %vm1388_vm4, %v1861_v59, %v1843_v48  ;;  %v1881_v1 = vsel %vm1388_vm4, %v1879_v60, %v1804_v31  ;;  %v12978_v44 = vld [vmem:[%s15050_s25 + $0x2d0] ss:$8 sps:$4 sm:$0xff]   ;;  %v12995_v55 = vld [vmem:[%s15050_s25 + $0x284] ss:$8 sps:$4 sm:$0xff]   ;;  %v12993_v56 = vld [vmem:[%s15050_s25 + $0x280] ss:$8 sps:$4 sm:$0xff]  }
 0x2b7   : > { %v1815_v2 = vsel %vm1377_vm2, %v1803_v16, 0.0  ;;  %v1816_v3 = vsel %vm1377_vm2, %v1805_v34, 0.0  ;;  %v1864_v4 = vsel %vm1388_vm4, %v1862_v61, %v1844_v47  ;;  %v1882_v5 = vsel %vm1388_vm4, %v1880_v62, %v1806_v39  ;;  %v12963_v34 = vld [vmem:[%s15050_s25 + $0x220] ss:$8 sps:$4 sm:$0xff]   ;;  %v12990_v54 = vld [vmem:[%s15050_s25 + $0x290] ss:$8 sps:$4 sm:$0xff]  }
 0x2b8   : > { %v1904_v7 = vpack.c.bf16 %v1864_v4, %v1864_v4  ;;  %v1906_v8 = vpack.c.bf16 %v1882_v5, %v1882_v5  ;;  %v1892_v9 = vsel %vm1849_vm8, %v1890_v43, %v1866_v32  ;;  %v1893_v10 = vsel %vm1852_vm9, %v1891_v23, %v1835_v38  ;;  %v12960_v32 = vld [vmem:[%s15050_s25 + $0x230] ss:$8 sps:$4 sm:$0xff]   ;;  %v12969_v38 = vld [vmem:[%s15050_s25 + $0x200] ss:$8 sps:$4 sm:$0xff]   ;;  %v12980_v43 = vld [vmem:[%s15050_s25 + $0x2d4] ss:$8 sps:$4 sm:$0xff]  }
 0x2b9   : > { %v1903_v11 = vpack.c.bf16 %v1863_v0, %v1863_v0  ;;  %v1905_v12 = vpack.c.bf16 %v1881_v1, %v1881_v1  ;;  %v1894_v13 = vsel %vm1852_vm9, %v1892_v9, %v1836_v45  ;;  %v1895_v14 = vsel %vm1855_vm10, %v1893_v10, %v1839_v42  ;;  %v12975_v42 = vld [vmem:[%s15050_s25 + $0x2e0] ss:$8 sps:$4 sm:$0xff]   ;;  %v12983_v45 = vld [vmem:[%s15050_s25 + $0x2c4] ss:$8 sps:$4 sm:$0xff]   ;;  %v12996_v58 = vld [vmem:[%s15953_s7 + $0x70] ss:$8 sps:$4 sm:$0xff]  }
 0x2ba   : > { %v1885_v15 = vrot.slane %v1815_v2, 1  ;;  %2529 = vmatprep.mubr.bf16.mxu0 %v1904_v7  ;;  %2570 = vmatprep.mubr.bf16.mxu1 %v1906_v8  ;;  %v1896_v16 = vsel %vm1855_vm10, %v1894_v13, %v1840_v46  ;;  %v1897_v18 = vsel %vm1858_vm11, %v1895_v14, %v1843_v48  ;;  %v1886_v19 = vrot.slane %v1816_v3, 1  ;;  %v12981_v46 = vld [vmem:[%s15050_s25 + $0x2c0] ss:$8 sps:$4 sm:$0xff]   ;;  %v12984_v48 = vld [vmem:[%s15050_s25 + $0x2b0] ss:$8 sps:$4 sm:$0xff]  }
 0x2bb   : > { %2530 = vmatmul.mubr.bf16.vlgmr.msra.gmra.mxu0 %v1903_v11  ;;  %2571 = vmatmul.mubr.bf16.vlgmr.msra.gmra.mxu1 %v1905_v12  ;;  %v1898_v20 = vsel %vm1858_vm11, %v1896_v16, %v1844_v47  ;;  %v1899_v23 = vsel %vm1396_vm5, %v1897_v18, %v1804_v31  ;;  %v12962_v31 = vld [vmem:[%s15050_s25 + $0x234] ss:$8 sps:$4 sm:$0xff]   ;;  %v13001_v60 = vld [vmem:[%s15953_s7 + $0x64] ss:$8 sps:$4 sm:$0xff]   ;;  %v13002_v61 = vld [vmem:[%s15953_s7 + $0x170] ss:$8 sps:$4 sm:$0xff]  }
 0x2bc   : > { %2580 = vmatpush1.bf16.msra.mxu0 %v12948_v63  ;;  %v1900_v24 = vsel %vm1396_vm5, %v1898_v20, %v1806_v39  ;;  %v1901_v25 = vsel %vm1388_vm4, %v1899_v23, %v1885_v15  ;;  %v12974_v39 = vld [vmem:[%s15050_s25 + $0x2f4] ss:$8 sps:$4 sm:$0xff]   ;;  %v12999_v63 = vld [vmem:[%s15953_s7 + $0x60] ss:$8 sps:$4 sm:$0xff]   ;;  %v13010_v0 = vld [vmem:[%s15953_s7 + $0x164] ss:$8 sps:$4 sm:$0xff]  }
 0x2bd   : > { %v1902_v26 = vsel %vm1388_vm4, %v1900_v24, %v1886_v19  ;;  %2581 = vmatprep.subr.bf16.mxu0 %v12953_v6  ;;  %v12986_v47 = vld [vmem:[%s15050_s25 + $0x2b4] ss:$8 sps:$4 sm:$0xff]   ;;  %v1907_v57 = vpack.c.bf16 %v1901_v25, %v1901_v25  ;;  %v13008_v2 = vld [vmem:[%s15953_s7 + $0x160] ss:$8 sps:$4 sm:$0xff]   ;;  %v13005_v4 = vld [vmem:[%s15953_s7 + $0x50] ss:$8 sps:$4 sm:$0xff]  }
 0x2be   : > { %v1908_v27 = vpack.c.bf16 %v1902_v26, %v1902_v26  ;;  %v12998_v59 = vld [vmem:[%s15953_s7 + $0x74] ss:$8 sps:$4 sm:$0xff]   ;;  %v13013_v5 = vld [vmem:[%s15953_s7 + $0x44] ss:$8 sps:$4 sm:$0xff]   ;;  %v13014_v6 = vld [vmem:[%s15953_s7 + $0x150] ss:$8 sps:$4 sm:$0xff]  }
 0x2bf   : > { %v13004_v62 = vld [vmem:[%s15953_s7 + $0x174] ss:$8 sps:$4 sm:$0xff]   ;;  %3246 = vmatprep.subr.bf16.mxu1 %v12998_v59  ;;  %v13022_v7 = vld [vmem:[%s15953_s7 + $0x144] ss:$8 sps:$4 sm:$0xff]   ;;  %v13011_v8 = vld [vmem:[%s15953_s7 + $0x40] ss:$8 sps:$4 sm:$0xff]  }
 0x2c0   : > { %2611 = vmatprep.mubr.bf16.mxu0 %v1908_v27  ;;  %2582 = vmatpush1.bf16.msra.mxu0 %v12951_v17  ;;  %v13007_v1 = vld [vmem:[%s15953_s7 + $0x54] ss:$8 sps:$4 sm:$0xff]   ;;  %v13020_v10 = vld [vmem:[%s15953_s7 + $0x140] ss:$8 sps:$4 sm:$0xff]   ;;  %v13017_v12 = vld [vmem:[%s15953_s7 + $0x30] ss:$8 sps:$4 sm:$0xff]  }
 0x2c1   : > { %2583 = vmatprep.subr.bf16.mxu0 %v12956_v21  ;;  %3247 = vmatpush1.bf16.msra.mxu1 %v12996_v58  ;;  %v13016_v3 = vld [vmem:[%s15953_s7 + $0x154] ss:$8 sps:$4 sm:$0xff]   ;;  %v13025_v13 = vld [vmem:[%s15953_s7 + $0x24] ss:$8 sps:$4 sm:$0xff]   ;;  %v13026_v14 = vld [vmem:[%s15953_s7 + $0x130] ss:$8 sps:$4 sm:$0xff]  }
 0x2c2   : > { %3248 = vmatprep.subr.bf16.mxu1 %v13001_v60  ;;  %v13019_v9 = vld [vmem:[%s15953_s7 + $0x34] ss:$8 sps:$4 sm:$0xff]   ;;  %v13034_v15 = vld [vmem:[%s15953_s7 + $0x124] ss:$8 sps:$4 sm:$0xff]   ;;  %v13023_v16 = vld [vmem:[%s15953_s7 + $0x20] ss:$8 sps:$4 sm:$0xff]  }
 0x2c3   : > { %v13028_v11 = vld [vmem:[%s15953_s7 + $0x134] ss:$8 sps:$4 sm:$0xff]   ;;  %v13032_v18 = vld [vmem:[%s15953_s7 + $0x120] ss:$8 sps:$4 sm:$0xff]   ;;  %v13029_v20 = vld [vmem:[%s15953_s7 + $0x10] ss:$8 sps:$4 sm:$0xff]  }
 0x2c4   : > { %2584 = vmatpush1.bf16.msra.mxu0 %v12954_v28  ;;  %v13031_v17 = vld [vmem:[%s15953_s7 + $0x14] ss:$8 sps:$4 sm:$0xff]   ;;  %v13037_v21 = vld [vmem:[%s15953_s7 + $0x4] ss:$8 sps:$4 sm:$0xff]   ;;  %v13038_v23 = vld [vmem:[%s15953_s7 + $0x110] ss:$8 sps:$4 sm:$0xff]  }
 0x2c5   : > { %2585 = vmatprep.subr.bf16.mxu0 %v12959_v29  ;;  %3249 = vmatpush1.bf16.msra.mxu1 %v12999_v63  ;;  %v13040_v19 = vld [vmem:[%s15953_s7 + $0x114] ss:$8 sps:$4 sm:$0xff]   ;;  %v13046_v24 = vld [vmem:[%s15953_s7 + $0x104] ss:$8 sps:$4 sm:$0xff]   ;;  %v13035_v25 = vld [vmem:[%s15953_s7] ss:$8 sps:$4 sm:$0xff]  }
 0x2c6   : > { %3250 = vmatprep.subr.bf16.mxu1 %v13007_v1  ;;  %v13043_v26 = vld [vmem:[%s15953_s7 + $0xf4] ss:$8 sps:$4 sm:$0xff]   ;;  %v13044_v27 = vld [vmem:[%s15953_s7 + $0x100] ss:$8 sps:$4 sm:$0xff]   ;;  %v13041_v29 = vld [vmem:[%s15953_s7 + $0xf0] ss:$8 sps:$4 sm:$0xff]  }
 0x2c7   : > { %v13052_v28 = vld [vmem:[%s15953_s7 + $0x1f4] ss:$8 sps:$4 sm:$0xff]   ;;  %v13094_v60 = vld [vmem:[%s15953_s7 + $0x184] ss:$8 sps:$4 sm:$0xff]  }
 0x2c8   : > { %2586 = vmatpush1.bf16.msra.mxu0 %v12957_v30  ;;  %v13049_v30 = vld [vmem:[%s15953_s7 + $0xe4] ss:$8 sps:$4 sm:$0xff]   ;;  %v13088_v58 = vld [vmem:[%s15953_s7 + $0x194] ss:$8 sps:$4 sm:$0xff]  }
 0x2c9   : > { %2587 = vmatprep.subr.bf16.mxu0 %v12962_v31  ;;  %3251 = vmatpush1.bf16.msra.mxu1 %v13005_v4  ;;  %v13050_v31 = vld [vmem:[%s15953_s7 + $0x1f0] ss:$8 sps:$4 sm:$0xff]   ;;  %v13091_v59 = vld [vmem:[%s15953_s7 + $0x274] ss:$8 sps:$4 sm:$0xff]  }
 0x2ca   : > { %3252 = vmatprep.subr.bf16.mxu1 %v13013_v5 }
 0x2cc   : > { %2588 = vmatpush1.bf16.msra.mxu0 %v12960_v32  ;;  %v13058_v32 = vld [vmem:[%s15953_s7 + $0x1e4] ss:$8 sps:$4 sm:$0xff]  }
 0x2cd   : > { %2589 = vmatprep.subr.bf16.mxu0 %v12965_v33  ;;  %3253 = vmatpush1.bf16.msra.mxu1 %v13011_v8  ;;  %v13047_v33 = vld [vmem:[%s15953_s7 + $0xe0] ss:$8 sps:$4 sm:$0xff]  }
 0x2ce   : > { %3254 = vmatprep.subr.bf16.mxu1 %v13019_v9 }
 0x2d0   : > { %2590 = vmatpush1.bf16.msra.mxu0 %v12963_v34  ;;  %v13055_v34 = vld [vmem:[%s15953_s7 + $0xd4] ss:$8 sps:$4 sm:$0xff]  }
 0x2d1   : > { %2591 = vmatprep.subr.bf16.mxu0 %v12968_v35  ;;  %3255 = vmatpush1.bf16.msra.mxu1 %v13017_v12  ;;  %v13056_v35 = vld [vmem:[%s15953_s7 + $0x1e0] ss:$8 sps:$4 sm:$0xff]  }
 0x2d2   : > { %3256 = vmatprep.subr.bf16.mxu1 %v13025_v13 }
 0x2d4   : > { %2592 = vmatpush1.bf16.msra.mxu0 %v12966_v36  ;;  %v13064_v36 = vld [vmem:[%s15953_s7 + $0x1d4] ss:$8 sps:$4 sm:$0xff]  }
 0x2d5   : > { %2593 = vmatprep.subr.bf16.mxu0 %v12971_v37  ;;  %3257 = vmatpush1.bf16.msra.mxu1 %v13023_v16  ;;  %v13053_v37 = vld [vmem:[%s15953_s7 + $0xd0] ss:$8 sps:$4 sm:$0xff]  }
 0x2d6   : > { %3258 = vmatprep.subr.bf16.mxu1 %v13031_v17 }
 0x2d8   : > { %2594 = vmatpush1.bf16.msra.mxu0 %v12969_v38  ;;  %v13061_v38 = vld [vmem:[%s15953_s7 + $0xc4] ss:$8 sps:$4 sm:$0xff]  }
 0x2d9   : > { %2595 = vmatprep.subr.bf16.mxu0 %v12974_v39  ;;  %3259 = vmatpush1.bf16.msra.mxu1 %v13029_v20  ;;  %v13062_v39 = vld [vmem:[%s15953_s7 + $0x1d0] ss:$8 sps:$4 sm:$0xff]  }
 0x2da   : > { %3260 = vmatprep.subr.bf16.mxu1 %v13037_v21 }
 0x2dc   : > { %2596 = vmatpush2.bf16.msra.mxu0 %v12972_v40  ;;  %v13070_v40 = vld [vmem:[%s15953_s7 + $0x1c4] ss:$8 sps:$4 sm:$0xff]  }
 0x2dd   : > { %2597 = vmatprep.subr.bf16.mxu0 %v12977_v41  ;;  %3261 = vmatpush1.bf16.msra.mxu1 %v13035_v25  ;;  %v13059_v41 = vld [vmem:[%s15953_s7 + $0xc0] ss:$8 sps:$4 sm:$0xff]  }
 0x2de   : > { %3262 = vmatprep.subr.bf16.mxu1 %v13043_v26 }
 0x2e0   : > { %2598 = vmatpush2.bf16.msra.mxu0 %v12975_v42  ;;  %v13067_v42 = vld [vmem:[%s15953_s7 + $0xb4] ss:$8 sps:$4 sm:$0xff]  }
 0x2e1   : > { %2599 = vmatprep.subr.bf16.mxu0 %v12980_v43  ;;  %3263 = vmatpush2.bf16.msra.mxu1 %v13041_v29  ;;  %v13068_v43 = vld [vmem:[%s15953_s7 + $0x1c0] ss:$8 sps:$4 sm:$0xff]  }
 0x2e2   : > { %3264 = vmatprep.subr.bf16.mxu1 %v13049_v30 }
 0x2e4   : > { %2600 = vmatpush2.bf16.msra.mxu0 %v12978_v44  ;;  %v13065_v44 = vld [vmem:[%s15953_s7 + $0xb0] ss:$8 sps:$4 sm:$0xff]  }
 0x2e5   : > { %2601 = vmatprep.subr.bf16.mxu0 %v12983_v45  ;;  %3265 = vmatpush2.bf16.msra.mxu1 %v13047_v33  ;;  %v13073_v45 = vld [vmem:[%s15953_s7 + $0xa4] ss:$8 sps:$4 sm:$0xff]  }
 0x2e6   : > { %3266 = vmatprep.subr.bf16.mxu1 %v13055_v34 }
 0x2e8   : > { %2602 = vmatpush2.bf16.msra.mxu0 %v12981_v46  ;;  %v13071_v46 = vld [vmem:[%s15953_s7 + $0xa0] ss:$8 sps:$4 sm:$0xff]  }
 0x2e9   : > { %2603 = vmatprep.subr.bf16.mxu0 %v12986_v47  ;;  %3267 = vmatpush2.bf16.msra.mxu1 %v13053_v37  ;;  %v13076_v47 = vld [vmem:[%s15953_s7 + $0x1b4] ss:$8 sps:$4 sm:$0xff]   ;;  %v13097_v37 = vld [vmem:[%s15953_s7 + $0x264] ss:$8 sps:$4 sm:$0xff]  }
 0x2ea   : > { %3268 = vmatprep.subr.bf16.mxu1 %v13061_v38 }
 0x2ec   : > { %2604 = vmatpush2.bf16.msra.mxu0 %v12984_v48  ;;  %v13074_v48 = vld [vmem:[%s15953_s7 + $0x1b0] ss:$8 sps:$4 sm:$0xff]  }
 0x2ed   : > { %2605 = vmatprep.subr.bf16.mxu0 %v12989_v51  ;;  %3269 = vmatpush2.bf16.msra.mxu1 %v13059_v41  ;;  %v13079_v51 = vld [vmem:[%s15953_s7 + $0x94] ss:$8 sps:$4 sm:$0xff]   ;;  %v13095_v41 = vld [vmem:[%s15953_s7 + $0x260] ss:$8 sps:$4 sm:$0xff]  }
 0x2ee   : > { %3270 = vmatprep.subr.bf16.mxu1 %v13067_v42 }
 0x2f0   : > { %2606 = vmatpush2.bf16.msra.mxu0 %v12987_v52  ;;  %v13077_v52 = vld [vmem:[%s15953_s7 + $0x90] ss:$8 sps:$4 sm:$0xff]  }
 0x2f1   : > { %2607 = vmatprep.subr.bf16.mxu0 %v12992_v53  ;;  %3271 = vmatpush2.bf16.msra.mxu1 %v13065_v44  ;;  %v13082_v53 = vld [vmem:[%s15953_s7 + $0x1a4] ss:$8 sps:$4 sm:$0xff]   ;;  %v13100_v44 = vld [vmem:[%s15953_s7 + $0x254] ss:$8 sps:$4 sm:$0xff]  }
 0x2f2   : > { %3272 = vmatprep.subr.bf16.mxu1 %v13073_v45  ;;  %v13098_v45 = vld [vmem:[%s15953_s7 + $0x250] ss:$8 sps:$4 sm:$0xff]  }
 0x2f4   : > { %2608 = vmatpush2.bf16.msra.mxu0 %v12990_v54  ;;  %v13080_v54 = vld [vmem:[%s15953_s7 + $0x1a0] ss:$8 sps:$4 sm:$0xff]  }
 0x2f5   : > { %2609 = vmatprep.subr.bf16.mxu0 %v12995_v55  ;;  %3273 = vmatpush2.bf16.msra.mxu1 %v13071_v46  ;;  %v13083_v55 = vld [vmem:[%s15953_s7 + $0x80] ss:$8 sps:$4 sm:$0xff]   ;;  %v13103_v46 = vld [vmem:[%s15953_s7 + $0x244] ss:$8 sps:$4 sm:$0xff]  }
 0x2f6   : > { %3274 = vmatprep.subr.bf16.mxu1 %v13079_v51  ;;  %v13104_v51 = vld [vmem:[%s15953_s7 + $0x230] ss:$8 sps:$4 sm:$0xff]  }
 0x2f8   : > { %2610 = vmatpush2.bf16.msra.mxu0 %v12993_v56  ;;  %v13085_v56 = vld [vmem:[%s15953_s7 + $0x84] ss:$8 sps:$4 sm:$0xff]  }
 0x2f9   : > { %3287 = vmatprep.subr.bf16.mxu0 %v13004_v62  ;;  %3275 = vmatpush2.bf16.msra.mxu1 %v13077_v52  ;;  %v13109_v52 = vld [vmem:[%s15953_s7 + $0x224] ss:$8 sps:$4 sm:$0xff]  }
 0x2fa   : > { %3276 = vmatprep.subr.bf16.mxu1 %v13085_v56  ;;  %v13115_v56 = vld [vmem:[%s15953_s7 + $0x204] ss:$8 sps:$4 sm:$0xff]  }
 0x2fb   : > { %2612 = vmatmul.mubr.bf16.vlgmr.msra.gmra.mxu0 %v1907_v57  ;;  %v13086_v57 = vld [vmem:[%s15953_s7 + $0x190] ss:$8 sps:$4 sm:$0xff]  }
 0x2fc   : > { %3288 = vmatpush1.bf16.msra.mxu0 %v13002_v61  ;;  %v13092_v61 = vld [vmem:[%s15953_s7 + $0x180] ss:$8 sps:$4 sm:$0xff]  }
 0x2fd   : > { %3289 = vmatprep.subr.bf16.mxu0 %v13010_v0  ;;  %3277 = vmatpush2.bf16.msra.mxu1 %v13083_v55  ;;  %v13110_v55 = vld [vmem:[%s15953_s7 + $0x210] ss:$8 sps:$4 sm:$0xff]  }
 0x2fe   : > { %3328 = vmatprep.subr.bf16.mxu1 %v13091_v59  ;;  %v13116_v59 = vld [vmem:[%s15953_s7 + $0x2f0] ss:$8 sps:$4 sm:$0xff]  }
 0x300   : > { %3290 = vmatpush1.bf16.msra.mxu0 %v13008_v2 }
 0x301   : > { %3291 = vmatprep.subr.bf16.mxu0 %v13016_v3 }
 0x304   : > { %3292 = vmatpush1.bf16.msra.mxu0 %v13014_v6  ;;  %v2005_v6 = vld [vmem:[%s15954_s6] sm:$0x3]  ;;  %s1109_s6 = sand.u32 1, %s14958_s23  }
 0x305   : > { %3293 = vmatprep.subr.bf16.mxu0 %v13022_v7  ;;  %v2010_v7 = vrot.slane %v2005_v6, %v15471_v49  ;;  %v2014_v8 = vrot.slane %v2005_v6, %v15473_v50  ;;  %v13136_v6 = vld [vmem:[%s15953_s7 + $0x294] ss:$8 sps:$4 sm:$0xff]  }
 0x308   : > { %3294 = vmatpush1.bf16.msra.mxu0 %v13020_v10 }
 0x309   : > { %3295 = vmatprep.subr.bf16.mxu0 %v13028_v11 }
 0x30c   : > { %3296 = vmatpush1.bf16.msra.mxu0 %v13026_v14 }
 0x30d   : > { %3297 = vmatprep.subr.bf16.mxu0 %v13034_v15 }
 0x310   : > { %3298 = vmatpush1.bf16.msra.mxu0 %v13032_v18 }
 0x311   : > { %3299 = vmatprep.subr.bf16.mxu0 %v13040_v19 }
 0x314   : > { %3300 = vmatpush1.bf16.msra.mxu0 %v13038_v23 }
 0x315   : > { %3301 = vmatprep.subr.bf16.mxu0 %v13046_v24 }
 0x318   : > { %3302 = vmatpush1.bf16.msra.mxu0 %v13044_v27 }
 0x319   : > { %3303 = vmatprep.subr.bf16.mxu0 %v13052_v28 }
 0x31c   : > { %3304 = vmatpush2.bf16.msra.mxu0 %v13050_v31 }
 0x31d   : > { %3305 = vmatprep.subr.bf16.mxu0 %v13058_v32  ;;  %v13089_v32 = vld [vmem:[%s15953_s7 + $0x270] ss:$8 sps:$4 sm:$0xff]  }
 0x320   : > { %3306 = vmatpush2.bf16.msra.mxu0 %v13056_v35 }
 0x321   : > { %3307 = vmatprep.subr.bf16.mxu0 %v13064_v36 }
 0x324   : > { %3308 = vmatpush2.bf16.msra.mxu0 %v13062_v39 }
 0x325   : > { %3309 = vmatprep.subr.bf16.mxu0 %v13070_v40 }
 0x328   : > { %3310 = vmatpush2.bf16.msra.mxu0 %v13068_v43 }
 0x329   : > { %3311 = vmatprep.subr.bf16.mxu0 %v13076_v47  ;;  %v13101_v47 = vld [vmem:[%s15953_s7 + $0x240] ss:$8 sps:$4 sm:$0xff]  }
 0x32c   : > { %3312 = vmatpush2.bf16.msra.mxu0 %v13074_v48  ;;  %v13106_v48 = vld [vmem:[%s15953_s7 + $0x234] ss:$8 sps:$4 sm:$0xff]  }
 0x32d   : > { %3313 = vmatprep.subr.bf16.mxu0 %v13082_v53  ;;  %v13107_v53 = vld [vmem:[%s15953_s7 + $0x220] ss:$8 sps:$4 sm:$0xff]  }
 0x330   : > { %3314 = vmatpush2.bf16.msra.mxu0 %v13080_v54  ;;  %v13112_v54 = vld [vmem:[%s15953_s7 + $0x214] ss:$8 sps:$4 sm:$0xff]  }
 0x331   : > { %3315 = vmatprep.subr.bf16.mxu0 %v13088_v58  ;;  %v13118_v58 = vld [vmem:[%s15953_s7 + $0x2f4] ss:$8 sps:$4 sm:$0xff]  }
 0x334   : > { %3316 = vmatpush2.bf16.msra.mxu0 %v13086_v57  ;;  %v13113_v57 = vld [vmem:[%s15953_s7 + $0x200] ss:$8 sps:$4 sm:$0xff]  }
 0x335   : > { %3317 = vmatprep.subr.bf16.mxu0 %v13094_v60  ;;  %v13121_v60 = vld [vmem:[%s15953_s7 + $0x2e4] ss:$8 sps:$4 sm:$0xff]  }
 0x338   : > { %3318 = vmatpush2.bf16.msra.mxu0 %v13092_v61  ;;  %v13119_v61 = vld [vmem:[%s15953_s7 + $0x2e0] ss:$8 sps:$4 sm:$0xff]  }
 0x37b   : > { %v2531_v62 = vpop.f32.mrf.mxu0  ;;  %v2572_v63 = vpop.f32.mrf.mxu1 }
 0x37c   : > { %v2532_v9 = vadd.f32 %v2531_v62, %v2010_v7  ;;  %v13124_v62 = vld [vmem:[%s15953_s7 + $0x2d4] ss:$8 sps:$4 sm:$0xff]   ;;  %v13134_v7 = vld [vmem:[%s15953_s7 + $0x290] ss:$8 sps:$4 sm:$0xff]  }
 0x37d   : > { %v2533_v0 = vpop.f32.mrf.mxu0  ;;  %v2574_v1 = vpop.f32.mrf.mxu1 }
 0x37e   : > { %v2534_v10 = vadd.f32 %v2533_v0, %v2014_v8  ;;  %v2573_v11 = vadd.f32 %v2572_v63, %v2532_v9  ;;  %v13122_v63 = vld [vmem:[%s15953_s7 + $0x2d0] ss:$8 sps:$4 sm:$0xff]   ;;  %v13127_v0 = vld [vmem:[%s15953_s7 + $0x2c4] ss:$8 sps:$4 sm:$0xff]  }
 0x37f   : > { %v2535_v2 = vpop.f32.mrf.mxu0  ;;  %v2576_v3 = vpop.f32.mrf.mxu1  ;;  %v13139_v8 = vld [vmem:[%s15953_s7 + $0x284] ss:$8 sps:$4 sm:$0xff]  }
 0x380   : > { %v2575_v13 = vadd.f32 %v2574_v1, %v2534_v10  ;;  %v13125_v1 = vld [vmem:[%s15953_s7 + $0x2c0] ss:$8 sps:$4 sm:$0xff]   ;;  %v13130_v2 = vld [vmem:[%s15953_s7 + $0x2b4] ss:$8 sps:$4 sm:$0xff]   ;;  %v13128_v3 = vld [vmem:[%s15953_s7 + $0x2b0] ss:$8 sps:$4 sm:$0xff]  }
 0x381   : > { %v2536_v4 = vpop.f32.mrf.mxu0  ;;  %v2577_v5 = vpop.f32.mrf.mxu1 }
 0x382   : > { %v13133_v4 = vld [vmem:[%s15953_s7 + $0x2a4] ss:$8 sps:$4 sm:$0xff]   ;;  %v13131_v5 = vld [vmem:[%s15953_s7 + $0x2a0] ss:$8 sps:$4 sm:$0xff]  }
 0x3bb   : > { %v2613_v12 = vpop.f32.mrf.mxu0 }
 0x3bc   : > { %v2614_v14 = vadd.f32 %v2613_v12, %v2573_v11  ;;  %v13137_v11 = vld [vmem:[%s15953_s7 + $0x280] ss:$8 sps:$4 sm:$0xff]  }
 0x3bd   : > { %v2615_v15 = vpop.f32.mrf.mxu0 }
 0x3be   : > { %v2620_v16 = vmax.f32 %v2614_v14, 0.0  ;;  %v2616_v17 = vadd.f32 %v2615_v15, %v2575_v13  ;;  %v13140_v14 = vld [vmem:[#allocation5 + $0x70] ss:$8 sps:$4 sm:$0xff]   ;;  %v13142_v15 = vld [vmem:[#allocation5 + $0x74] ss:$8 sps:$4 sm:$0xff]  }
 0x3bf   : > { %v2617_v18 = vpop.f32.mrf.mxu0  ;;  %4017 = vmatprep.subr.bf16.mxu0 %v13142_v15  ;;  %v13233_v15 = vld [vmem:[#allocation5 + $0x180] ss:$8 sps:$4 sm:$0xff]  }
 0x3c0   : > { %v2624_v19 = vrot.slane %v2620_v16, 7  ;;  %v2621_v20 = vmax.f32 %v2616_v17, 0.0  ;;  %v13143_v16 = vld [vmem:[#allocation5 + $0x170] ss:$8 sps:$4 sm:$0xff]   ;;  %v13145_v17 = vld [vmem:[#allocation5 + $0x174] ss:$8 sps:$4 sm:$0xff]  }
 0x3c1   : > { %v2618_v21 = vpop.f32.mrf.mxu0  ;;  %v13148_v18 = vld [vmem:[#allocation5 + $0x64] ss:$8 sps:$4 sm:$0xff]  }
 0x3c2   : > { %v15625_v23 = vsel %vm1377_vm2, 0.0, %v2624_v19  ;;  %v15628_v24 = vsel %vm1377_vm2, %v2624_v19, 0.0  ;;  %v2625_v25 = vrot.slane %v2621_v20, 7  ;;  %v11486_v28 = vpack.c.bf16 %v2624_v19, %v2624_v19  ;;  %v13151_v19 = vld [vmem:[#allocation5 + $0x164] ss:$8 sps:$4 sm:$0xff]  }
 0x3c3   : > { %v2636_v26 = vrot.slane %v15625_v23, 1  ;;  %v2637_v27 = vrot.slane %v15628_v24, 1  ;;  %v2644_v9 = vrot.slane %v15625_v23, 2  ;;  %v2645_v10 = vrot.slane %v15628_v24, 2  ;;  %v13146_v20 = vld [vmem:[#allocation5 + $0x60] ss:$8 sps:$4 sm:$0xff]  }
 0x3c4   : > { %v2629_v29 = vsel %vm1377_vm2, 0.0, %v2625_v25  ;;  %v2631_v30 = vsel %vm1377_vm2, %v2625_v25, 0.0  ;;  %v11481_v31 = vpack.c.bf16 %v2625_v25, %v2625_v25  ;;  %v13149_v21 = vld [vmem:[#allocation5 + $0x160] ss:$8 sps:$4 sm:$0xff]   ;;  %v13154_v23 = vld [vmem:[#allocation5 + $0x54] ss:$8 sps:$4 sm:$0xff]  }
 0x3c5   : > { %v2639_v33 = vrot.slane %v2629_v29, 1  ;;  %v2640_v34 = vrot.slane %v2631_v30, 1  ;;  %v2647_v35 = vrot.slane %v2629_v29, 2  ;;  %v2648_v36 = vrot.slane %v2631_v30, 2  ;;  %v13157_v24 = vld [vmem:[#allocation5 + $0x154] ss:$8 sps:$4 sm:$0xff]  }
 0x3c6   : > { %11482 = vmatprep.mubr.msk.bf16.mxu1 %vm11480_vm12, %v11481_v31  ;;  %v2638_v22 = vsel %vm1388_vm4, %v2636_v26, %v2637_v27  ;;  %v2646_v12 = vsel %vm1396_vm5, %v2644_v9, %v2645_v10  ;;  %v13152_v25 = vld [vmem:[#allocation5 + $0x50] ss:$8 sps:$4 sm:$0xff]   ;;  %v13160_v27 = vld [vmem:[#allocation5 + $0x44] ss:$8 sps:$4 sm:$0xff]   ;;  %v13158_v29 = vld [vmem:[#allocation5 + $0x40] ss:$8 sps:$4 sm:$0xff]  }
 0x3c7   : > { %11487 = vmatmul.mubr.msk.bf16.vlgmr.msra.gmra.mxu1 %vm11480_vm12, %v11486_v28  ;;  %v2641_v38 = vsel %vm1388_vm4, %v2639_v33, %v2640_v34  ;;  %v2649_v39 = vsel %vm1396_vm5, %v2647_v35, %v2648_v36  ;;  %v2654_v43 = vpack.c.bf16 %v2638_v22, %v2638_v22  ;;  %v2656_v13 = vpack.c.bf16 %v2646_v12, %v2646_v12  ;;  %v13155_v26 = vld [vmem:[#allocation5 + $0x150] ss:$8 sps:$4 sm:$0xff]   ;;  %v13163_v28 = vld [vmem:[#allocation5 + $0x144] ss:$8 sps:$4 sm:$0xff]   ;;  %v13161_v30 = vld [vmem:[#allocation5 + $0x140] ss:$8 sps:$4 sm:$0xff]  }
 0x3c8   : > { %3329 = vmatpush1.bf16.msra.mxu1 %v13089_v32  ;;  %v2655_v40 = vpack.c.bf16 %v2641_v38, %v2641_v38  ;;  %v2657_v42 = vpack.c.bf16 %v2649_v39, %v2649_v39  ;;  %v13166_v31 = vld [vmem:[#allocation5 + $0x34] ss:$8 sps:$4 sm:$0xff]   ;;  %v13164_v33 = vld [vmem:[#allocation5 + $0x30] ss:$8 sps:$4 sm:$0xff]   ;;  %v13172_v35 = vld [vmem:[#allocation5 + $0x24] ss:$8 sps:$4 sm:$0xff]  }
 0x3c9   : > { %3330 = vmatprep.subr.bf16.mxu1 %v13097_v37  ;;  %v13169_v32 = vld [vmem:[#allocation5 + $0x134] ss:$8 sps:$4 sm:$0xff]   ;;  %v13167_v34 = vld [vmem:[#allocation5 + $0x130] ss:$8 sps:$4 sm:$0xff]   ;;  %v13175_v36 = vld [vmem:[#allocation5 + $0x124] ss:$8 sps:$4 sm:$0xff]  }
 0x3ca   : > { %3319 = vmatprep.mubr.bf16.mxu0 %v2655_v40  ;;  %3360 = vmatprep.mubr.bf16.mxu1 %v2657_v42  ;;  %v13170_v37 = vld [vmem:[#allocation5 + $0x20] ss:$8 sps:$4 sm:$0xff]   ;;  %v13178_v38 = vld [vmem:[#allocation5 + $0x14] ss:$8 sps:$4 sm:$0xff]   ;;  %v13176_v40 = vld [vmem:[#allocation5 + $0x10] ss:$8 sps:$4 sm:$0xff]  }
 0x3cb   : > { %3320 = vmatmul.mubr.bf16.vlgmr.msra.gmra.mxu0 %v2654_v43  ;;  %v13173_v22 = vld [vmem:[#allocation5 + $0x120] ss:$8 sps:$4 sm:$0xff]   ;;  %v13181_v39 = vld [vmem:[#allocation5 + $0x114] ss:$8 sps:$4 sm:$0xff]   ;;  %v13184_v42 = vld [vmem:[#allocation5 + $0x4] ss:$8 sps:$4 sm:$0xff]  }
 0x3cc   : > { %3331 = vmatpush1.bf16.msra.mxu1 %v13095_v41  ;;  %4018 = vmatpush1.bf16.msra.mxu0 %v13140_v14  ;;  %v13179_v41 = vld [vmem:[#allocation5 + $0x110] ss:$8 sps:$4 sm:$0xff]   ;;  %v13187_v43 = vld [vmem:[#allocation5 + $0x104] ss:$8 sps:$4 sm:$0xff]   ;;  %v13229_v10 = vld [vmem:[#allocation5 + $0x194] ss:$8 sps:$4 sm:$0xff]  }
 0x3cd   : > { %3332 = vmatprep.subr.bf16.mxu1 %v13100_v44  ;;  %4019 = vmatprep.subr.bf16.mxu0 %v13148_v18  ;;  %v13182_v44 = vld [vmem:[#allocation5] ss:$8 sps:$4 sm:$0xff]   ;;  %v13224_v9 = vld [vmem:[#allocation5 + $0x90] ss:$8 sps:$4 sm:$0xff]   ;;  %v13232_v12 = vld [vmem:[#allocation5 + $0x84] ss:$8 sps:$4 sm:$0xff]  }
 0x3ce   : > { %v13230_v14 = vld [vmem:[#allocation5 + $0x80] ss:$8 sps:$4 sm:$0xff]  }
 0x3d0   : > { %3333 = vmatpush1.bf16.msra.mxu1 %v13098_v45  ;;  %4020 = vmatpush1.bf16.msra.mxu0 %v13146_v20  ;;  %v13185_v45 = vld [vmem:[#allocation5 + $0x100] ss:$8 sps:$4 sm:$0xff]  }
 0x3d1   : > { %3334 = vmatprep.subr.bf16.mxu1 %v13103_v46  ;;  %4021 = vmatprep.subr.bf16.mxu0 %v13154_v23  ;;  %v13190_v46 = vld [vmem:[#allocation5 + $0xf4] ss:$8 sps:$4 sm:$0xff]  }
 0x3d4   : > { %3335 = vmatpush1.bf16.msra.mxu1 %v13101_v47  ;;  %4022 = vmatpush1.bf16.msra.mxu0 %v13152_v25  ;;  %v13193_v47 = vld [vmem:[#allocation5 + $0x1f4] ss:$8 sps:$4 sm:$0xff]  }
 0x3d5   : > { %3336 = vmatprep.subr.bf16.mxu1 %v13106_v48  ;;  %4023 = vmatprep.subr.bf16.mxu0 %v13160_v27  ;;  %v13188_v48 = vld [vmem:[#allocation5 + $0xf0] ss:$8 sps:$4 sm:$0xff]  }
 0x3d8   : > { %3337 = vmatpush1.bf16.msra.mxu1 %v13104_v51  ;;  %4024 = vmatpush1.bf16.msra.mxu0 %v13158_v29  ;;  %v13191_v51 = vld [vmem:[#allocation5 + $0x1f0] ss:$8 sps:$4 sm:$0xff]  }
 0x3d9   : > { %3338 = vmatprep.subr.bf16.mxu1 %v13109_v52  ;;  %4025 = vmatprep.subr.bf16.mxu0 %v13166_v31  ;;  %v13196_v52 = vld [vmem:[#allocation5 + $0xe4] ss:$8 sps:$4 sm:$0xff]  }
 0x3dc   : > { %3339 = vmatpush1.bf16.msra.mxu1 %v13107_v53  ;;  %4026 = vmatpush1.bf16.msra.mxu0 %v13164_v33  ;;  %v13199_v53 = vld [vmem:[#allocation5 + $0x1e4] ss:$8 sps:$4 sm:$0xff]  }
 0x3dd   : > { %3340 = vmatprep.subr.bf16.mxu1 %v13112_v54  ;;  %4027 = vmatprep.subr.bf16.mxu0 %v13172_v35  ;;  %v13194_v54 = vld [vmem:[#allocation5 + $0xe0] ss:$8 sps:$4 sm:$0xff]  }
 0x3e0   : > { %3341 = vmatpush1.bf16.msra.mxu1 %v13110_v55  ;;  %4028 = vmatpush1.bf16.msra.mxu0 %v13170_v37  ;;  %v13197_v55 = vld [vmem:[#allocation5 + $0x1e0] ss:$8 sps:$4 sm:$0xff]  }
 0x3e1   : > { %3342 = vmatprep.subr.bf16.mxu1 %v13115_v56  ;;  %4029 = vmatprep.subr.bf16.mxu0 %v13178_v38  ;;  %v13202_v56 = vld [vmem:[#allocation5 + $0xd4] ss:$8 sps:$4 sm:$0xff]  }
 0x3e4   : > { %3343 = vmatpush1.bf16.msra.mxu1 %v13113_v57  ;;  %4030 = vmatpush1.bf16.msra.mxu0 %v13176_v40  ;;  %v13205_v57 = vld [vmem:[#allocation5 + $0x1d4] ss:$8 sps:$4 sm:$0xff]  }
 0x3e5   : > { %3344 = vmatprep.subr.bf16.mxu1 %v13118_v58  ;;  %4031 = vmatprep.subr.bf16.mxu0 %v13184_v42  ;;  %v13200_v58 = vld [vmem:[#allocation5 + $0xd0] ss:$8 sps:$4 sm:$0xff]  }
 0x3e8   : > { %3345 = vmatpush2.bf16.msra.mxu1 %v13116_v59  ;;  %4032 = vmatpush1.bf16.msra.mxu0 %v13182_v44  ;;  %v13203_v59 = vld [vmem:[#allocation5 + $0x1d0] ss:$8 sps:$4 sm:$0xff]  }
 0x3e9   : > { %3346 = vmatprep.subr.bf16.mxu1 %v13121_v60  ;;  %4033 = vmatprep.subr.bf16.mxu0 %v13190_v46  ;;  %v13208_v60 = vld [vmem:[#allocation5 + $0xc4] ss:$8 sps:$4 sm:$0xff]  }
 0x3ec   : > { %3347 = vmatpush2.bf16.msra.mxu1 %v13119_v61  ;;  %4034 = vmatpush2.bf16.msra.mxu0 %v13188_v48  ;;  %v13211_v61 = vld [vmem:[#allocation5 + $0x1c4] ss:$8 sps:$4 sm:$0xff]  }
 0x3ed   : > { %3348 = vmatprep.subr.bf16.mxu1 %v13124_v62  ;;  %4035 = vmatprep.subr.bf16.mxu0 %v13196_v52  ;;  %v13206_v62 = vld [vmem:[#allocation5 + $0xc0] ss:$8 sps:$4 sm:$0xff]  }
 0x3f0   : > { %3349 = vmatpush2.bf16.msra.mxu1 %v13122_v63  ;;  %4036 = vmatpush2.bf16.msra.mxu0 %v13194_v54  ;;  %v13209_v63 = vld [vmem:[#allocation5 + $0x1c0] ss:$8 sps:$4 sm:$0xff]  }
 0x3f1   : > { %3350 = vmatprep.subr.bf16.mxu1 %v13127_v0  ;;  %4037 = vmatprep.subr.bf16.mxu0 %v13202_v56  ;;  %v13214_v0 = vld [vmem:[#allocation5 + $0xb4] ss:$8 sps:$4 sm:$0xff]  }
 0x3f4   : > { %3351 = vmatpush2.bf16.msra.mxu1 %v13125_v1  ;;  %4038 = vmatpush2.bf16.msra.mxu0 %v13200_v58  ;;  %v13212_v1 = vld [vmem:[#allocation5 + $0xb0] ss:$8 sps:$4 sm:$0xff]  }
 0x3f5   : > { %3352 = vmatprep.subr.bf16.mxu1 %v13130_v2  ;;  %4039 = vmatprep.subr.bf16.mxu0 %v13208_v60  ;;  %v13217_v2 = vld [vmem:[#allocation5 + $0x1b4] ss:$8 sps:$4 sm:$0xff]  }
 0x3f8   : > { %3353 = vmatpush2.bf16.msra.mxu1 %v13128_v3  ;;  %4040 = vmatpush2.bf16.msra.mxu0 %v13206_v62  ;;  %v13215_v3 = vld [vmem:[#allocation5 + $0x1b0] ss:$8 sps:$4 sm:$0xff]  }
 0x3f9   : > { %3354 = vmatprep.subr.bf16.mxu1 %v13133_v4  ;;  %4041 = vmatprep.subr.bf16.mxu0 %v13214_v0  ;;  %v13220_v4 = vld [vmem:[#allocation5 + $0xa4] ss:$8 sps:$4 sm:$0xff]  }
 0x3fc   : > { %3355 = vmatpush2.bf16.msra.mxu1 %v13131_v5  ;;  %4042 = vmatpush2.bf16.msra.mxu0 %v13212_v1  ;;  %v13218_v5 = vld [vmem:[#allocation5 + $0xa0] ss:$8 sps:$4 sm:$0xff]  }
 0x3fd   : > { %3356 = vmatprep.subr.bf16.mxu1 %v13136_v6  ;;  %v13223_v6 = vld [vmem:[#allocation5 + $0x1a4] ss:$8 sps:$4 sm:$0xff]   ;;  %4043 = vmatprep.subr.bf16.mxu0 %v13220_v4 }
 0x400   : > { %3357 = vmatpush2.bf16.msra.mxu1 %v13134_v7  ;;  %v13221_v7 = vld [vmem:[#allocation5 + $0x1a0] ss:$8 sps:$4 sm:$0xff]   ;;  %4044 = vmatpush2.bf16.msra.mxu0 %v13218_v5 }
 0x401   : > { %3358 = vmatprep.subr.bf16.mxu1 %v13139_v8  ;;  %v13226_v8 = vld [vmem:[#allocation5 + $0x94] ss:$8 sps:$4 sm:$0xff]  }
 0x402   : > { %4045 = vmatprep.subr.bf16.mxu0 %v13226_v8 }
 0x404   : > { %3359 = vmatpush2.bf16.msra.mxu1 %v13137_v11  ;;  %v13227_v11 = vld [vmem:[#allocation5 + $0x190] ss:$8 sps:$4 sm:$0xff]   ;;  %4046 = vmatpush2.bf16.msra.mxu0 %v13224_v9 }
 0x405   : > { %4058 = vmatprep.subr.bf16.mxu1 %v13145_v17  ;;  %4047 = vmatprep.subr.bf16.mxu0 %v13232_v12  ;;  %v13236_v9 = vld [vmem:[#allocation5 + $0x270] ss:$8 sps:$4 sm:$0xff]  }
 0x407   : > { %3361 = vmatmul.mubr.bf16.vlgmr.msra.gmra.mxu1 %v2656_v13  ;;  %v13235_v13 = vld [vmem:[#allocation5 + $0x184] ss:$8 sps:$4 sm:$0xff]  }
 0x408   : > { %4059 = vmatpush1.bf16.msra.mxu1 %v13143_v16  ;;  %v13238_v16 = vld [vmem:[#allocation5 + $0x274] ss:$8 sps:$4 sm:$0xff]   ;;  %4048 = vmatpush2.bf16.msra.mxu0 %v13230_v14 }
 0x409   : > { %4060 = vmatprep.subr.bf16.mxu1 %v13151_v19  ;;  %4099 = vmatprep.subr.bf16.mxu0 %v13238_v16 }
 0x40c   : > { %4061 = vmatpush1.bf16.msra.mxu1 %v13149_v21 }
 0x40d   : > { %4062 = vmatprep.subr.bf16.mxu1 %v13157_v24 }
 0x410   : > { %4063 = vmatpush1.bf16.msra.mxu1 %v13155_v26  ;;  %v2754_v26 = vld [vmem:[%s15955_s16] sm:$0x3]  ;;  %s12512_s16 = sshll.u32 %s15203_s0, 4 }
 0x411   : > { %4064 = vmatprep.subr.bf16.mxu1 %v13163_v28  ;;  %v2759_v27 = vrot.slane %v2754_v26, %v15471_v49  ;;  %v2763_v28 = vrot.slane %v2754_v26, %v15473_v50  ;;  %v13248_v26 = vld [vmem:[#allocation5 + $0x230] ss:$8 sps:$4 sm:$0xff]  }
 0x414   : > { %4065 = vmatpush1.bf16.msra.mxu1 %v13161_v30 }
 0x415   : > { %4066 = vmatprep.subr.bf16.mxu1 %v13169_v32 }
 0x418   : > { %4067 = vmatpush1.bf16.msra.mxu1 %v13167_v34 }
 0x419   : > { %4068 = vmatprep.subr.bf16.mxu1 %v13175_v36 }
 0x41c   : > { %4069 = vmatpush1.bf16.msra.mxu1 %v13173_v22 }
 0x41d   : > { %4070 = vmatprep.subr.bf16.mxu1 %v13181_v39 }
 0x420   : > { %4071 = vmatpush1.bf16.msra.mxu1 %v13179_v41 }
 0x421   : > { %4072 = vmatprep.subr.bf16.mxu1 %v13187_v43 }
 0x424   : > { %4073 = vmatpush1.bf16.msra.mxu1 %v13185_v45 }
 0x425   : > { %4074 = vmatprep.subr.bf16.mxu1 %v13193_v47 }
 0x428   : > { %4075 = vmatpush2.bf16.msra.mxu1 %v13191_v51 }
 0x429   : > { %4076 = vmatprep.subr.bf16.mxu1 %v13199_v53 }
 0x42c   : > { %4077 = vmatpush2.bf16.msra.mxu1 %v13197_v55 }
 0x42d   : > { %4078 = vmatprep.subr.bf16.mxu1 %v13205_v57 }
 0x430   : > { %4079 = vmatpush2.bf16.msra.mxu1 %v13203_v59 }
 0x431   : > { %4080 = vmatprep.subr.bf16.mxu1 %v13211_v61 }
 0x434   : > { %4081 = vmatpush2.bf16.msra.mxu1 %v13209_v63 }
 0x435   : > { %4082 = vmatprep.subr.bf16.mxu1 %v13217_v2 }
 0x438   : > { %4083 = vmatpush2.bf16.msra.mxu1 %v13215_v3 }
 0x439   : > { %4084 = vmatprep.subr.bf16.mxu1 %v13223_v6 }
 0x43c   : > { %4085 = vmatpush2.bf16.msra.mxu1 %v13221_v7 }
 0x43d   : > { %4086 = vmatprep.subr.bf16.mxu1 %v13229_v10 }
 0x440   : > { %4087 = vmatpush2.bf16.msra.mxu1 %v13227_v11 }
 0x441   : > { %4088 = vmatprep.subr.bf16.mxu1 %v13235_v13 }
 0x444   : > { %4089 = vmatpush2.bf16.msra.mxu1 %v13233_v15  ;;  %v13241_v15 = vld [vmem:[#allocation5 + $0x264] ss:$8 sps:$4 sm:$0xff]  }
 0x487   : > { %v3280_v17 = vpop.f32.mrf.mxu1 }
 0x488   : > { %v3281_v29 = vadd.f32 %v3280_v17, %v2759_v27  ;;  %v13253_v27 = vld [vmem:[#allocation5 + $0x224] ss:$8 sps:$4 sm:$0xff]  }
 0x489   : > { %v3282_v18 = vpop.f32.mrf.mxu1 }
 0x48a   : > { %v3283_v30 = vadd.f32 %v3282_v18, %v2763_v28  ;;  %v13251_v28 = vld [vmem:[#allocation5 + $0x220] ss:$8 sps:$4 sm:$0xff]  }
 0x48b   : > { %v3284_v19 = vpop.f32.mrf.mxu1  ;;  %v3321_v20 = vpop.f32.mrf.mxu0 }
 0x48c   : > { %v3322_v31 = vadd.f32 %v3321_v20, %v3281_v29  ;;  %v13239_v19 = vld [vmem:[#allocation5 + $0x260] ss:$8 sps:$4 sm:$0xff]   ;;  %v13244_v20 = vld [vmem:[#allocation5 + $0x254] ss:$8 sps:$4 sm:$0xff]  }
 0x48d   : > { %v3285_v21 = vpop.f32.mrf.mxu1  ;;  %v3323_v23 = vpop.f32.mrf.mxu0  ;;  %v13256_v29 = vld [vmem:[#allocation5 + $0x214] ss:$8 sps:$4 sm:$0xff]  }
 0x48e   : > { %v3324_v33 = vadd.f32 %v3323_v23, %v3283_v30  ;;  %v13242_v21 = vld [vmem:[#allocation5 + $0x250] ss:$8 sps:$4 sm:$0xff]   ;;  %v13247_v23 = vld [vmem:[#allocation5 + $0x244] ss:$8 sps:$4 sm:$0xff]  }
 0x48f   : > { %v3325_v24 = vpop.f32.mrf.mxu0  ;;  %v13254_v30 = vld [vmem:[#allocation5 + $0x210] ss:$8 sps:$4 sm:$0xff]  }
 0x490   : > { %v13245_v24 = vld [vmem:[#allocation5 + $0x240] ss:$8 sps:$4 sm:$0xff]  }
 0x491   : > { %v3326_v25 = vpop.f32.mrf.mxu0 }
 0x492   : > { %v13250_v25 = vld [vmem:[#allocation5 + $0x234] ss:$8 sps:$4 sm:$0xff]  }
 0x4c7   : > { %v3362_v32 = vpop.f32.mrf.mxu1 }
 0x4c8   : > { %v3363_v34 = vadd.f32 %v3362_v32, %v3322_v31  ;;  %v13259_v31 = vld [vmem:[#allocation5 + $0x204] ss:$8 sps:$4 sm:$0xff]   ;;  %v13257_v32 = vld [vmem:[#allocation5 + $0x200] ss:$8 sps:$4 sm:$0xff]  }
 0x4c9   : > { %v3364_v35 = vpop.f32.mrf.mxu1 }
 0x4ca   : > { %v3369_v36 = vmax.f32 %v3363_v34, 0.0  ;;  %v3365_v37 = vadd.f32 %v3364_v35, %v3324_v33  ;;  %v13262_v33 = vld [vmem:[#allocation5 + $0x2f4] ss:$8 sps:$4 sm:$0xff]   ;;  %v13260_v34 = vld [vmem:[#allocation5 + $0x2f0] ss:$8 sps:$4 sm:$0xff]  }
 0x4cb   : > { %v3366_v22 = vpop.f32.mrf.mxu1  ;;  %v13265_v35 = vld [vmem:[#allocation5 + $0x2e4] ss:$8 sps:$4 sm:$0xff]  }
 0x4cc   : > { %v3373_v38 = vrot.slane %v3369_v36, 7  ;;  %v3370_v39 = vmax.f32 %v3365_v37, 0.0  ;;  %v13263_v36 = vld [vmem:[#allocation5 + $0x2e0] ss:$8 sps:$4 sm:$0xff]   ;;  %v13268_v37 = vld [vmem:[#allocation5 + $0x2d4] ss:$8 sps:$4 sm:$0xff]  }
 0x4cd   : > { %v3367_v40 = vpop.f32.mrf.mxu1  ;;  %v13266_v22 = vld [vmem:[#allocation5 + $0x2d0] ss:$8 sps:$4 sm:$0xff]  }
 0x4ce   : > { %v3377_v41 = vsel %vm1377_vm2, 0.0, %v3373_v38  ;;  %v3374_v42 = vrot.slane %v3370_v39, 7  ;;  %v3379_v46 = vsel %vm1377_vm2, %v3373_v38, 0.0  ;;  %v13271_v38 = vld [vmem:[#allocation5 + $0x2c4] ss:$8 sps:$4 sm:$0xff]  }
 0x4cf   : > { %v3383_v43 = vrot.slane %v3377_v41, 1  ;;  %v3387_v44 = vrot.slane %v3377_v41, 2  ;;  %v3391_v45 = vrot.slane %v3377_v41, 3  ;;  %v3401_v47 = vrot.slane %v3377_v41, 4  ;;  %v13269_v39 = vld [vmem:[#allocation5 + $0x2c0] ss:$8 sps:$4 sm:$0xff]  }
 0x4d0   : > { %v3378_v48 = vsel %vm1377_vm2, 0.0, %v3374_v42  ;;  %v3380_v52 = vsel %vm1377_vm2, %v3374_v42, 0.0  ;;  %v3413_v59 = vrot.slane %v3379_v46, 5  ;;  %v13274_v40 = vld [vmem:[#allocation5 + $0x2b4] ss:$8 sps:$4 sm:$0xff]  }
 0x4d1   : > { %v3395_v51 = vsel %vm1377_vm2, %v3377_v41, %v3383_v43  ;;  %v3384_v53 = vrot.slane %v3378_v48, 1  ;;  %v3388_v54 = vrot.slane %v3378_v48, 2  ;;  %v3392_v55 = vrot.slane %v3378_v48, 3  ;;  %v13272_v41 = vld [vmem:[#allocation5 + $0x2b0] ss:$8 sps:$4 sm:$0xff]  }
 0x4d2   : > { %v3402_v56 = vrot.slane %v3378_v48, 4  ;;  %v3397_v57 = vsel %vm1849_vm8, %v3395_v51, %v3387_v44  ;;  %v3405_v58 = vsel %vm1377_vm2, %v3383_v43, %v3387_v44  ;;  %v3414_v3 = vrot.slane %v3380_v52, 5  ;;  %v13277_v42 = vld [vmem:[#allocation5 + $0x2a4] ss:$8 sps:$4 sm:$0xff]   ;;  %v13275_v43 = vld [vmem:[#allocation5 + $0x2a0] ss:$8 sps:$4 sm:$0xff]  }
 0x4d3   : > { %v3396_v60 = vsel %vm1377_vm2, %v3378_v48, %v3384_v53  ;;  %v3406_v61 = vsel %vm1377_vm2, %v3384_v53, %v3388_v54  ;;  %v3407_v62 = vsel %vm1849_vm8, %v3405_v58, %v3391_v45  ;;  %v3399_v1 = vsel %vm1852_vm9, %v3397_v57, %v3391_v45  ;;  %v13283_v46 = vld [vmem:[#allocation5 + $0x284] ss:$8 sps:$4 sm:$0xff]   ;;  %v13284_v51 = vld [vmem:[#allocation7 + $0x70] ss:$8 sps:$4 sm:$0xff]   ;;  %v13286_v52 = vld [vmem:[#allocation7 + $0x74] ss:$8 sps:$4 sm:$0xff]  }
 0x4d4   : > { %v3398_v63 = vsel %vm1849_vm8, %v3396_v60, %v3388_v54  ;;  %v3408_v0 = vsel %vm1849_vm8, %v3406_v61, %v3392_v55  ;;  %v3409_v2 = vsel %vm1852_vm9, %v3407_v62, %v3401_v47  ;;  %v3418_v6 = vsel %vm1377_vm2, %v3388_v54, %v3392_v55  ;;  %v13289_v53 = vld [vmem:[#allocation7 + $0x64] ss:$8 sps:$4 sm:$0xff]   ;;  %v13290_v54 = vld [vmem:[#allocation7 + $0x170] ss:$8 sps:$4 sm:$0xff]   ;;  %4756 = vmatprep.subr.bf16.mxu1 %v13286_v52  ;;  %v13295_v58 = vld [vmem:[#allocation7 + $0x54] ss:$8 sps:$4 sm:$0xff]  }
 0x4d5   : > { %v3400_v4 = vsel %vm1852_vm9, %v3398_v63, %v3392_v55  ;;  %v3410_v5 = vsel %vm1852_vm9, %v3408_v0, %v3402_v56  ;;  %v3420_v10 = vsel %vm1849_vm8, %v3418_v6, %v3402_v56  ;;  %v3417_v11 = vsel %vm1377_vm2, %v3387_v44, %v3391_v45  ;;  %v13280_v44 = vld [vmem:[#allocation5 + $0x294] ss:$8 sps:$4 sm:$0xff]   ;;  %v13278_v45 = vld [vmem:[#allocation5 + $0x290] ss:$8 sps:$4 sm:$0xff]   ;;  %v13287_v56 = vld [vmem:[#allocation7 + $0x60] ss:$8 sps:$4 sm:$0xff]  }
 0x4d6   : > { %v3424_v7 = vpack.c.bf16 %v3400_v4, %v3400_v4  ;;  %v3426_v8 = vpack.c.bf16 %v3410_v5, %v3410_v5  ;;  %v3423_v12 = vpack.c.bf16 %v3399_v1, %v3399_v1  ;;  %v3425_v13 = vpack.c.bf16 %v3409_v2, %v3409_v2  ;;  %v13292_v55 = vld [vmem:[#allocation7 + $0x174] ss:$8 sps:$4 sm:$0xff]   ;;  %v13298_v57 = vld [vmem:[#allocation7 + $0x164] ss:$8 sps:$4 sm:$0xff]   ;;  %v13293_v61 = vld [vmem:[#allocation7 + $0x50] ss:$8 sps:$4 sm:$0xff]  }
 0x4d7   : > { %v3422_v14 = vsel %vm1852_vm9, %v3420_v10, %v3414_v3  ;;  %v3419_v16 = vsel %vm1849_vm8, %v3417_v11, %v3401_v47  ;;  %v13281_v47 = vld [vmem:[#allocation5 + $0x280] ss:$8 sps:$4 sm:$0xff]   ;;  %v13304_v60 = vld [vmem:[#allocation7 + $0x154] ss:$8 sps:$4 sm:$0xff]   ;;  %v13301_v62 = vld [vmem:[#allocation7 + $0x44] ss:$8 sps:$4 sm:$0xff]  }
 0x4d8   : > { %4049 = vmatprep.mubr.bf16.mxu0 %v3424_v7  ;;  %4090 = vmatprep.mubr.bf16.mxu1 %v3426_v8  ;;  %v3428_v17 = vpack.c.bf16 %v3422_v14, %v3422_v14  ;;  %v15699_v18 = vsel %vm1852_vm9, %v3419_v16, %v3413_v59  ;;  %v13296_v59 = vld [vmem:[#allocation7 + $0x160] ss:$8 sps:$4 sm:$0xff]   ;;  %v13302_v63 = vld [vmem:[#allocation7 + $0x150] ss:$8 sps:$4 sm:$0xff]   ;;  %v13310_v0 = vld [vmem:[#allocation7 + $0x144] ss:$8 sps:$4 sm:$0xff]  }
 0x4d9   : > { %4050 = vmatmul.mubr.bf16.vlgmr.msra.gmra.mxu0 %v3423_v12  ;;  %4091 = vmatmul.mubr.bf16.vlgmr.msra.gmra.mxu1 %v3425_v13  ;;  %v3427_v48 = vpack.c.bf16 %v15699_v18, %v15699_v18  ;;  %v13299_v1 = vld [vmem:[#allocation7 + $0x40] ss:$8 sps:$4 sm:$0xff]   ;;  %v13307_v2 = vld [vmem:[#allocation7 + $0x34] ss:$8 sps:$4 sm:$0xff]   ;;  %v13305_v5 = vld [vmem:[#allocation7 + $0x30] ss:$8 sps:$4 sm:$0xff]  }
 0x4da   : > { %4100 = vmatpush1.bf16.msra.mxu0 %v13236_v9  ;;  %4131 = vmatprep.mubr.bf16.mxu0 %v3428_v17  ;;  %v13308_v3 = vld [vmem:[#allocation7 + $0x140] ss:$8 sps:$4 sm:$0xff]   ;;  %v13316_v4 = vld [vmem:[#allocation7 + $0x134] ss:$8 sps:$4 sm:$0xff]   ;;  %v13313_v6 = vld [vmem:[#allocation7 + $0x24] ss:$8 sps:$4 sm:$0xff]  }
 0x4db   : > { %4101 = vmatprep.subr.bf16.mxu0 %v13241_v15  ;;  %4757 = vmatpush1.bf16.msra.mxu1 %v13284_v51  ;;  %v13314_v7 = vld [vmem:[#allocation7 + $0x130] ss:$8 sps:$4 sm:$0xff]   ;;  %v13322_v8 = vld [vmem:[#allocation7 + $0x124] ss:$8 sps:$4 sm:$0xff]   ;;  %v13311_v9 = vld [vmem:[#allocation7 + $0x20] ss:$8 sps:$4 sm:$0xff]  }
 0x4dc   : > { %4758 = vmatprep.subr.bf16.mxu1 %v13289_v53  ;;  %v13319_v10 = vld [vmem:[#allocation7 + $0x14] ss:$8 sps:$4 sm:$0xff]   ;;  %v13320_v11 = vld [vmem:[#allocation7 + $0x120] ss:$8 sps:$4 sm:$0xff]   ;;  %v13317_v13 = vld [vmem:[#allocation7 + $0x10] ss:$8 sps:$4 sm:$0xff]  }
 0x4dd   : > { %v13328_v12 = vld [vmem:[#allocation7 + $0x114] ss:$8 sps:$4 sm:$0xff]   ;;  %v13325_v14 = vld [vmem:[#allocation7 + $0x4] ss:$8 sps:$4 sm:$0xff]   ;;  %v13326_v15 = vld [vmem:[#allocation7 + $0x110] ss:$8 sps:$4 sm:$0xff]  }
 0x4de   : > { %4102 = vmatpush1.bf16.msra.mxu0 %v13239_v19  ;;  %v13334_v16 = vld [vmem:[#allocation7 + $0x104] ss:$8 sps:$4 sm:$0xff]   ;;  %v13323_v17 = vld [vmem:[#allocation7] ss:$8 sps:$4 sm:$0xff]   ;;  %v13331_v18 = vld [vmem:[#allocation7 + $0xf4] ss:$8 sps:$4 sm:$0xff]  }
 0x4df   : > { %4103 = vmatprep.subr.bf16.mxu0 %v13244_v20  ;;  %4759 = vmatpush1.bf16.msra.mxu1 %v13287_v56  ;;  %v13332_v19 = vld [vmem:[#allocation7 + $0x100] ss:$8 sps:$4 sm:$0xff]   ;;  %v13340_v20 = vld [vmem:[#allocation7 + $0x1f4] ss:$8 sps:$4 sm:$0xff]   ;;  %v13379_v51 = vld [vmem:[#allocation7 + $0x184] ss:$8 sps:$4 sm:$0xff]  }
 0x4e0   : > { %4760 = vmatprep.subr.bf16.mxu1 %v13295_v58  ;;  %v13377_v52 = vld [vmem:[#allocation7 + $0x180] ss:$8 sps:$4 sm:$0xff]   ;;  %v13382_v53 = vld [vmem:[#allocation7 + $0x274] ss:$8 sps:$4 sm:$0xff]  }
 0x4e2   : > { %4104 = vmatpush1.bf16.msra.mxu0 %v13242_v21  ;;  %v13329_v21 = vld [vmem:[#allocation7 + $0xf0] ss:$8 sps:$4 sm:$0xff]  }
 0x4e3   : > { %4105 = vmatprep.subr.bf16.mxu0 %v13247_v23  ;;  %4761 = vmatpush1.bf16.msra.mxu1 %v13293_v61  ;;  %v13337_v23 = vld [vmem:[#allocation7 + $0xe4] ss:$8 sps:$4 sm:$0xff]  }
 0x4e4   : > { %4762 = vmatprep.subr.bf16.mxu1 %v13301_v62  ;;  %v3525_v62 = vld [vmem:[%s15956_s14] sm:$0x3]  ;;  %s1110_s14 = scalar_lea.vmem [#allocation20], %s1109_s6 }
 0x4e6   : > { %4106 = vmatpush1.bf16.msra.mxu0 %v13245_v24  ;;  %v13338_v24 = vld [vmem:[#allocation7 + $0x1f0] ss:$8 sps:$4 sm:$0xff]  }
 0x4e7   : > { %4107 = vmatprep.subr.bf16.mxu0 %v13250_v25  ;;  %4763 = vmatpush1.bf16.msra.mxu1 %v13299_v1  ;;  %v13346_v25 = vld [vmem:[#allocation7 + $0x1e4] ss:$8 sps:$4 sm:$0xff]  }
 0x4e8   : > { %4764 = vmatprep.subr.bf16.mxu1 %v13307_v2 }
 0x4ea   : > { %4108 = vmatpush1.bf16.msra.mxu0 %v13248_v26  ;;  %v13335_v26 = vld [vmem:[#allocation7 + $0xe0] ss:$8 sps:$4 sm:$0xff]  }
 0x4eb   : > { %4109 = vmatprep.subr.bf16.mxu0 %v13253_v27  ;;  %4765 = vmatpush1.bf16.msra.mxu1 %v13305_v5  ;;  %v13343_v27 = vld [vmem:[#allocation7 + $0xd4] ss:$8 sps:$4 sm:$0xff]  }
 0x4ec   : > { %4766 = vmatprep.subr.bf16.mxu1 %v13313_v6 }
 0x4ee   : > { %4110 = vmatpush1.bf16.msra.mxu0 %v13251_v28  ;;  %v13344_v28 = vld [vmem:[#allocation7 + $0x1e0] ss:$8 sps:$4 sm:$0xff]  }
 0x4ef   : > { %4111 = vmatprep.subr.bf16.mxu0 %v13256_v29  ;;  %4767 = vmatpush1.bf16.msra.mxu1 %v13311_v9  ;;  %v13352_v29 = vld [vmem:[#allocation7 + $0x1d4] ss:$8 sps:$4 sm:$0xff]  }
 0x4f0   : > { %4768 = vmatprep.subr.bf16.mxu1 %v13319_v10 }
 0x4f2   : > { %4112 = vmatpush1.bf16.msra.mxu0 %v13254_v30  ;;  %v13341_v30 = vld [vmem:[#allocation7 + $0xd0] ss:$8 sps:$4 sm:$0xff]  }
 0x4f3   : > { %4113 = vmatprep.subr.bf16.mxu0 %v13259_v31  ;;  %4769 = vmatpush1.bf16.msra.mxu1 %v13317_v13  ;;  %v13349_v31 = vld [vmem:[#allocation7 + $0xc4] ss:$8 sps:$4 sm:$0xff]  }
 0x4f4   : > { %4770 = vmatprep.subr.bf16.mxu1 %v13325_v14 }
 0x4f6   : > { %4114 = vmatpush1.bf16.msra.mxu0 %v13257_v32  ;;  %v13350_v32 = vld [vmem:[#allocation7 + $0x1d0] ss:$8 sps:$4 sm:$0xff]  }
 0x4f7   : > { %4115 = vmatprep.subr.bf16.mxu0 %v13262_v33  ;;  %4771 = vmatpush1.bf16.msra.mxu1 %v13323_v17  ;;  %v13358_v33 = vld [vmem:[#allocation7 + $0x1c4] ss:$8 sps:$4 sm:$0xff]  }
 0x4f8   : > { %4772 = vmatprep.subr.bf16.mxu1 %v13331_v18 }
 0x4fa   : > { %4116 = vmatpush2.bf16.msra.mxu0 %v13260_v34  ;;  %v13347_v34 = vld [vmem:[#allocation7 + $0xc0] ss:$8 sps:$4 sm:$0xff]  }
 0x4fb   : > { %4117 = vmatprep.subr.bf16.mxu0 %v13265_v35  ;;  %4773 = vmatpush2.bf16.msra.mxu1 %v13329_v21  ;;  %v13355_v35 = vld [vmem:[#allocation7 + $0xb4] ss:$8 sps:$4 sm:$0xff]   ;;  %v13380_v21 = vld [vmem:[#allocation7 + $0x270] ss:$8 sps:$4 sm:$0xff]  }
 0x4fc   : > { %4774 = vmatprep.subr.bf16.mxu1 %v13337_v23 }
 0x4fe   : > { %4118 = vmatpush2.bf16.msra.mxu0 %v13263_v36  ;;  %v13356_v36 = vld [vmem:[#allocation7 + $0x1c0] ss:$8 sps:$4 sm:$0xff]  }
 0x4ff   : > { %4119 = vmatprep.subr.bf16.mxu0 %v13268_v37  ;;  %4775 = vmatpush2.bf16.msra.mxu1 %v13335_v26  ;;  %v13353_v37 = vld [vmem:[#allocation7 + $0xb0] ss:$8 sps:$4 sm:$0xff]   ;;  %v13385_v26 = vld [vmem:[#allocation7 + $0x264] ss:$8 sps:$4 sm:$0xff]  }
 0x500   : > { %4776 = vmatprep.subr.bf16.mxu1 %v13343_v27 }
 0x502   : > { %4120 = vmatpush2.bf16.msra.mxu0 %v13266_v22  ;;  %v13361_v22 = vld [vmem:[#allocation7 + $0xa4] ss:$8 sps:$4 sm:$0xff]  }
 0x503   : > { %4121 = vmatprep.subr.bf16.mxu0 %v13271_v38  ;;  %4777 = vmatpush2.bf16.msra.mxu1 %v13341_v30  ;;  %v13364_v38 = vld [vmem:[#allocation7 + $0x1b4] ss:$8 sps:$4 sm:$0xff]   ;;  %v13383_v30 = vld [vmem:[#allocation7 + $0x260] ss:$8 sps:$4 sm:$0xff]  }
 0x504   : > { %4778 = vmatprep.subr.bf16.mxu1 %v13349_v31  ;;  %v13388_v31 = vld [vmem:[#allocation7 + $0x254] ss:$8 sps:$4 sm:$0xff]  }
 0x506   : > { %4122 = vmatpush2.bf16.msra.mxu0 %v13269_v39  ;;  %v13359_v39 = vld [vmem:[#allocation7 + $0xa0] ss:$8 sps:$4 sm:$0xff]  }
 0x507   : > { %4123 = vmatprep.subr.bf16.mxu0 %v13274_v40  ;;  %4779 = vmatpush2.bf16.msra.mxu1 %v13347_v34  ;;  %v13362_v40 = vld [vmem:[#allocation7 + $0x1b0] ss:$8 sps:$4 sm:$0xff]   ;;  %v13389_v34 = vld [vmem:[#allocation7 + $0x240] ss:$8 sps:$4 sm:$0xff]  }
 0x508   : > { %4780 = vmatprep.subr.bf16.mxu1 %v13355_v35  ;;  %v13394_v35 = vld [vmem:[#allocation7 + $0x234] ss:$8 sps:$4 sm:$0xff]  }
 0x50a   : > { %4124 = vmatpush2.bf16.msra.mxu0 %v13272_v41  ;;  %v13367_v41 = vld [vmem:[#allocation7 + $0x94] ss:$8 sps:$4 sm:$0xff]  }
 0x50b   : > { %4125 = vmatprep.subr.bf16.mxu0 %v13277_v42  ;;  %4781 = vmatpush2.bf16.msra.mxu1 %v13353_v37  ;;  %v13370_v42 = vld [vmem:[#allocation7 + $0x1a4] ss:$8 sps:$4 sm:$0xff]  }
 0x50c   : > { %4782 = vmatprep.subr.bf16.mxu1 %v13361_v22  ;;  %v13397_v37 = vld [vmem:[#allocation7 + $0x224] ss:$8 sps:$4 sm:$0xff]   ;;  %v13395_v22 = vld [vmem:[#allocation7 + $0x220] ss:$8 sps:$4 sm:$0xff]  }
 0x50e   : > { %4126 = vmatpush2.bf16.msra.mxu0 %v13275_v43  ;;  %v13365_v43 = vld [vmem:[#allocation7 + $0x90] ss:$8 sps:$4 sm:$0xff]  }
 0x50f   : > { %4127 = vmatprep.subr.bf16.mxu0 %v13280_v44  ;;  %4783 = vmatpush2.bf16.msra.mxu1 %v13359_v39  ;;  %v13368_v44 = vld [vmem:[#allocation7 + $0x1a0] ss:$8 sps:$4 sm:$0xff]   ;;  %v13398_v39 = vld [vmem:[#allocation7 + $0x210] ss:$8 sps:$4 sm:$0xff]  }
 0x510   : > { %4784 = vmatprep.subr.bf16.mxu1 %v13367_v41  ;;  %v13401_v41 = vld [vmem:[#allocation7 + $0x200] ss:$8 sps:$4 sm:$0xff]  }
 0x512   : > { %4128 = vmatpush2.bf16.msra.mxu0 %v13278_v45  ;;  %v13373_v45 = vld [vmem:[#allocation7 + $0x84] ss:$8 sps:$4 sm:$0xff]  }
 0x513   : > { %4129 = vmatprep.subr.bf16.mxu0 %v13283_v46  ;;  %4785 = vmatpush2.bf16.msra.mxu1 %v13365_v43  ;;  %v13376_v46 = vld [vmem:[#allocation7 + $0x194] ss:$8 sps:$4 sm:$0xff]   ;;  %v13404_v43 = vld [vmem:[#allocation7 + $0x2f0] ss:$8 sps:$4 sm:$0xff]  }
 0x514   : > { %4786 = vmatprep.subr.bf16.mxu1 %v13373_v45  ;;  %v13407_v45 = vld [vmem:[#allocation7 + $0x2e0] ss:$8 sps:$4 sm:$0xff]  }
 0x516   : > { %4130 = vmatpush2.bf16.msra.mxu0 %v13281_v47  ;;  %v13371_v47 = vld [vmem:[#allocation7 + $0x80] ss:$8 sps:$4 sm:$0xff]  }
 0x517   : > { %4797 = vmatprep.subr.bf16.mxu0 %v13292_v55  ;;  %4787 = vmatpush2.bf16.msra.mxu1 %v13371_v47  ;;  %v13410_v47 = vld [vmem:[#allocation7 + $0x2d0] ss:$8 sps:$4 sm:$0xff]  }
 0x518   : > { %4838 = vmatprep.subr.bf16.mxu1 %v13382_v53  ;;  %v13416_v53 = vld [vmem:[#allocation7 + $0x2b0] ss:$8 sps:$4 sm:$0xff]  }
 0x519   : > { %4132 = vmatmul.mubr.bf16.vlgmr.msra.gmra.mxu0 %v3427_v48  ;;  %v13374_v48 = vld [vmem:[#allocation7 + $0x190] ss:$8 sps:$4 sm:$0xff]  }
 0x51a   : > { %4798 = vmatpush1.bf16.msra.mxu0 %v13290_v54 }
 0x51b   : > { %4799 = vmatprep.subr.bf16.mxu0 %v13298_v57 }
 0x51e   : > { %4800 = vmatpush1.bf16.msra.mxu0 %v13296_v59 }
 0x51f   : > { %4801 = vmatprep.subr.bf16.mxu0 %v13304_v60 }
 0x522   : > { %4802 = vmatpush1.bf16.msra.mxu0 %v13302_v63  ;;  %v3530_v63 = vrot.slane %v3525_v62, %v15471_v49 }
 0x523   : > { %4803 = vmatprep.subr.bf16.mxu0 %v13310_v0  ;;  %v3534_v0 = vrot.slane %v3525_v62, %v15473_v50  ;;  %v13428_v62 = vld [vmem:[#allocation8 + $0x70] ss:$8 sps:$4 sm:$0xff]  }
 0x526   : > { %4804 = vmatpush1.bf16.msra.mxu0 %v13308_v3 }
 0x527   : > { %4805 = vmatprep.subr.bf16.mxu0 %v13316_v4 }
 0x52a   : > { %4806 = vmatpush1.bf16.msra.mxu0 %v13314_v7 }
 0x52b   : > { %4807 = vmatprep.subr.bf16.mxu0 %v13322_v8 }
 0x52e   : > { %4808 = vmatpush1.bf16.msra.mxu0 %v13320_v11 }
 0x52f   : > { %4809 = vmatprep.subr.bf16.mxu0 %v13328_v12 }
 0x532   : > { %4810 = vmatpush1.bf16.msra.mxu0 %v13326_v15 }
 0x533   : > { %4811 = vmatprep.subr.bf16.mxu0 %v13334_v16 }
 0x536   : > { %4812 = vmatpush1.bf16.msra.mxu0 %v13332_v19 }
 0x537   : > { %4813 = vmatprep.subr.bf16.mxu0 %v13340_v20 }
 0x53a   : > { %4814 = vmatpush2.bf16.msra.mxu0 %v13338_v24 }
 0x53b   : > { %4815 = vmatprep.subr.bf16.mxu0 %v13346_v25 }
 0x53e   : > { %4816 = vmatpush2.bf16.msra.mxu0 %v13344_v28 }
 0x53f   : > { %4817 = vmatprep.subr.bf16.mxu0 %v13352_v29 }
 0x542   : > { %4818 = vmatpush2.bf16.msra.mxu0 %v13350_v32  ;;  %v13386_v32 = vld [vmem:[#allocation7 + $0x250] ss:$8 sps:$4 sm:$0xff]  }
 0x543   : > { %4819 = vmatprep.subr.bf16.mxu0 %v13358_v33  ;;  %v13391_v33 = vld [vmem:[#allocation7 + $0x244] ss:$8 sps:$4 sm:$0xff]  }
 0x546   : > { %4820 = vmatpush2.bf16.msra.mxu0 %v13356_v36  ;;  %v13392_v36 = vld [vmem:[#allocation7 + $0x230] ss:$8 sps:$4 sm:$0xff]  }
 0x547   : > { %4821 = vmatprep.subr.bf16.mxu0 %v13364_v38  ;;  %v13400_v38 = vld [vmem:[#allocation7 + $0x214] ss:$8 sps:$4 sm:$0xff]  }
 0x54a   : > { %4822 = vmatpush2.bf16.msra.mxu0 %v13362_v40  ;;  %v13403_v40 = vld [vmem:[#allocation7 + $0x204] ss:$8 sps:$4 sm:$0xff]  }
 0x54b   : > { %4823 = vmatprep.subr.bf16.mxu0 %v13370_v42  ;;  %v13406_v42 = vld [vmem:[#allocation7 + $0x2f4] ss:$8 sps:$4 sm:$0xff]  }
 0x54e   : > { %4824 = vmatpush2.bf16.msra.mxu0 %v13368_v44  ;;  %v13409_v44 = vld [vmem:[#allocation7 + $0x2e4] ss:$8 sps:$4 sm:$0xff]  }
 0x54f   : > { %4825 = vmatprep.subr.bf16.mxu0 %v13376_v46  ;;  %v13412_v46 = vld [vmem:[#allocation7 + $0x2d4] ss:$8 sps:$4 sm:$0xff]  }
 0x552   : > { %4826 = vmatpush2.bf16.msra.mxu0 %v13374_v48  ;;  %v13415_v48 = vld [vmem:[#allocation7 + $0x2c4] ss:$8 sps:$4 sm:$0xff]  }
 0x553   : > { %4827 = vmatprep.subr.bf16.mxu0 %v13379_v51  ;;  %v13413_v51 = vld [vmem:[#allocation7 + $0x2c0] ss:$8 sps:$4 sm:$0xff]  }
 0x556   : > { %4828 = vmatpush2.bf16.msra.mxu0 %v13377_v52  ;;  %v13418_v52 = vld [vmem:[#allocation7 + $0x2b4] ss:$8 sps:$4 sm:$0xff]  }
 0x599   : > { %v4051_v54 = vpop.f32.mrf.mxu0  ;;  %v4092_v55 = vpop.f32.mrf.mxu1 }
 0x59a   : > { %v4052_v1 = vadd.f32 %v4051_v54, %v3530_v63  ;;  %v13421_v54 = vld [vmem:[#allocation7 + $0x2a4] ss:$8 sps:$4 sm:$0xff]   ;;  %v13430_v63 = vld [vmem:[#allocation8 + $0x74] ss:$8 sps:$4 sm:$0xff]  }
 0x59b   : > { %v4053_v56 = vpop.f32.mrf.mxu0  ;;  %v4094_v57 = vpop.f32.mrf.mxu1  ;;  %5505 = vmatprep.subr.bf16.mxu0 %v13430_v63  ;;  %v13521_v63 = vld [vmem:[#allocation8 + $0x180] ss:$8 sps:$4 sm:$0xff]  }
 0x59c   : > { %v4054_v2 = vadd.f32 %v4053_v56, %v3534_v0  ;;  %v4093_v3 = vadd.f32 %v4092_v55, %v4052_v1  ;;  %v13419_v55 = vld [vmem:[#allocation7 + $0x2a0] ss:$8 sps:$4 sm:$0xff]   ;;  %v13424_v56 = vld [vmem:[#allocation7 + $0x294] ss:$8 sps:$4 sm:$0xff]   ;;  %v13431_v0 = vld [vmem:[#allocation8 + $0x170] ss:$8 sps:$4 sm:$0xff]  }
 0x59d   : > { %v4055_v58 = vpop.f32.mrf.mxu0  ;;  %v4096_v59 = vpop.f32.mrf.mxu1  ;;  %v13433_v1 = vld [vmem:[#allocation8 + $0x174] ss:$8 sps:$4 sm:$0xff]  }
 0x59e   : > { %v4095_v5 = vadd.f32 %v4094_v57, %v4054_v2  ;;  %v13422_v57 = vld [vmem:[#allocation7 + $0x290] ss:$8 sps:$4 sm:$0xff]   ;;  %v13427_v58 = vld [vmem:[#allocation7 + $0x284] ss:$8 sps:$4 sm:$0xff]   ;;  %v13425_v59 = vld [vmem:[#allocation7 + $0x280] ss:$8 sps:$4 sm:$0xff]  }
 0x59f   : > { %v4056_v60 = vpop.f32.mrf.mxu0  ;;  %v4097_v61 = vpop.f32.mrf.mxu1  ;;  %v13436_v2 = vld [vmem:[#allocation8 + $0x64] ss:$8 sps:$4 sm:$0xff]  }
 0x5d9   : > { %v4133_v4 = vpop.f32.mrf.mxu0 }
 0x5da   : > { %v4134_v6 = vadd.f32 %v4133_v4, %v4093_v3  ;;  %v13439_v3 = vld [vmem:[#allocation8 + $0x164] ss:$8 sps:$4 sm:$0xff]   ;;  %v13434_v4 = vld [vmem:[#allocation8 + $0x60] ss:$8 sps:$4 sm:$0xff]  }
 0x5db   : > { %v4135_v7 = vpop.f32.mrf.mxu0 }
 0x5dc   : > { %v4140_v8 = vmax.f32 %v4134_v6, 0.0  ;;  %v4136_v9 = vadd.f32 %v4135_v7, %v4095_v5  ;;  %v13437_v5 = vld [vmem:[#allocation8 + $0x160] ss:$8 sps:$4 sm:$0xff]   ;;  %v13442_v6 = vld [vmem:[#allocation8 + $0x54] ss:$8 sps:$4 sm:$0xff]  }
 0x5dd   : > { %v4137_v10 = vpop.f32.mrf.mxu0  ;;  %v13445_v7 = vld [vmem:[#allocation8 + $0x154] ss:$8 sps:$4 sm:$0xff]  }
 0x5de   : > { %v4144_v11 = vrot.slane %v4140_v8, 7  ;;  %v4141_v12 = vmax.f32 %v4136_v9, 0.0  ;;  %v13440_v8 = vld [vmem:[#allocation8 + $0x50] ss:$8 sps:$4 sm:$0xff]   ;;  %v13448_v10 = vld [vmem:[#allocation8 + $0x44] ss:$8 sps:$4 sm:$0xff]  }
 0x5df   : > { %v4138_v13 = vpop.f32.mrf.mxu0  ;;  %v13443_v9 = vld [vmem:[#allocation8 + $0x150] ss:$8 sps:$4 sm:$0xff]  }
 0x5e0   : > { %v4148_v14 = vsel %vm1377_vm2, 0.0, %v4144_v11  ;;  %v4145_v15 = vrot.slane %v4141_v12, 7  ;;  %v13451_v11 = vld [vmem:[#allocation8 + $0x144] ss:$8 sps:$4 sm:$0xff]   ;;  %v13446_v12 = vld [vmem:[#allocation8 + $0x40] ss:$8 sps:$4 sm:$0xff]  }
 0x5e1   : > { %v15708_v16 = vsel %vm1858_vm11, %v4148_v14, 0.0  ;;  %v11684_v23 = vpack.c.bf16 %v4148_v14, %v4148_v14  ;;  %v13449_v13 = vld [vmem:[#allocation8 + $0x140] ss:$8 sps:$4 sm:$0xff]   ;;  %v13454_v14 = vld [vmem:[#allocation8 + $0x34] ss:$8 sps:$4 sm:$0xff]  }
 0x5e2   : > { %v4149_v17 = vsel %vm1377_vm2, 0.0, %v4145_v15  ;;  %v4154_v18 = vrot.slane %v15708_v16, 1  ;;  %v4158_v60 = vrot.slane %v15708_v16, 2  ;;  %v13457_v15 = vld [vmem:[#allocation8 + $0x134] ss:$8 sps:$4 sm:$0xff]  }
 0x5e3   : > { %v4151_v19 = vsel %vm1858_vm11, %v4149_v17, 0.0  ;;  %v11681_v20 = vpack.c.bf16 %v4149_v17, %v4149_v17  ;;  %v13452_v16 = vld [vmem:[#allocation8 + $0x30] ss:$8 sps:$4 sm:$0xff]  }
 0x5e4   : > { %v4155_v24 = vrot.slane %v4151_v19, 1  ;;  %v4159_v25 = vrot.slane %v4151_v19, 2  ;;  %v4164_v29 = vpack.c.bf16 %v4154_v18, %v4154_v18  ;;  %v4166_v61 = vpack.c.bf16 %v4158_v60, %v4158_v60  ;;  %v13455_v17 = vld [vmem:[#allocation8 + $0x130] ss:$8 sps:$4 sm:$0xff]   ;;  %v13460_v18 = vld [vmem:[#allocation8 + $0x24] ss:$8 sps:$4 sm:$0xff]  }
 0x5e5   : > { %11682 = vmatprep.mubr.msk.bf16.mxu1 %vm11680_vm13, %v11681_v20  ;;  %v13463_v19 = vld [vmem:[#allocation8 + $0x124] ss:$8 sps:$4 sm:$0xff]   ;;  %v13458_v20 = vld [vmem:[#allocation8 + $0x20] ss:$8 sps:$4 sm:$0xff]  }
 0x5e6   : > { %11685 = vmatmul.mubr.msk.bf16.vlgmr.msra.gmra.mxu1 %vm11680_vm13, %v11684_v23  ;;  %v4165_v27 = vpack.c.bf16 %v4155_v24, %v4155_v24  ;;  %v4167_v28 = vpack.c.bf16 %v4159_v25, %v4159_v25  ;;  %v13466_v23 = vld [vmem:[#allocation8 + $0x14] ss:$8 sps:$4 sm:$0xff]   ;;  %v13464_v25 = vld [vmem:[#allocation8 + $0x10] ss:$8 sps:$4 sm:$0xff]   ;;  %v13520_v60 = vld [vmem:[#allocation8 + $0x84] ss:$8 sps:$4 sm:$0xff]  }
 0x5e7   : > { %4839 = vmatpush1.bf16.msra.mxu1 %v13380_v21  ;;  %v13461_v21 = vld [vmem:[#allocation8 + $0x120] ss:$8 sps:$4 sm:$0xff]   ;;  %v13469_v24 = vld [vmem:[#allocation8 + $0x114] ss:$8 sps:$4 sm:$0xff]  }
 0x5e8   : > { %4829 = vmatprep.mubr.bf16.mxu0 %v4165_v27  ;;  %4870 = vmatprep.mubr.bf16.mxu1 %v4167_v28  ;;  %v13472_v27 = vld [vmem:[#allocation8 + $0x4] ss:$8 sps:$4 sm:$0xff]  }
 0x5e9   : > { %4830 = vmatmul.mubr.bf16.vlgmr.msra.gmra.mxu0 %v4164_v29  ;;  %4840 = vmatprep.subr.bf16.mxu1 %v13385_v26  ;;  %v13467_v26 = vld [vmem:[#allocation8 + $0x110] ss:$8 sps:$4 sm:$0xff]   ;;  %v13475_v28 = vld [vmem:[#allocation8 + $0x104] ss:$8 sps:$4 sm:$0xff]   ;;  %v13470_v29 = vld [vmem:[#allocation8] ss:$8 sps:$4 sm:$0xff]  }
 0x5ea   : > { %5506 = vmatpush1.bf16.msra.mxu0 %v13428_v62  ;;  %v13523_v62 = vld [vmem:[#allocation8 + $0x184] ss:$8 sps:$4 sm:$0xff]  }
 0x5eb   : > { %4841 = vmatpush1.bf16.msra.mxu1 %v13383_v30  ;;  %5507 = vmatprep.subr.bf16.mxu0 %v13436_v2  ;;  %v13473_v30 = vld [vmem:[#allocation8 + $0x100] ss:$8 sps:$4 sm:$0xff]  }
 0x5ec   : > { %4842 = vmatprep.subr.bf16.mxu1 %v13388_v31  ;;  %v13478_v31 = vld [vmem:[#allocation8 + $0xf4] ss:$8 sps:$4 sm:$0xff]  }
 0x5ee   : > { %5508 = vmatpush1.bf16.msra.mxu0 %v13434_v4 }
 0x5ef   : > { %4843 = vmatpush1.bf16.msra.mxu1 %v13386_v32  ;;  %5509 = vmatprep.subr.bf16.mxu0 %v13442_v6  ;;  %v13481_v32 = vld [vmem:[#allocation8 + $0x1f4] ss:$8 sps:$4 sm:$0xff]  }
 0x5f0   : > { %4844 = vmatprep.subr.bf16.mxu1 %v13391_v33  ;;  %v13476_v33 = vld [vmem:[#allocation8 + $0xf0] ss:$8 sps:$4 sm:$0xff]  }
 0x5f2   : > { %5510 = vmatpush1.bf16.msra.mxu0 %v13440_v8 }
 0x5f3   : > { %4845 = vmatpush1.bf16.msra.mxu1 %v13389_v34  ;;  %5511 = vmatprep.subr.bf16.mxu0 %v13448_v10  ;;  %v13479_v34 = vld [vmem:[#allocation8 + $0x1f0] ss:$8 sps:$4 sm:$0xff]  }
 0x5f4   : > { %4846 = vmatprep.subr.bf16.mxu1 %v13394_v35  ;;  %v13484_v35 = vld [vmem:[#allocation8 + $0xe4] ss:$8 sps:$4 sm:$0xff]  }
 0x5f6   : > { %5512 = vmatpush1.bf16.msra.mxu0 %v13446_v12 }
 0x5f7   : > { %4847 = vmatpush1.bf16.msra.mxu1 %v13392_v36  ;;  %5513 = vmatprep.subr.bf16.mxu0 %v13454_v14  ;;  %v13487_v36 = vld [vmem:[#allocation8 + $0x1e4] ss:$8 sps:$4 sm:$0xff]  }
 0x5f8   : > { %4848 = vmatprep.subr.bf16.mxu1 %v13397_v37  ;;  %v13482_v37 = vld [vmem:[#allocation8 + $0xe0] ss:$8 sps:$4 sm:$0xff]  }
 0x5fa   : > { %5514 = vmatpush1.bf16.msra.mxu0 %v13452_v16 }
 0x5fb   : > { %4849 = vmatpush1.bf16.msra.mxu1 %v13395_v22  ;;  %5515 = vmatprep.subr.bf16.mxu0 %v13460_v18  ;;  %v13485_v22 = vld [vmem:[#allocation8 + $0x1e0] ss:$8 sps:$4 sm:$0xff]  }
 0x5fc   : > { %4850 = vmatprep.subr.bf16.mxu1 %v13400_v38  ;;  %v13490_v38 = vld [vmem:[#allocation8 + $0xd4] ss:$8 sps:$4 sm:$0xff]  }
 0x5fe   : > { %5516 = vmatpush1.bf16.msra.mxu0 %v13458_v20 }
 0x5ff   : > { %4851 = vmatpush1.bf16.msra.mxu1 %v13398_v39  ;;  %5517 = vmatprep.subr.bf16.mxu0 %v13466_v23  ;;  %v13493_v39 = vld [vmem:[#allocation8 + $0x1d4] ss:$8 sps:$4 sm:$0xff]  }
 0x600   : > { %4852 = vmatprep.subr.bf16.mxu1 %v13403_v40  ;;  %v13488_v40 = vld [vmem:[#allocation8 + $0xd0] ss:$8 sps:$4 sm:$0xff]  }
 0x602   : > { %5518 = vmatpush1.bf16.msra.mxu0 %v13464_v25 }
 0x603   : > { %4853 = vmatpush1.bf16.msra.mxu1 %v13401_v41  ;;  %5519 = vmatprep.subr.bf16.mxu0 %v13472_v27  ;;  %v13491_v41 = vld [vmem:[#allocation8 + $0x1d0] ss:$8 sps:$4 sm:$0xff]  }
 0x604   : > { %4854 = vmatprep.subr.bf16.mxu1 %v13406_v42  ;;  %v13496_v42 = vld [vmem:[#allocation8 + $0xc4] ss:$8 sps:$4 sm:$0xff]  }
 0x606   : > { %5520 = vmatpush1.bf16.msra.mxu0 %v13470_v29 }
 0x607   : > { %4855 = vmatpush2.bf16.msra.mxu1 %v13404_v43  ;;  %5521 = vmatprep.subr.bf16.mxu0 %v13478_v31  ;;  %v13499_v43 = vld [vmem:[#allocation8 + $0x1c4] ss:$8 sps:$4 sm:$0xff]  }
 0x608   : > { %4856 = vmatprep.subr.bf16.mxu1 %v13409_v44  ;;  %v13494_v44 = vld [vmem:[#allocation8 + $0xc0] ss:$8 sps:$4 sm:$0xff]  }
 0x60a   : > { %5522 = vmatpush2.bf16.msra.mxu0 %v13476_v33 }
 0x60b   : > { %4857 = vmatpush2.bf16.msra.mxu1 %v13407_v45  ;;  %5523 = vmatprep.subr.bf16.mxu0 %v13484_v35  ;;  %v13497_v45 = vld [vmem:[#allocation8 + $0x1c0] ss:$8 sps:$4 sm:$0xff]  }
 0x60c   : > { %4858 = vmatprep.subr.bf16.mxu1 %v13412_v46  ;;  %v13502_v46 = vld [vmem:[#allocation8 + $0xb4] ss:$8 sps:$4 sm:$0xff]  }
 0x60e   : > { %5524 = vmatpush2.bf16.msra.mxu0 %v13482_v37 }
 0x60f   : > { %4859 = vmatpush2.bf16.msra.mxu1 %v13410_v47  ;;  %5525 = vmatprep.subr.bf16.mxu0 %v13490_v38  ;;  %v13500_v47 = vld [vmem:[#allocation8 + $0xb0] ss:$8 sps:$4 sm:$0xff]  }
 0x610   : > { %4860 = vmatprep.subr.bf16.mxu1 %v13415_v48  ;;  %v13505_v48 = vld [vmem:[#allocation8 + $0x1b4] ss:$8 sps:$4 sm:$0xff]  }
 0x612   : > { %5526 = vmatpush2.bf16.msra.mxu0 %v13488_v40 }
 0x613   : > { %4861 = vmatpush2.bf16.msra.mxu1 %v13413_v51  ;;  %5527 = vmatprep.subr.bf16.mxu0 %v13496_v42  ;;  %v13503_v51 = vld [vmem:[#allocation8 + $0x1b0] ss:$8 sps:$4 sm:$0xff]  }
 0x614   : > { %4862 = vmatprep.subr.bf16.mxu1 %v13418_v52  ;;  %v13508_v52 = vld [vmem:[#allocation8 + $0xa4] ss:$8 sps:$4 sm:$0xff]  }
 0x616   : > { %5528 = vmatpush2.bf16.msra.mxu0 %v13494_v44  ;;  %v13524_v44 = vld [vmem:[#allocation8 + $0x270] ss:$8 sps:$4 sm:$0xff]  }
 0x617   : > { %4863 = vmatpush2.bf16.msra.mxu1 %v13416_v53  ;;  %5529 = vmatprep.subr.bf16.mxu0 %v13502_v46  ;;  %v13506_v53 = vld [vmem:[#allocation8 + $0xa0] ss:$8 sps:$4 sm:$0xff]  }
 0x618   : > { %4864 = vmatprep.subr.bf16.mxu1 %v13421_v54  ;;  %v13511_v54 = vld [vmem:[#allocation8 + $0x1a4] ss:$8 sps:$4 sm:$0xff]  }
 0x61a   : > { %5530 = vmatpush2.bf16.msra.mxu0 %v13500_v47  ;;  %v13529_v47 = vld [vmem:[#allocation8 + $0x264] ss:$8 sps:$4 sm:$0xff]  }
 0x61b   : > { %4865 = vmatpush2.bf16.msra.mxu1 %v13419_v55  ;;  %5531 = vmatprep.subr.bf16.mxu0 %v13508_v52  ;;  %v13509_v55 = vld [vmem:[#allocation8 + $0x1a0] ss:$8 sps:$4 sm:$0xff]   ;;  %v13532_v52 = vld [vmem:[#allocation8 + $0x254] ss:$8 sps:$4 sm:$0xff]  }
 0x61c   : > { %4866 = vmatprep.subr.bf16.mxu1 %v13424_v56  ;;  %v13514_v56 = vld [vmem:[#allocation8 + $0x94] ss:$8 sps:$4 sm:$0xff]  }
 0x61e   : > { %5532 = vmatpush2.bf16.msra.mxu0 %v13506_v53  ;;  %v13530_v53 = vld [vmem:[#allocation8 + $0x250] ss:$8 sps:$4 sm:$0xff]  }
 0x61f   : > { %4867 = vmatpush2.bf16.msra.mxu1 %v13422_v57  ;;  %v13512_v57 = vld [vmem:[#allocation8 + $0x90] ss:$8 sps:$4 sm:$0xff]   ;;  %5533 = vmatprep.subr.bf16.mxu0 %v13514_v56  ;;  %v13538_v56 = vld [vmem:[#allocation8 + $0x234] ss:$8 sps:$4 sm:$0xff]  }
 0x620   : > { %4868 = vmatprep.subr.bf16.mxu1 %v13427_v58  ;;  %v13517_v58 = vld [vmem:[#allocation8 + $0x194] ss:$8 sps:$4 sm:$0xff]  }
 0x622   : > { %5534 = vmatpush2.bf16.msra.mxu0 %v13512_v57  ;;  %v13536_v57 = vld [vmem:[#allocation8 + $0x230] ss:$8 sps:$4 sm:$0xff]  }
 0x623   : > { %4869 = vmatpush2.bf16.msra.mxu1 %v13425_v59  ;;  %v13515_v59 = vld [vmem:[#allocation8 + $0x190] ss:$8 sps:$4 sm:$0xff]   ;;  %5535 = vmatprep.subr.bf16.mxu0 %v13520_v60  ;;  %v13544_v60 = vld [vmem:[#allocation8 + $0x214] ss:$8 sps:$4 sm:$0xff]  }
 0x624   : > { %5546 = vmatprep.subr.bf16.mxu1 %v13433_v1 }
 0x626   : > { %4871 = vmatmul.mubr.bf16.vlgmr.msra.gmra.mxu1 %v4166_v61  ;;  %v13518_v61 = vld [vmem:[#allocation8 + $0x80] ss:$8 sps:$4 sm:$0xff]  }
 0x627   : > { %5547 = vmatpush1.bf16.msra.mxu1 %v13431_v0  ;;  %5536 = vmatpush2.bf16.msra.mxu0 %v13518_v61  ;;  %v13526_v0 = vld [vmem:[#allocation8 + $0x274] ss:$8 sps:$4 sm:$0xff]   ;;  %v13542_v61 = vld [vmem:[#allocation8 + $0x210] ss:$8 sps:$4 sm:$0xff]  }
 0x628   : > { %5548 = vmatprep.subr.bf16.mxu1 %v13439_v3  ;;  %5587 = vmatprep.subr.bf16.mxu0 %v13526_v0  ;;  %v13550_v0 = vld [vmem:[#allocation8 + $0x2f4] ss:$8 sps:$4 sm:$0xff]  }
 0x62b   : > { %5549 = vmatpush1.bf16.msra.mxu1 %v13437_v5 }
 0x62c   : > { %5550 = vmatprep.subr.bf16.mxu1 %v13445_v7 }
 0x62f   : > { %5551 = vmatpush1.bf16.msra.mxu1 %v13443_v9  ;;  %v4264_v9 = vld [vmem:[%s15957_s28] sm:$0x3]  ;;  %s10991_s28 = sshll.u32 %s1110_s14, 4  ;;  %s10992_s28 = int_to_ptr.vmem [resolvable:$true] %s10991_s28 }
 0x630   : > { %5552 = vmatprep.subr.bf16.mxu1 %v13451_v11  ;;  %v4269_v10 = vrot.slane %v4264_v9, %v15471_v49  ;;  %v4273_v11 = vrot.slane %v4264_v9, %v15473_v50  ;;  %v13560_v9 = vld [vmem:[#allocation8 + $0x2b0] ss:$8 sps:$4 sm:$0xff]  }
 0x633   : > { %5553 = vmatpush1.bf16.msra.mxu1 %v13449_v13 }
 0x634   : > { %5554 = vmatprep.subr.bf16.mxu1 %v13457_v15 }
 0x637   : > { %5555 = vmatpush1.bf16.msra.mxu1 %v13455_v17 }
 0x638   : > { %5556 = vmatprep.subr.bf16.mxu1 %v13463_v19 }
 0x63b   : > { %5557 = vmatpush1.bf16.msra.mxu1 %v13461_v21 }
 0x63c   : > { %5558 = vmatprep.subr.bf16.mxu1 %v13469_v24 }
 0x63f   : > { %5559 = vmatpush1.bf16.msra.mxu1 %v13467_v26 }
 0x640   : > { %5560 = vmatprep.subr.bf16.mxu1 %v13475_v28 }
 0x643   : > { %5561 = vmatpush1.bf16.msra.mxu1 %v13473_v30 }
 0x644   : > { %5562 = vmatprep.subr.bf16.mxu1 %v13481_v32 }
 0x647   : > { %5563 = vmatpush2.bf16.msra.mxu1 %v13479_v34 }
 0x648   : > { %5564 = vmatprep.subr.bf16.mxu1 %v13487_v36 }
 0x64b   : > { %5565 = vmatpush2.bf16.msra.mxu1 %v13485_v22 }
 0x64c   : > { %5566 = vmatprep.subr.bf16.mxu1 %v13493_v39 }
 0x64f   : > { %5567 = vmatpush2.bf16.msra.mxu1 %v13491_v41 }
 0x650   : > { %5568 = vmatprep.subr.bf16.mxu1 %v13499_v43 }
 0x653   : > { %5569 = vmatpush2.bf16.msra.mxu1 %v13497_v45 }
 0x654   : > { %5570 = vmatprep.subr.bf16.mxu1 %v13505_v48 }
 0x657   : > { %5571 = vmatpush2.bf16.msra.mxu1 %v13503_v51  ;;  %v13527_v51 = vld [vmem:[#allocation8 + $0x260] ss:$8 sps:$4 sm:$0xff]  }
 0x658   : > { %5572 = vmatprep.subr.bf16.mxu1 %v13511_v54  ;;  %v13535_v54 = vld [vmem:[#allocation8 + $0x244] ss:$8 sps:$4 sm:$0xff]  }
 0x65b   : > { %5573 = vmatpush2.bf16.msra.mxu1 %v13509_v55  ;;  %v13533_v55 = vld [vmem:[#allocation8 + $0x240] ss:$8 sps:$4 sm:$0xff]  }
 0x65c   : > { %5574 = vmatprep.subr.bf16.mxu1 %v13517_v58  ;;  %v13541_v58 = vld [vmem:[#allocation8 + $0x224] ss:$8 sps:$4 sm:$0xff]  }
 0x65f   : > { %5575 = vmatpush2.bf16.msra.mxu1 %v13515_v59  ;;  %v13539_v59 = vld [vmem:[#allocation8 + $0x220] ss:$8 sps:$4 sm:$0xff]  }
 0x660   : > { %5576 = vmatprep.subr.bf16.mxu1 %v13523_v62  ;;  %v13547_v62 = vld [vmem:[#allocation8 + $0x204] ss:$8 sps:$4 sm:$0xff]  }
 0x663   : > { %5577 = vmatpush2.bf16.msra.mxu1 %v13521_v63  ;;  %v13545_v63 = vld [vmem:[#allocation8 + $0x200] ss:$8 sps:$4 sm:$0xff]  }
 0x6a6   : > { %v4790_v1 = vpop.f32.mrf.mxu1 }
 0x6a7   : > { %v4791_v12 = vadd.f32 %v4790_v1, %v4269_v10  ;;  %v13548_v1 = vld [vmem:[#allocation8 + $0x2f0] ss:$8 sps:$4 sm:$0xff]   ;;  %v13565_v10 = vld [vmem:[#allocation8 + $0x2a4] ss:$8 sps:$4 sm:$0xff]  }
 0x6a8   : > { %v4792_v2 = vpop.f32.mrf.mxu1 }
 0x6a9   : > { %v4831_v3 = vpop.f32.mrf.mxu0  ;;  %v4793_v13 = vadd.f32 %v4792_v2, %v4273_v11  ;;  %v13553_v2 = vld [vmem:[#allocation8 + $0x2e4] ss:$8 sps:$4 sm:$0xff]   ;;  %v13563_v11 = vld [vmem:[#allocation8 + $0x2a0] ss:$8 sps:$4 sm:$0xff]  }
 0x6aa   : > { %v4794_v4 = vpop.f32.mrf.mxu1  ;;  %v4832_v14 = vadd.f32 %v4831_v3, %v4791_v12  ;;  %v13551_v3 = vld [vmem:[#allocation8 + $0x2e0] ss:$8 sps:$4 sm:$0xff]   ;;  %v13568_v12 = vld [vmem:[#allocation8 + $0x294] ss:$8 sps:$4 sm:$0xff]  }
 0x6ab   : > { %v4833_v5 = vpop.f32.mrf.mxu0  ;;  %v13556_v4 = vld [vmem:[#allocation8 + $0x2d4] ss:$8 sps:$4 sm:$0xff]  }
 0x6ac   : > { %v4795_v6 = vpop.f32.mrf.mxu1  ;;  %v4834_v16 = vadd.f32 %v4833_v5, %v4793_v13  ;;  %v13554_v5 = vld [vmem:[#allocation8 + $0x2d0] ss:$8 sps:$4 sm:$0xff]  }
 0x6ad   : > { %v4835_v7 = vpop.f32.mrf.mxu0  ;;  %v13559_v6 = vld [vmem:[#allocation8 + $0x2c4] ss:$8 sps:$4 sm:$0xff]   ;;  %v13566_v13 = vld [vmem:[#allocation8 + $0x290] ss:$8 sps:$4 sm:$0xff]  }
 0x6ae   : > { %v13557_v7 = vld [vmem:[#allocation8 + $0x2c0] ss:$8 sps:$4 sm:$0xff]  }
 0x6af   : > { %v4836_v8 = vpop.f32.mrf.mxu0 }
 0x6b0   : > { %v13562_v8 = vld [vmem:[#allocation8 + $0x2b4] ss:$8 sps:$4 sm:$0xff]  }
 0x6e6   : > { %v4872_v15 = vpop.f32.mrf.mxu1 }
 0x6e7   : > { %v4873_v17 = vadd.f32 %v4872_v15, %v4832_v14  ;;  %v13571_v14 = vld [vmem:[#allocation8 + $0x284] ss:$8 sps:$4 sm:$0xff]   ;;  %v13569_v15 = vld [vmem:[#allocation8 + $0x280] ss:$8 sps:$4 sm:$0xff]  }
 0x6e8   : > { %v4874_v18 = vpop.f32.mrf.mxu1 }
 0x6e9   : > { %v4879_v19 = vmax.f32 %v4873_v17, 0.0  ;;  %v4875_v20 = vadd.f32 %v4874_v18, %v4834_v16  ;;  %v13572_v17 = vld [vmem:[#allocation10 + $0x70] ss:$8 sps:$4 sm:$0xff]   ;;  %v13574_v18 = vld [vmem:[#allocation10 + $0x74] ss:$8 sps:$4 sm:$0xff]  }
 0x6ea   : > { %v4876_v21 = vpop.f32.mrf.mxu1  ;;  %6244 = vmatprep.subr.bf16.mxu1 %v13574_v18  ;;  %v13667_v18 = vld [vmem:[#allocation10 + $0x184] ss:$8 sps:$4 sm:$0xff]  }
 0x6eb   : > { %v4883_v23 = vrot.slane %v4879_v19, 7  ;;  %v4880_v24 = vmax.f32 %v4875_v20, 0.0  ;;  %v13577_v19 = vld [vmem:[#allocation10 + $0x64] ss:$8 sps:$4 sm:$0xff]   ;;  %v13578_v20 = vld [vmem:[#allocation10 + $0x170] ss:$8 sps:$4 sm:$0xff]  }
 0x6ec   : > { %v4877_v25 = vpop.f32.mrf.mxu1  ;;  %v13580_v21 = vld [vmem:[#allocation10 + $0x174] ss:$8 sps:$4 sm:$0xff]  }
 0x6ed   : > { %v4887_v26 = vsel %vm1377_vm2, 0.0, %v4883_v23  ;;  %v4884_v27 = vrot.slane %v4880_v24, 7  ;;  %v13575_v23 = vld [vmem:[#allocation10 + $0x60] ss:$8 sps:$4 sm:$0xff]   ;;  %v13586_v24 = vld [vmem:[#allocation10 + $0x164] ss:$8 sps:$4 sm:$0xff]  }
 0x6ee   : > { %v4889_v28 = vsel %vm1858_vm11, %v4887_v26, 0.0  ;;  %v13583_v25 = vld [vmem:[#allocation10 + $0x54] ss:$8 sps:$4 sm:$0xff]   ;;  %v13584_v26 = vld [vmem:[#allocation10 + $0x160] ss:$8 sps:$4 sm:$0xff]  }
 0x6ef   : > { %v4893_v29 = vrot.slane %v4889_v28, 1  ;;  %v4899_v30 = vrot.slane %v4889_v28, 2  ;;  %v4905_v31 = vrot.slane %v4889_v28, 3  ;;  %v4888_v32 = vsel %vm1377_vm2, 0.0, %v4884_v27  ;;  %v13592_v27 = vld [vmem:[#allocation10 + $0x154] ss:$8 sps:$4 sm:$0xff]  }
 0x6f0   : > { %v4890_v33 = vsel %vm1858_vm11, %v4888_v32, 0.0  ;;  %v13587_v32 = vld [vmem:[#allocation10 + $0x40] ss:$8 sps:$4 sm:$0xff]  }
 0x6f1   : > { %v4894_v34 = vrot.slane %v4890_v33, 1  ;;  %v4900_v35 = vrot.slane %v4890_v33, 2  ;;  %v4906_v36 = vrot.slane %v4890_v33, 3  ;;  %v4897_v37 = vsel %vm1377_vm2, %v4889_v28, %v4893_v29  ;;  %v13581_v28 = vld [vmem:[#allocation10 + $0x50] ss:$8 sps:$4 sm:$0xff]  }
 0x6f2   : > { %v4903_v22 = vsel %vm1377_vm2, %v4893_v29, %v4899_v30  ;;  %v15726_v38 = vsel %vm1377_vm2, %v4899_v30, %v4905_v31  ;;  %v4911_v45 = vpack.c.bf16 %v4897_v37, %v4897_v37  ;;  %v13589_v29 = vld [vmem:[#allocation10 + $0x44] ss:$8 sps:$4 sm:$0xff]   ;;  %v13590_v30 = vld [vmem:[#allocation10 + $0x150] ss:$8 sps:$4 sm:$0xff]  }
 0x6f3   : > { %v4898_v39 = vsel %vm1377_vm2, %v4890_v33, %v4894_v34  ;;  %v4904_v40 = vsel %vm1377_vm2, %v4894_v34, %v4900_v35  ;;  %v4910_v41 = vsel %vm1377_vm2, %v4900_v35, %v4906_v36  ;;  %v4913_v46 = vpack.c.bf16 %v4903_v22, %v4903_v22  ;;  %v13598_v31 = vld [vmem:[#allocation10 + $0x144] ss:$8 sps:$4 sm:$0xff]   ;;  %v13595_v33 = vld [vmem:[#allocation10 + $0x34] ss:$8 sps:$4 sm:$0xff]   ;;  %v13596_v34 = vld [vmem:[#allocation10 + $0x140] ss:$8 sps:$4 sm:$0xff]  }
 0x6f4   : > { %v4912_v42 = vpack.c.bf16 %v4898_v39, %v4898_v39  ;;  %v4914_v43 = vpack.c.bf16 %v4904_v40, %v4904_v40  ;;  %v4916_v48 = vpack.c.bf16 %v4910_v41, %v4910_v41  ;;  %v4915_v16 = vpack.c.bf16 %v15726_v38, %v15726_v38  ;;  %v13604_v35 = vld [vmem:[#allocation10 + $0x134] ss:$8 sps:$4 sm:$0xff]   ;;  %v13593_v36 = vld [vmem:[#allocation10 + $0x30] ss:$8 sps:$4 sm:$0xff]   ;;  %v13601_v37 = vld [vmem:[#allocation10 + $0x24] ss:$8 sps:$4 sm:$0xff]  }
 0x6f5   : > { %v13602_v22 = vld [vmem:[#allocation10 + $0x130] ss:$8 sps:$4 sm:$0xff]   ;;  %v13610_v38 = vld [vmem:[#allocation10 + $0x124] ss:$8 sps:$4 sm:$0xff]   ;;  %v13599_v39 = vld [vmem:[#allocation10 + $0x20] ss:$8 sps:$4 sm:$0xff]  }
 0x6f6   : > { %5537 = vmatprep.mubr.bf16.mxu0 %v4912_v42  ;;  %5578 = vmatprep.mubr.bf16.mxu1 %v4914_v43  ;;  %v13607_v40 = vld [vmem:[#allocation10 + $0x14] ss:$8 sps:$4 sm:$0xff]   ;;  %v13608_v41 = vld [vmem:[#allocation10 + $0x120] ss:$8 sps:$4 sm:$0xff]   ;;  %v13605_v43 = vld [vmem:[#allocation10 + $0x10] ss:$8 sps:$4 sm:$0xff]  }
 0x6f7   : > { %5538 = vmatmul.mubr.bf16.vlgmr.msra.gmra.mxu0 %v4911_v45  ;;  %5579 = vmatmul.mubr.bf16.vlgmr.msra.gmra.mxu1 %v4913_v46  ;;  %v13616_v42 = vld [vmem:[#allocation10 + $0x114] ss:$8 sps:$4 sm:$0xff]   ;;  %v13614_v45 = vld [vmem:[#allocation10 + $0x110] ss:$8 sps:$4 sm:$0xff]   ;;  %v13622_v46 = vld [vmem:[#allocation10 + $0x104] ss:$8 sps:$4 sm:$0xff]  }
 0x6f8   : > { %5588 = vmatpush1.bf16.msra.mxu0 %v13524_v44  ;;  %5619 = vmatprep.mubr.bf16.mxu0 %v4916_v48  ;;  %v13613_v44 = vld [vmem:[#allocation10 + $0x4] ss:$8 sps:$4 sm:$0xff]   ;;  %v13619_v48 = vld [vmem:[#allocation10 + $0xf4] ss:$8 sps:$4 sm:$0xff]  }
 0x6f9   : > { %5589 = vmatprep.subr.bf16.mxu0 %v13529_v47  ;;  %6245 = vmatpush1.bf16.msra.mxu1 %v13572_v17  ;;  %v13611_v47 = vld [vmem:[#allocation10] ss:$8 sps:$4 sm:$0xff]  }
 0x6fa   : > { %6246 = vmatprep.subr.bf16.mxu1 %v13577_v19  ;;  %v13665_v17 = vld [vmem:[#allocation10 + $0x180] ss:$8 sps:$4 sm:$0xff]   ;;  %v13670_v19 = vld [vmem:[#allocation10 + $0x274] ss:$8 sps:$4 sm:$0xff]  }
 0x6fc   : > { %5590 = vmatpush1.bf16.msra.mxu0 %v13527_v51  ;;  %v13620_v51 = vld [vmem:[#allocation10 + $0x100] ss:$8 sps:$4 sm:$0xff]  }
 0x6fd   : > { %5591 = vmatprep.subr.bf16.mxu0 %v13532_v52  ;;  %6247 = vmatpush1.bf16.msra.mxu1 %v13575_v23  ;;  %v13628_v52 = vld [vmem:[#allocation10 + $0x1f4] ss:$8 sps:$4 sm:$0xff]  }
 0x6fe   : > { %6248 = vmatprep.subr.bf16.mxu1 %v13583_v25 }
 0x700   : > { %5592 = vmatpush1.bf16.msra.mxu0 %v13530_v53  ;;  %v13617_v53 = vld [vmem:[#allocation10 + $0xf0] ss:$8 sps:$4 sm:$0xff]  }
 0x701   : > { %5593 = vmatprep.subr.bf16.mxu0 %v13535_v54  ;;  %6249 = vmatpush1.bf16.msra.mxu1 %v13581_v28  ;;  %v13625_v54 = vld [vmem:[#allocation10 + $0xe4] ss:$8 sps:$4 sm:$0xff]  }
 0x702   : > { %6250 = vmatprep.subr.bf16.mxu1 %v13589_v29  ;;  %v5013_v29 = vld [vmem:[%s15958_s1] sm:$0x3]  ;;  %s15865_s1 = scalar_lea.hbm %s15180_s13, %s12512_s16 }
 0x704   : > { %5594 = vmatpush1.bf16.msra.mxu0 %v13533_v55  ;;  %v13626_v55 = vld [vmem:[#allocation10 + $0x1f0] ss:$8 sps:$4 sm:$0xff]  }
 0x705   : > { %5595 = vmatprep.subr.bf16.mxu0 %v13538_v56  ;;  %6251 = vmatpush1.bf16.msra.mxu1 %v13587_v32  ;;  %v13634_v56 = vld [vmem:[#allocation10 + $0x1e4] ss:$8 sps:$4 sm:$0xff]  }
 0x706   : > { %6252 = vmatprep.subr.bf16.mxu1 %v13595_v33 }
 0x708   : > { %5596 = vmatpush1.bf16.msra.mxu0 %v13536_v57  ;;  %v13623_v57 = vld [vmem:[#allocation10 + $0xe0] ss:$8 sps:$4 sm:$0xff]  }
 0x709   : > { %5597 = vmatprep.subr.bf16.mxu0 %v13541_v58  ;;  %6253 = vmatpush1.bf16.msra.mxu1 %v13593_v36  ;;  %v13631_v58 = vld [vmem:[#allocation10 + $0xd4] ss:$8 sps:$4 sm:$0xff]  }
 0x70a   : > { %6254 = vmatprep.subr.bf16.mxu1 %v13601_v37 }
 0x70c   : > { %5598 = vmatpush1.bf16.msra.mxu0 %v13539_v59  ;;  %v13632_v59 = vld [vmem:[#allocation10 + $0x1e0] ss:$8 sps:$4 sm:$0xff]  }
 0x70d   : > { %5599 = vmatprep.subr.bf16.mxu0 %v13544_v60  ;;  %6255 = vmatpush1.bf16.msra.mxu1 %v13599_v39  ;;  %v13640_v60 = vld [vmem:[#allocation10 + $0x1d4] ss:$8 sps:$4 sm:$0xff]  }
 0x70e   : > { %6256 = vmatprep.subr.bf16.mxu1 %v13607_v40 }
 0x710   : > { %5600 = vmatpush1.bf16.msra.mxu0 %v13542_v61  ;;  %v13629_v61 = vld [vmem:[#allocation10 + $0xd0] ss:$8 sps:$4 sm:$0xff]  }
 0x711   : > { %5601 = vmatprep.subr.bf16.mxu0 %v13547_v62  ;;  %6257 = vmatpush1.bf16.msra.mxu1 %v13605_v43  ;;  %v13637_v62 = vld [vmem:[#allocation10 + $0xc4] ss:$8 sps:$4 sm:$0xff]  }
 0x712   : > { %6258 = vmatprep.subr.bf16.mxu1 %v13613_v44 }
 0x714   : > { %5602 = vmatpush1.bf16.msra.mxu0 %v13545_v63  ;;  %v13638_v63 = vld [vmem:[#allocation10 + $0x1d0] ss:$8 sps:$4 sm:$0xff]  }
 0x715   : > { %5603 = vmatprep.subr.bf16.mxu0 %v13550_v0  ;;  %6259 = vmatpush1.bf16.msra.mxu1 %v13611_v47  ;;  %v13646_v0 = vld [vmem:[#allocation10 + $0x1c4] ss:$8 sps:$4 sm:$0xff]  }
 0x716   : > { %6260 = vmatprep.subr.bf16.mxu1 %v13619_v48  ;;  %v14400_v48 = vld [vmem:[#allocation17 + $0x230] ss:$8 sps:$4 sm:$0xff]  }
 0x718   : > { %5604 = vmatpush2.bf16.msra.mxu0 %v13548_v1  ;;  %v13635_v1 = vld [vmem:[#allocation10 + $0xc0] ss:$8 sps:$4 sm:$0xff]  }
 0x719   : > { %5605 = vmatprep.subr.bf16.mxu0 %v13553_v2  ;;  %6261 = vmatpush2.bf16.msra.mxu1 %v13617_v53  ;;  %v13643_v2 = vld [vmem:[#allocation10 + $0xb4] ss:$8 sps:$4 sm:$0xff]  }
 0x71a   : > { %6262 = vmatprep.subr.bf16.mxu1 %v13625_v54  ;;  %v13668_v54 = vld [vmem:[#allocation10 + $0x270] ss:$8 sps:$4 sm:$0xff]  }
 0x71c   : > { %5606 = vmatpush2.bf16.msra.mxu0 %v13551_v3  ;;  %v13644_v3 = vld [vmem:[#allocation10 + $0x1c0] ss:$8 sps:$4 sm:$0xff]  }
 0x71d   : > { %5607 = vmatprep.subr.bf16.mxu0 %v13556_v4  ;;  %6263 = vmatpush2.bf16.msra.mxu1 %v13623_v57  ;;  %v13641_v4 = vld [vmem:[#allocation10 + $0xb0] ss:$8 sps:$4 sm:$0xff]  }
 0x71e   : > { %6264 = vmatprep.subr.bf16.mxu1 %v13631_v58  ;;  %v13673_v58 = vld [vmem:[#allocation10 + $0x264] ss:$8 sps:$4 sm:$0xff]  }
 0x720   : > { %5608 = vmatpush2.bf16.msra.mxu0 %v13554_v5  ;;  %v13649_v5 = vld [vmem:[#allocation10 + $0xa4] ss:$8 sps:$4 sm:$0xff]  }
 0x721   : > { %5609 = vmatprep.subr.bf16.mxu0 %v13559_v6  ;;  %6265 = vmatpush2.bf16.msra.mxu1 %v13629_v61  ;;  %v13652_v6 = vld [vmem:[#allocation10 + $0x1b4] ss:$8 sps:$4 sm:$0xff]  }
 0x722   : > { %6266 = vmatprep.subr.bf16.mxu1 %v13637_v62  ;;  %v13671_v62 = vld [vmem:[#allocation10 + $0x260] ss:$8 sps:$4 sm:$0xff]  }
 0x724   : > { %5610 = vmatpush2.bf16.msra.mxu0 %v13557_v7  ;;  %v13647_v7 = vld [vmem:[#allocation10 + $0xa0] ss:$8 sps:$4 sm:$0xff]  }
 0x725   : > { %5611 = vmatprep.subr.bf16.mxu0 %v13562_v8  ;;  %6267 = vmatpush2.bf16.msra.mxu1 %v13635_v1  ;;  %v13650_v8 = vld [vmem:[#allocation10 + $0x1b0] ss:$8 sps:$4 sm:$0xff]   ;;  %v13679_v1 = vld [vmem:[#allocation10 + $0x244] ss:$8 sps:$4 sm:$0xff]  }
 0x726   : > { %6268 = vmatprep.subr.bf16.mxu1 %v13643_v2  ;;  %v13677_v2 = vld [vmem:[#allocation10 + $0x240] ss:$8 sps:$4 sm:$0xff]  }
 0x728   : > { %5612 = vmatpush2.bf16.msra.mxu0 %v13560_v9  ;;  %v13655_v9 = vld [vmem:[#allocation10 + $0x94] ss:$8 sps:$4 sm:$0xff]  }
 0x729   : > { %5613 = vmatprep.subr.bf16.mxu0 %v13565_v10  ;;  %6269 = vmatpush2.bf16.msra.mxu1 %v13641_v4  ;;  %v13658_v10 = vld [vmem:[#allocation10 + $0x1a4] ss:$8 sps:$4 sm:$0xff]   ;;  %v13680_v4 = vld [vmem:[#allocation10 + $0x230] ss:$8 sps:$4 sm:$0xff]  }
 0x72a   : > { %6270 = vmatprep.subr.bf16.mxu1 %v13649_v5  ;;  %v13685_v5 = vld [vmem:[#allocation10 + $0x224] ss:$8 sps:$4 sm:$0xff]  }
 0x72c   : > { %5614 = vmatpush2.bf16.msra.mxu0 %v13563_v11  ;;  %v13653_v11 = vld [vmem:[#allocation10 + $0x90] ss:$8 sps:$4 sm:$0xff]  }
 0x72d   : > { %5615 = vmatprep.subr.bf16.mxu0 %v13568_v12  ;;  %6271 = vmatpush2.bf16.msra.mxu1 %v13647_v7  ;;  %v13656_v12 = vld [vmem:[#allocation10 + $0x1a0] ss:$8 sps:$4 sm:$0xff]   ;;  %v13688_v7 = vld [vmem:[#allocation10 + $0x214] ss:$8 sps:$4 sm:$0xff]  }
 0x72e   : > { %6272 = vmatprep.subr.bf16.mxu1 %v13655_v9  ;;  %v13691_v9 = vld [vmem:[#allocation10 + $0x204] ss:$8 sps:$4 sm:$0xff]  }
 0x730   : > { %5616 = vmatpush2.bf16.msra.mxu0 %v13566_v13  ;;  %v13661_v13 = vld [vmem:[#allocation10 + $0x84] ss:$8 sps:$4 sm:$0xff]  }
 0x731   : > { %5617 = vmatprep.subr.bf16.mxu0 %v13571_v14  ;;  %6273 = vmatpush2.bf16.msra.mxu1 %v13653_v11  ;;  %v13664_v14 = vld [vmem:[#allocation10 + $0x194] ss:$8 sps:$4 sm:$0xff]  }
 0x732   : > { %6274 = vmatprep.subr.bf16.mxu1 %v13661_v13  ;;  %v13694_v11 = vld [vmem:[#allocation10 + $0x2f4] ss:$8 sps:$4 sm:$0xff]   ;;  %v13697_v13 = vld [vmem:[#allocation10 + $0x2e4] ss:$8 sps:$4 sm:$0xff]  }
 0x734   : > { %5618 = vmatpush2.bf16.msra.mxu0 %v13569_v15  ;;  %v13659_v15 = vld [vmem:[#allocation10 + $0x80] ss:$8 sps:$4 sm:$0xff]  }
 0x735   : > { %6285 = vmatprep.subr.bf16.mxu0 %v13580_v21  ;;  %6275 = vmatpush2.bf16.msra.mxu1 %v13659_v15  ;;  %v13700_v15 = vld [vmem:[#allocation10 + $0x2d4] ss:$8 sps:$4 sm:$0xff]  }
 0x736   : > { %6326 = vmatprep.subr.bf16.mxu1 %v13670_v19  ;;  %v13706_v19 = vld [vmem:[#allocation10 + $0x2b4] ss:$8 sps:$4 sm:$0xff]  }
 0x737   : > { %5620 = vmatmul.mubr.bf16.vlgmr.msra.gmra.mxu0 %v4915_v16  ;;  %v13662_v16 = vld [vmem:[#allocation10 + $0x190] ss:$8 sps:$4 sm:$0xff]  }
 0x738   : > { %6286 = vmatpush1.bf16.msra.mxu0 %v13578_v20 }
 0x739   : > { %6287 = vmatprep.subr.bf16.mxu0 %v13586_v24 }
 0x73c   : > { %6288 = vmatpush1.bf16.msra.mxu0 %v13584_v26 }
 0x73d   : > { %6289 = vmatprep.subr.bf16.mxu0 %v13592_v27 }
 0x740   : > { %6290 = vmatpush1.bf16.msra.mxu0 %v13590_v30  ;;  %v5018_v30 = vrot.slane %v5013_v29, %v15471_v49 }
 0x741   : > { %6291 = vmatprep.subr.bf16.mxu0 %v13598_v31  ;;  %v5022_v31 = vrot.slane %v5013_v29, %v15473_v50 }
 0x744   : > { %6292 = vmatpush1.bf16.msra.mxu0 %v13596_v34 }
 0x745   : > { %6293 = vmatprep.subr.bf16.mxu0 %v13604_v35 }
 0x748   : > { %6294 = vmatpush1.bf16.msra.mxu0 %v13602_v22 }
 0x749   : > { %6295 = vmatprep.subr.bf16.mxu0 %v13610_v38 }
 0x74c   : > { %6296 = vmatpush1.bf16.msra.mxu0 %v13608_v41 }
 0x74d   : > { %6297 = vmatprep.subr.bf16.mxu0 %v13616_v42 }
 0x750   : > { %6298 = vmatpush1.bf16.msra.mxu0 %v13614_v45 }
 0x751   : > { %6299 = vmatprep.subr.bf16.mxu0 %v13622_v46 }
 0x754   : > { %6300 = vmatpush1.bf16.msra.mxu0 %v13620_v51 }
 0x755   : > { %6301 = vmatprep.subr.bf16.mxu0 %v13628_v52 }
 0x758   : > { %6302 = vmatpush2.bf16.msra.mxu0 %v13626_v55 }
 0x759   : > { %6303 = vmatprep.subr.bf16.mxu0 %v13634_v56 }
 0x75c   : > { %6304 = vmatpush2.bf16.msra.mxu0 %v13632_v59 }
 0x75d   : > { %6305 = vmatprep.subr.bf16.mxu0 %v13640_v60 }
 0x760   : > { %6306 = vmatpush2.bf16.msra.mxu0 %v13638_v63  ;;  %v13676_v63 = vld [vmem:[#allocation10 + $0x254] ss:$8 sps:$4 sm:$0xff]  }
 0x761   : > { %6307 = vmatprep.subr.bf16.mxu0 %v13646_v0  ;;  %v13674_v0 = vld [vmem:[#allocation10 + $0x250] ss:$8 sps:$4 sm:$0xff]  }
 0x764   : > { %6308 = vmatpush2.bf16.msra.mxu0 %v13644_v3  ;;  %v13682_v3 = vld [vmem:[#allocation10 + $0x234] ss:$8 sps:$4 sm:$0xff]  }
 0x765   : > { %6309 = vmatprep.subr.bf16.mxu0 %v13652_v6  ;;  %v13683_v6 = vld [vmem:[#allocation10 + $0x220] ss:$8 sps:$4 sm:$0xff]  }
 0x768   : > { %6310 = vmatpush2.bf16.msra.mxu0 %v13650_v8  ;;  %v13686_v8 = vld [vmem:[#allocation10 + $0x210] ss:$8 sps:$4 sm:$0xff]  }
 0x769   : > { %6311 = vmatprep.subr.bf16.mxu0 %v13658_v10  ;;  %v13689_v10 = vld [vmem:[#allocation10 + $0x200] ss:$8 sps:$4 sm:$0xff]  }
 0x76c   : > { %6312 = vmatpush2.bf16.msra.mxu0 %v13656_v12  ;;  %v13692_v12 = vld [vmem:[#allocation10 + $0x2f0] ss:$8 sps:$4 sm:$0xff]  }
 0x76d   : > { %6313 = vmatprep.subr.bf16.mxu0 %v13664_v14  ;;  %v13695_v14 = vld [vmem:[#allocation10 + $0x2e0] ss:$8 sps:$4 sm:$0xff]  }
 0x770   : > { %6314 = vmatpush2.bf16.msra.mxu0 %v13662_v16  ;;  %v13698_v16 = vld [vmem:[#allocation10 + $0x2d0] ss:$8 sps:$4 sm:$0xff]  }
 0x771   : > { %6315 = vmatprep.subr.bf16.mxu0 %v13667_v18  ;;  %v13701_v18 = vld [vmem:[#allocation10 + $0x2c0] ss:$8 sps:$4 sm:$0xff]  }
 0x774   : > { %6316 = vmatpush2.bf16.msra.mxu0 %v13665_v17  ;;  %v13703_v17 = vld [vmem:[#allocation10 + $0x2c4] ss:$8 sps:$4 sm:$0xff]  }
 0x7b7   : > { %v5539_v20 = vpop.f32.mrf.mxu0  ;;  %v5580_v21 = vpop.f32.mrf.mxu1 }
 0x7b8   : > { %v5540_v32 = vadd.f32 %v5539_v20, %v5018_v30  ;;  %v13704_v20 = vld [vmem:[#allocation10 + $0x2b0] ss:$8 sps:$4 sm:$0xff]  }
 0x7b9   : > { %v5541_v23 = vpop.f32.mrf.mxu0  ;;  %v5582_v24 = vpop.f32.mrf.mxu1  ;;  %v13716_v30 = vld [vmem:[#allocation11 + $0x70] ss:$8 sps:$4 sm:$0xff]  }
 0x7ba   : > { %v5542_v33 = vadd.f32 %v5541_v23, %v5022_v31  ;;  %v5581_v34 = vadd.f32 %v5580_v21, %v5540_v32  ;;  %v13709_v21 = vld [vmem:[#allocation10 + $0x2a4] ss:$8 sps:$4 sm:$0xff]   ;;  %v13707_v23 = vld [vmem:[#allocation10 + $0x2a0] ss:$8 sps:$4 sm:$0xff]   ;;  %v13718_v31 = vld [vmem:[#allocation11 + $0x74] ss:$8 sps:$4 sm:$0xff]  }
 0x7bb   : > { %v5543_v25 = vpop.f32.mrf.mxu0  ;;  %v5584_v26 = vpop.f32.mrf.mxu1  ;;  %v13721_v32 = vld [vmem:[#allocation11 + $0x64] ss:$8 sps:$4 sm:$0xff]   ;;  %6983 = vmatprep.subr.bf16.mxu0 %v13718_v31 }
 0x7bc   : > { %v5583_v36 = vadd.f32 %v5582_v24, %v5542_v33  ;;  %v13712_v24 = vld [vmem:[#allocation10 + $0x294] ss:$8 sps:$4 sm:$0xff]   ;;  %v13710_v25 = vld [vmem:[#allocation10 + $0x290] ss:$8 sps:$4 sm:$0xff]   ;;  %v13715_v26 = vld [vmem:[#allocation10 + $0x284] ss:$8 sps:$4 sm:$0xff]  }
 0x7bd   : > { %v5544_v27 = vpop.f32.mrf.mxu0  ;;  %v5585_v28 = vpop.f32.mrf.mxu1  ;;  %v13722_v33 = vld [vmem:[#allocation11 + $0x170] ss:$8 sps:$4 sm:$0xff]   ;;  %v13811_v31 = vld [vmem:[#allocation11 + $0x184] ss:$8 sps:$4 sm:$0xff]  }
 0x7be   : > { %v13713_v27 = vld [vmem:[#allocation10 + $0x280] ss:$8 sps:$4 sm:$0xff]  }
 0x7f7   : > { %v5621_v35 = vpop.f32.mrf.mxu0 }
 0x7f8   : > { %v5622_v37 = vadd.f32 %v5621_v35, %v5581_v34  ;;  %v13724_v34 = vld [vmem:[#allocation11 + $0x174] ss:$8 sps:$4 sm:$0xff]   ;;  %v13719_v35 = vld [vmem:[#allocation11 + $0x60] ss:$8 sps:$4 sm:$0xff]  }
 0x7f9   : > { %v5623_v22 = vpop.f32.mrf.mxu0 }
 0x7fa   : > { %v5628_v38 = vmax.f32 %v5622_v37, 0.0  ;;  %v5624_v39 = vadd.f32 %v5623_v22, %v5583_v36  ;;  %v13730_v36 = vld [vmem:[#allocation11 + $0x164] ss:$8 sps:$4 sm:$0xff]   ;;  %v13727_v37 = vld [vmem:[#allocation11 + $0x54] ss:$8 sps:$4 sm:$0xff]  }
 0x7fb   : > { %v5625_v40 = vpop.f32.mrf.mxu0  ;;  %v13728_v22 = vld [vmem:[#allocation11 + $0x160] ss:$8 sps:$4 sm:$0xff]  }
 0x7fc   : > { %v5632_v41 = vrot.slane %v5628_v38, 7  ;;  %v5629_v42 = vmax.f32 %v5624_v39, 0.0  ;;  %v13736_v38 = vld [vmem:[#allocation11 + $0x154] ss:$8 sps:$4 sm:$0xff]   ;;  %v13725_v39 = vld [vmem:[#allocation11 + $0x50] ss:$8 sps:$4 sm:$0xff]  }
 0x7fd   : > { %v5626_v43 = vpop.f32.mrf.mxu0  ;;  %v13733_v40 = vld [vmem:[#allocation11 + $0x44] ss:$8 sps:$4 sm:$0xff]  }
 0x7fe   : > { %v5636_v44 = vsel %vm1377_vm2, 0.0, %v5632_v41  ;;  %v5633_v45 = vrot.slane %v5629_v42, 7  ;;  %v13734_v41 = vld [vmem:[#allocation11 + $0x150] ss:$8 sps:$4 sm:$0xff]   ;;  %v13742_v42 = vld [vmem:[#allocation11 + $0x144] ss:$8 sps:$4 sm:$0xff]  }
 0x7ff   : > { %v15738_v46 = vsel %vm1852_vm9, %v5636_v44, 0.0  ;;  %v11882_v55 = vpack.c.bf16 %v5636_v44, %v5636_v44  ;;  %v13731_v43 = vld [vmem:[#allocation11 + $0x40] ss:$8 sps:$4 sm:$0xff]   ;;  %v13739_v44 = vld [vmem:[#allocation11 + $0x34] ss:$8 sps:$4 sm:$0xff]  }
 0x800   : > { %v5637_v47 = vsel %vm1377_vm2, 0.0, %v5633_v45  ;;  %v5642_v51 = vrot.slane %v15738_v46, 1  ;;  %v5646_v28 = vrot.slane %v15738_v46, 2  ;;  %v13740_v45 = vld [vmem:[#allocation11 + $0x140] ss:$8 sps:$4 sm:$0xff]  }
 0x801   : > { %v5639_v52 = vsel %vm1852_vm9, %v5637_v47, 0.0  ;;  %v11879_v53 = vpack.c.bf16 %v5637_v47, %v5637_v47  ;;  %v13748_v46 = vld [vmem:[#allocation11 + $0x134] ss:$8 sps:$4 sm:$0xff]   ;;  %v13737_v47 = vld [vmem:[#allocation11 + $0x30] ss:$8 sps:$4 sm:$0xff]  }
 0x802   : > { %v5643_v56 = vrot.slane %v5639_v52, 1  ;;  %v5647_v57 = vrot.slane %v5639_v52, 2  ;;  %v5652_v61 = vpack.c.bf16 %v5642_v51, %v5642_v51  ;;  %v5654_v29 = vpack.c.bf16 %v5646_v28, %v5646_v28  ;;  %v13745_v51 = vld [vmem:[#allocation11 + $0x24] ss:$8 sps:$4 sm:$0xff]   ;;  %v13746_v52 = vld [vmem:[#allocation11 + $0x130] ss:$8 sps:$4 sm:$0xff]  }
 0x803   : > { %11880 = vmatprep.mubr.msk.bf16.mxu1 %vm15743_vm14, %v11879_v53  ;;  %v13754_v53 = vld [vmem:[#allocation11 + $0x124] ss:$8 sps:$4 sm:$0xff]   ;;  %v13808_v28 = vld [vmem:[#allocation11 + $0x194] ss:$8 sps:$4 sm:$0xff]  }
 0x804   : > { %11883 = vmatmul.mubr.msk.bf16.vlgmr.msra.gmra.mxu1 %vm15743_vm14, %v11882_v55  ;;  %v5653_v59 = vpack.c.bf16 %v5643_v56, %v5643_v56  ;;  %v5655_v60 = vpack.c.bf16 %v5647_v57, %v5647_v57  ;;  %v13751_v55 = vld [vmem:[#allocation11 + $0x14] ss:$8 sps:$4 sm:$0xff]   ;;  %v13752_v56 = vld [vmem:[#allocation11 + $0x120] ss:$8 sps:$4 sm:$0xff]  }
 0x805   : > { %6327 = vmatpush1.bf16.msra.mxu1 %v13668_v54  ;;  %v13743_v54 = vld [vmem:[#allocation11 + $0x20] ss:$8 sps:$4 sm:$0xff]   ;;  %v13760_v57 = vld [vmem:[#allocation11 + $0x114] ss:$8 sps:$4 sm:$0xff]  }
 0x806   : > { %6317 = vmatprep.mubr.bf16.mxu0 %v5653_v59  ;;  %6358 = vmatprep.mubr.bf16.mxu1 %v5655_v60  ;;  %v13757_v59 = vld [vmem:[#allocation11 + $0x4] ss:$8 sps:$4 sm:$0xff]   ;;  %v13758_v60 = vld [vmem:[#allocation11 + $0x110] ss:$8 sps:$4 sm:$0xff]  }
 0x807   : > { %6318 = vmatmul.mubr.bf16.vlgmr.msra.gmra.mxu0 %v5652_v61  ;;  %6328 = vmatprep.subr.bf16.mxu1 %v13673_v58  ;;  %v13749_v58 = vld [vmem:[#allocation11 + $0x10] ss:$8 sps:$4 sm:$0xff]   ;;  %v13766_v61 = vld [vmem:[#allocation11 + $0x104] ss:$8 sps:$4 sm:$0xff]  }
 0x808   : > { %6984 = vmatpush1.bf16.msra.mxu0 %v13716_v30  ;;  %v13806_v30 = vld [vmem:[#allocation11 + $0x190] ss:$8 sps:$4 sm:$0xff]  }
 0x809   : > { %6329 = vmatpush1.bf16.msra.mxu1 %v13671_v62  ;;  %6985 = vmatprep.subr.bf16.mxu0 %v13721_v32  ;;  %v13755_v62 = vld [vmem:[#allocation11] ss:$8 sps:$4 sm:$0xff]   ;;  %v13814_v32 = vld [vmem:[#allocation11 + $0x274] ss:$8 sps:$4 sm:$0xff]  }
 0x80a   : > { %6330 = vmatprep.subr.bf16.mxu1 %v13676_v63  ;;  %v13763_v63 = vld [vmem:[#allocation11 + $0xf4] ss:$8 sps:$4 sm:$0xff]  }
 0x80c   : > { %6986 = vmatpush1.bf16.msra.mxu0 %v13719_v35 }
 0x80d   : > { %6331 = vmatpush1.bf16.msra.mxu1 %v13674_v0  ;;  %6987 = vmatprep.subr.bf16.mxu0 %v13727_v37  ;;  %v13764_v0 = vld [vmem:[#allocation11 + $0x100] ss:$8 sps:$4 sm:$0xff]  }
 0x80e   : > { %6332 = vmatprep.subr.bf16.mxu1 %v13679_v1  ;;  %v13772_v1 = vld [vmem:[#allocation11 + $0x1f4] ss:$8 sps:$4 sm:$0xff]  }
 0x810   : > { %6988 = vmatpush1.bf16.msra.mxu0 %v13725_v39 }
 0x811   : > { %6333 = vmatpush1.bf16.msra.mxu1 %v13677_v2  ;;  %6989 = vmatprep.subr.bf16.mxu0 %v13733_v40  ;;  %v13761_v2 = vld [vmem:[#allocation11 + $0xf0] ss:$8 sps:$4 sm:$0xff]  }
 0x812   : > { %6334 = vmatprep.subr.bf16.mxu1 %v13682_v3  ;;  %v13769_v3 = vld [vmem:[#allocation11 + $0xe4] ss:$8 sps:$4 sm:$0xff]  }
 0x814   : > { %6990 = vmatpush1.bf16.msra.mxu0 %v13731_v43 }
 0x815   : > { %6335 = vmatpush1.bf16.msra.mxu1 %v13680_v4  ;;  %6991 = vmatprep.subr.bf16.mxu0 %v13739_v44  ;;  %v13770_v4 = vld [vmem:[#allocation11 + $0x1f0] ss:$8 sps:$4 sm:$0xff]  }
 0x816   : > { %6336 = vmatprep.subr.bf16.mxu1 %v13685_v5  ;;  %v13778_v5 = vld [vmem:[#allocation11 + $0x1e4] ss:$8 sps:$4 sm:$0xff]  }
 0x818   : > { %6992 = vmatpush1.bf16.msra.mxu0 %v13737_v47 }
 0x819   : > { %6337 = vmatpush1.bf16.msra.mxu1 %v13683_v6  ;;  %6993 = vmatprep.subr.bf16.mxu0 %v13745_v51  ;;  %v13767_v6 = vld [vmem:[#allocation11 + $0xe0] ss:$8 sps:$4 sm:$0xff]  }
 0x81a   : > { %6338 = vmatprep.subr.bf16.mxu1 %v13688_v7  ;;  %v13775_v7 = vld [vmem:[#allocation11 + $0xd4] ss:$8 sps:$4 sm:$0xff]  }
 0x81c   : > { %6994 = vmatpush1.bf16.msra.mxu0 %v13743_v54 }
 0x81d   : > { %6339 = vmatpush1.bf16.msra.mxu1 %v13686_v8  ;;  %6995 = vmatprep.subr.bf16.mxu0 %v13751_v55  ;;  %v13776_v8 = vld [vmem:[#allocation11 + $0x1e0] ss:$8 sps:$4 sm:$0xff]  }
 0x81e   : > { %6340 = vmatprep.subr.bf16.mxu1 %v13691_v9  ;;  %v13784_v9 = vld [vmem:[#allocation11 + $0x1d4] ss:$8 sps:$4 sm:$0xff]  }
 0x820   : > { %6996 = vmatpush1.bf16.msra.mxu0 %v13749_v58 }
 0x821   : > { %6341 = vmatpush1.bf16.msra.mxu1 %v13689_v10  ;;  %6997 = vmatprep.subr.bf16.mxu0 %v13757_v59  ;;  %v13773_v10 = vld [vmem:[#allocation11 + $0xd0] ss:$8 sps:$4 sm:$0xff]  }
 0x822   : > { %6342 = vmatprep.subr.bf16.mxu1 %v13694_v11  ;;  %v13781_v11 = vld [vmem:[#allocation11 + $0xc4] ss:$8 sps:$4 sm:$0xff]  }
 0x824   : > { %6998 = vmatpush1.bf16.msra.mxu0 %v13755_v62 }
 0x825   : > { %6343 = vmatpush2.bf16.msra.mxu1 %v13692_v12  ;;  %6999 = vmatprep.subr.bf16.mxu0 %v13763_v63  ;;  %v13782_v12 = vld [vmem:[#allocation11 + $0x1d0] ss:$8 sps:$4 sm:$0xff]  }
 0x826   : > { %6344 = vmatprep.subr.bf16.mxu1 %v13697_v13  ;;  %v13790_v13 = vld [vmem:[#allocation11 + $0x1c4] ss:$8 sps:$4 sm:$0xff]  }
 0x828   : > { %7000 = vmatpush2.bf16.msra.mxu0 %v13761_v2 }
 0x829   : > { %6345 = vmatpush2.bf16.msra.mxu1 %v13695_v14  ;;  %7001 = vmatprep.subr.bf16.mxu0 %v13769_v3  ;;  %v13779_v14 = vld [vmem:[#allocation11 + $0xc0] ss:$8 sps:$4 sm:$0xff]   ;;  %v13812_v3 = vld [vmem:[#allocation11 + $0x270] ss:$8 sps:$4 sm:$0xff]  }
 0x82a   : > { %6346 = vmatprep.subr.bf16.mxu1 %v13700_v15  ;;  %v13787_v15 = vld [vmem:[#allocation11 + $0xb4] ss:$8 sps:$4 sm:$0xff]  }
 0x82c   : > { %7002 = vmatpush2.bf16.msra.mxu0 %v13767_v6 }
 0x82d   : > { %6347 = vmatpush2.bf16.msra.mxu1 %v13698_v16  ;;  %7003 = vmatprep.subr.bf16.mxu0 %v13775_v7  ;;  %v13788_v16 = vld [vmem:[#allocation11 + $0x1c0] ss:$8 sps:$4 sm:$0xff]   ;;  %v13817_v7 = vld [vmem:[#allocation11 + $0x264] ss:$8 sps:$4 sm:$0xff]  }
 0x82e   : > { %6348 = vmatprep.subr.bf16.mxu1 %v13703_v17  ;;  %v13785_v17 = vld [vmem:[#allocation11 + $0xb0] ss:$8 sps:$4 sm:$0xff]  }
 0x830   : > { %7004 = vmatpush2.bf16.msra.mxu0 %v13773_v10 }
 0x831   : > { %6349 = vmatpush2.bf16.msra.mxu1 %v13701_v18  ;;  %7005 = vmatprep.subr.bf16.mxu0 %v13781_v11  ;;  %v13793_v18 = vld [vmem:[#allocation11 + $0xa4] ss:$8 sps:$4 sm:$0xff]   ;;  %v13815_v11 = vld [vmem:[#allocation11 + $0x260] ss:$8 sps:$4 sm:$0xff]  }
 0x832   : > { %6350 = vmatprep.subr.bf16.mxu1 %v13706_v19  ;;  %v13796_v19 = vld [vmem:[#allocation11 + $0x1b4] ss:$8 sps:$4 sm:$0xff]  }
 0x834   : > { %7006 = vmatpush2.bf16.msra.mxu0 %v13779_v14  ;;  %v13823_v14 = vld [vmem:[#allocation11 + $0x244] ss:$8 sps:$4 sm:$0xff]  }
 0x835   : > { %6351 = vmatpush2.bf16.msra.mxu1 %v13704_v20  ;;  %7007 = vmatprep.subr.bf16.mxu0 %v13787_v15  ;;  %v13791_v20 = vld [vmem:[#allocation11 + $0xa0] ss:$8 sps:$4 sm:$0xff]  }
 0x836   : > { %6352 = vmatprep.subr.bf16.mxu1 %v13709_v21  ;;  %v13794_v21 = vld [vmem:[#allocation11 + $0x1b0] ss:$8 sps:$4 sm:$0xff]   ;;  %v13821_v15 = vld [vmem:[#allocation11 + $0x240] ss:$8 sps:$4 sm:$0xff]  }
 0x838   : > { %7008 = vmatpush2.bf16.msra.mxu0 %v13785_v17  ;;  %v13824_v17 = vld [vmem:[#allocation11 + $0x230] ss:$8 sps:$4 sm:$0xff]  }
 0x839   : > { %6353 = vmatpush2.bf16.msra.mxu1 %v13707_v23  ;;  %7009 = vmatprep.subr.bf16.mxu0 %v13793_v18  ;;  %v13799_v23 = vld [vmem:[#allocation11 + $0x94] ss:$8 sps:$4 sm:$0xff]   ;;  %v13829_v18 = vld [vmem:[#allocation11 + $0x224] ss:$8 sps:$4 sm:$0xff]  }
 0x83a   : > { %6354 = vmatprep.subr.bf16.mxu1 %v13712_v24  ;;  %v13802_v24 = vld [vmem:[#allocation11 + $0x1a4] ss:$8 sps:$4 sm:$0xff]  }
 0x83c   : > { %7010 = vmatpush2.bf16.msra.mxu0 %v13791_v20  ;;  %v13832_v20 = vld [vmem:[#allocation11 + $0x214] ss:$8 sps:$4 sm:$0xff]  }
 0x83d   : > { %6355 = vmatpush2.bf16.msra.mxu1 %v13710_v25  ;;  %v13797_v25 = vld [vmem:[#allocation11 + $0x90] ss:$8 sps:$4 sm:$0xff]   ;;  %7011 = vmatprep.subr.bf16.mxu0 %v13799_v23  ;;  %v13835_v23 = vld [vmem:[#allocation11 + $0x204] ss:$8 sps:$4 sm:$0xff]  }
 0x83e   : > { %6356 = vmatprep.subr.bf16.mxu1 %v13715_v26  ;;  %v13800_v26 = vld [vmem:[#allocation11 + $0x1a0] ss:$8 sps:$4 sm:$0xff]  }
 0x840   : > { %7012 = vmatpush2.bf16.msra.mxu0 %v13797_v25  ;;  %v13838_v25 = vld [vmem:[#allocation11 + $0x2f4] ss:$8 sps:$4 sm:$0xff]  }
 0x841   : > { %6357 = vmatpush2.bf16.msra.mxu1 %v13713_v27  ;;  %v13805_v27 = vld [vmem:[#allocation11 + $0x84] ss:$8 sps:$4 sm:$0xff]  }
 0x842   : > { %7024 = vmatprep.subr.bf16.mxu1 %v13724_v34  ;;  %7013 = vmatprep.subr.bf16.mxu0 %v13805_v27  ;;  %v13841_v27 = vld [vmem:[#allocation11 + $0x2e4] ss:$8 sps:$4 sm:$0xff]  }
 0x844   : > { %6359 = vmatmul.mubr.bf16.vlgmr.msra.gmra.mxu1 %v5654_v29  ;;  %v13803_v29 = vld [vmem:[#allocation11 + $0x80] ss:$8 sps:$4 sm:$0xff]  }
 0x845   : > { %7025 = vmatpush1.bf16.msra.mxu1 %v13722_v33  ;;  %7014 = vmatpush2.bf16.msra.mxu0 %v13803_v29  ;;  %v13809_v33 = vld [vmem:[#allocation11 + $0x180] ss:$8 sps:$4 sm:$0xff]   ;;  %v13844_v29 = vld [vmem:[#allocation11 + $0x2d4] ss:$8 sps:$4 sm:$0xff]  }
 0x846   : > { %7026 = vmatprep.subr.bf16.mxu1 %v13730_v36  ;;  %7065 = vmatprep.subr.bf16.mxu0 %v13814_v32  ;;  %v13845_v32 = vld [vmem:[#allocation11 + $0x2c0] ss:$8 sps:$4 sm:$0xff]  }
 0x849   : > { %7027 = vmatpush1.bf16.msra.mxu1 %v13728_v22 }
 0x84a   : > { %7028 = vmatprep.subr.bf16.mxu1 %v13736_v38 }
 0x84d   : > { %7029 = vmatpush1.bf16.msra.mxu1 %v13734_v41  ;;  %v5752_v41 = vld [vmem:[%s15961_s26] sm:$0x3]  ;;  %s10979_s26 = scalar_lea.sflag [#allocation4], %s1109_s6 }
 0x84e   : > { %7030 = vmatprep.subr.bf16.mxu1 %v13742_v42  ;;  %v5757_v42 = vrot.slane %v5752_v41, %v15471_v49  ;;  %v5761_v43 = vrot.slane %v5752_v41, %v15473_v50 }
 0x851   : > { %7031 = vmatpush1.bf16.msra.mxu1 %v13740_v45 }
 0x852   : > { %7032 = vmatprep.subr.bf16.mxu1 %v13748_v46 }
 0x855   : > { %7033 = vmatpush1.bf16.msra.mxu1 %v13746_v52 }
 0x856   : > { %7034 = vmatprep.subr.bf16.mxu1 %v13754_v53 }
 0x859   : > { %7035 = vmatpush1.bf16.msra.mxu1 %v13752_v56 }
 0x85a   : > { %7036 = vmatprep.subr.bf16.mxu1 %v13760_v57 }
 0x85d   : > { %7037 = vmatpush1.bf16.msra.mxu1 %v13758_v60 }
 0x85e   : > { %7038 = vmatprep.subr.bf16.mxu1 %v13766_v61 }
 0x861   : > { %7039 = vmatpush1.bf16.msra.mxu1 %v13764_v0 }
 0x862   : > { %7040 = vmatprep.subr.bf16.mxu1 %v13772_v1 }
 0x865   : > { %7041 = vmatpush2.bf16.msra.mxu1 %v13770_v4 }
 0x866   : > { %7042 = vmatprep.subr.bf16.mxu1 %v13778_v5 }
 0x869   : > { %7043 = vmatpush2.bf16.msra.mxu1 %v13776_v8 }
 0x86a   : > { %7044 = vmatprep.subr.bf16.mxu1 %v13784_v9 }
 0x86d   : > { %7045 = vmatpush2.bf16.msra.mxu1 %v13782_v12  ;;  %v13820_v12 = vld [vmem:[#allocation11 + $0x254] ss:$8 sps:$4 sm:$0xff]  }
 0x86e   : > { %7046 = vmatprep.subr.bf16.mxu1 %v13790_v13  ;;  %v13818_v13 = vld [vmem:[#allocation11 + $0x250] ss:$8 sps:$4 sm:$0xff]  }
 0x871   : > { %7047 = vmatpush2.bf16.msra.mxu1 %v13788_v16  ;;  %v13826_v16 = vld [vmem:[#allocation11 + $0x234] ss:$8 sps:$4 sm:$0xff]  }
 0x872   : > { %7048 = vmatprep.subr.bf16.mxu1 %v13796_v19  ;;  %v13827_v19 = vld [vmem:[#allocation11 + $0x220] ss:$8 sps:$4 sm:$0xff]  }
 0x875   : > { %7049 = vmatpush2.bf16.msra.mxu1 %v13794_v21  ;;  %v13830_v21 = vld [vmem:[#allocation11 + $0x210] ss:$8 sps:$4 sm:$0xff]  }
 0x876   : > { %7050 = vmatprep.subr.bf16.mxu1 %v13802_v24  ;;  %v13833_v24 = vld [vmem:[#allocation11 + $0x200] ss:$8 sps:$4 sm:$0xff]  }
 0x879   : > { %7051 = vmatpush2.bf16.msra.mxu1 %v13800_v26  ;;  %v13836_v26 = vld [vmem:[#allocation11 + $0x2f0] ss:$8 sps:$4 sm:$0xff]  }
 0x87a   : > { %7052 = vmatprep.subr.bf16.mxu1 %v13808_v28  ;;  %v13839_v28 = vld [vmem:[#allocation11 + $0x2e0] ss:$8 sps:$4 sm:$0xff]  }
 0x87d   : > { %7053 = vmatpush2.bf16.msra.mxu1 %v13806_v30  ;;  %v13842_v30 = vld [vmem:[#allocation11 + $0x2d0] ss:$8 sps:$4 sm:$0xff]  }
 0x87e   : > { %7054 = vmatprep.subr.bf16.mxu1 %v13811_v31  ;;  %v13847_v31 = vld [vmem:[#allocation11 + $0x2c4] ss:$8 sps:$4 sm:$0xff]  }
 0x881   : > { %7055 = vmatpush2.bf16.msra.mxu1 %v13809_v33  ;;  %v13850_v33 = vld [vmem:[#allocation11 + $0x2b4] ss:$8 sps:$4 sm:$0xff]  }
 0x8c4   : > { %v6278_v34 = vpop.f32.mrf.mxu1 }
 0x8c5   : > { %v6279_v44 = vadd.f32 %v6278_v34, %v5757_v42  ;;  %v13848_v34 = vld [vmem:[#allocation11 + $0x2b0] ss:$8 sps:$4 sm:$0xff]  }
 0x8c6   : > { %v6280_v35 = vpop.f32.mrf.mxu1  ;;  %v13860_v42 = vld [vmem:[#allocation13 + $0x70] ss:$8 sps:$4 sm:$0xff]  }
 0x8c7   : > { %v6319_v36 = vpop.f32.mrf.mxu0  ;;  %v6281_v45 = vadd.f32 %v6280_v35, %v5761_v43  ;;  %v13853_v35 = vld [vmem:[#allocation11 + $0x2a4] ss:$8 sps:$4 sm:$0xff]   ;;  %v13862_v43 = vld [vmem:[#allocation13 + $0x74] ss:$8 sps:$4 sm:$0xff]  }
 0x8c8   : > { %v6282_v37 = vpop.f32.mrf.mxu1  ;;  %v6320_v46 = vadd.f32 %v6319_v36, %v6279_v44  ;;  %v13851_v36 = vld [vmem:[#allocation11 + $0x2a0] ss:$8 sps:$4 sm:$0xff]   ;;  %v13865_v44 = vld [vmem:[#allocation13 + $0x64] ss:$8 sps:$4 sm:$0xff]   ;;  %7722 = vmatprep.subr.bf16.mxu1 %v13862_v43 }
 0x8c9   : > { %v6321_v22 = vpop.f32.mrf.mxu0  ;;  %v13856_v37 = vld [vmem:[#allocation11 + $0x294] ss:$8 sps:$4 sm:$0xff]   ;;  %v13955_v43 = vld [vmem:[#allocation13 + $0x184] ss:$8 sps:$4 sm:$0xff]  }
 0x8ca   : > { %v6283_v38 = vpop.f32.mrf.mxu1  ;;  %v6322_v51 = vadd.f32 %v6321_v22, %v6281_v45  ;;  %v13854_v22 = vld [vmem:[#allocation11 + $0x290] ss:$8 sps:$4 sm:$0xff]  }
 0x8cb   : > { %v6323_v39 = vpop.f32.mrf.mxu0  ;;  %v13859_v38 = vld [vmem:[#allocation11 + $0x284] ss:$8 sps:$4 sm:$0xff]   ;;  %v13866_v45 = vld [vmem:[#allocation13 + $0x170] ss:$8 sps:$4 sm:$0xff]  }
 0x8cc   : > { %v13857_v39 = vld [vmem:[#allocation11 + $0x280] ss:$8 sps:$4 sm:$0xff]  }
 0x8cd   : > { %v6324_v40 = vpop.f32.mrf.mxu0 }
 0x904   : > { %v6360_v47 = vpop.f32.mrf.mxu1 }
 0x905   : > { %v6361_v52 = vadd.f32 %v6360_v47, %v6320_v46  ;;  %v13868_v46 = vld [vmem:[#allocation13 + $0x174] ss:$8 sps:$4 sm:$0xff]   ;;  %v13863_v47 = vld [vmem:[#allocation13 + $0x60] ss:$8 sps:$4 sm:$0xff]  }
 0x906   : > { %v6362_v53 = vpop.f32.mrf.mxu1 }
 0x907   : > { %v6367_v54 = vmax.f32 %v6361_v52, 0.0  ;;  %v6363_v55 = vadd.f32 %v6362_v53, %v6322_v51  ;;  %v13874_v51 = vld [vmem:[#allocation13 + $0x164] ss:$8 sps:$4 sm:$0xff]   ;;  %v13871_v52 = vld [vmem:[#allocation13 + $0x54] ss:$8 sps:$4 sm:$0xff]  }
 0x908   : > { %v6364_v56 = vpop.f32.mrf.mxu1  ;;  %v13872_v53 = vld [vmem:[#allocation13 + $0x160] ss:$8 sps:$4 sm:$0xff]  }
 0x909   : > { %v6371_v57 = vrot.slane %v6367_v54, 7  ;;  %v6368_v58 = vmax.f32 %v6363_v55, 0.0  ;;  %v13880_v54 = vld [vmem:[#allocation13 + $0x154] ss:$8 sps:$4 sm:$0xff]   ;;  %v13869_v55 = vld [vmem:[#allocation13 + $0x50] ss:$8 sps:$4 sm:$0xff]  }
 0x90a   : > { %v6365_v59 = vpop.f32.mrf.mxu1  ;;  %v13877_v56 = vld [vmem:[#allocation13 + $0x44] ss:$8 sps:$4 sm:$0xff]  }
 0x90b   : > { %v6375_v60 = vsel %vm1377_vm2, 0.0, %v6371_v57  ;;  %v6372_v61 = vrot.slane %v6368_v58, 7  ;;  %v13878_v57 = vld [vmem:[#allocation13 + $0x150] ss:$8 sps:$4 sm:$0xff]   ;;  %v13886_v58 = vld [vmem:[#allocation13 + $0x144] ss:$8 sps:$4 sm:$0xff]  }
 0x90c   : > { %v15759_v62 = vsel %vm1852_vm9, %v6375_v60, 0.0  ;;  %v11984_v4 = vpack.c.bf16 %v6375_v60, %v6375_v60  ;;  %v13875_v59 = vld [vmem:[#allocation13 + $0x40] ss:$8 sps:$4 sm:$0xff]   ;;  %v13883_v60 = vld [vmem:[#allocation13 + $0x34] ss:$8 sps:$4 sm:$0xff]  }
 0x90d   : > { %v6376_v63 = vsel %vm1377_vm2, 0.0, %v6372_v61  ;;  %v6381_v0 = vrot.slane %v15759_v62, 1  ;;  %v6385_v40 = vrot.slane %v15759_v62, 2  ;;  %v13884_v61 = vld [vmem:[#allocation13 + $0x140] ss:$8 sps:$4 sm:$0xff]  }
 0x90e   : > { %v6378_v1 = vsel %vm1852_vm9, %v6376_v63, 0.0  ;;  %v11981_v2 = vpack.c.bf16 %v6376_v63, %v6376_v63  ;;  %v13892_v62 = vld [vmem:[#allocation13 + $0x134] ss:$8 sps:$4 sm:$0xff]   ;;  %v13881_v63 = vld [vmem:[#allocation13 + $0x30] ss:$8 sps:$4 sm:$0xff]  }
 0x90f   : > { %v6382_v5 = vrot.slane %v6378_v1, 1  ;;  %v6386_v6 = vrot.slane %v6378_v1, 2  ;;  %v6391_v10 = vpack.c.bf16 %v6381_v0, %v6381_v0  ;;  %v6393_v41 = vpack.c.bf16 %v6385_v40, %v6385_v40  ;;  %v13889_v0 = vld [vmem:[#allocation13 + $0x24] ss:$8 sps:$4 sm:$0xff]   ;;  %v13890_v1 = vld [vmem:[#allocation13 + $0x130] ss:$8 sps:$4 sm:$0xff]  }
 0x910   : > { %11982 = vmatprep.mubr.msk.bf16.mxu0 %vm15743_vm14, %v11981_v2  ;;  %v13898_v2 = vld [vmem:[#allocation13 + $0x124] ss:$8 sps:$4 sm:$0xff]   ;;  %v13952_v40 = vld [vmem:[#allocation13 + $0x194] ss:$8 sps:$4 sm:$0xff]  }
 0x911   : > { %11985 = vmatmul.mubr.msk.bf16.vlgmr.msra.gmra.mxu0 %vm15743_vm14, %v11984_v4  ;;  %v6392_v8 = vpack.c.bf16 %v6382_v5, %v6382_v5  ;;  %v6394_v9 = vpack.c.bf16 %v6386_v6, %v6386_v6  ;;  %v13895_v4 = vld [vmem:[#allocation13 + $0x14] ss:$8 sps:$4 sm:$0xff]   ;;  %v13896_v5 = vld [vmem:[#allocation13 + $0x120] ss:$8 sps:$4 sm:$0xff]  }
 0x912   : > { %7066 = vmatpush1.bf16.msra.mxu0 %v13812_v3  ;;  %v13887_v3 = vld [vmem:[#allocation13 + $0x20] ss:$8 sps:$4 sm:$0xff]   ;;  %v13904_v6 = vld [vmem:[#allocation13 + $0x114] ss:$8 sps:$4 sm:$0xff]  }
 0x913   : > { %7056 = vmatprep.mubr.bf16.mxu1 %v6392_v8  ;;  %7097 = vmatprep.mubr.bf16.mxu0 %v6394_v9  ;;  %v13901_v8 = vld [vmem:[#allocation13 + $0x4] ss:$8 sps:$4 sm:$0xff]   ;;  %v13902_v9 = vld [vmem:[#allocation13 + $0x110] ss:$8 sps:$4 sm:$0xff]  }
 0x914   : > { %7057 = vmatmul.mubr.bf16.vlgmr.msra.gmra.mxu1 %v6391_v10  ;;  %7067 = vmatprep.subr.bf16.mxu0 %v13817_v7  ;;  %v13893_v7 = vld [vmem:[#allocation13 + $0x10] ss:$8 sps:$4 sm:$0xff]   ;;  %v13910_v10 = vld [vmem:[#allocation13 + $0x104] ss:$8 sps:$4 sm:$0xff]  }
 0x915   : > { %7723 = vmatpush1.bf16.msra.mxu1 %v13860_v42  ;;  %v13950_v42 = vld [vmem:[#allocation13 + $0x190] ss:$8 sps:$4 sm:$0xff]  }
 0x916   : > { %7068 = vmatpush1.bf16.msra.mxu0 %v13815_v11  ;;  %7724 = vmatprep.subr.bf16.mxu1 %v13865_v44  ;;  %v13899_v11 = vld [vmem:[#allocation13] ss:$8 sps:$4 sm:$0xff]   ;;  %v13958_v44 = vld [vmem:[#allocation13 + $0x274] ss:$8 sps:$4 sm:$0xff]  }
 0x917   : > { %7069 = vmatprep.subr.bf16.mxu0 %v13820_v12  ;;  %v13907_v12 = vld [vmem:[#allocation13 + $0xf4] ss:$8 sps:$4 sm:$0xff]  }
 0x919   : > { %7725 = vmatpush1.bf16.msra.mxu1 %v13863_v47 }
 0x91a   : > { %7070 = vmatpush1.bf16.msra.mxu0 %v13818_v13  ;;  %7726 = vmatprep.subr.bf16.mxu1 %v13871_v52  ;;  %v13908_v13 = vld [vmem:[#allocation13 + $0x100] ss:$8 sps:$4 sm:$0xff]  }
 0x91b   : > { %7071 = vmatprep.subr.bf16.mxu0 %v13823_v14  ;;  %v13916_v14 = vld [vmem:[#allocation13 + $0x1f4] ss:$8 sps:$4 sm:$0xff]  }
 0x91d   : > { %7727 = vmatpush1.bf16.msra.mxu1 %v13869_v55 }
 0x91e   : > { %7072 = vmatpush1.bf16.msra.mxu0 %v13821_v15  ;;  %7728 = vmatprep.subr.bf16.mxu1 %v13877_v56  ;;  %v13905_v15 = vld [vmem:[#allocation13 + $0xf0] ss:$8 sps:$4 sm:$0xff]  }
 0x91f   : > { %7073 = vmatprep.subr.bf16.mxu0 %v13826_v16  ;;  %v13913_v16 = vld [vmem:[#allocation13 + $0xe4] ss:$8 sps:$4 sm:$0xff]  }
 0x921   : > { %7729 = vmatpush1.bf16.msra.mxu1 %v13875_v59 }
 0x922   : > { %7074 = vmatpush1.bf16.msra.mxu0 %v13824_v17  ;;  %7730 = vmatprep.subr.bf16.mxu1 %v13883_v60  ;;  %v13914_v17 = vld [vmem:[#allocation13 + $0x1f0] ss:$8 sps:$4 sm:$0xff]  }
 0x923   : > { %7075 = vmatprep.subr.bf16.mxu0 %v13829_v18  ;;  %v13922_v18 = vld [vmem:[#allocation13 + $0x1e4] ss:$8 sps:$4 sm:$0xff]  }
 0x925   : > { %7731 = vmatpush1.bf16.msra.mxu1 %v13881_v63 }
 0x926   : > { %7076 = vmatpush1.bf16.msra.mxu0 %v13827_v19  ;;  %7732 = vmatprep.subr.bf16.mxu1 %v13889_v0  ;;  %v13911_v19 = vld [vmem:[#allocation13 + $0xe0] ss:$8 sps:$4 sm:$0xff]  }
 0x927   : > { %7077 = vmatprep.subr.bf16.mxu0 %v13832_v20  ;;  %v13919_v20 = vld [vmem:[#allocation13 + $0xd4] ss:$8 sps:$4 sm:$0xff]  }
 0x929   : > { %7733 = vmatpush1.bf16.msra.mxu1 %v13887_v3 }
 0x92a   : > { %7078 = vmatpush1.bf16.msra.mxu0 %v13830_v21  ;;  %7734 = vmatprep.subr.bf16.mxu1 %v13895_v4  ;;  %v13920_v21 = vld [vmem:[#allocation13 + $0x1e0] ss:$8 sps:$4 sm:$0xff]  }
 0x92b   : > { %7079 = vmatprep.subr.bf16.mxu0 %v13835_v23  ;;  %v13928_v23 = vld [vmem:[#allocation13 + $0x1d4] ss:$8 sps:$4 sm:$0xff]  }
 0x92d   : > { %7735 = vmatpush1.bf16.msra.mxu1 %v13893_v7 }
 0x92e   : > { %7080 = vmatpush1.bf16.msra.mxu0 %v13833_v24  ;;  %7736 = vmatprep.subr.bf16.mxu1 %v13901_v8  ;;  %v13917_v24 = vld [vmem:[#allocation13 + $0xd0] ss:$8 sps:$4 sm:$0xff]  }
 0x92f   : > { %7081 = vmatprep.subr.bf16.mxu0 %v13838_v25  ;;  %v13925_v25 = vld [vmem:[#allocation13 + $0xc4] ss:$8 sps:$4 sm:$0xff]  }
 0x931   : > { %7737 = vmatpush1.bf16.msra.mxu1 %v13899_v11 }
 0x932   : > { %7082 = vmatpush2.bf16.msra.mxu0 %v13836_v26  ;;  %7738 = vmatprep.subr.bf16.mxu1 %v13907_v12  ;;  %v13926_v26 = vld [vmem:[#allocation13 + $0x1d0] ss:$8 sps:$4 sm:$0xff]  }
 0x933   : > { %7083 = vmatprep.subr.bf16.mxu0 %v13841_v27  ;;  %v13934_v27 = vld [vmem:[#allocation13 + $0x1c4] ss:$8 sps:$4 sm:$0xff]  }
 0x935   : > { %7739 = vmatpush2.bf16.msra.mxu1 %v13905_v15 }
 0x936   : > { %7084 = vmatpush2.bf16.msra.mxu0 %v13839_v28  ;;  %7740 = vmatprep.subr.bf16.mxu1 %v13913_v16  ;;  %v13923_v28 = vld [vmem:[#allocation13 + $0xc0] ss:$8 sps:$4 sm:$0xff]   ;;  %v13956_v16 = vld [vmem:[#allocation13 + $0x270] ss:$8 sps:$4 sm:$0xff]  }
 0x937   : > { %7085 = vmatprep.subr.bf16.mxu0 %v13844_v29  ;;  %v13931_v29 = vld [vmem:[#allocation13 + $0xb4] ss:$8 sps:$4 sm:$0xff]  }
 0x939   : > { %7741 = vmatpush2.bf16.msra.mxu1 %v13911_v19 }
 0x93a   : > { %7086 = vmatpush2.bf16.msra.mxu0 %v13842_v30  ;;  %7742 = vmatprep.subr.bf16.mxu1 %v13919_v20  ;;  %v13932_v30 = vld [vmem:[#allocation13 + $0x1c0] ss:$8 sps:$4 sm:$0xff]   ;;  %v13961_v20 = vld [vmem:[#allocation13 + $0x264] ss:$8 sps:$4 sm:$0xff]  }
 0x93b   : > { %7087 = vmatprep.subr.bf16.mxu0 %v13847_v31  ;;  %v13929_v31 = vld [vmem:[#allocation13 + $0xb0] ss:$8 sps:$4 sm:$0xff]  }
 0x93d   : > { %7743 = vmatpush2.bf16.msra.mxu1 %v13917_v24 }
 0x93e   : > { %7088 = vmatpush2.bf16.msra.mxu0 %v13845_v32  ;;  %7744 = vmatprep.subr.bf16.mxu1 %v13925_v25  ;;  %v13937_v32 = vld [vmem:[#allocation13 + $0xa4] ss:$8 sps:$4 sm:$0xff]   ;;  %v13959_v25 = vld [vmem:[#allocation13 + $0x260] ss:$8 sps:$4 sm:$0xff]  }
 0x93f   : > { %7089 = vmatprep.subr.bf16.mxu0 %v13850_v33  ;;  %v13940_v33 = vld [vmem:[#allocation13 + $0x1b4] ss:$8 sps:$4 sm:$0xff]  }
 0x941   : > { %7745 = vmatpush2.bf16.msra.mxu1 %v13923_v28  ;;  %v13967_v28 = vld [vmem:[#allocation13 + $0x244] ss:$8 sps:$4 sm:$0xff]  }
 0x942   : > { %7090 = vmatpush2.bf16.msra.mxu0 %v13848_v34  ;;  %7746 = vmatprep.subr.bf16.mxu1 %v13931_v29  ;;  %v13935_v34 = vld [vmem:[#allocation13 + $0xa0] ss:$8 sps:$4 sm:$0xff]  }
 0x943   : > { %7091 = vmatprep.subr.bf16.mxu0 %v13853_v35  ;;  %v13938_v35 = vld [vmem:[#allocation13 + $0x1b0] ss:$8 sps:$4 sm:$0xff]   ;;  %v13965_v29 = vld [vmem:[#allocation13 + $0x240] ss:$8 sps:$4 sm:$0xff]  }
 0x945   : > { %7747 = vmatpush2.bf16.msra.mxu1 %v13929_v31  ;;  %v13968_v31 = vld [vmem:[#allocation13 + $0x230] ss:$8 sps:$4 sm:$0xff]  }
 0x946   : > { %7092 = vmatpush2.bf16.msra.mxu0 %v13851_v36  ;;  %7748 = vmatprep.subr.bf16.mxu1 %v13937_v32  ;;  %v13943_v36 = vld [vmem:[#allocation13 + $0x94] ss:$8 sps:$4 sm:$0xff]   ;;  %v13973_v32 = vld [vmem:[#allocation13 + $0x224] ss:$8 sps:$4 sm:$0xff]  }
 0x947   : > { %7093 = vmatprep.subr.bf16.mxu0 %v13856_v37  ;;  %v13946_v37 = vld [vmem:[#allocation13 + $0x1a4] ss:$8 sps:$4 sm:$0xff]  }
 0x949   : > { %7749 = vmatpush2.bf16.msra.mxu1 %v13935_v34  ;;  %v13976_v34 = vld [vmem:[#allocation13 + $0x214] ss:$8 sps:$4 sm:$0xff]  }
 0x94a   : > { %7094 = vmatpush2.bf16.msra.mxu0 %v13854_v22  ;;  %v13941_v22 = vld [vmem:[#allocation13 + $0x90] ss:$8 sps:$4 sm:$0xff]   ;;  %7750 = vmatprep.subr.bf16.mxu1 %v13943_v36  ;;  %v13979_v36 = vld [vmem:[#allocation13 + $0x204] ss:$8 sps:$4 sm:$0xff]  }
 0x94b   : > { %7095 = vmatprep.subr.bf16.mxu0 %v13859_v38  ;;  %v13944_v38 = vld [vmem:[#allocation13 + $0x1a0] ss:$8 sps:$4 sm:$0xff]  }
 0x94d   : > { %7751 = vmatpush2.bf16.msra.mxu1 %v13941_v22  ;;  %v13982_v22 = vld [vmem:[#allocation13 + $0x2f4] ss:$8 sps:$4 sm:$0xff]  }
 0x94e   : > { %7096 = vmatpush2.bf16.msra.mxu0 %v13857_v39  ;;  %v13949_v39 = vld [vmem:[#allocation13 + $0x84] ss:$8 sps:$4 sm:$0xff]  }
 0x94f   : > { %7763 = vmatprep.subr.bf16.mxu0 %v13868_v46  ;;  %7752 = vmatprep.subr.bf16.mxu1 %v13949_v39  ;;  %v13985_v39 = vld [vmem:[#allocation13 + $0x2e4] ss:$8 sps:$4 sm:$0xff]  }
 0x951   : > { %7098 = vmatmul.mubr.bf16.vlgmr.msra.gmra.mxu0 %v6393_v41  ;;  %v13947_v41 = vld [vmem:[#allocation13 + $0x80] ss:$8 sps:$4 sm:$0xff]  }
 0x952   : > { %7764 = vmatpush1.bf16.msra.mxu0 %v13866_v45  ;;  %7753 = vmatpush2.bf16.msra.mxu1 %v13947_v41  ;;  %v13953_v45 = vld [vmem:[#allocation13 + $0x180] ss:$8 sps:$4 sm:$0xff]   ;;  %v13988_v41 = vld [vmem:[#allocation13 + $0x2d4] ss:$8 sps:$4 sm:$0xff]  }
 0x953   : > { %7765 = vmatprep.subr.bf16.mxu0 %v13874_v51  ;;  %7804 = vmatprep.subr.bf16.mxu1 %v13958_v44  ;;  %v13989_v44 = vld [vmem:[#allocation13 + $0x2c0] ss:$8 sps:$4 sm:$0xff]  }
 0x956   : > { %7766 = vmatpush1.bf16.msra.mxu0 %v13872_v53 }
 0x957   : > { %7767 = vmatprep.subr.bf16.mxu0 %v13880_v54 }
 0x95a   : > { %7768 = vmatpush1.bf16.msra.mxu0 %v13878_v57  ;;  %v6491_v57 = vld [vmem:[%s15962_s22] sm:$0x3]  ;;  %s14882_s22 = scalar_lea.vmem %s10992_s28, 16 }
 0x95b   : > { %7769 = vmatprep.subr.bf16.mxu0 %v13886_v58  ;;  %v6496_v58 = vrot.slane %v6491_v57, %v15471_v49  ;;  %v6500_v59 = vrot.slane %v6491_v57, %v15473_v50  ;;  %p14883_p1 = scmp.ne.s32.totalorder %s10992_s28, %s14882_s22 }
 0x95d   : > { %p14884_p13 = pnand %p14883_p1, %p15967_p9 }
 0x95e   : > { %7770 = vmatpush1.bf16.msra.mxu0 %v13884_v61 }
 0x95f   : > { %7771 = vmatprep.subr.bf16.mxu0 %v13892_v62  ;;  %p14885_p5 = pneg %p14884_p13 }
 0x962   : > { %7772 = vmatpush1.bf16.msra.mxu0 %v13890_v1 }
 0x963   : > { %7773 = vmatprep.subr.bf16.mxu0 %v13898_v2 }
 0x966   : > { %7774 = vmatpush1.bf16.msra.mxu0 %v13896_v5 }
 0x967   : > { %7775 = vmatprep.subr.bf16.mxu0 %v13904_v6 }
 0x96a   : > { %7776 = vmatpush1.bf16.msra.mxu0 %v13902_v9 }
 0x96b   : > { %7777 = vmatprep.subr.bf16.mxu0 %v13910_v10 }
 0x96e   : > { %7778 = vmatpush1.bf16.msra.mxu0 %v13908_v13 }
 0x96f   : > { %7779 = vmatprep.subr.bf16.mxu0 %v13916_v14 }
 0x972   : > { %7780 = vmatpush2.bf16.msra.mxu0 %v13914_v17 }
 0x973   : > { %7781 = vmatprep.subr.bf16.mxu0 %v13922_v18 }
 0x976   : > { %7782 = vmatpush2.bf16.msra.mxu0 %v13920_v21 }
 0x977   : > { %7783 = vmatprep.subr.bf16.mxu0 %v13928_v23 }
 0x97a   : > { %7784 = vmatpush2.bf16.msra.mxu0 %v13926_v26  ;;  %v13964_v26 = vld [vmem:[#allocation13 + $0x254] ss:$8 sps:$4 sm:$0xff]  }
 0x97b   : > { %7785 = vmatprep.subr.bf16.mxu0 %v13934_v27  ;;  %v13962_v27 = vld [vmem:[#allocation13 + $0x250] ss:$8 sps:$4 sm:$0xff]  }
 0x97e   : > { %7786 = vmatpush2.bf16.msra.mxu0 %v13932_v30  ;;  %v13970_v30 = vld [vmem:[#allocation13 + $0x234] ss:$8 sps:$4 sm:$0xff]  }
 0x97f   : > { %7787 = vmatprep.subr.bf16.mxu0 %v13940_v33  ;;  %v13971_v33 = vld [vmem:[#allocation13 + $0x220] ss:$8 sps:$4 sm:$0xff]  }
 0x982   : > { %7788 = vmatpush2.bf16.msra.mxu0 %v13938_v35  ;;  %v13974_v35 = vld [vmem:[#allocation13 + $0x210] ss:$8 sps:$4 sm:$0xff]  }
 0x983   : > { %7789 = vmatprep.subr.bf16.mxu0 %v13946_v37  ;;  %v13977_v37 = vld [vmem:[#allocation13 + $0x200] ss:$8 sps:$4 sm:$0xff]  }
 0x986   : > { %7790 = vmatpush2.bf16.msra.mxu0 %v13944_v38  ;;  %v13980_v38 = vld [vmem:[#allocation13 + $0x2f0] ss:$8 sps:$4 sm:$0xff]  }
 0x987   : > { %7791 = vmatprep.subr.bf16.mxu0 %v13952_v40  ;;  %v13983_v40 = vld [vmem:[#allocation13 + $0x2e0] ss:$8 sps:$4 sm:$0xff]  }
 0x98a   : > { %7792 = vmatpush2.bf16.msra.mxu0 %v13950_v42  ;;  %v13986_v42 = vld [vmem:[#allocation13 + $0x2d0] ss:$8 sps:$4 sm:$0xff]  }
 0x98b   : > { %7793 = vmatprep.subr.bf16.mxu0 %v13955_v43  ;;  %v13991_v43 = vld [vmem:[#allocation13 + $0x2c4] ss:$8 sps:$4 sm:$0xff]  }
 0x98e   : > { %7794 = vmatpush2.bf16.msra.mxu0 %v13953_v45  ;;  %v13994_v45 = vld [vmem:[#allocation13 + $0x2b4] ss:$8 sps:$4 sm:$0xff]  }
 0x9d1   : > { %v7017_v46 = vpop.f32.mrf.mxu0 }
 0x9d2   : > { %v7018_v60 = vadd.f32 %v7017_v46, %v6496_v58  ;;  %v13992_v46 = vld [vmem:[#allocation13 + $0x2b0] ss:$8 sps:$4 sm:$0xff]  }
 0x9d3   : > { %v7019_v47 = vpop.f32.mrf.mxu0  ;;  %v14004_v58 = vld [vmem:[#allocation14 + $0x70] ss:$8 sps:$4 sm:$0xff]  }
 0x9d4   : > { %v7058_v51 = vpop.f32.mrf.mxu1  ;;  %v7020_v61 = vadd.f32 %v7019_v47, %v6500_v59  ;;  %v13997_v47 = vld [vmem:[#allocation13 + $0x2a4] ss:$8 sps:$4 sm:$0xff]   ;;  %v14006_v59 = vld [vmem:[#allocation14 + $0x74] ss:$8 sps:$4 sm:$0xff]  }
 0x9d5   : > { %v7021_v52 = vpop.f32.mrf.mxu0  ;;  %v7059_v62 = vadd.f32 %v7058_v51, %v7018_v60  ;;  %v13995_v51 = vld [vmem:[#allocation13 + $0x2a0] ss:$8 sps:$4 sm:$0xff]   ;;  %v14009_v60 = vld [vmem:[#allocation14 + $0x64] ss:$8 sps:$4 sm:$0xff]   ;;  %8461 = vmatprep.subr.bf16.mxu0 %v14006_v59 }
 0x9d6   : > { %v7060_v53 = vpop.f32.mrf.mxu1  ;;  %v14000_v52 = vld [vmem:[#allocation13 + $0x294] ss:$8 sps:$4 sm:$0xff]   ;;  %v14099_v59 = vld [vmem:[#allocation14 + $0x184] ss:$8 sps:$4 sm:$0xff]  }
 0x9d7   : > { %v7022_v54 = vpop.f32.mrf.mxu0  ;;  %v7061_v0 = vadd.f32 %v7060_v53, %v7020_v61  ;;  %v13998_v53 = vld [vmem:[#allocation13 + $0x290] ss:$8 sps:$4 sm:$0xff]  }
 0x9d8   : > { %v7062_v55 = vpop.f32.mrf.mxu1  ;;  %v14003_v54 = vld [vmem:[#allocation13 + $0x284] ss:$8 sps:$4 sm:$0xff]   ;;  %v14010_v61 = vld [vmem:[#allocation14 + $0x170] ss:$8 sps:$4 sm:$0xff]  }
 0x9d9   : > { %v14001_v55 = vld [vmem:[#allocation13 + $0x280] ss:$8 sps:$4 sm:$0xff]  }
 0x9da   : > { %v7063_v56 = vpop.f32.mrf.mxu1 }
 0xa11   : > { %v7099_v63 = vpop.f32.mrf.mxu0 }
 0xa12   : > { %v7100_v1 = vadd.f32 %v7099_v63, %v7059_v62  ;;  %v14012_v62 = vld [vmem:[#allocation14 + $0x174] ss:$8 sps:$4 sm:$0xff]   ;;  %v14007_v63 = vld [vmem:[#allocation14 + $0x60] ss:$8 sps:$4 sm:$0xff]  }
 0xa13   : > { %v7101_v2 = vpop.f32.mrf.mxu0 }
 0xa14   : > { %v7106_v3 = vmax.f32 %v7100_v1, 0.0  ;;  %v7102_v4 = vadd.f32 %v7101_v2, %v7061_v0  ;;  %v14018_v0 = vld [vmem:[#allocation14 + $0x164] ss:$8 sps:$4 sm:$0xff]   ;;  %v14015_v1 = vld [vmem:[#allocation14 + $0x54] ss:$8 sps:$4 sm:$0xff]  }
 0xa15   : > { %v7103_v5 = vpop.f32.mrf.mxu0  ;;  %v14016_v2 = vld [vmem:[#allocation14 + $0x160] ss:$8 sps:$4 sm:$0xff]  }
 0xa16   : > { %v7110_v6 = vrot.slane %v7106_v3, 7  ;;  %v7107_v7 = vmax.f32 %v7102_v4, 0.0  ;;  %v14024_v3 = vld [vmem:[#allocation14 + $0x154] ss:$8 sps:$4 sm:$0xff]   ;;  %v14013_v4 = vld [vmem:[#allocation14 + $0x50] ss:$8 sps:$4 sm:$0xff]  }
 0xa17   : > { %v7104_v8 = vpop.f32.mrf.mxu0  ;;  %v14021_v5 = vld [vmem:[#allocation14 + $0x44] ss:$8 sps:$4 sm:$0xff]  }
 0xa18   : > { %v7114_v9 = vsel %vm1377_vm2, 0.0, %v7110_v6  ;;  %v7111_v10 = vrot.slane %v7107_v7, 7  ;;  %v14022_v6 = vld [vmem:[#allocation14 + $0x150] ss:$8 sps:$4 sm:$0xff]   ;;  %v14030_v7 = vld [vmem:[#allocation14 + $0x144] ss:$8 sps:$4 sm:$0xff]  }
 0xa19   : > { %v15774_v11 = vsel %vm1852_vm9, %v7114_v9, 0.0  ;;  %v12086_v17 = vpack.c.bf16 %v7114_v9, %v7114_v9  ;;  %v14019_v8 = vld [vmem:[#allocation14 + $0x40] ss:$8 sps:$4 sm:$0xff]   ;;  %v14027_v9 = vld [vmem:[#allocation14 + $0x34] ss:$8 sps:$4 sm:$0xff]  }
 0xa1a   : > { %v7115_v12 = vsel %vm1377_vm2, 0.0, %v7111_v10  ;;  %v7120_v13 = vrot.slane %v15774_v11, 1  ;;  %v7124_v56 = vrot.slane %v15774_v11, 2  ;;  %v14028_v10 = vld [vmem:[#allocation14 + $0x140] ss:$8 sps:$4 sm:$0xff]  }
 0xa1b   : > { %v7117_v14 = vsel %vm1852_vm9, %v7115_v12, 0.0  ;;  %v12083_v15 = vpack.c.bf16 %v7115_v12, %v7115_v12  ;;  %v14036_v11 = vld [vmem:[#allocation14 + $0x134] ss:$8 sps:$4 sm:$0xff]   ;;  %v14025_v12 = vld [vmem:[#allocation14 + $0x30] ss:$8 sps:$4 sm:$0xff]  }
 0xa1c   : > { %v7121_v18 = vrot.slane %v7117_v14, 1  ;;  %v7125_v19 = vrot.slane %v7117_v14, 2  ;;  %v7130_v24 = vpack.c.bf16 %v7120_v13, %v7120_v13  ;;  %v7132_v57 = vpack.c.bf16 %v7124_v56, %v7124_v56  ;;  %v14033_v13 = vld [vmem:[#allocation14 + $0x24] ss:$8 sps:$4 sm:$0xff]   ;;  %v14034_v14 = vld [vmem:[#allocation14 + $0x130] ss:$8 sps:$4 sm:$0xff]  }
 0xa1d   : > { %12084 = vmatprep.mubr.msk.bf16.mxu1 %vm15743_vm14, %v12083_v15  ;;  %v14042_v15 = vld [vmem:[#allocation14 + $0x124] ss:$8 sps:$4 sm:$0xff]   ;;  %v14096_v56 = vld [vmem:[#allocation14 + $0x194] ss:$8 sps:$4 sm:$0xff]  }
 0xa1e   : > { %12087 = vmatmul.mubr.msk.bf16.vlgmr.msra.gmra.mxu1 %vm15743_vm14, %v12086_v17  ;;  %v7131_v21 = vpack.c.bf16 %v7121_v18, %v7121_v18  ;;  %v7133_v23 = vpack.c.bf16 %v7125_v19, %v7125_v19  ;;  %v14039_v17 = vld [vmem:[#allocation14 + $0x14] ss:$8 sps:$4 sm:$0xff]   ;;  %v14040_v18 = vld [vmem:[#allocation14 + $0x120] ss:$8 sps:$4 sm:$0xff]  }
 0xa1f   : > { %7805 = vmatpush1.bf16.msra.mxu1 %v13956_v16  ;;  %v14031_v16 = vld [vmem:[#allocation14 + $0x20] ss:$8 sps:$4 sm:$0xff]   ;;  %v14048_v19 = vld [vmem:[#allocation14 + $0x114] ss:$8 sps:$4 sm:$0xff]  }
 0xa20   : > { %7795 = vmatprep.mubr.bf16.mxu0 %v7131_v21  ;;  %7836 = vmatprep.mubr.bf16.mxu1 %v7133_v23  ;;  %v14045_v21 = vld [vmem:[#allocation14 + $0x4] ss:$8 sps:$4 sm:$0xff]   ;;  %v14046_v23 = vld [vmem:[#allocation14 + $0x110] ss:$8 sps:$4 sm:$0xff]  }
 0xa21   : > { %7796 = vmatmul.mubr.bf16.vlgmr.msra.gmra.mxu0 %v7130_v24  ;;  %7806 = vmatprep.subr.bf16.mxu1 %v13961_v20  ;;  %v14037_v20 = vld [vmem:[#allocation14 + $0x10] ss:$8 sps:$4 sm:$0xff]   ;;  %v14054_v24 = vld [vmem:[#allocation14 + $0x104] ss:$8 sps:$4 sm:$0xff]  }
 0xa22   : > { %8462 = vmatpush1.bf16.msra.mxu0 %v14004_v58  ;;  %v14094_v58 = vld [vmem:[#allocation14 + $0x190] ss:$8 sps:$4 sm:$0xff]  }
 0xa23   : > { %7807 = vmatpush1.bf16.msra.mxu1 %v13959_v25  ;;  %8463 = vmatprep.subr.bf16.mxu0 %v14009_v60  ;;  %v14043_v25 = vld [vmem:[#allocation14] ss:$8 sps:$4 sm:$0xff]   ;;  %v14102_v60 = vld [vmem:[#allocation14 + $0x274] ss:$8 sps:$4 sm:$0xff]  }
 0xa24   : > { %7808 = vmatprep.subr.bf16.mxu1 %v13964_v26  ;;  %v14051_v26 = vld [vmem:[#allocation14 + $0xf4] ss:$8 sps:$4 sm:$0xff]  }
 0xa26   : > { %8464 = vmatpush1.bf16.msra.mxu0 %v14007_v63 }
 0xa27   : > { %7809 = vmatpush1.bf16.msra.mxu1 %v13962_v27  ;;  %8465 = vmatprep.subr.bf16.mxu0 %v14015_v1  ;;  %v14052_v27 = vld [vmem:[#allocation14 + $0x100] ss:$8 sps:$4 sm:$0xff]  }
 0xa28   : > { %7810 = vmatprep.subr.bf16.mxu1 %v13967_v28  ;;  %v14060_v28 = vld [vmem:[#allocation14 + $0x1f4] ss:$8 sps:$4 sm:$0xff]  }
 0xa2a   : > { %8466 = vmatpush1.bf16.msra.mxu0 %v14013_v4 }
 0xa2b   : > { %7811 = vmatpush1.bf16.msra.mxu1 %v13965_v29  ;;  %8467 = vmatprep.subr.bf16.mxu0 %v14021_v5  ;;  %v14049_v29 = vld [vmem:[#allocation14 + $0xf0] ss:$8 sps:$4 sm:$0xff]  }
 0xa2c   : > { %7812 = vmatprep.subr.bf16.mxu1 %v13970_v30  ;;  %v14057_v30 = vld [vmem:[#allocation14 + $0xe4] ss:$8 sps:$4 sm:$0xff]  }
 0xa2e   : > { %8468 = vmatpush1.bf16.msra.mxu0 %v14019_v8 }
 0xa2f   : > { %7813 = vmatpush1.bf16.msra.mxu1 %v13968_v31  ;;  %8469 = vmatprep.subr.bf16.mxu0 %v14027_v9  ;;  %v14058_v31 = vld [vmem:[#allocation14 + $0x1f0] ss:$8 sps:$4 sm:$0xff]  }
 0xa30   : > { %7814 = vmatprep.subr.bf16.mxu1 %v13973_v32  ;;  %v14066_v32 = vld [vmem:[#allocation14 + $0x1e4] ss:$8 sps:$4 sm:$0xff]  }
 0xa32   : > { %8470 = vmatpush1.bf16.msra.mxu0 %v14025_v12 }
 0xa33   : > { %7815 = vmatpush1.bf16.msra.mxu1 %v13971_v33  ;;  %8471 = vmatprep.subr.bf16.mxu0 %v14033_v13  ;;  %v14055_v33 = vld [vmem:[#allocation14 + $0xe0] ss:$8 sps:$4 sm:$0xff]  }
 0xa34   : > { %7816 = vmatprep.subr.bf16.mxu1 %v13976_v34  ;;  %v14063_v34 = vld [vmem:[#allocation14 + $0xd4] ss:$8 sps:$4 sm:$0xff]  }
 0xa36   : > { %8472 = vmatpush1.bf16.msra.mxu0 %v14031_v16 }
 0xa37   : > { %7817 = vmatpush1.bf16.msra.mxu1 %v13974_v35  ;;  %8473 = vmatprep.subr.bf16.mxu0 %v14039_v17  ;;  %v14064_v35 = vld [vmem:[#allocation14 + $0x1e0] ss:$8 sps:$4 sm:$0xff]  }
 0xa38   : > { %7818 = vmatprep.subr.bf16.mxu1 %v13979_v36  ;;  %v14072_v36 = vld [vmem:[#allocation14 + $0x1d4] ss:$8 sps:$4 sm:$0xff]  }
 0xa3a   : > { %8474 = vmatpush1.bf16.msra.mxu0 %v14037_v20 }
 0xa3b   : > { %7819 = vmatpush1.bf16.msra.mxu1 %v13977_v37  ;;  %8475 = vmatprep.subr.bf16.mxu0 %v14045_v21  ;;  %v14061_v37 = vld [vmem:[#allocation14 + $0xd0] ss:$8 sps:$4 sm:$0xff]  }
 0xa3c   : > { %7820 = vmatprep.subr.bf16.mxu1 %v13982_v22  ;;  %v14069_v22 = vld [vmem:[#allocation14 + $0xc4] ss:$8 sps:$4 sm:$0xff]  }
 0xa3e   : > { %8476 = vmatpush1.bf16.msra.mxu0 %v14043_v25 }
 0xa3f   : > { %7821 = vmatpush2.bf16.msra.mxu1 %v13980_v38  ;;  %8477 = vmatprep.subr.bf16.mxu0 %v14051_v26  ;;  %v14070_v38 = vld [vmem:[#allocation14 + $0x1d0] ss:$8 sps:$4 sm:$0xff]  }
 0xa40   : > { %7822 = vmatprep.subr.bf16.mxu1 %v13985_v39  ;;  %v14078_v39 = vld [vmem:[#allocation14 + $0x1c4] ss:$8 sps:$4 sm:$0xff]  }
 0xa42   : > { %8478 = vmatpush2.bf16.msra.mxu0 %v14049_v29 }
 0xa43   : > { %7823 = vmatpush2.bf16.msra.mxu1 %v13983_v40  ;;  %8479 = vmatprep.subr.bf16.mxu0 %v14057_v30  ;;  %v14067_v40 = vld [vmem:[#allocation14 + $0xc0] ss:$8 sps:$4 sm:$0xff]   ;;  %v14100_v30 = vld [vmem:[#allocation14 + $0x270] ss:$8 sps:$4 sm:$0xff]  }
 0xa44   : > { %7824 = vmatprep.subr.bf16.mxu1 %v13988_v41  ;;  %v14075_v41 = vld [vmem:[#allocation14 + $0xb4] ss:$8 sps:$4 sm:$0xff]  }
 0xa46   : > { %8480 = vmatpush2.bf16.msra.mxu0 %v14055_v33 }
 0xa47   : > { %7825 = vmatpush2.bf16.msra.mxu1 %v13986_v42  ;;  %8481 = vmatprep.subr.bf16.mxu0 %v14063_v34  ;;  %v14076_v42 = vld [vmem:[#allocation14 + $0x1c0] ss:$8 sps:$4 sm:$0xff]   ;;  %v14105_v34 = vld [vmem:[#allocation14 + $0x264] ss:$8 sps:$4 sm:$0xff]  }
 0xa48   : > { %7826 = vmatprep.subr.bf16.mxu1 %v13991_v43  ;;  %v14073_v43 = vld [vmem:[#allocation14 + $0xb0] ss:$8 sps:$4 sm:$0xff]  }
 0xa4a   : > { %8482 = vmatpush2.bf16.msra.mxu0 %v14061_v37 }
 0xa4b   : > { %7827 = vmatpush2.bf16.msra.mxu1 %v13989_v44  ;;  %8483 = vmatprep.subr.bf16.mxu0 %v14069_v22  ;;  %v14081_v44 = vld [vmem:[#allocation14 + $0xa4] ss:$8 sps:$4 sm:$0xff]   ;;  %v14103_v22 = vld [vmem:[#allocation14 + $0x260] ss:$8 sps:$4 sm:$0xff]  }
 0xa4c   : > { %7828 = vmatprep.subr.bf16.mxu1 %v13994_v45  ;;  %v14084_v45 = vld [vmem:[#allocation14 + $0x1b4] ss:$8 sps:$4 sm:$0xff]  }
 0xa4e   : > { %8484 = vmatpush2.bf16.msra.mxu0 %v14067_v40  ;;  %v14111_v40 = vld [vmem:[#allocation14 + $0x244] ss:$8 sps:$4 sm:$0xff]  }
 0xa4f   : > { %7829 = vmatpush2.bf16.msra.mxu1 %v13992_v46  ;;  %8485 = vmatprep.subr.bf16.mxu0 %v14075_v41  ;;  %v14079_v46 = vld [vmem:[#allocation14 + $0xa0] ss:$8 sps:$4 sm:$0xff]  }
 0xa50   : > { %7830 = vmatprep.subr.bf16.mxu1 %v13997_v47  ;;  %v14082_v47 = vld [vmem:[#allocation14 + $0x1b0] ss:$8 sps:$4 sm:$0xff]   ;;  %v14109_v41 = vld [vmem:[#allocation14 + $0x240] ss:$8 sps:$4 sm:$0xff]  }
 0xa52   : > { %8486 = vmatpush2.bf16.msra.mxu0 %v14073_v43  ;;  %v14112_v43 = vld [vmem:[#allocation14 + $0x230] ss:$8 sps:$4 sm:$0xff]  }
 0xa53   : > { %7831 = vmatpush2.bf16.msra.mxu1 %v13995_v51  ;;  %8487 = vmatprep.subr.bf16.mxu0 %v14081_v44  ;;  %v14087_v51 = vld [vmem:[#allocation14 + $0x94] ss:$8 sps:$4 sm:$0xff]   ;;  %v14117_v44 = vld [vmem:[#allocation14 + $0x224] ss:$8 sps:$4 sm:$0xff]  }
 0xa54   : > { %7832 = vmatprep.subr.bf16.mxu1 %v14000_v52  ;;  %v14090_v52 = vld [vmem:[#allocation14 + $0x1a4] ss:$8 sps:$4 sm:$0xff]  }
 0xa56   : > { %8488 = vmatpush2.bf16.msra.mxu0 %v14079_v46  ;;  %v14120_v46 = vld [vmem:[#allocation14 + $0x214] ss:$8 sps:$4 sm:$0xff]  }
 0xa57   : > { %7833 = vmatpush2.bf16.msra.mxu1 %v13998_v53  ;;  %v14085_v53 = vld [vmem:[#allocation14 + $0x90] ss:$8 sps:$4 sm:$0xff]   ;;  %8489 = vmatprep.subr.bf16.mxu0 %v14087_v51  ;;  %v14123_v51 = vld [vmem:[#allocation14 + $0x204] ss:$8 sps:$4 sm:$0xff]  }
 0xa58   : > { %7834 = vmatprep.subr.bf16.mxu1 %v14003_v54  ;;  %v14088_v54 = vld [vmem:[#allocation14 + $0x1a0] ss:$8 sps:$4 sm:$0xff]  }
 0xa5a   : > { %8490 = vmatpush2.bf16.msra.mxu0 %v14085_v53  ;;  %v14126_v53 = vld [vmem:[#allocation14 + $0x2f4] ss:$8 sps:$4 sm:$0xff]  }
 0xa5b   : > { %7835 = vmatpush2.bf16.msra.mxu1 %v14001_v55  ;;  %v14093_v55 = vld [vmem:[#allocation14 + $0x84] ss:$8 sps:$4 sm:$0xff]  }
 0xa5c   : > { %8502 = vmatprep.subr.bf16.mxu1 %v14012_v62  ;;  %8491 = vmatprep.subr.bf16.mxu0 %v14093_v55  ;;  %v14129_v55 = vld [vmem:[#allocation14 + $0x2e4] ss:$8 sps:$4 sm:$0xff]  }
 0xa5e   : > { %7837 = vmatmul.mubr.bf16.vlgmr.msra.gmra.mxu1 %v7132_v57  ;;  %v14091_v57 = vld [vmem:[#allocation14 + $0x80] ss:$8 sps:$4 sm:$0xff]  }
 0xa5f   : > { %8503 = vmatpush1.bf16.msra.mxu1 %v14010_v61  ;;  %8492 = vmatpush2.bf16.msra.mxu0 %v14091_v57  ;;  %v14097_v61 = vld [vmem:[#allocation14 + $0x180] ss:$8 sps:$4 sm:$0xff]   ;;  %v14132_v57 = vld [vmem:[#allocation14 + $0x2d4] ss:$8 sps:$4 sm:$0xff]  }
 0xa60   : > { %8504 = vmatprep.subr.bf16.mxu1 %v14018_v0  ;;  %8543 = vmatprep.subr.bf16.mxu0 %v14102_v60  ;;  %v14133_v60 = vld [vmem:[#allocation14 + $0x2c0] ss:$8 sps:$4 sm:$0xff]  }
 0xa63   : > { %8505 = vmatpush1.bf16.msra.mxu1 %v14016_v2 }
 0xa64   : > { %8506 = vmatprep.subr.bf16.mxu1 %v14024_v3 }
 0xa67   : > { %8507 = vmatpush1.bf16.msra.mxu1 %v14022_v6  ;;  %v7230_v6 = vld [vmem:[%s15963_s18] sm:$0x3]  ;;  %s15016_s18 = smov [#allocation20]  }
 0xa68   : > { %8508 = vmatprep.subr.bf16.mxu1 %v14030_v7  ;;  %v7235_v7 = vrot.slane %v7230_v6, %v15471_v49  ;;  %v7239_v8 = vrot.slane %v7230_v6, %v15473_v50 }
 0xa6b   : > { %8509 = vmatpush1.bf16.msra.mxu1 %v14028_v10 }
 0xa6c   : > { %8510 = vmatprep.subr.bf16.mxu1 %v14036_v11 }
 0xa6f   : > { %8511 = vmatpush1.bf16.msra.mxu1 %v14034_v14 }
 0xa70   : > { %8512 = vmatprep.subr.bf16.mxu1 %v14042_v15 }
 0xa73   : > { %8513 = vmatpush1.bf16.msra.mxu1 %v14040_v18 }
 0xa74   : > { %8514 = vmatprep.subr.bf16.mxu1 %v14048_v19 }
 0xa77   : > { %8515 = vmatpush1.bf16.msra.mxu1 %v14046_v23 }
 0xa78   : > { %8516 = vmatprep.subr.bf16.mxu1 %v14054_v24 }
 0xa7b   : > { %8517 = vmatpush1.bf16.msra.mxu1 %v14052_v27 }
 0xa7c   : > { %8518 = vmatprep.subr.bf16.mxu1 %v14060_v28 }
 0xa7f   : > { %8519 = vmatpush2.bf16.msra.mxu1 %v14058_v31 }
 0xa80   : > { %8520 = vmatprep.subr.bf16.mxu1 %v14066_v32 }
 0xa83   : > { %8521 = vmatpush2.bf16.msra.mxu1 %v14064_v35 }
 0xa84   : > { %8522 = vmatprep.subr.bf16.mxu1 %v14072_v36 }
 0xa87   : > { %8523 = vmatpush2.bf16.msra.mxu1 %v14070_v38  ;;  %v14108_v38 = vld [vmem:[#allocation14 + $0x254] ss:$8 sps:$4 sm:$0xff]  }
 0xa88   : > { %8524 = vmatprep.subr.bf16.mxu1 %v14078_v39  ;;  %v14106_v39 = vld [vmem:[#allocation14 + $0x250] ss:$8 sps:$4 sm:$0xff]  }
 0xa8b   : > { %8525 = vmatpush2.bf16.msra.mxu1 %v14076_v42  ;;  %v14114_v42 = vld [vmem:[#allocation14 + $0x234] ss:$8 sps:$4 sm:$0xff]  }
 0xa8c   : > { %8526 = vmatprep.subr.bf16.mxu1 %v14084_v45  ;;  %v14115_v45 = vld [vmem:[#allocation14 + $0x220] ss:$8 sps:$4 sm:$0xff]  }
 0xa8f   : > { %8527 = vmatpush2.bf16.msra.mxu1 %v14082_v47  ;;  %v14118_v47 = vld [vmem:[#allocation14 + $0x210] ss:$8 sps:$4 sm:$0xff]  }
 0xa90   : > { %8528 = vmatprep.subr.bf16.mxu1 %v14090_v52  ;;  %v14121_v52 = vld [vmem:[#allocation14 + $0x200] ss:$8 sps:$4 sm:$0xff]  }
 0xa93   : > { %8529 = vmatpush2.bf16.msra.mxu1 %v14088_v54  ;;  %v14124_v54 = vld [vmem:[#allocation14 + $0x2f0] ss:$8 sps:$4 sm:$0xff]  }
 0xa94   : > { %8530 = vmatprep.subr.bf16.mxu1 %v14096_v56  ;;  %v14127_v56 = vld [vmem:[#allocation14 + $0x2e0] ss:$8 sps:$4 sm:$0xff]  }
 0xa97   : > { %8531 = vmatpush2.bf16.msra.mxu1 %v14094_v58  ;;  %v14130_v58 = vld [vmem:[#allocation14 + $0x2d0] ss:$8 sps:$4 sm:$0xff]  }
 0xa98   : > { %8532 = vmatprep.subr.bf16.mxu1 %v14099_v59  ;;  %v14135_v59 = vld [vmem:[#allocation14 + $0x2c4] ss:$8 sps:$4 sm:$0xff]  }
 0xa9b   : > { %8533 = vmatpush2.bf16.msra.mxu1 %v14097_v61  ;;  %v14138_v61 = vld [vmem:[#allocation14 + $0x2b4] ss:$8 sps:$4 sm:$0xff]  }
 0xade   : > { %v7756_v62 = vpop.f32.mrf.mxu1 }
 0xadf   : > { %v7757_v9 = vadd.f32 %v7756_v62, %v7235_v7  ;;  %v14136_v62 = vld [vmem:[#allocation14 + $0x2b0] ss:$8 sps:$4 sm:$0xff]  }
 0xae0   : > { %v7758_v63 = vpop.f32.mrf.mxu1  ;;  %v14148_v7 = vld [vmem:[#allocation16 + $0x70] ss:$8 sps:$4 sm:$0xff]  }
 0xae1   : > { %v7797_v0 = vpop.f32.mrf.mxu0  ;;  %v7759_v10 = vadd.f32 %v7758_v63, %v7239_v8  ;;  %v14141_v63 = vld [vmem:[#allocation14 + $0x2a4] ss:$8 sps:$4 sm:$0xff]   ;;  %v14150_v8 = vld [vmem:[#allocation16 + $0x74] ss:$8 sps:$4 sm:$0xff]  }
 0xae2   : > { %v7760_v1 = vpop.f32.mrf.mxu1  ;;  %v7798_v11 = vadd.f32 %v7797_v0, %v7757_v9  ;;  %v14139_v0 = vld [vmem:[#allocation14 + $0x2a0] ss:$8 sps:$4 sm:$0xff]   ;;  %v14153_v9 = vld [vmem:[#allocation16 + $0x64] ss:$8 sps:$4 sm:$0xff]   ;;  %9200 = vmatprep.subr.bf16.mxu1 %v14150_v8 }
 0xae3   : > { %v7799_v2 = vpop.f32.mrf.mxu0  ;;  %v14144_v1 = vld [vmem:[#allocation14 + $0x294] ss:$8 sps:$4 sm:$0xff]   ;;  %v14243_v8 = vld [vmem:[#allocation16 + $0x184] ss:$8 sps:$4 sm:$0xff]  }
 0xae4   : > { %v7761_v3 = vpop.f32.mrf.mxu1  ;;  %v7800_v13 = vadd.f32 %v7799_v2, %v7759_v10  ;;  %v14142_v2 = vld [vmem:[#allocation14 + $0x290] ss:$8 sps:$4 sm:$0xff]  }
 0xae5   : > { %v7801_v4 = vpop.f32.mrf.mxu0  ;;  %v14147_v3 = vld [vmem:[#allocation14 + $0x284] ss:$8 sps:$4 sm:$0xff]   ;;  %v14154_v10 = vld [vmem:[#allocation16 + $0x170] ss:$8 sps:$4 sm:$0xff]  }
 0xae6   : > { %v14145_v4 = vld [vmem:[#allocation14 + $0x280] ss:$8 sps:$4 sm:$0xff]  }
 0xae7   : > { %v7802_v5 = vpop.f32.mrf.mxu0 }
 0xb1e   : > { %v7838_v12 = vpop.f32.mrf.mxu1 }
 0xb1f   : > { %v7839_v14 = vadd.f32 %v7838_v12, %v7798_v11  ;;  %v14156_v11 = vld [vmem:[#allocation16 + $0x174] ss:$8 sps:$4 sm:$0xff]   ;;  %v14151_v12 = vld [vmem:[#allocation16 + $0x60] ss:$8 sps:$4 sm:$0xff]  }
 0xb20   : > { %v7840_v15 = vpop.f32.mrf.mxu1 }
 0xb21   : > { %v7845_v16 = vmax.f32 %v7839_v14, 0.0  ;;  %v7841_v17 = vadd.f32 %v7840_v15, %v7800_v13  ;;  %v14162_v13 = vld [vmem:[#allocation16 + $0x164] ss:$8 sps:$4 sm:$0xff]   ;;  %v14159_v14 = vld [vmem:[#allocation16 + $0x54] ss:$8 sps:$4 sm:$0xff]  }
 0xb22   : > { %v7842_v18 = vpop.f32.mrf.mxu1  ;;  %v14160_v15 = vld [vmem:[#allocation16 + $0x160] ss:$8 sps:$4 sm:$0xff]  }
 0xb23   : > { %v7849_v19 = vrot.slane %v7845_v16, 7  ;;  %v7846_v20 = vmax.f32 %v7841_v17, 0.0  ;;  %v14168_v16 = vld [vmem:[#allocation16 + $0x154] ss:$8 sps:$4 sm:$0xff]   ;;  %v14157_v17 = vld [vmem:[#allocation16 + $0x50] ss:$8 sps:$4 sm:$0xff]  }
 0xb24   : > { %v7843_v21 = vpop.f32.mrf.mxu1  ;;  %v14165_v18 = vld [vmem:[#allocation16 + $0x44] ss:$8 sps:$4 sm:$0xff]  }
 0xb25   : > { %v7853_v23 = vsel %vm1377_vm2, 0.0, %v7849_v19  ;;  %v7850_v24 = vrot.slane %v7846_v20, 7  ;;  %v14166_v19 = vld [vmem:[#allocation16 + $0x150] ss:$8 sps:$4 sm:$0xff]   ;;  %v14174_v20 = vld [vmem:[#allocation16 + $0x144] ss:$8 sps:$4 sm:$0xff]  }
 0xb26   : > { %v15789_v25 = vsel %vm1852_vm9, %v7853_v23, 0.0  ;;  %v12188_v31 = vpack.c.bf16 %v7853_v23, %v7853_v23  ;;  %v14163_v21 = vld [vmem:[#allocation16 + $0x40] ss:$8 sps:$4 sm:$0xff]   ;;  %v14171_v23 = vld [vmem:[#allocation16 + $0x34] ss:$8 sps:$4 sm:$0xff]  }
 0xb27   : > { %v7854_v26 = vsel %vm1377_vm2, 0.0, %v7850_v24  ;;  %v7859_v27 = vrot.slane %v15789_v25, 1  ;;  %v7863_v5 = vrot.slane %v15789_v25, 2  ;;  %v14172_v24 = vld [vmem:[#allocation16 + $0x140] ss:$8 sps:$4 sm:$0xff]  }
 0xb28   : > { %v7856_v28 = vsel %vm1852_vm9, %v7854_v26, 0.0  ;;  %v12185_v29 = vpack.c.bf16 %v7854_v26, %v7854_v26  ;;  %v14180_v25 = vld [vmem:[#allocation16 + $0x134] ss:$8 sps:$4 sm:$0xff]   ;;  %v14169_v26 = vld [vmem:[#allocation16 + $0x30] ss:$8 sps:$4 sm:$0xff]  }
 0xb29   : > { %v7860_v32 = vrot.slane %v7856_v28, 1  ;;  %v7864_v33 = vrot.slane %v7856_v28, 2  ;;  %v7869_v37 = vpack.c.bf16 %v7859_v27, %v7859_v27  ;;  %v7871_v6 = vpack.c.bf16 %v7863_v5, %v7863_v5  ;;  %v14177_v27 = vld [vmem:[#allocation16 + $0x24] ss:$8 sps:$4 sm:$0xff]   ;;  %v14178_v28 = vld [vmem:[#allocation16 + $0x130] ss:$8 sps:$4 sm:$0xff]  }
 0xb2a   : > { %12186 = vmatprep.mubr.msk.bf16.mxu0 %vm15743_vm14, %v12185_v29  ;;  %v14186_v29 = vld [vmem:[#allocation16 + $0x124] ss:$8 sps:$4 sm:$0xff]   ;;  %v14240_v5 = vld [vmem:[#allocation16 + $0x194] ss:$8 sps:$4 sm:$0xff]  }
 0xb2b   : > { %12189 = vmatmul.mubr.msk.bf16.vlgmr.msra.gmra.mxu0 %vm15743_vm14, %v12188_v31  ;;  %v7870_v35 = vpack.c.bf16 %v7860_v32, %v7860_v32  ;;  %v7872_v36 = vpack.c.bf16 %v7864_v33, %v7864_v33  ;;  %v14183_v31 = vld [vmem:[#allocation16 + $0x14] ss:$8 sps:$4 sm:$0xff]   ;;  %v14184_v32 = vld [vmem:[#allocation16 + $0x120] ss:$8 sps:$4 sm:$0xff]  }
 0xb2c   : > { %8544 = vmatpush1.bf16.msra.mxu0 %v14100_v30  ;;  %v14175_v30 = vld [vmem:[#allocation16 + $0x20] ss:$8 sps:$4 sm:$0xff]   ;;  %v14192_v33 = vld [vmem:[#allocation16 + $0x114] ss:$8 sps:$4 sm:$0xff]  }
 0xb2d   : > { %8534 = vmatprep.mubr.bf16.mxu1 %v7870_v35  ;;  %8575 = vmatprep.mubr.bf16.mxu0 %v7872_v36  ;;  %v14189_v35 = vld [vmem:[#allocation16 + $0x4] ss:$8 sps:$4 sm:$0xff]   ;;  %v14190_v36 = vld [vmem:[#allocation16 + $0x110] ss:$8 sps:$4 sm:$0xff]  }
 0xb2e   : > { %8535 = vmatmul.mubr.bf16.vlgmr.msra.gmra.mxu1 %v7869_v37  ;;  %8545 = vmatprep.subr.bf16.mxu0 %v14105_v34  ;;  %v14181_v34 = vld [vmem:[#allocation16 + $0x10] ss:$8 sps:$4 sm:$0xff]   ;;  %v14198_v37 = vld [vmem:[#allocation16 + $0x104] ss:$8 sps:$4 sm:$0xff]  }
 0xb2f   : > { %9201 = vmatpush1.bf16.msra.mxu1 %v14148_v7  ;;  %v14238_v7 = vld [vmem:[#allocation16 + $0x190] ss:$8 sps:$4 sm:$0xff]  }
 0xb30   : > { %8546 = vmatpush1.bf16.msra.mxu0 %v14103_v22  ;;  %9202 = vmatprep.subr.bf16.mxu1 %v14153_v9  ;;  %v14187_v22 = vld [vmem:[#allocation16] ss:$8 sps:$4 sm:$0xff]   ;;  %v14246_v9 = vld [vmem:[#allocation16 + $0x274] ss:$8 sps:$4 sm:$0xff]  }
 0xb31   : > { %8547 = vmatprep.subr.bf16.mxu0 %v14108_v38  ;;  %v14195_v38 = vld [vmem:[#allocation16 + $0xf4] ss:$8 sps:$4 sm:$0xff]  }
 0xb33   : > { %9203 = vmatpush1.bf16.msra.mxu1 %v14151_v12 }
 0xb34   : > { %8548 = vmatpush1.bf16.msra.mxu0 %v14106_v39  ;;  %9204 = vmatprep.subr.bf16.mxu1 %v14159_v14  ;;  %v14196_v39 = vld [vmem:[#allocation16 + $0x100] ss:$8 sps:$4 sm:$0xff]  }
 0xb35   : > { %8549 = vmatprep.subr.bf16.mxu0 %v14111_v40  ;;  %v14204_v40 = vld [vmem:[#allocation16 + $0x1f4] ss:$8 sps:$4 sm:$0xff]  }
 0xb37   : > { %9205 = vmatpush1.bf16.msra.mxu1 %v14157_v17 }
 0xb38   : > { %8550 = vmatpush1.bf16.msra.mxu0 %v14109_v41  ;;  %9206 = vmatprep.subr.bf16.mxu1 %v14165_v18  ;;  %v14193_v41 = vld [vmem:[#allocation16 + $0xf0] ss:$8 sps:$4 sm:$0xff]  }
 0xb39   : > { %8551 = vmatprep.subr.bf16.mxu0 %v14114_v42  ;;  %v14201_v42 = vld [vmem:[#allocation16 + $0xe4] ss:$8 sps:$4 sm:$0xff]  }
 0xb3b   : > { %9207 = vmatpush1.bf16.msra.mxu1 %v14163_v21 }
 0xb3c   : > { %8552 = vmatpush1.bf16.msra.mxu0 %v14112_v43  ;;  %9208 = vmatprep.subr.bf16.mxu1 %v14171_v23  ;;  %v14202_v43 = vld [vmem:[#allocation16 + $0x1f0] ss:$8 sps:$4 sm:$0xff]  }
 0xb3d   : > { %8553 = vmatprep.subr.bf16.mxu0 %v14117_v44  ;;  %v14210_v44 = vld [vmem:[#allocation16 + $0x1e4] ss:$8 sps:$4 sm:$0xff]  }
 0xb3f   : > { %9209 = vmatpush1.bf16.msra.mxu1 %v14169_v26 }
 0xb40   : > { %8554 = vmatpush1.bf16.msra.mxu0 %v14115_v45  ;;  %9210 = vmatprep.subr.bf16.mxu1 %v14177_v27  ;;  %v14199_v45 = vld [vmem:[#allocation16 + $0xe0] ss:$8 sps:$4 sm:$0xff]  }
 0xb41   : > { %8555 = vmatprep.subr.bf16.mxu0 %v14120_v46  ;;  %v14207_v46 = vld [vmem:[#allocation16 + $0xd4] ss:$8 sps:$4 sm:$0xff]  }
 0xb43   : > { %9211 = vmatpush1.bf16.msra.mxu1 %v14175_v30 }
 0xb44   : > { %8556 = vmatpush1.bf16.msra.mxu0 %v14118_v47  ;;  %9212 = vmatprep.subr.bf16.mxu1 %v14183_v31  ;;  %v14208_v47 = vld [vmem:[#allocation16 + $0x1e0] ss:$8 sps:$4 sm:$0xff]  }
 0xb45   : > { %8557 = vmatprep.subr.bf16.mxu0 %v14123_v51  ;;  %v14216_v51 = vld [vmem:[#allocation16 + $0x1d4] ss:$8 sps:$4 sm:$0xff]  }
 0xb47   : > { %9213 = vmatpush1.bf16.msra.mxu1 %v14181_v34 }
 0xb48   : > { %8558 = vmatpush1.bf16.msra.mxu0 %v14121_v52  ;;  %9214 = vmatprep.subr.bf16.mxu1 %v14189_v35  ;;  %v14205_v52 = vld [vmem:[#allocation16 + $0xd0] ss:$8 sps:$4 sm:$0xff]  }
 0xb49   : > { %8559 = vmatprep.subr.bf16.mxu0 %v14126_v53  ;;  %v14213_v53 = vld [vmem:[#allocation16 + $0xc4] ss:$8 sps:$4 sm:$0xff]  }
 0xb4b   : > { %9215 = vmatpush1.bf16.msra.mxu1 %v14187_v22 }
 0xb4c   : > { %8560 = vmatpush2.bf16.msra.mxu0 %v14124_v54  ;;  %9216 = vmatprep.subr.bf16.mxu1 %v14195_v38  ;;  %v14214_v54 = vld [vmem:[#allocation16 + $0x1d0] ss:$8 sps:$4 sm:$0xff]  }
 0xb4d   : > { %8561 = vmatprep.subr.bf16.mxu0 %v14129_v55  ;;  %v14222_v55 = vld [vmem:[#allocation16 + $0x1c4] ss:$8 sps:$4 sm:$0xff]  }
 0xb4f   : > { %9217 = vmatpush2.bf16.msra.mxu1 %v14193_v41 }
 0xb50   : > { %8562 = vmatpush2.bf16.msra.mxu0 %v14127_v56  ;;  %9218 = vmatprep.subr.bf16.mxu1 %v14201_v42  ;;  %v14211_v56 = vld [vmem:[#allocation16 + $0xc0] ss:$8 sps:$4 sm:$0xff]   ;;  %v14244_v42 = vld [vmem:[#allocation16 + $0x270] ss:$8 sps:$4 sm:$0xff]  }
 0xb51   : > { %8563 = vmatprep.subr.bf16.mxu0 %v14132_v57  ;;  %v14219_v57 = vld [vmem:[#allocation16 + $0xb4] ss:$8 sps:$4 sm:$0xff]  }
 0xb53   : > { %9219 = vmatpush2.bf16.msra.mxu1 %v14199_v45 }
 0xb54   : > { %8564 = vmatpush2.bf16.msra.mxu0 %v14130_v58  ;;  %9220 = vmatprep.subr.bf16.mxu1 %v14207_v46  ;;  %v14220_v58 = vld [vmem:[#allocation16 + $0x1c0] ss:$8 sps:$4 sm:$0xff]   ;;  %v14249_v46 = vld [vmem:[#allocation16 + $0x264] ss:$8 sps:$4 sm:$0xff]  }
 0xb55   : > { %8565 = vmatprep.subr.bf16.mxu0 %v14135_v59  ;;  %v14217_v59 = vld [vmem:[#allocation16 + $0xb0] ss:$8 sps:$4 sm:$0xff]  }
 0xb57   : > { %9221 = vmatpush2.bf16.msra.mxu1 %v14205_v52 }
 0xb58   : > { %8566 = vmatpush2.bf16.msra.mxu0 %v14133_v60  ;;  %9222 = vmatprep.subr.bf16.mxu1 %v14213_v53  ;;  %v14225_v60 = vld [vmem:[#allocation16 + $0xa4] ss:$8 sps:$4 sm:$0xff]   ;;  %v14247_v53 = vld [vmem:[#allocation16 + $0x260] ss:$8 sps:$4 sm:$0xff]  }
 0xb59   : > { %8567 = vmatprep.subr.bf16.mxu0 %v14138_v61  ;;  %v14228_v61 = vld [vmem:[#allocation16 + $0x1b4] ss:$8 sps:$4 sm:$0xff]  }
 0xb5b   : > { %9223 = vmatpush2.bf16.msra.mxu1 %v14211_v56  ;;  %v14255_v56 = vld [vmem:[#allocation16 + $0x244] ss:$8 sps:$4 sm:$0xff]  }
 0xb5c   : > { %8568 = vmatpush2.bf16.msra.mxu0 %v14136_v62  ;;  %9224 = vmatprep.subr.bf16.mxu1 %v14219_v57  ;;  %v14223_v62 = vld [vmem:[#allocation16 + $0xa0] ss:$8 sps:$4 sm:$0xff]  }
 0xb5d   : > { %8569 = vmatprep.subr.bf16.mxu0 %v14141_v63  ;;  %v14226_v63 = vld [vmem:[#allocation16 + $0x1b0] ss:$8 sps:$4 sm:$0xff]   ;;  %v14253_v57 = vld [vmem:[#allocation16 + $0x240] ss:$8 sps:$4 sm:$0xff]  }
 0xb5f   : > { %9225 = vmatpush2.bf16.msra.mxu1 %v14217_v59  ;;  %v14256_v59 = vld [vmem:[#allocation16 + $0x230] ss:$8 sps:$4 sm:$0xff]  }
 0xb60   : > { %8570 = vmatpush2.bf16.msra.mxu0 %v14139_v0  ;;  %9226 = vmatprep.subr.bf16.mxu1 %v14225_v60  ;;  %v14231_v0 = vld [vmem:[#allocation16 + $0x94] ss:$8 sps:$4 sm:$0xff]   ;;  %v14261_v60 = vld [vmem:[#allocation16 + $0x224] ss:$8 sps:$4 sm:$0xff]  }
 0xb61   : > { %8571 = vmatprep.subr.bf16.mxu0 %v14144_v1  ;;  %v14234_v1 = vld [vmem:[#allocation16 + $0x1a4] ss:$8 sps:$4 sm:$0xff]  }
 0xb63   : > { %9227 = vmatpush2.bf16.msra.mxu1 %v14223_v62  ;;  %v14264_v62 = vld [vmem:[#allocation16 + $0x214] ss:$8 sps:$4 sm:$0xff]  }
 0xb64   : > { %8572 = vmatpush2.bf16.msra.mxu0 %v14142_v2  ;;  %v14229_v2 = vld [vmem:[#allocation16 + $0x90] ss:$8 sps:$4 sm:$0xff]   ;;  %9228 = vmatprep.subr.bf16.mxu1 %v14231_v0  ;;  %v14267_v0 = vld [vmem:[#allocation16 + $0x204] ss:$8 sps:$4 sm:$0xff]  }
 0xb65   : > { %8573 = vmatprep.subr.bf16.mxu0 %v14147_v3  ;;  %v14232_v3 = vld [vmem:[#allocation16 + $0x1a0] ss:$8 sps:$4 sm:$0xff]  }
 0xb67   : > { %9229 = vmatpush2.bf16.msra.mxu1 %v14229_v2  ;;  %v14270_v2 = vld [vmem:[#allocation16 + $0x2f4] ss:$8 sps:$4 sm:$0xff]  }
 0xb68   : > { %8574 = vmatpush2.bf16.msra.mxu0 %v14145_v4  ;;  %v14237_v4 = vld [vmem:[#allocation16 + $0x84] ss:$8 sps:$4 sm:$0xff]  }
 0xb69   : > { %9241 = vmatprep.subr.bf16.mxu0 %v14156_v11  ;;  %9230 = vmatprep.subr.bf16.mxu1 %v14237_v4  ;;  %v14273_v4 = vld [vmem:[#allocation16 + $0x2e4] ss:$8 sps:$4 sm:$0xff]  }
 0xb6b   : > { %8576 = vmatmul.mubr.bf16.vlgmr.msra.gmra.mxu0 %v7871_v6  ;;  %v14235_v6 = vld [vmem:[#allocation16 + $0x80] ss:$8 sps:$4 sm:$0xff]  }
 0xb6c   : > { %9242 = vmatpush1.bf16.msra.mxu0 %v14154_v10  ;;  %9231 = vmatpush2.bf16.msra.mxu1 %v14235_v6  ;;  %v14241_v10 = vld [vmem:[#allocation16 + $0x180] ss:$8 sps:$4 sm:$0xff]   ;;  %v14276_v6 = vld [vmem:[#allocation16 + $0x2d4] ss:$8 sps:$4 sm:$0xff]  }
 0xb6d   : > { %9243 = vmatprep.subr.bf16.mxu0 %v14162_v13  ;;  %9282 = vmatprep.subr.bf16.mxu1 %v14246_v9  ;;  %v14277_v9 = vld [vmem:[#allocation16 + $0x2c0] ss:$8 sps:$4 sm:$0xff]  }
 0xb70   : > { %9244 = vmatpush1.bf16.msra.mxu0 %v14160_v15 }
 0xb71   : > { %9245 = vmatprep.subr.bf16.mxu0 %v14168_v16 }
 0xb74   : > { %9246 = vmatpush1.bf16.msra.mxu0 %v14166_v19  ;;  %v7969_v19 = vld [vmem:[%s15964_s10] sm:$0x3]  ;;  %s14886_s10 = sshll.u32 %s15016_s18, 4  ;;  %s14887_s10 = int_to_ptr.vmem [resolvable:$false] %s14886_s10 }
 0xb75   : > { %9247 = vmatprep.subr.bf16.mxu0 %v14174_v20  ;;  %v7974_v20 = vrot.slane %v7969_v19, %v15471_v49  ;;  %v7978_v21 = vrot.slane %v7969_v19, %v15473_v50  ;;  %s14888_s0 = scalar_lea.vmem %s14887_s10, 32  ;;  %p14889_p3 = scmp.lt.s32.totalorder %s10992_s28, %s14887_s10 }
 0xb76   : > { %p14890_p2 = scmp.lt.s32.totalorder %s14888_s0, %s14882_s22 }
 0xb78   : > { %9248 = vmatpush1.bf16.msra.mxu0 %v14172_v24  ;;  %p14891_p12 = por %p14890_p2, %p14889_p3 }
 0xb79   : > { %9249 = vmatprep.subr.bf16.mxu0 %v14180_v25 }
 0xb7a   : > { %p14892_p10 = pnand %p14891_p12, %p14885_p5 }
 0xb7c   : > { %9250 = vmatpush1.bf16.msra.mxu0 %v14178_v28 }
 0xb7d   : > { %9251 = vmatprep.subr.bf16.mxu0 %v14186_v29 }
 0xb80   : > { %9252 = vmatpush1.bf16.msra.mxu0 %v14184_v32 }
 0xb81   : > { %9253 = vmatprep.subr.bf16.mxu0 %v14192_v33 }
 0xb84   : > { %9254 = vmatpush1.bf16.msra.mxu0 %v14190_v36 }
 0xb85   : > { %9255 = vmatprep.subr.bf16.mxu0 %v14198_v37 }
 0xb88   : > { %9256 = vmatpush1.bf16.msra.mxu0 %v14196_v39 }
 0xb89   : > { %9257 = vmatprep.subr.bf16.mxu0 %v14204_v40 }
 0xb8c   : > { %9258 = vmatpush2.bf16.msra.mxu0 %v14202_v43 }
 0xb8d   : > { %9259 = vmatprep.subr.bf16.mxu0 %v14210_v44 }
 0xb90   : > { %9260 = vmatpush2.bf16.msra.mxu0 %v14208_v47 }
 0xb91   : > { %9261 = vmatprep.subr.bf16.mxu0 %v14216_v51 }
 0xb94   : > { %9262 = vmatpush2.bf16.msra.mxu0 %v14214_v54  ;;  %v14252_v54 = vld [vmem:[#allocation16 + $0x254] ss:$8 sps:$4 sm:$0xff]  }
 0xb95   : > { %9263 = vmatprep.subr.bf16.mxu0 %v14222_v55  ;;  %v14250_v55 = vld [vmem:[#allocation16 + $0x250] ss:$8 sps:$4 sm:$0xff]  }
 0xb98   : > { %9264 = vmatpush2.bf16.msra.mxu0 %v14220_v58  ;;  %v14258_v58 = vld [vmem:[#allocation16 + $0x234] ss:$8 sps:$4 sm:$0xff]  }
 0xb99   : > { %9265 = vmatprep.subr.bf16.mxu0 %v14228_v61  ;;  %v14259_v61 = vld [vmem:[#allocation16 + $0x220] ss:$8 sps:$4 sm:$0xff]  }
 0xb9c   : > { %9266 = vmatpush2.bf16.msra.mxu0 %v14226_v63  ;;  %v14262_v63 = vld [vmem:[#allocation16 + $0x210] ss:$8 sps:$4 sm:$0xff]  }
 0xb9d   : > { %9267 = vmatprep.subr.bf16.mxu0 %v14234_v1  ;;  %v14265_v1 = vld [vmem:[#allocation16 + $0x200] ss:$8 sps:$4 sm:$0xff]  }
 0xba0   : > { %9268 = vmatpush2.bf16.msra.mxu0 %v14232_v3  ;;  %v14268_v3 = vld [vmem:[#allocation16 + $0x2f0] ss:$8 sps:$4 sm:$0xff]  }
 0xba1   : > { %9269 = vmatprep.subr.bf16.mxu0 %v14240_v5  ;;  %v14271_v5 = vld [vmem:[#allocation16 + $0x2e0] ss:$8 sps:$4 sm:$0xff]  }
 0xba4   : > { %9270 = vmatpush2.bf16.msra.mxu0 %v14238_v7  ;;  %v14274_v7 = vld [vmem:[#allocation16 + $0x2d0] ss:$8 sps:$4 sm:$0xff]  }
 0xba5   : > { %9271 = vmatprep.subr.bf16.mxu0 %v14243_v8  ;;  %v14279_v8 = vld [vmem:[#allocation16 + $0x2c4] ss:$8 sps:$4 sm:$0xff]  }
 0xba8   : > { %9272 = vmatpush2.bf16.msra.mxu0 %v14241_v10  ;;  %v14282_v10 = vld [vmem:[#allocation16 + $0x2b4] ss:$8 sps:$4 sm:$0xff]  }
 0xbeb   : > { %v8495_v11 = vpop.f32.mrf.mxu0 }
 0xbec   : > { %v8496_v23 = vadd.f32 %v8495_v11, %v7974_v20  ;;  %v14280_v11 = vld [vmem:[#allocation16 + $0x2b0] ss:$8 sps:$4 sm:$0xff]  }
 0xbed   : > { %v8497_v12 = vpop.f32.mrf.mxu0  ;;  %v14292_v20 = vld [vmem:[#allocation17 + $0x70] ss:$8 sps:$4 sm:$0xff]  }
 0xbee   : > { %v8536_v13 = vpop.f32.mrf.mxu1  ;;  %v8498_v24 = vadd.f32 %v8497_v12, %v7978_v21  ;;  %v14285_v12 = vld [vmem:[#allocation16 + $0x2a4] ss:$8 sps:$4 sm:$0xff]   ;;  %v14294_v21 = vld [vmem:[#allocation17 + $0x74] ss:$8 sps:$4 sm:$0xff]  }
 0xbef   : > { %v8499_v14 = vpop.f32.mrf.mxu0  ;;  %v8537_v25 = vadd.f32 %v8536_v13, %v8496_v23  ;;  %v14283_v13 = vld [vmem:[#allocation16 + $0x2a0] ss:$8 sps:$4 sm:$0xff]   ;;  %v14297_v23 = vld [vmem:[#allocation17 + $0x64] ss:$8 sps:$4 sm:$0xff]   ;;  %9939 = vmatprep.subr.bf16.mxu0 %v14294_v21 }
 0xbf0   : > { %v8538_v15 = vpop.f32.mrf.mxu1  ;;  %v14288_v14 = vld [vmem:[#allocation16 + $0x294] ss:$8 sps:$4 sm:$0xff]   ;;  %v14387_v21 = vld [vmem:[#allocation17 + $0x184] ss:$8 sps:$4 sm:$0xff]  }
 0xbf1   : > { %v8500_v16 = vpop.f32.mrf.mxu0  ;;  %v8539_v27 = vadd.f32 %v8538_v15, %v8498_v24  ;;  %v14286_v15 = vld [vmem:[#allocation16 + $0x290] ss:$8 sps:$4 sm:$0xff]  }
 0xbf2   : > { %v8540_v17 = vpop.f32.mrf.mxu1  ;;  %v14291_v16 = vld [vmem:[#allocation16 + $0x284] ss:$8 sps:$4 sm:$0xff]   ;;  %v14298_v24 = vld [vmem:[#allocation17 + $0x170] ss:$8 sps:$4 sm:$0xff]  }
 0xbf3   : > { %v14289_v17 = vld [vmem:[#allocation16 + $0x280] ss:$8 sps:$4 sm:$0xff]  }
 0xbf4   : > { %v8541_v18 = vpop.f32.mrf.mxu1 }
 0xc2b   : > { %v8577_v26 = vpop.f32.mrf.mxu0 }
 0xc2c   : > { %v8578_v28 = vadd.f32 %v8577_v26, %v8537_v25  ;;  %v14300_v25 = vld [vmem:[#allocation17 + $0x174] ss:$8 sps:$4 sm:$0xff]   ;;  %v14295_v26 = vld [vmem:[#allocation17 + $0x60] ss:$8 sps:$4 sm:$0xff]  }
 0xc2d   : > { %v8579_v29 = vpop.f32.mrf.mxu0 }
 0xc2e   : > { %v8584_v30 = vmax.f32 %v8578_v28, 0.0  ;;  %v8580_v31 = vadd.f32 %v8579_v29, %v8539_v27  ;;  %v14306_v27 = vld [vmem:[#allocation17 + $0x164] ss:$8 sps:$4 sm:$0xff]   ;;  %v14303_v28 = vld [vmem:[#allocation17 + $0x54] ss:$8 sps:$4 sm:$0xff]  }
 0xc2f   : > { %v8581_v32 = vpop.f32.mrf.mxu0  ;;  %v14304_v29 = vld [vmem:[#allocation17 + $0x160] ss:$8 sps:$4 sm:$0xff]  }
 0xc30   : > { %v8588_v33 = vrot.slane %v8584_v30, 7  ;;  %v8585_v34 = vmax.f32 %v8580_v31, 0.0  ;;  %v14312_v30 = vld [vmem:[#allocation17 + $0x154] ss:$8 sps:$4 sm:$0xff]   ;;  %v14301_v31 = vld [vmem:[#allocation17 + $0x50] ss:$8 sps:$4 sm:$0xff]  }
 0xc31   : > { %v8582_v35 = vpop.f32.mrf.mxu0  ;;  %v14309_v32 = vld [vmem:[#allocation17 + $0x44] ss:$8 sps:$4 sm:$0xff]  }
 0xc32   : > { %v8592_v36 = vsel %vm1377_vm2, 0.0, %v8588_v33  ;;  %v8589_v37 = vrot.slane %v8585_v34, 7  ;;  %v14310_v33 = vld [vmem:[#allocation17 + $0x150] ss:$8 sps:$4 sm:$0xff]   ;;  %v14318_v34 = vld [vmem:[#allocation17 + $0x144] ss:$8 sps:$4 sm:$0xff]  }
 0xc33   : > { %v15804_v22 = vsel %vm1852_vm9, %v8592_v36, 0.0  ;;  %v12290_v43 = vpack.c.bf16 %v8592_v36, %v8592_v36  ;;  %v14307_v35 = vld [vmem:[#allocation17 + $0x40] ss:$8 sps:$4 sm:$0xff]   ;;  %v14315_v36 = vld [vmem:[#allocation17 + $0x34] ss:$8 sps:$4 sm:$0xff]  }
 0xc34   : > { %v8593_v38 = vsel %vm1377_vm2, 0.0, %v8589_v37  ;;  %v8598_v39 = vrot.slane %v15804_v22, 1  ;;  %v8602_v18 = vrot.slane %v15804_v22, 2  ;;  %v14316_v37 = vld [vmem:[#allocation17 + $0x140] ss:$8 sps:$4 sm:$0xff]  }
 0xc35   : > { %v8595_v40 = vsel %vm1852_vm9, %v8593_v38, 0.0  ;;  %v12287_v41 = vpack.c.bf16 %v8593_v38, %v8593_v38  ;;  %v14324_v22 = vld [vmem:[#allocation17 + $0x134] ss:$8 sps:$4 sm:$0xff]   ;;  %v14313_v38 = vld [vmem:[#allocation17 + $0x30] ss:$8 sps:$4 sm:$0xff]  }
 0xc36   : > { %v8599_v44 = vrot.slane %v8595_v40, 1  ;;  %v8603_v45 = vrot.slane %v8595_v40, 2  ;;  %v8608_v52 = vpack.c.bf16 %v8598_v39, %v8598_v39  ;;  %v8610_v19 = vpack.c.bf16 %v8602_v18, %v8602_v18  ;;  %v14321_v39 = vld [vmem:[#allocation17 + $0x24] ss:$8 sps:$4 sm:$0xff]   ;;  %v14322_v40 = vld [vmem:[#allocation17 + $0x130] ss:$8 sps:$4 sm:$0xff]  }
 0xc37   : > { %12288 = vmatprep.mubr.msk.bf16.mxu1 %vm15743_vm14, %v12287_v41  ;;  %v14330_v41 = vld [vmem:[#allocation17 + $0x124] ss:$8 sps:$4 sm:$0xff]   ;;  %v14384_v18 = vld [vmem:[#allocation17 + $0x194] ss:$8 sps:$4 sm:$0xff]  }
 0xc38   : > { %12291 = vmatmul.mubr.msk.bf16.vlgmr.msra.gmra.mxu1 %vm15743_vm14, %v12290_v43  ;;  %v8609_v47 = vpack.c.bf16 %v8599_v44, %v8599_v44  ;;  %v8611_v51 = vpack.c.bf16 %v8603_v45, %v8603_v45  ;;  %v14327_v43 = vld [vmem:[#allocation17 + $0x14] ss:$8 sps:$4 sm:$0xff]   ;;  %v14328_v44 = vld [vmem:[#allocation17 + $0x120] ss:$8 sps:$4 sm:$0xff]  }
 0xc39   : > { %9283 = vmatpush1.bf16.msra.mxu1 %v14244_v42  ;;  %v14319_v42 = vld [vmem:[#allocation17 + $0x20] ss:$8 sps:$4 sm:$0xff]   ;;  %v14336_v45 = vld [vmem:[#allocation17 + $0x114] ss:$8 sps:$4 sm:$0xff]  }
 0xc3a   : > { %9273 = vmatprep.mubr.bf16.mxu0 %v8609_v47  ;;  %9314 = vmatprep.mubr.bf16.mxu1 %v8611_v51  ;;  %v14333_v47 = vld [vmem:[#allocation17 + $0x4] ss:$8 sps:$4 sm:$0xff]   ;;  %v14334_v51 = vld [vmem:[#allocation17 + $0x110] ss:$8 sps:$4 sm:$0xff]  }
 0xc3b   : > { %9274 = vmatmul.mubr.bf16.vlgmr.msra.gmra.mxu0 %v8608_v52  ;;  %9284 = vmatprep.subr.bf16.mxu1 %v14249_v46  ;;  %v14325_v46 = vld [vmem:[#allocation17 + $0x10] ss:$8 sps:$4 sm:$0xff]   ;;  %v14342_v52 = vld [vmem:[#allocation17 + $0x104] ss:$8 sps:$4 sm:$0xff]  }
 0xc3c   : > { %9940 = vmatpush1.bf16.msra.mxu0 %v14292_v20  ;;  %v14382_v20 = vld [vmem:[#allocation17 + $0x190] ss:$8 sps:$4 sm:$0xff]  }
 0xc3d   : > { %9285 = vmatpush1.bf16.msra.mxu1 %v14247_v53  ;;  %9941 = vmatprep.subr.bf16.mxu0 %v14297_v23  ;;  %v14331_v53 = vld [vmem:[#allocation17] ss:$8 sps:$4 sm:$0xff]   ;;  %v14390_v23 = vld [vmem:[#allocation17 + $0x274] ss:$8 sps:$4 sm:$0xff]  }
 0xc3e   : > { %9286 = vmatprep.subr.bf16.mxu1 %v14252_v54  ;;  %v14339_v54 = vld [vmem:[#allocation17 + $0xf4] ss:$8 sps:$4 sm:$0xff]  }
 0xc40   : > { %9942 = vmatpush1.bf16.msra.mxu0 %v14295_v26 }
 0xc41   : > { %9287 = vmatpush1.bf16.msra.mxu1 %v14250_v55  ;;  %9943 = vmatprep.subr.bf16.mxu0 %v14303_v28  ;;  %v14340_v55 = vld [vmem:[#allocation17 + $0x100] ss:$8 sps:$4 sm:$0xff]  }
 0xc42   : > { %9288 = vmatprep.subr.bf16.mxu1 %v14255_v56  ;;  %v14348_v56 = vld [vmem:[#allocation17 + $0x1f4] ss:$8 sps:$4 sm:$0xff]  }
 0xc44   : > { %9944 = vmatpush1.bf16.msra.mxu0 %v14301_v31 }
 0xc45   : > { %9289 = vmatpush1.bf16.msra.mxu1 %v14253_v57  ;;  %9945 = vmatprep.subr.bf16.mxu0 %v14309_v32  ;;  %v14337_v57 = vld [vmem:[#allocation17 + $0xf0] ss:$8 sps:$4 sm:$0xff]  }
 0xc46   : > { %9290 = vmatprep.subr.bf16.mxu1 %v14258_v58  ;;  %v14345_v58 = vld [vmem:[#allocation17 + $0xe4] ss:$8 sps:$4 sm:$0xff]  }
 0xc48   : > { %9946 = vmatpush1.bf16.msra.mxu0 %v14307_v35 }
 0xc49   : > { %9291 = vmatpush1.bf16.msra.mxu1 %v14256_v59  ;;  %9947 = vmatprep.subr.bf16.mxu0 %v14315_v36  ;;  %v14346_v59 = vld [vmem:[#allocation17 + $0x1f0] ss:$8 sps:$4 sm:$0xff]  }
 0xc4a   : > { %9292 = vmatprep.subr.bf16.mxu1 %v14261_v60  ;;  %v14354_v60 = vld [vmem:[#allocation17 + $0x1e4] ss:$8 sps:$4 sm:$0xff]  }
 0xc4c   : > { %9948 = vmatpush1.bf16.msra.mxu0 %v14313_v38 }
 0xc4d   : > { %9293 = vmatpush1.bf16.msra.mxu1 %v14259_v61  ;;  %9949 = vmatprep.subr.bf16.mxu0 %v14321_v39  ;;  %v14343_v61 = vld [vmem:[#allocation17 + $0xe0] ss:$8 sps:$4 sm:$0xff]  }
 0xc4e   : > { %9294 = vmatprep.subr.bf16.mxu1 %v14264_v62  ;;  %v14351_v62 = vld [vmem:[#allocation17 + $0xd4] ss:$8 sps:$4 sm:$0xff]  }
 0xc50   : > { %9950 = vmatpush1.bf16.msra.mxu0 %v14319_v42 }
 0xc51   : > { %9295 = vmatpush1.bf16.msra.mxu1 %v14262_v63  ;;  %9951 = vmatprep.subr.bf16.mxu0 %v14327_v43  ;;  %v14352_v63 = vld [vmem:[#allocation17 + $0x1e0] ss:$8 sps:$4 sm:$0xff]  }
 0xc52   : > { %9296 = vmatprep.subr.bf16.mxu1 %v14267_v0  ;;  %v14360_v0 = vld [vmem:[#allocation17 + $0x1d4] ss:$8 sps:$4 sm:$0xff]  }
 0xc54   : > { %9952 = vmatpush1.bf16.msra.mxu0 %v14325_v46 }
 0xc55   : > { %9297 = vmatpush1.bf16.msra.mxu1 %v14265_v1  ;;  %9953 = vmatprep.subr.bf16.mxu0 %v14333_v47  ;;  %v14349_v1 = vld [vmem:[#allocation17 + $0xd0] ss:$8 sps:$4 sm:$0xff]  }
 0xc56   : > { %9298 = vmatprep.subr.bf16.mxu1 %v14270_v2  ;;  %v14357_v2 = vld [vmem:[#allocation17 + $0xc4] ss:$8 sps:$4 sm:$0xff]  }
 0xc58   : > { %9954 = vmatpush1.bf16.msra.mxu0 %v14331_v53 }
 0xc59   : > { %9299 = vmatpush2.bf16.msra.mxu1 %v14268_v3  ;;  %9955 = vmatprep.subr.bf16.mxu0 %v14339_v54  ;;  %v14358_v3 = vld [vmem:[#allocation17 + $0x1d0] ss:$8 sps:$4 sm:$0xff]  }
 0xc5a   : > { %9300 = vmatprep.subr.bf16.mxu1 %v14273_v4  ;;  %v14366_v4 = vld [vmem:[#allocation17 + $0x1c4] ss:$8 sps:$4 sm:$0xff]  }
 0xc5c   : > { %9956 = vmatpush2.bf16.msra.mxu0 %v14337_v57 }
 0xc5d   : > { %9301 = vmatpush2.bf16.msra.mxu1 %v14271_v5  ;;  %9957 = vmatprep.subr.bf16.mxu0 %v14345_v58  ;;  %v14355_v5 = vld [vmem:[#allocation17 + $0xc0] ss:$8 sps:$4 sm:$0xff]   ;;  %v14388_v58 = vld [vmem:[#allocation17 + $0x270] ss:$8 sps:$4 sm:$0xff]  }
 0xc5e   : > { %9302 = vmatprep.subr.bf16.mxu1 %v14276_v6  ;;  %v14363_v6 = vld [vmem:[#allocation17 + $0xb4] ss:$8 sps:$4 sm:$0xff]  }
 0xc60   : > { %9958 = vmatpush2.bf16.msra.mxu0 %v14343_v61 }
 0xc61   : > { %9303 = vmatpush2.bf16.msra.mxu1 %v14274_v7  ;;  %9959 = vmatprep.subr.bf16.mxu0 %v14351_v62  ;;  %v14364_v7 = vld [vmem:[#allocation17 + $0x1c0] ss:$8 sps:$4 sm:$0xff]   ;;  %v14393_v62 = vld [vmem:[#allocation17 + $0x264] ss:$8 sps:$4 sm:$0xff]  }
 0xc62   : > { %9304 = vmatprep.subr.bf16.mxu1 %v14279_v8  ;;  %v14361_v8 = vld [vmem:[#allocation17 + $0xb0] ss:$8 sps:$4 sm:$0xff]  }
 0xc64   : > { %9960 = vmatpush2.bf16.msra.mxu0 %v14349_v1 }
 0xc65   : > { %9305 = vmatpush2.bf16.msra.mxu1 %v14277_v9  ;;  %9961 = vmatprep.subr.bf16.mxu0 %v14357_v2  ;;  %v14369_v9 = vld [vmem:[#allocation17 + $0xa4] ss:$8 sps:$4 sm:$0xff]   ;;  %v14391_v2 = vld [vmem:[#allocation17 + $0x260] ss:$8 sps:$4 sm:$0xff]  }
 0xc66   : > { %9306 = vmatprep.subr.bf16.mxu1 %v14282_v10  ;;  %v14372_v10 = vld [vmem:[#allocation17 + $0x1b4] ss:$8 sps:$4 sm:$0xff]  }
 0xc68   : > { %9962 = vmatpush2.bf16.msra.mxu0 %v14355_v5  ;;  %v14399_v5 = vld [vmem:[#allocation17 + $0x244] ss:$8 sps:$4 sm:$0xff]  }
 0xc69   : > { %9307 = vmatpush2.bf16.msra.mxu1 %v14280_v11  ;;  %9963 = vmatprep.subr.bf16.mxu0 %v14363_v6  ;;  %v14367_v11 = vld [vmem:[#allocation17 + $0xa0] ss:$8 sps:$4 sm:$0xff]  }
 0xc6a   : > { %9308 = vmatprep.subr.bf16.mxu1 %v14285_v12  ;;  %v14370_v12 = vld [vmem:[#allocation17 + $0x1b0] ss:$8 sps:$4 sm:$0xff]   ;;  %v14397_v6 = vld [vmem:[#allocation17 + $0x240] ss:$8 sps:$4 sm:$0xff]  }
 0xc6c   : > { %9964 = vmatpush2.bf16.msra.mxu0 %v14361_v8  ;;  %v14405_v8 = vld [vmem:[#allocation17 + $0x224] ss:$8 sps:$4 sm:$0xff]  }
 0xc6d   : > { %9309 = vmatpush2.bf16.msra.mxu1 %v14283_v13  ;;  %9965 = vmatprep.subr.bf16.mxu0 %v14369_v9  ;;  %v14375_v13 = vld [vmem:[#allocation17 + $0x94] ss:$8 sps:$4 sm:$0xff]   ;;  %v14403_v9 = vld [vmem:[#allocation17 + $0x220] ss:$8 sps:$4 sm:$0xff]  }
 0xc6e   : > { %9310 = vmatprep.subr.bf16.mxu1 %v14288_v14  ;;  %v14378_v14 = vld [vmem:[#allocation17 + $0x1a4] ss:$8 sps:$4 sm:$0xff]  }
 0xc70   : > { %9966 = vmatpush2.bf16.msra.mxu0 %v14367_v11  ;;  %v14406_v11 = vld [vmem:[#allocation17 + $0x210] ss:$8 sps:$4 sm:$0xff]  }
 0xc71   : > { %9311 = vmatpush2.bf16.msra.mxu1 %v14286_v15  ;;  %v14373_v15 = vld [vmem:[#allocation17 + $0x90] ss:$8 sps:$4 sm:$0xff]   ;;  %9967 = vmatprep.subr.bf16.mxu0 %v14375_v13  ;;  %v14409_v13 = vld [vmem:[#allocation17 + $0x200] ss:$8 sps:$4 sm:$0xff]  }
 0xc72   : > { %9312 = vmatprep.subr.bf16.mxu1 %v14291_v16  ;;  %v14376_v16 = vld [vmem:[#allocation17 + $0x1a0] ss:$8 sps:$4 sm:$0xff]  }
 0xc74   : > { %9968 = vmatpush2.bf16.msra.mxu0 %v14373_v15  ;;  %v14412_v15 = vld [vmem:[#allocation17 + $0x2f0] ss:$8 sps:$4 sm:$0xff]  }
 0xc75   : > { %9313 = vmatpush2.bf16.msra.mxu1 %v14289_v17  ;;  %v14381_v17 = vld [vmem:[#allocation17 + $0x84] ss:$8 sps:$4 sm:$0xff]  }
 0xc76   : > { %9980 = vmatprep.subr.bf16.mxu1 %v14300_v25  ;;  %9969 = vmatprep.subr.bf16.mxu0 %v14381_v17  ;;  %v14415_v17 = vld [vmem:[#allocation17 + $0x2e0] ss:$8 sps:$4 sm:$0xff]  }
 0xc78   : > { %9315 = vmatmul.mubr.bf16.vlgmr.msra.gmra.mxu1 %v8610_v19  ;;  %v14379_v19 = vld [vmem:[#allocation17 + $0x80] ss:$8 sps:$4 sm:$0xff]  }
 0xc79   : > { %9981 = vmatpush1.bf16.msra.mxu1 %v14298_v24  ;;  %9970 = vmatpush2.bf16.msra.mxu0 %v14379_v19  ;;  %v14385_v24 = vld [vmem:[#allocation17 + $0x180] ss:$8 sps:$4 sm:$0xff]   ;;  %v14418_v19 = vld [vmem:[#allocation17 + $0x2d0] ss:$8 sps:$4 sm:$0xff]  }
 0xc7a   : > { %9982 = vmatprep.subr.bf16.mxu1 %v14306_v27  ;;  %10021 = vmatprep.subr.bf16.mxu0 %v14390_v23  ;;  %v14426_v23 = vld [vmem:[#allocation17 + $0x2b4] ss:$8 sps:$4 sm:$0xff]  }
 0xc7d   : > { %9983 = vmatpush1.bf16.msra.mxu1 %v14304_v29 }
 0xc7e   : > { %9984 = vmatprep.subr.bf16.mxu1 %v14312_v30 }
 0xc81   : > { %9985 = vmatpush1.bf16.msra.mxu1 %v14310_v33  ;;  %v8708_v33 = vld [vmem:[%s15965_s11] sm:$0x3] }
 0xc82   : > { %9986 = vmatprep.subr.bf16.mxu1 %v14318_v34  ;;  %v8713_v34 = vrot.slane %v8708_v33, %v15471_v49  ;;  %v8717_v35 = vrot.slane %v8708_v33, %v15473_v50  ;;  %v14436_v33 = vld [vmem:[#allocation19 + $0x70] ss:$8 sps:$4 sm:$0xff]  }
 0xc85   : > { %9987 = vmatpush1.bf16.msra.mxu1 %v14316_v37 }
 0xc86   : > { %9988 = vmatprep.subr.bf16.mxu1 %v14324_v22 }
 0xc89   : > { %9989 = vmatpush1.bf16.msra.mxu1 %v14322_v40 }
 0xc8a   : > { %9990 = vmatprep.subr.bf16.mxu1 %v14330_v41 }
 0xc8d   : > { %9991 = vmatpush1.bf16.msra.mxu1 %v14328_v44 }
 0xc8e   : > { %9992 = vmatprep.subr.bf16.mxu1 %v14336_v45 }
 0xc91   : > { %9993 = vmatpush1.bf16.msra.mxu1 %v14334_v51 }
 0xc92   : > { %9994 = vmatprep.subr.bf16.mxu1 %v14342_v52 }
 0xc95   : > { %9995 = vmatpush1.bf16.msra.mxu1 %v14340_v55 }
 0xc96   : > { %9996 = vmatprep.subr.bf16.mxu1 %v14348_v56 }
 0xc99   : > { %9997 = vmatpush2.bf16.msra.mxu1 %v14346_v59 }
 0xc9a   : > { %9998 = vmatprep.subr.bf16.mxu1 %v14354_v60 }
 0xc9d   : > { %9999 = vmatpush2.bf16.msra.mxu1 %v14352_v63 }
 0xc9e   : > { %10000 = vmatprep.subr.bf16.mxu1 %v14360_v0 }
 0xca1   : > { %10001 = vmatpush2.bf16.msra.mxu1 %v14358_v3  ;;  %v14396_v3 = vld [vmem:[#allocation17 + $0x254] ss:$8 sps:$4 sm:$0xff]  }
 0xca2   : > { %10002 = vmatprep.subr.bf16.mxu1 %v14366_v4  ;;  %v14394_v4 = vld [vmem:[#allocation17 + $0x250] ss:$8 sps:$4 sm:$0xff]  }
 0xca5   : > { %10003 = vmatpush2.bf16.msra.mxu1 %v14364_v7  ;;  %v14402_v7 = vld [vmem:[#allocation17 + $0x234] ss:$8 sps:$4 sm:$0xff]  }
 0xca6   : > { %10004 = vmatprep.subr.bf16.mxu1 %v14372_v10  ;;  %v14408_v10 = vld [vmem:[#allocation17 + $0x214] ss:$8 sps:$4 sm:$0xff]  }
 0xca9   : > { %10005 = vmatpush2.bf16.msra.mxu1 %v14370_v12  ;;  %v14411_v12 = vld [vmem:[#allocation17 + $0x204] ss:$8 sps:$4 sm:$0xff]  }
 0xcaa   : > { %10006 = vmatprep.subr.bf16.mxu1 %v14378_v14  ;;  %v14414_v14 = vld [vmem:[#allocation17 + $0x2f4] ss:$8 sps:$4 sm:$0xff]  }
 0xcad   : > { %10007 = vmatpush2.bf16.msra.mxu1 %v14376_v16  ;;  %v14417_v16 = vld [vmem:[#allocation17 + $0x2e4] ss:$8 sps:$4 sm:$0xff]  }
 0xcae   : > { %10008 = vmatprep.subr.bf16.mxu1 %v14384_v18  ;;  %v14420_v18 = vld [vmem:[#allocation17 + $0x2d4] ss:$8 sps:$4 sm:$0xff]  }
 0xcb1   : > { %10009 = vmatpush2.bf16.msra.mxu1 %v14382_v20  ;;  %v14423_v20 = vld [vmem:[#allocation17 + $0x2c4] ss:$8 sps:$4 sm:$0xff]  }
 0xcb2   : > { %10010 = vmatprep.subr.bf16.mxu1 %v14387_v21  ;;  %v14421_v21 = vld [vmem:[#allocation17 + $0x2c0] ss:$8 sps:$4 sm:$0xff]  }
 0xcb5   : > { %10011 = vmatpush2.bf16.msra.mxu1 %v14385_v24  ;;  %v14424_v24 = vld [vmem:[#allocation17 + $0x2b0] ss:$8 sps:$4 sm:$0xff]  }
 0xcf8   : > { %v9234_v25 = vpop.f32.mrf.mxu1 }
 0xcf9   : > { %v9235_v36 = vadd.f32 %v9234_v25, %v8713_v34  ;;  %v14429_v25 = vld [vmem:[#allocation17 + $0x2a4] ss:$8 sps:$4 sm:$0xff]   ;;  %v14438_v34 = vld [vmem:[#allocation19 + $0x74] ss:$8 sps:$4 sm:$0xff]  }
 0xcfa   : > { %v9236_v26 = vpop.f32.mrf.mxu1  ;;  %10678 = vmatprep.subr.bf16.mxu1 %v14438_v34  ;;  %v14534_v34 = vld [vmem:[#allocation19 + $0x274] ss:$8 sps:$4 sm:$0xff]  }
 0xcfb   : > { %v9275_v27 = vpop.f32.mrf.mxu0  ;;  %v9237_v37 = vadd.f32 %v9236_v26, %v8717_v35  ;;  %v14427_v26 = vld [vmem:[#allocation17 + $0x2a0] ss:$8 sps:$4 sm:$0xff]   ;;  %v14441_v35 = vld [vmem:[#allocation19 + $0x64] ss:$8 sps:$4 sm:$0xff]  }
 0xcfc   : > { %v9238_v28 = vpop.f32.mrf.mxu1  ;;  %v9276_v22 = vadd.f32 %v9275_v27, %v9235_v36  ;;  %v14432_v27 = vld [vmem:[#allocation17 + $0x294] ss:$8 sps:$4 sm:$0xff]   ;;  %v14442_v36 = vld [vmem:[#allocation19 + $0x170] ss:$8 sps:$4 sm:$0xff]  }
 0xcfd   : > { %v9277_v29 = vpop.f32.mrf.mxu0  ;;  %v14430_v28 = vld [vmem:[#allocation17 + $0x290] ss:$8 sps:$4 sm:$0xff]  }
 0xcfe   : > { %v9239_v30 = vpop.f32.mrf.mxu1  ;;  %v9278_v39 = vadd.f32 %v9277_v29, %v9237_v37  ;;  %v14435_v29 = vld [vmem:[#allocation17 + $0x284] ss:$8 sps:$4 sm:$0xff]   ;;  %v14444_v37 = vld [vmem:[#allocation19 + $0x174] ss:$8 sps:$4 sm:$0xff]  }
 0xcff   : > { %v9279_v31 = vpop.f32.mrf.mxu0  ;;  %v14433_v30 = vld [vmem:[#allocation17 + $0x280] ss:$8 sps:$4 sm:$0xff]  }
 0xd01   : > { %v9280_v32 = vpop.f32.mrf.mxu0 }
 0xd38   : > { %v9316_v38 = vpop.f32.mrf.mxu1 }
 0xd39   : > { %v9317_v40 = vadd.f32 %v9316_v38, %v9276_v22  ;;  %v14439_v22 = vld [vmem:[#allocation19 + $0x60] ss:$8 sps:$4 sm:$0xff]   ;;  %v14450_v38 = vld [vmem:[#allocation19 + $0x164] ss:$8 sps:$4 sm:$0xff]  }
 0xd3a   : > { %v9318_v41 = vpop.f32.mrf.mxu1 }
 0xd3b   : > { %v9323_v42 = vmax.f32 %v9317_v40, 0.0  ;;  %v9319_v43 = vadd.f32 %v9318_v41, %v9278_v39  ;;  %v14447_v39 = vld [vmem:[#allocation19 + $0x54] ss:$8 sps:$4 sm:$0xff]   ;;  %v14448_v40 = vld [vmem:[#allocation19 + $0x160] ss:$8 sps:$4 sm:$0xff]  }
 0xd3c   : > { %v9320_v44 = vpop.f32.mrf.mxu1  ;;  %v14456_v41 = vld [vmem:[#allocation19 + $0x154] ss:$8 sps:$4 sm:$0xff]  }
 0xd3d   : > { %v9327_v45 = vrot.slane %v9323_v42, 7  ;;  %v9324_v46 = vmax.f32 %v9319_v43, 0.0  ;;  %v14445_v42 = vld [vmem:[#allocation19 + $0x50] ss:$8 sps:$4 sm:$0xff]   ;;  %v14453_v43 = vld [vmem:[#allocation19 + $0x44] ss:$8 sps:$4 sm:$0xff]  }
 0xd3e   : > { %v9321_v47 = vpop.f32.mrf.mxu1  ;;  %v14454_v44 = vld [vmem:[#allocation19 + $0x150] ss:$8 sps:$4 sm:$0xff]  }
 0xd3f   : > { %v9331_v51 = vsel %vm1377_vm2, 0.0, %v9327_v45  ;;  %v9328_v52 = vrot.slane %v9324_v46, 7  ;;  %v14462_v45 = vld [vmem:[#allocation19 + $0x144] ss:$8 sps:$4 sm:$0xff]   ;;  %v14451_v46 = vld [vmem:[#allocation19 + $0x40] ss:$8 sps:$4 sm:$0xff]  }
 0xd40   : > { %v15819_v53 = vsel %vm1852_vm9, %v9331_v51, 0.0  ;;  %v12392_v59 = vpack.c.bf16 %v9331_v51, %v9331_v51  ;;  %v14459_v47 = vld [vmem:[#allocation19 + $0x34] ss:$8 sps:$4 sm:$0xff]   ;;  %v14460_v51 = vld [vmem:[#allocation19 + $0x140] ss:$8 sps:$4 sm:$0xff]  }
 0xd41   : > { %v9332_v54 = vsel %vm1377_vm2, 0.0, %v9328_v52  ;;  %v9337_v55 = vrot.slane %v15819_v53, 1  ;;  %v9341_v31 = vrot.slane %v15819_v53, 2  ;;  %v14468_v52 = vld [vmem:[#allocation19 + $0x134] ss:$8 sps:$4 sm:$0xff]  }
 0xd42   : > { %v9334_v56 = vsel %vm1852_vm9, %v9332_v54, 0.0  ;;  %v12389_v57 = vpack.c.bf16 %v9332_v54, %v9332_v54  ;;  %v14457_v53 = vld [vmem:[#allocation19 + $0x30] ss:$8 sps:$4 sm:$0xff]   ;;  %v14465_v54 = vld [vmem:[#allocation19 + $0x24] ss:$8 sps:$4 sm:$0xff]  }
 0xd43   : > { %v9338_v60 = vrot.slane %v9334_v56, 1  ;;  %v9342_v61 = vrot.slane %v9334_v56, 2  ;;  %v9347_v1 = vpack.c.bf16 %v9337_v55, %v9337_v55  ;;  %v9349_v32 = vpack.c.bf16 %v9341_v31, %v9341_v31  ;;  %v14466_v55 = vld [vmem:[#allocation19 + $0x130] ss:$8 sps:$4 sm:$0xff]   ;;  %v14474_v56 = vld [vmem:[#allocation19 + $0x124] ss:$8 sps:$4 sm:$0xff]  }
 0xd44   : > { %12390 = vmatprep.mubr.msk.bf16.mxu0 %vm15743_vm14, %v12389_v57  ;;  %v14463_v57 = vld [vmem:[#allocation19 + $0x20] ss:$8 sps:$4 sm:$0xff]  }
 0xd45   : > { %12393 = vmatmul.mubr.msk.bf16.vlgmr.msra.gmra.mxu0 %vm15743_vm14, %v12392_v59  ;;  %v9348_v63 = vpack.c.bf16 %v9338_v60, %v9338_v60  ;;  %v9350_v0 = vpack.c.bf16 %v9342_v61, %v9342_v61  ;;  %v14472_v59 = vld [vmem:[#allocation19 + $0x120] ss:$8 sps:$4 sm:$0xff]   ;;  %v14480_v60 = vld [vmem:[#allocation19 + $0x114] ss:$8 sps:$4 sm:$0xff]   ;;  %v14469_v61 = vld [vmem:[#allocation19 + $0x10] ss:$8 sps:$4 sm:$0xff]  }
 0xd46   : > { %10022 = vmatpush1.bf16.msra.mxu0 %v14388_v58  ;;  %v14471_v58 = vld [vmem:[#allocation19 + $0x14] ss:$8 sps:$4 sm:$0xff]   ;;  %v14523_v31 = vld [vmem:[#allocation19 + $0x80] ss:$8 sps:$4 sm:$0xff]  }
 0xd47   : > { %10012 = vmatprep.mubr.bf16.mxu1 %v9348_v63  ;;  %10053 = vmatprep.mubr.bf16.mxu0 %v9350_v0  ;;  %v14478_v63 = vld [vmem:[#allocation19 + $0x110] ss:$8 sps:$4 sm:$0xff]   ;;  %v14486_v0 = vld [vmem:[#allocation19 + $0x104] ss:$8 sps:$4 sm:$0xff]  }
 0xd48   : > { %10013 = vmatmul.mubr.bf16.vlgmr.msra.gmra.mxu1 %v9347_v1  ;;  %10023 = vmatprep.subr.bf16.mxu0 %v14393_v62  ;;  %v14477_v62 = vld [vmem:[#allocation19 + $0x4] ss:$8 sps:$4 sm:$0xff]   ;;  %v14475_v1 = vld [vmem:[#allocation19] ss:$8 sps:$4 sm:$0xff]  }
 0xd49   : > { %10679 = vmatpush1.bf16.msra.mxu1 %v14436_v33  ;;  %v14531_v33 = vld [vmem:[#allocation19 + $0x184] ss:$8 sps:$4 sm:$0xff]  }
 0xd4a   : > { %10024 = vmatpush1.bf16.msra.mxu0 %v14391_v2  ;;  %10680 = vmatprep.subr.bf16.mxu1 %v14441_v35  ;;  %v14483_v2 = vld [vmem:[#allocation19 + $0xf4] ss:$8 sps:$4 sm:$0xff]   ;;  %v14529_v35 = vld [vmem:[#allocation19 + $0x180] ss:$8 sps:$4 sm:$0xff]  }
 0xd4b   : > { %10025 = vmatprep.subr.bf16.mxu0 %v14396_v3  ;;  %v14484_v3 = vld [vmem:[#allocation19 + $0x100] ss:$8 sps:$4 sm:$0xff]  }
 0xd4d   : > { %10681 = vmatpush1.bf16.msra.mxu1 %v14439_v22 }
 0xd4e   : > { %10026 = vmatpush1.bf16.msra.mxu0 %v14394_v4  ;;  %10682 = vmatprep.subr.bf16.mxu1 %v14447_v39  ;;  %v14492_v4 = vld [vmem:[#allocation19 + $0x1f4] ss:$8 sps:$4 sm:$0xff]  }
 0xd4f   : > { %10027 = vmatprep.subr.bf16.mxu0 %v14399_v5  ;;  %v14481_v5 = vld [vmem:[#allocation19 + $0xf0] ss:$8 sps:$4 sm:$0xff]  }
 0xd51   : > { %10683 = vmatpush1.bf16.msra.mxu1 %v14445_v42 }
 0xd52   : > { %10028 = vmatpush1.bf16.msra.mxu0 %v14397_v6  ;;  %10684 = vmatprep.subr.bf16.mxu1 %v14453_v43  ;;  %v14489_v6 = vld [vmem:[#allocation19 + $0xe4] ss:$8 sps:$4 sm:$0xff]   ;;  %v9447_v43 = vld [vmem:[%s15966_s2] sm:$0x3] }
 0xd53   : > { %10029 = vmatprep.subr.bf16.mxu0 %v14402_v7  ;;  %v14490_v7 = vld [vmem:[#allocation19 + $0x1f0] ss:$8 sps:$4 sm:$0xff]  }
 0xd55   : > { %10685 = vmatpush1.bf16.msra.mxu1 %v14451_v46 }
 0xd56   : > { %10030 = vmatpush1.bf16.msra.mxu0 %v14400_v48  ;;  %10686 = vmatprep.subr.bf16.mxu1 %v14459_v47  ;;  %v14498_v48 = vld [vmem:[#allocation19 + $0x1e4] ss:$8 sps:$4 sm:$0xff]  }
 0xd57   : > { %10031 = vmatprep.subr.bf16.mxu0 %v14405_v8  ;;  %v14487_v8 = vld [vmem:[#allocation19 + $0xe0] ss:$8 sps:$4 sm:$0xff]  }
 0xd59   : > { %10687 = vmatpush1.bf16.msra.mxu1 %v14457_v53 }
 0xd5a   : > { %10032 = vmatpush1.bf16.msra.mxu0 %v14403_v9  ;;  %10688 = vmatprep.subr.bf16.mxu1 %v14465_v54  ;;  %v14495_v9 = vld [vmem:[#allocation19 + $0xd4] ss:$8 sps:$4 sm:$0xff]  }
 0xd5b   : > { %10033 = vmatprep.subr.bf16.mxu0 %v14408_v10  ;;  %v14496_v10 = vld [vmem:[#allocation19 + $0x1e0] ss:$8 sps:$4 sm:$0xff]  }
 0xd5d   : > { %10689 = vmatpush1.bf16.msra.mxu1 %v14463_v57 }
 0xd5e   : > { %10034 = vmatpush1.bf16.msra.mxu0 %v14406_v11  ;;  %10690 = vmatprep.subr.bf16.mxu1 %v14471_v58  ;;  %v14504_v11 = vld [vmem:[#allocation19 + $0x1d4] ss:$8 sps:$4 sm:$0xff]  }
 0xd5f   : > { %10035 = vmatprep.subr.bf16.mxu0 %v14411_v12  ;;  %v14493_v12 = vld [vmem:[#allocation19 + $0xd0] ss:$8 sps:$4 sm:$0xff]  }
 0xd61   : > { %10691 = vmatpush1.bf16.msra.mxu1 %v14469_v61 }
 0xd62   : > { %10036 = vmatpush1.bf16.msra.mxu0 %v14409_v13  ;;  %10692 = vmatprep.subr.bf16.mxu1 %v14477_v62  ;;  %v14501_v13 = vld [vmem:[#allocation19 + $0xc4] ss:$8 sps:$4 sm:$0xff]  }
 0xd63   : > { %10037 = vmatprep.subr.bf16.mxu0 %v14414_v14  ;;  %v14502_v14 = vld [vmem:[#allocation19 + $0x1d0] ss:$8 sps:$4 sm:$0xff]  }
 0xd65   : > { %10693 = vmatpush1.bf16.msra.mxu1 %v14475_v1 }
 0xd66   : > { %10038 = vmatpush2.bf16.msra.mxu0 %v14412_v15  ;;  %10694 = vmatprep.subr.bf16.mxu1 %v14483_v2  ;;  %v14510_v15 = vld [vmem:[#allocation19 + $0x1c4] ss:$8 sps:$4 sm:$0xff]  }
 0xd67   : > { %10039 = vmatprep.subr.bf16.mxu0 %v14417_v16  ;;  %v14499_v16 = vld [vmem:[#allocation19 + $0xc0] ss:$8 sps:$4 sm:$0xff]  }
 0xd69   : > { %10695 = vmatpush2.bf16.msra.mxu1 %v14481_v5  ;;  %v14532_v5 = vld [vmem:[#allocation19 + $0x270] ss:$8 sps:$4 sm:$0xff]  }
 0xd6a   : > { %10040 = vmatpush2.bf16.msra.mxu0 %v14415_v17  ;;  %10696 = vmatprep.subr.bf16.mxu1 %v14489_v6  ;;  %v14507_v17 = vld [vmem:[#allocation19 + $0xb4] ss:$8 sps:$4 sm:$0xff]  }
 0xd6b   : > { %10041 = vmatprep.subr.bf16.mxu0 %v14420_v18  ;;  %v14508_v18 = vld [vmem:[#allocation19 + $0x1c0] ss:$8 sps:$4 sm:$0xff]  }
 0xd6d   : > { %10697 = vmatpush2.bf16.msra.mxu1 %v14487_v8  ;;  %v14537_v8 = vld [vmem:[#allocation19 + $0x264] ss:$8 sps:$4 sm:$0xff]  }
 0xd6e   : > { %10042 = vmatpush2.bf16.msra.mxu0 %v14418_v19  ;;  %10698 = vmatprep.subr.bf16.mxu1 %v14495_v9  ;;  %v14505_v19 = vld [vmem:[#allocation19 + $0xb0] ss:$8 sps:$4 sm:$0xff]  }
 0xd6f   : > { %10043 = vmatprep.subr.bf16.mxu0 %v14423_v20  ;;  %v14513_v20 = vld [vmem:[#allocation19 + $0xa4] ss:$8 sps:$4 sm:$0xff]  }
 0xd71   : > { %10699 = vmatpush2.bf16.msra.mxu1 %v14493_v12  ;;  %v14535_v12 = vld [vmem:[#allocation19 + $0x260] ss:$8 sps:$4 sm:$0xff]  }
 0xd72   : > { %10044 = vmatpush2.bf16.msra.mxu0 %v14421_v21  ;;  %10700 = vmatprep.subr.bf16.mxu1 %v14501_v13  ;;  %v14516_v21 = vld [vmem:[#allocation19 + $0x1b4] ss:$8 sps:$4 sm:$0xff]  }
 0xd73   : > { %10045 = vmatprep.subr.bf16.mxu0 %v14426_v23  ;;  %v14511_v23 = vld [vmem:[#allocation19 + $0xa0] ss:$8 sps:$4 sm:$0xff]   ;;  %v14540_v13 = vld [vmem:[#allocation19 + $0x254] ss:$8 sps:$4 sm:$0xff]  }
 0xd75   : > { %10701 = vmatpush2.bf16.msra.mxu1 %v14499_v16  ;;  %v14541_v16 = vld [vmem:[#allocation19 + $0x240] ss:$8 sps:$4 sm:$0xff]  }
 0xd76   : > { %10046 = vmatpush2.bf16.msra.mxu0 %v14424_v24  ;;  %10702 = vmatprep.subr.bf16.mxu1 %v14507_v17  ;;  %v14514_v24 = vld [vmem:[#allocation19 + $0x1b0] ss:$8 sps:$4 sm:$0xff]   ;;  %v14546_v17 = vld [vmem:[#allocation19 + $0x234] ss:$8 sps:$4 sm:$0xff]  }
 0xd77   : > { %10047 = vmatprep.subr.bf16.mxu0 %v14429_v25  ;;  %v14519_v25 = vld [vmem:[#allocation19 + $0x94] ss:$8 sps:$4 sm:$0xff]  }
 0xd79   : > { %10703 = vmatpush2.bf16.msra.mxu1 %v14505_v19  ;;  %v14549_v19 = vld [vmem:[#allocation19 + $0x224] ss:$8 sps:$4 sm:$0xff]  }
 0xd7a   : > { %10048 = vmatpush2.bf16.msra.mxu0 %v14427_v26  ;;  %10704 = vmatprep.subr.bf16.mxu1 %v14513_v20  ;;  %v14522_v26 = vld [vmem:[#allocation19 + $0x1a4] ss:$8 sps:$4 sm:$0xff]   ;;  %v14547_v20 = vld [vmem:[#allocation19 + $0x220] ss:$8 sps:$4 sm:$0xff]  }
 0xd7b   : > { %10049 = vmatprep.subr.bf16.mxu0 %v14432_v27  ;;  %v14517_v27 = vld [vmem:[#allocation19 + $0x90] ss:$8 sps:$4 sm:$0xff]  }
 0xd7d   : > { %10705 = vmatpush2.bf16.msra.mxu1 %v14511_v23  ;;  %v14550_v23 = vld [vmem:[#allocation19 + $0x210] ss:$8 sps:$4 sm:$0xff]  }
 0xd7e   : > { %10050 = vmatpush2.bf16.msra.mxu0 %v14430_v28  ;;  %v14520_v28 = vld [vmem:[#allocation19 + $0x1a0] ss:$8 sps:$4 sm:$0xff]   ;;  %10706 = vmatprep.subr.bf16.mxu1 %v14519_v25 }
 0xd7f   : > { %10051 = vmatprep.subr.bf16.mxu0 %v14435_v29  ;;  %v14525_v29 = vld [vmem:[#allocation19 + $0x84] ss:$8 sps:$4 sm:$0xff]   ;;  %v14553_v25 = vld [vmem:[#allocation19 + $0x200] ss:$8 sps:$4 sm:$0xff]  }
 0xd81   : > { %10707 = vmatpush2.bf16.msra.mxu1 %v14517_v27  ;;  %v14556_v27 = vld [vmem:[#allocation19 + $0x2f0] ss:$8 sps:$4 sm:$0xff]  }
 0xd82   : > { %10052 = vmatpush2.bf16.msra.mxu0 %v14433_v30  ;;  %v14528_v30 = vld [vmem:[#allocation19 + $0x194] ss:$8 sps:$4 sm:$0xff]   ;;  %10708 = vmatprep.subr.bf16.mxu1 %v14525_v29  ;;  %v14559_v29 = vld [vmem:[#allocation19 + $0x2e0] ss:$8 sps:$4 sm:$0xff]  }
 0xd83   : > { %10719 = vmatprep.subr.bf16.mxu0 %v14444_v37 }
 0xd85   : > { %10054 = vmatmul.mubr.bf16.vlgmr.msra.gmra.mxu0 %v9349_v32  ;;  %v14526_v32 = vld [vmem:[#allocation19 + $0x190] ss:$8 sps:$4 sm:$0xff]   ;;  %10709 = vmatpush2.bf16.msra.mxu1 %v14523_v31 }
 0xd86   : > { %10720 = vmatpush1.bf16.msra.mxu0 %v14442_v36  ;;  %10760 = vmatprep.subr.bf16.mxu1 %v14534_v34  ;;  %v14562_v31 = vld [vmem:[#allocation19 + $0x2d0] ss:$8 sps:$4 sm:$0xff]   ;;  %v14570_v34 = vld [vmem:[#allocation19 + $0x2b4] ss:$8 sps:$4 sm:$0xff]  }
 0xd87   : > { %10721 = vmatprep.subr.bf16.mxu0 %v14450_v38 }
 0xd8a   : > { %10722 = vmatpush1.bf16.msra.mxu0 %v14448_v40 }
 0xd8b   : > { %10723 = vmatprep.subr.bf16.mxu0 %v14456_v41 }
 0xd8e   : > { %10724 = vmatpush1.bf16.msra.mxu0 %v14454_v44  ;;  %v9932_v44 = vrot.slane %v9447_v43, %v15471_v49 }
 0xd8f   : > { %10725 = vmatprep.subr.bf16.mxu0 %v14462_v45  ;;  %v9936_v45 = vrot.slane %v9447_v43, %v15473_v50  ;;  %v14580_v43 = vld [vmem:[%s15170_s21 + $0x78] sm:$0xff]  }
 0xd92   : > { %10726 = vmatpush1.bf16.msra.mxu0 %v14460_v51 }
 0xd93   : > { %10727 = vmatprep.subr.bf16.mxu0 %v14468_v52 }
 0xd96   : > { %10728 = vmatpush1.bf16.msra.mxu0 %v14466_v55 }
 0xd97   : > { %10729 = vmatprep.subr.bf16.mxu0 %v14474_v56 }
 0xd9a   : > { %10730 = vmatpush1.bf16.msra.mxu0 %v14472_v59 }
 0xd9b   : > { %10731 = vmatprep.subr.bf16.mxu0 %v14480_v60 }
 0xd9e   : > { %10732 = vmatpush1.bf16.msra.mxu0 %v14478_v63 }
 0xd9f   : > { %10733 = vmatprep.subr.bf16.mxu0 %v14486_v0 }
 0xda2   : > { %10734 = vmatpush1.bf16.msra.mxu0 %v14484_v3 }
 0xda3   : > { %10735 = vmatprep.subr.bf16.mxu0 %v14492_v4 }
 0xda6   : > { %10736 = vmatpush2.bf16.msra.mxu0 %v14490_v7 }
 0xda7   : > { %10737 = vmatprep.subr.bf16.mxu0 %v14498_v48 }
 0xdaa   : > { %10738 = vmatpush2.bf16.msra.mxu0 %v14496_v10 }
 0xdab   : > { %10739 = vmatprep.subr.bf16.mxu0 %v14504_v11 }
 0xdae   : > { %10740 = vmatpush2.bf16.msra.mxu0 %v14502_v14  ;;  %v14538_v14 = vld [vmem:[#allocation19 + $0x250] ss:$8 sps:$4 sm:$0xff]  }
 0xdaf   : > { %10741 = vmatprep.subr.bf16.mxu0 %v14510_v15  ;;  %v14543_v15 = vld [vmem:[#allocation19 + $0x244] ss:$8 sps:$4 sm:$0xff]  }
 0xdb2   : > { %10742 = vmatpush2.bf16.msra.mxu0 %v14508_v18  ;;  %v14544_v18 = vld [vmem:[#allocation19 + $0x230] ss:$8 sps:$4 sm:$0xff]  }
 0xdb3   : > { %10743 = vmatprep.subr.bf16.mxu0 %v14516_v21  ;;  %v14552_v21 = vld [vmem:[#allocation19 + $0x214] ss:$8 sps:$4 sm:$0xff]  }
 0xdb6   : > { %10744 = vmatpush2.bf16.msra.mxu0 %v14514_v24  ;;  %v14555_v24 = vld [vmem:[#allocation19 + $0x204] ss:$8 sps:$4 sm:$0xff]  }
 0xdb7   : > { %10745 = vmatprep.subr.bf16.mxu0 %v14522_v26  ;;  %v14558_v26 = vld [vmem:[#allocation19 + $0x2f4] ss:$8 sps:$4 sm:$0xff]  }
 0xdba   : > { %10746 = vmatpush2.bf16.msra.mxu0 %v14520_v28  ;;  %v14561_v28 = vld [vmem:[#allocation19 + $0x2e4] ss:$8 sps:$4 sm:$0xff]  }
 0xdbb   : > { %10747 = vmatprep.subr.bf16.mxu0 %v14528_v30  ;;  %v14564_v30 = vld [vmem:[#allocation19 + $0x2d4] ss:$8 sps:$4 sm:$0xff]  }
 0xdbe   : > { %10748 = vmatpush2.bf16.msra.mxu0 %v14526_v32  ;;  %v14567_v32 = vld [vmem:[#allocation19 + $0x2c4] ss:$8 sps:$4 sm:$0xff]  }
 0xdbf   : > { %10749 = vmatprep.subr.bf16.mxu0 %v14531_v33  ;;  %v14565_v33 = vld [vmem:[#allocation19 + $0x2c0] ss:$8 sps:$4 sm:$0xff]  }
 0xdc2   : > { %10750 = vmatpush2.bf16.msra.mxu0 %v14529_v35  ;;  %v14568_v35 = vld [vmem:[#allocation19 + $0x2b0] ss:$8 sps:$4 sm:$0xff]  }
 0xdc3   : > { %12540 = vmatprep.subr.bf16.mxu0 %v14580_v43 }
 0xe05   : > { %v9973_v36 = vpop.f32.mrf.mxu0 }
 0xe06   : > { %v9974_v46 = vadd.f32 %v9973_v36, %v9932_v44  ;;  %v14573_v36 = vld [vmem:[#allocation19 + $0x2a4] ss:$8 sps:$4 sm:$0xff]   ;;  %v14581_v44 = vld [vmem:[%s15170_s21 + $0x38] sm:$0xff]  }
 0xe07   : > { %v9975_v37 = vpop.f32.mrf.mxu0 }
 0xe08   : > { %v10014_v22 = vpop.f32.mrf.mxu1  ;;  %v9976_v47 = vadd.f32 %v9975_v37, %v9936_v45  ;;  %v14571_v37 = vld [vmem:[#allocation19 + $0x2a0] ss:$8 sps:$4 sm:$0xff]   ;;  %v14582_v45 = vld [vmem:[%s15170_s21 + $0x70] sm:$0xff]  }
 0xe09   : > { %v9977_v38 = vpop.f32.mrf.mxu0  ;;  %v10015_v51 = vadd.f32 %v10014_v22, %v9974_v46  ;;  %v14576_v22 = vld [vmem:[#allocation19 + $0x294] ss:$8 sps:$4 sm:$0xff]  }
 0xe0a   : > { %v10016_v39 = vpop.f32.mrf.mxu1  ;;  %v14574_v38 = vld [vmem:[#allocation19 + $0x290] ss:$8 sps:$4 sm:$0xff]  }
 0xe0b   : > { %v9978_v40 = vpop.f32.mrf.mxu0  ;;  %v10017_v53 = vadd.f32 %v10016_v39, %v9976_v47  ;;  %v14579_v39 = vld [vmem:[#allocation19 + $0x284] ss:$8 sps:$4 sm:$0xff]   ;;  %v14583_v46 = vld [vmem:[%s15170_s21 + $0x30] sm:$0xff]  }
 0xe0c   : > { %v10018_v41 = vpop.f32.mrf.mxu1  ;;  %v14577_v40 = vld [vmem:[#allocation19 + $0x280] ss:$8 sps:$4 sm:$0xff]  }
 0xe0d   : > { %v14584_v47 = vld [vmem:[%s15170_s21 + $0x68] sm:$0xff]  }
 0xe0e   : > { %v10019_v42 = vpop.f32.mrf.mxu1 }
 0xe45   : > { %v10055_v52 = vpop.f32.mrf.mxu0 }
 0xe46   : > { %v10056_v54 = vadd.f32 %v10055_v52, %v10015_v51  ;;  %v14585_v51 = vld [vmem:[%s15170_s21 + $0x28] sm:$0xff]   ;;  %v14586_v52 = vld [vmem:[%s15170_s21 + $0x60] sm:$0xff]  }
 0xe47   : > { %v10057_v55 = vpop.f32.mrf.mxu0 }
 0xe48   : > { %v10062_v56 = vmax.f32 %v10056_v54, 0.0  ;;  %v10058_v57 = vadd.f32 %v10057_v55, %v10017_v53  ;;  %v14587_v53 = vld [vmem:[%s15170_s21 + $0x20] sm:$0xff]   ;;  %v14588_v54 = vld [vmem:[%s15170_s21 + $0x58] sm:$0xff]  }
 0xe49   : > { %v10059_v58 = vpop.f32.mrf.mxu0  ;;  %v14589_v55 = vld [vmem:[%s15170_s21 + $0x18] sm:$0xff]  }
 0xe4a   : > { %v10066_v59 = vrot.slane %v10062_v56, 7  ;;  %v10063_v60 = vmax.f32 %v10058_v57, 0.0  ;;  %v14590_v56 = vld [vmem:[%s15170_s21 + $0x50] sm:$0xff]   ;;  %v14592_v58 = vld [vmem:[%s15170_s21 + $0x48] sm:$0xff]  }
 0xe4b   : > { %v10060_v61 = vpop.f32.mrf.mxu0  ;;  %v14591_v57 = vld [vmem:[%s15170_s21 + $0x10] sm:$0xff]  }
 0xe4c   : > { %v10070_v62 = vsel %vm1377_vm2, 0.0, %v10066_v59  ;;  %v10067_v63 = vrot.slane %v10063_v60, 7  ;;  %v14593_v59 = vld [vmem:[%s15170_s21 + $0x8] sm:$0xff]   ;;  %v14594_v60 = vld [vmem:[%s15170_s21 + $0x40] sm:$0xff]  }
 0xe4d   : > { %v15834_v0 = vsel %vm1849_vm8, %v10070_v62, 0.0  ;;  %v12494_v6 = vpack.c.bf16 %v10070_v62, %v10070_v62  ;;  %v14595_v61 = vld [vmem:[%s15170_s21] sm:$0xff]  }
 0xe4e   : > { %v10071_v1 = vsel %vm1377_vm2, 0.0, %v10067_v63  ;;  %v10076_v2 = vrot.slane %v15834_v0, 1  ;;  %v10080_v41 = vrot.slane %v15834_v0, 2 }
 0xe4f   : > { %v10073_v3 = vsel %vm1849_vm8, %v10071_v1, 0.0  ;;  %v12491_v4 = vpack.c.bf16 %v10071_v1, %v10071_v1 }
 0xe50   : > { %v10077_v7 = vrot.slane %v10073_v3, 1  ;;  %v10081_v48 = vrot.slane %v10073_v3, 2  ;;  %v10086_v11 = vpack.c.bf16 %v10076_v2, %v10076_v2  ;;  %v10088_v42 = vpack.c.bf16 %v10080_v41, %v10080_v41 }
 0xe51   : > { %12492 = vmatprep.mubr.msk.bf16.mxu1 %vm12490_vm15, %v12491_v4 }
 0xe52   : > { %12495 = vmatmul.mubr.msk.bf16.vlgmr.msra.gmra.mxu1 %vm12490_vm15, %v12494_v6  ;;  %v10087_v9 = vpack.c.bf16 %v10077_v7, %v10077_v7  ;;  %v10089_v10 = vpack.c.bf16 %v10081_v48, %v10081_v48  ;;  %v10186_v6 = vld [vmem:[%s15165_s27] sm:$0x3] }
 0xe53   : > { %10761 = vmatpush1.bf16.msra.mxu1 %v14532_v5  ;;  %v10671_v7 = vrot.slane %v10186_v6, %v15471_v49  ;;  %v10675_v48 = vrot.slane %v10186_v6, %v15473_v50 }
 0xe54   : > { %10751 = vmatprep.mubr.bf16.mxu0 %v10087_v9  ;;  %10792 = vmatprep.mubr.bf16.mxu1 %v10089_v10 }
 0xe55   : > { %10752 = vmatmul.mubr.bf16.vlgmr.msra.gmra.mxu0 %v10086_v11  ;;  %10762 = vmatprep.subr.bf16.mxu1 %v14537_v8 }
 0xe56   : > { %12541 = vmatpush3.bf16.msra.mxu0 %v14581_v44 }
 0xe57   : > { %10763 = vmatpush1.bf16.msra.mxu1 %v14535_v12  ;;  %12542 = vmatprep.subr.bf16.mxu0 %v14582_v45 }
 0xe58   : > { %10764 = vmatprep.subr.bf16.mxu1 %v14540_v13 }
 0xe5a   : > { %12543 = vmatpush3.bf16.msra.mxu0 %v14583_v46 }
 0xe5b   : > { %10765 = vmatpush1.bf16.msra.mxu1 %v14538_v14  ;;  %12544 = vmatprep.subr.bf16.mxu0 %v14584_v47 }
 0xe5c   : > { %10766 = vmatprep.subr.bf16.mxu1 %v14543_v15 }
 0xe5e   : > { %12545 = vmatpush3.bf16.msra.mxu0 %v14585_v51 }
 0xe5f   : > { %10767 = vmatpush1.bf16.msra.mxu1 %v14541_v16  ;;  %12546 = vmatprep.subr.bf16.mxu0 %v14586_v52 }
 0xe60   : > { %10768 = vmatprep.subr.bf16.mxu1 %v14546_v17 }
 0xe62   : > { %12547 = vmatpush3.bf16.msra.mxu0 %v14587_v53 }
 0xe63   : > { %10769 = vmatpush1.bf16.msra.mxu1 %v14544_v18  ;;  %12548 = vmatprep.subr.bf16.mxu0 %v14588_v54 }
 0xe64   : > { %10770 = vmatprep.subr.bf16.mxu1 %v14549_v19 }
 0xe66   : > { %12549 = vmatpush3.bf16.msra.mxu0 %v14589_v55 }
 0xe67   : > { %10771 = vmatpush1.bf16.msra.mxu1 %v14547_v20  ;;  %12550 = vmatprep.subr.bf16.mxu0 %v14590_v56 }
 0xe68   : > { %10772 = vmatprep.subr.bf16.mxu1 %v14552_v21  ;;  %v10839_v21 = vld [vmem:[%s15175_s12] sm:$0x1] }
 0xe6a   : > { %12551 = vmatpush3.bf16.msra.mxu0 %v14591_v57 }
 0xe6b   : > { %10773 = vmatpush1.bf16.msra.mxu1 %v14550_v23  ;;  %12552 = vmatprep.subr.bf16.mxu0 %v14592_v58 }
 0xe6c   : > { %10774 = vmatprep.subr.bf16.mxu1 %v14555_v24 }
 0xe6e   : > { %12553 = vmatpush3.bf16.msra.mxu0 %v14593_v59 }
 0xe6f   : > { %10775 = vmatpush1.bf16.msra.mxu1 %v14553_v25  ;;  %12554 = vmatprep.subr.bf16.mxu0 %v14594_v60 }
 0xe70   : > { %10776 = vmatprep.subr.bf16.mxu1 %v14558_v26 }
 0xe72   : > { %12555 = vmatpush3.bf16.msra.mxu0 %v14595_v61 }
 0xe73   : > { %10777 = vmatpush2.bf16.msra.mxu1 %v14556_v27 }
 0xe74   : > { %10778 = vmatprep.subr.bf16.mxu1 %v14561_v28 }
 0xe77   : > { %10779 = vmatpush2.bf16.msra.mxu1 %v14559_v29 }
 0xe78   : > { %10780 = vmatprep.subr.bf16.mxu1 %v14564_v30 }
 0xe7b   : > { %10781 = vmatpush2.bf16.msra.mxu1 %v14562_v31 }
 0xe7c   : > { %10782 = vmatprep.subr.bf16.mxu1 %v14567_v32 }
 0xe7f   : > { %10783 = vmatpush2.bf16.msra.mxu1 %v14565_v33 }
 0xe80   : > { %10784 = vmatprep.subr.bf16.mxu1 %v14570_v34 }
 0xe83   : > { %10785 = vmatpush2.bf16.msra.mxu1 %v14568_v35 }
 0xe84   : > { %10786 = vmatprep.subr.bf16.mxu1 %v14573_v36 }
 0xe87   : > { %10787 = vmatpush2.bf16.msra.mxu1 %v14571_v37 }
 0xe88   : > { %10788 = vmatprep.subr.bf16.mxu1 %v14576_v22 }
 0xe8b   : > { %10789 = vmatpush2.bf16.msra.mxu1 %v14574_v38 }
 0xe8c   : > { %10790 = vmatprep.subr.bf16.mxu1 %v14579_v39 }
 0xe8f   : > { %10791 = vmatpush2.bf16.msra.mxu1 %v14577_v40 }
 0xe92   : > { %10793 = vmatmul.mubr.bf16.vlgmr.msra.gmra.mxu1 %v10088_v42 }
 0xf12   : > { %v10712_v62 = vpop.f32.mrf.mxu1 }
 0xf13   : > { %v10713_v8 = vadd.f32 %v10712_v62, %v10671_v7 }
 0xf14   : > { %v10714_v63 = vpop.f32.mrf.mxu1 }
 0xf15   : > { %v10753_v0 = vpop.f32.mrf.mxu0  ;;  %v10715_v9 = vadd.f32 %v10714_v63, %v10675_v48 }
 0xf16   : > { %v10716_v1 = vpop.f32.mrf.mxu1  ;;  %v10754_v10 = vadd.f32 %v10753_v0, %v10713_v8 }
 0xf17   : > { %v10755_v2 = vpop.f32.mrf.mxu0 }
 0xf18   : > { %v10717_v3 = vpop.f32.mrf.mxu1  ;;  %v10756_v12 = vadd.f32 %v10755_v2, %v10715_v9 }
 0xf19   : > { %v10757_v4 = vpop.f32.mrf.mxu0 }
 0xf1b   : > { %v10758_v5 = vpop.f32.mrf.mxu0 }
 0xf52   : > { %v10794_v11 = vpop.f32.mrf.mxu1 }
 0xf53   : > { %v10795_v13 = vadd.f32 %v10794_v11, %v10754_v10 }
 0xf54   : > { %v10796_v14 = vpop.f32.mrf.mxu1 }
 0xf55   : > { %v10797_v15 = vadd.f32 %v10796_v14, %v10756_v12  ;;  %v10801_v16 = vmax.f32 %v10795_v13, 0.0 }
 0xf56   : > { %v10798_v17 = vpop.f32.mrf.mxu1 }
 0xf57   : > { %v10802_v18 = vmax.f32 %v10797_v15, 0.0  ;;  %v10805_v49 = vpack.c.bf16 %v10801_v16, %v10801_v16 }
 0xf58   : > { %v10799_v19 = vpop.f32.mrf.mxu1 }
 0xf59   : > { %v10806_v20 = vpack.c.bf16 %v10802_v18, %v10802_v18 }
 0xf5b   : > { %10968 = vmatprep.mubr.bf16.mxu0 %v10806_v20 }
 0xf5c   : > { %10969 = vmatmul.mubr.bf16.vlgmr.msra.gmra.mxu0 %v10805_v49 }
0x101c   : > { %v12556_v50 = vpop.f32.mrf.mxu0 }
0x101e   : > { %v12557_v23 = vpop.f32.mrf.mxu0 }
0x101f   : > { %v12558_v24 = vadd.f32 %v12557_v23, %v12556_v50 }
0x1020   : > { %v12559_v25 = vpop.f32.mrf.mxu0 }
0x1021   : > { %v10971_v26 = vadd.f32 %v12558_v24, %v10839_v21 }
0x1022   : > { %v12560_v27 = vpop.f32.mrf.mxu0 }
0x1023   : > { %10977 = vst.msk [vmem:[%s1110_s14] sm:$0x1] %vm10976_vm0, %v10971_v26 }
0x1024   : > { %14895 = shalt.err (!%p14892_p10)
}
0x1025   : > { %s14896_s11 = scalar_lea.hbm %s15865_s1, 16  ;;  %s14900_s2 = scalar_lea.hbm %s15180_s13, 32 }
0x1026   : > { %p14897_p7 = scmp.ne.s32.totalorder %s15865_s1, %s14896_s11  ;;  %p14901_p0 = scmp.lt.s32.totalorder %s15865_s1, %s15180_s13 }
0x1027   : > { %p14902_p11 = scmp.lt.s32.totalorder %s14900_s2, %s14896_s11 }
0x1028   : > { %p14898_p4 = pnand %p14897_p7, %p15967_p9 }
0x1029   : > { %p14903_p6 = por %p14902_p11, %p14901_p0 }
0x102a   : > { %p14899_p8 = pneg %p14898_p4 }
0x102c   : > { %p14904_p1 = pnand %p14903_p6, %p14899_p8 }
0x102e   : > { %14907 = shalt.err (!%p14904_p1)
}
0x102f   : > { %12615 = dma.vmem_to_hbm [thread:$0]  (%p15967_p9), %s10992_s28, 16, %s15865_s1, %s10979_s26  }
0x1030 PF: > { %s15968_s6 = sld [smem:[#allocation46_spill]] }
0x1031   : > { %s15969_s16 = sld [smem:[#allocation44_spill]] }
0x1032   : > { %s15970_s14 = sld [smem:[#allocation49_spill]] }
0x1036   : > { %p12677_p13 = scmp.ge.s32.totalorder %s15968_s6, 2 }
0x1037   : > { %s11003_s22 = sand.u32 1, %s15969_s16  }
0x1038   : > { %p15971_p5 = scmp.ne.s32.totalorder %s15970_s14, 0  ;;  %s11004_s18 = scalar_lea.sflag [#allocation4], %s11003_s22 }
0x103a   : > { %p12652_p3 = pnand %p12677_p13, %p15971_p5 }
0x103c   : > { %p12653_p2 = pneg %p12652_p3 }
0x103e   : > { %14949 = dma.done.wait (%p12653_p2), %s11004_s18, 16  }
0x103f   : > { %14951 = vsyncadd (%p12653_p2), %s11004_s18, 4294967280  ;;  %s15972_s28 = sld [smem:[#allocation47_spill]]  ;;  %s15975_s22 = smov %s14958_s23 }
0x1040   : > { %s15973_s10 = sld [smem:[#allocation45_spill]] }
0x1041   : > { %s15974_s26 = sld [smem:[#allocation48_spill]] }
0x1045   : > { %p79_p12 = scmp.ge.s32.totalorder %s15972_s28, 4  }
0x1046   : > { %s15976_s23 = smov %s15973_s10 }
0x1047   :  { %81 = sbr.rel (!%p79_p12) target bundleno = 60 (0x3c), region = 255 }
0x104c   :  { %11008 = vsyncpa [#allocation3], 1 }
0x104d   :  { %11010 = vsyncpa [#allocation3 + $0x1], 1 }
0x104e   :  { %11011 = vsyncpa [#allocation6], 1 }
0x104f   :  { %11012 = vsyncpa [#allocation9], 1 }
0x1050   :  { %11013 = vsyncpa [#allocation12], 1 }
0x1051   :  { %11014 = vsyncpa [#allocation15], 1 }
0x1052   :  { %11015 = vsyncpa [#allocation18], 1 }
0x1053   :  { %11016 = vsyncpa [#allocation4], 1 }
0x1054   :  { %11018 = vsyncpa [#allocation4 + $0x1], 1 }

</bundles_post_ra>
